<compile_context>
chip_gen: v7x
topology: tpu7x:2x2x1
jax: 0.10.0
libtpu: 0.0.40
codegen_flags: <defaults>
</compile_context>

<pallas_src>
import functools
import math

import jax
import jax.numpy as jnp
from jax import lax
from jax.experimental import pallas as pl
from jax.experimental.pallas import tpu as pltpu


_SQRT_2_OVER_PI = math.sqrt(2.0 / math.pi)
_VMEM_LIMIT = 48 * 1024 * 1024   # > default scoped limits, < v7x 64 MiB physical


# ----------------------------------------------------------------------------
# in-kernel helpers (f32 element-wise math)
# ----------------------------------------------------------------------------
def _gelu(x):
    # tanh-approx GELU (PyTorch default is erf-based; ~1e-3 deviation).
    return 0.5 * x * (1.0 + jnp.tanh(_SQRT_2_OVER_PI * (x + 0.044715 * x * x * x)))


def _ln(x, g, b, eps):
    mean = jnp.mean(x, axis=-1, keepdims=True)
    xc = x - mean
    var = jnp.mean(xc * xc, axis=-1, keepdims=True)
    return xc * lax.rsqrt(var + eps) * g + b


def _pick_tile(total, cap):
    if total <= cap:
        return total
    for cand in range(cap, 0, -1):
        if total % cand == 0:
            return cand
    return total


# ----------------------------------------------------------------------------
# fused ConvTower: kw-tap conv + GELU + 1x1 residual + max/avg pool (one kernel)
# ----------------------------------------------------------------------------
def _conv_tower_kernel(x_ref, w_ref, b_ref, wres_ref, bres_ref, o_ref, xf_ref, *,
                       kw, pool, pool_type, pad):
    # x_ref : (tl*pool + 2*pad, Cin) halo-padded input chunk (bf16)
    # w_ref : (kw*Cin, Cout) bf16  -- conv taps folded along the contraction dim
    # xf_ref: f32 scratch copy of the chunk (strided sublane loads on 32-bit data)
    tl = o_ref.shape[0]
    xf_ref[...] = x_ref[...].astype(jnp.float32)
    bias = b_ref[...]            # hoisted out of the phase loop
    bres = bres_ref[...]
    pooled = None
    for j in range(pool):        # pooling phase
        # tap t of phase j reads padded rows i*pool + j + t  (i = pooled index)
        taps = [xf_ref[pl.ds(j + t, tl, stride=pool), :] for t in range(kw)]
        xcat = jnp.concatenate(taps, axis=-1).astype(jnp.bfloat16)   # (tl, kw*Cin)
        conv = jnp.dot(xcat, w_ref[...], preferred_element_type=jnp.float32) + bias
        res = jnp.dot(taps[pad].astype(jnp.bfloat16), wres_ref[...],
                      preferred_element_type=jnp.float32) + bres
        yj = _gelu(conv) + res
        if pooled is None:
            pooled = yj
        elif pool_type == "max":
            pooled = jnp.maximum(pooled, yj)
        else:
            pooled = pooled + yj
    if pool_type != "max":
        pooled = pooled * (1.0 / pool)
    o_ref[...] = pooled.astype(o_ref.dtype)


def conv_tower(x, p, pool_type, pool_size, kw, l_tile=512):
    """x: (B, L, Cin) bf16 -> (B, L//pool, Cout) bf16, fully fused.

    No XLA-side im2col / phase slab: the padded input streams straight into the
    kernel; the grid is (B, Lout tiles) so large L pipelines and both TCs get
    work beyond batch.
    """
    B, L, Cin = x.shape
    assert L % pool_size == 0
    pad = kw // 2
    Lout = L // pool_size
    Cout = p["w"].shape[-1]
    tl = _pick_tile(Lout, l_tile)
    n_tiles = Lout // tl
    chunk = tl * pool_size + 2 * pad
    xp = jnp.pad(x, ((0, 0), (pad, pad), (0, 0)))
    if n_tiles == 1:
        xc = xp[:, None]                                   # (B, 1, L+2*pad, Cin)
    else:
        # overlapped halo chunks: only 2*pad extra rows per tl*pool rows (<1%)
        xc = jnp.stack(
            [lax.dynamic_slice_in_dim(xp, i * tl * pool_size, chunk, axis=1)
             for i in range(n_tiles)], axis=1)             # (B, n_tiles, chunk, Cin)
    kernel = functools.partial(_conv_tower_kernel, kw=kw, pool=pool_size,
                               pool_type=pool_type, pad=pad)
    cost = pl.CostEstimate(
        flops=int(2 * B * L * Cin * Cout * (kw + 1)),
        transcendentals=int(B * L * Cout),
        bytes_accessed=int(xc.size * 2 + p["w"].size * 2 + p["w_res"].size * 2
                           + B * Lout * Cout * 2),
    )
    return pl.pallas_call(
        kernel,
        out_shape=jax.ShapeDtypeStruct((B, Lout, Cout), jnp.bfloat16),
        grid=(B, n_tiles),
        in_specs=[
            pl.BlockSpec((None, None, chunk, Cin), lambda b, i: (b, i, 0, 0)),
            pl.BlockSpec((kw * Cin, Cout), lambda b, i: (0, 0)),
            pl.BlockSpec((1, Cout), lambda b, i: (0, 0)),
            pl.BlockSpec((Cin, Cout), lambda b, i: (0, 0)),
            pl.BlockSpec((1, Cout), lambda b, i: (0, 0)),
        ],
        out_specs=pl.BlockSpec((None, tl, Cout), lambda b, i: (b, i, 0)),
        scratch_shapes=[pltpu.VMEM((chunk, Cin), jnp.float32)],
        compiler_params=pltpu.CompilerParams(
            dimension_semantics=("parallel", "parallel"),
            vmem_limit_bytes=_VMEM_LIMIT),
        cost_estimate=cost,
    )(xc, p["w"], p["b"], p["w_res"], p["b_res"])


# ----------------------------------------------------------------------------
# fused metadata-embed + concat + fusion Linear + LayerNorm
# ----------------------------------------------------------------------------
def _fusion_kernel(xs_ref, xd_ref, xm_ref, wxmd_ref, bxmd_ref,
                   ws_ref, wm_ref, wd_ref, bf_ref, g_ref, gb_ref, o_ref, *, eps):
    # concat([sig, xmd, dna]) @ W == sig@W_sig + xmd@W_md + dna@W_dna (row split),
    # so the (l2, 2*f2+md) concat never materializes in HBM.
    emb = jnp.dot(xm_ref[...].astype(jnp.bfloat16), wxmd_ref[...],
                  preferred_element_type=jnp.float32) + bxmd_ref[...]       # (1, md)
    md_c = jnp.dot(emb.astype(jnp.bfloat16), wm_ref[...],
                   preferred_element_type=jnp.float32)                      # (1, f2)
    y = (jnp.dot(xs_ref[...], ws_ref[...], preferred_element_type=jnp.float32)
         + jnp.dot(xd_ref[...], wd_ref[...], preferred_element_type=jnp.float32)
         + md_c + bf_ref[...])
    o_ref[...] = _ln(y, g_ref[...], gb_ref[...], eps).astype(o_ref.dtype)


def fuse_inputs(x_sig, x_dna, x_metadata, xmd_p, fusion_p):
    B, l2, f2 = x_sig.shape
    f1 = x_metadata.shape[-1]
    md = xmd_p["w"].shape[-1]
    xm = x_metadata.reshape(B, 1, f1).astype(jnp.float32)
    w = fusion_p["w"]                        # (2*f2 + md, f2), rows [sig | md | dna]
    w_sig, w_md, w_dna = w[:f2], w[f2:f2 + md], w[f2 + md:]

    def c2(shape):
        return pl.BlockSpec(shape, lambda b: (0, 0))

    return pl.pallas_call(
        functools.partial(_fusion_kernel, eps=1e-5),
        out_shape=jax.ShapeDtypeStruct((B, l2, f2), jnp.bfloat16),
        grid=(B,),
        in_specs=[
            pl.BlockSpec((None, l2, f2), lambda b: (b, 0, 0)),
            pl.BlockSpec((None, l2, f2), lambda b: (b, 0, 0)),
            pl.BlockSpec((None, 1, f1), lambda b: (b, 0, 0)),
            c2((f1, md)), c2((1, md)),
            c2((f2, f2)), c2((md, f2)), c2((f2, f2)),
            c2((1, f2)), c2((1, f2)), c2((1, f2)),
        ],
        out_specs=pl.BlockSpec((None, l2, f2), lambda b: (b, 0, 0)),
        compiler_params=pltpu.CompilerParams(
            dimension_semantics=("parallel",), vmem_limit_bytes=_VMEM_LIMIT),
    )(x_sig, x_dna, xm, xmd_p["w"], xmd_p["b"], w_sig, w_md, w_dna,
      fusion_p["b"], fusion_p["g"], fusion_p["gb"])


# ----------------------------------------------------------------------------
# fully fused transformer encoder block (fused QKV MHA + residual LN + FFN + LN)
# ----------------------------------------------------------------------------
def _block_kernel(x_ref, wqkv_ref, bqkv_ref, wo_ref, bo_ref,
                  g1_ref, b1_ref, wff1_ref, bff1_ref, wff2_ref, bff2_ref,
                  g2_ref, b2_ref, bias_ref, o_ref, *, nhead, scale, eps):
    xv = x_ref[...]                                       # (L, D) bf16 residual stream
    xb = xv.astype(jnp.float32)
    xb_b = xv.astype(jnp.bfloat16)
    L, D = xb.shape
    dh = D // nhead

    # fused QKV: one lane-dense (L,D)@(D,3D) MXU push instead of 3*H narrow ones
    qkv = jnp.dot(xb_b, wqkv_ref[...],
                  preferred_element_type=jnp.float32) + bqkv_ref[...]       # (L, 3D)
    heads = []
    for h in range(nhead):
        qh = qkv[:, h * dh:(h + 1) * dh].astype(jnp.bfloat16)
        kh = qkv[:, D + h * dh:D + (h + 1) * dh].astype(jnp.bfloat16)
        vh = qkv[:, 2 * D + h * dh:2 * D + (h + 1) * dh].astype(jnp.bfloat16)
        # NT contraction on the MXU (no explicit transpose)
        s = lax.dot_general(qh, kh, (((1,), (1,)), ((), ())),
                            preferred_element_type=jnp.float32)
        s = s * scale + bias_ref[h].astype(jnp.float32)
        m = jnp.max(s, axis=-1, keepdims=True)
        p = jnp.exp(s - m)
        p = p * pl.reciprocal(jnp.sum(p, axis=-1, keepdims=True), approx=True)
        heads.append(jnp.dot(p.astype(jnp.bfloat16), vh,
                             preferred_element_type=jnp.float32))           # (L, dh)
    o_heads = jnp.concatenate(heads, axis=-1).astype(jnp.bfloat16)          # (L, D)
    # single lane-dense output projection
    o_attn = jnp.dot(o_heads, wo_ref[...],
                     preferred_element_type=jnp.float32) + bo_ref[...]

    x1 = _ln(xb + o_attn, g1_ref[...], b1_ref[...], eps)                    # post-norm
    h1 = _gelu(jnp.dot(x1.astype(jnp.bfloat16), wff1_ref[...],
                       preferred_element_type=jnp.float32)
               + bff1_ref[...]).astype(jnp.bfloat16)                        # bf16 early
    h2 = jnp.dot(h1, wff2_ref[...],
                 preferred_element_type=jnp.float32) + bff2_ref[...]
    o_ref[...] = _ln(x1 + h2, g2_ref[...], b2_ref[...], eps).astype(o_ref.dtype)


def transformer_block(x, p, cfg):
    B, L, D = x.shape
    H = cfg["nhead"]
    dh = D // H
    kernel = functools.partial(_block_kernel, nhead=H,
                               scale=1.0 / math.sqrt(dh), eps=1e-5)

    def w2(shape):
        return pl.BlockSpec(shape, lambda b: (0, 0))

    return pl.pallas_call(
        kernel,
        out_shape=jax.ShapeDtypeStruct((B, L, D), jnp.bfloat16),  # bf16 residual stream
        grid=(B,),
        in_specs=[
            pl.BlockSpec((None, L, D), lambda b: (b, 0, 0)),
            w2((D, 3 * D)), w2((1, 3 * D)),          # fused wqkv, bqkv
            w2((D, D)), w2((1, D)),                  # wo, bo
            w2((1, D)), w2((1, D)),                  # ln1 g, b
            w2((D, 4 * D)), w2((1, 4 * D)),          # ff1
            w2((4 * D, D)), w2((1, D)),              # ff2
            w2((1, D)), w2((1, D)),                  # ln2 g, b
            pl.BlockSpec((H, L, L), lambda b: (0, 0, 0)),   # relative-pos bias (bf16)
        ],
        out_specs=pl.BlockSpec((None, L, D), lambda b: (b, 0, 0)),
        compiler_params=pltpu.CompilerParams(
            dimension_semantics=("parallel",), vmem_limit_bytes=_VMEM_LIMIT),
    )(x, p["wqkv"], p["bqkv"], p["wo"], p["bo"], p["g1"], p["b1"],
      p["wff1"], p["bff1"], p["wff2"], p["bff2"], p["g2"], p["b2"], p["rel_bias"])


# ----------------------------------------------------------------------------
# attention pooling (per batch) + batched projection head (single small kernel)
# ----------------------------------------------------------------------------
def _attn_pool_kernel(x_ref, wp_ref, bp_ref, o_ref):
    xb = x_ref[...].astype(jnp.float32)                              # (L, D)
    s = jnp.sum(xb * wp_ref[...], axis=-1, keepdims=True) + bp_ref[...]   # (L, 1)
    m = jnp.max(s, axis=0, keepdims=True)
    w = jnp.exp(s - m)
    w = w * pl.reciprocal(jnp.sum(w, axis=0, keepdims=True), approx=True)
    o_ref[...] = jnp.sum(w * xb, axis=0, keepdims=True)              # (1, D)


def attention_pool(x, pool_p):
    B, L, D = x.shape
    out = pl.pallas_call(
        _attn_pool_kernel,
        out_shape=jax.ShapeDtypeStruct((B, 1, D), jnp.float32),
        grid=(B,),
        in_specs=[
            pl.BlockSpec((None, L, D), lambda b: (b, 0, 0)),
            pl.BlockSpec((1, D), lambda b: (0, 0)),
            pl.BlockSpec((1, 1), lambda b: (0, 0)),
        ],
        out_specs=pl.BlockSpec((None, 1, D), lambda b: (b, 0, 0)),
        compiler_params=pltpu.CompilerParams(dimension_semantics=("parallel",)),
    )(x, pool_p["w"], pool_p["b"])
    return out.reshape(B, D)


def _proj_head_kernel(x_ref, w1_ref, b1_ref, w2_ref, b2_ref, o_ref):
    h = _gelu(jnp.dot(x_ref[...].astype(jnp.bfloat16), w1_ref[...],
                      preferred_element_type=jnp.float32) + b1_ref[...])
    o_ref[...] = jnp.dot(h.astype(jnp.bfloat16), w2_ref[...],
                         preferred_element_type=jnp.float32) + b2_ref[...]


def projection_head(rep, p1, p2):
    B, D = rep.shape
    # whole-array kernel: (B, D) @ (D, D) x2 is sublane-dense, one launch.
    return pl.pallas_call(
        _proj_head_kernel,
        out_shape=jax.ShapeDtypeStruct((B, D), jnp.float32),
    )(rep, p1["w"], p1["b"], p2["w"], p2["b"])


# ----------------------------------------------------------------------------
# parameters
# ----------------------------------------------------------------------------
def exponential_linspace_int(start, end, num, divisible_by=1):
    def _round(x):
        return int(round(x / divisible_by) * divisible_by)
    base = math.exp(math.log(end / start) / (num - 1))
    return [_round(start * base ** i) for i in range(num)]


def _dense(key, shape, scale=0.05, dtype=jnp.bfloat16):
    return (scale * jax.random.normal(key, shape, jnp.float32)).astype(dtype)


def _init_conv(key, cin, cout, kw, groups, scale=0.1):
    k1, k2 = jax.random.split(key)
    w = scale * jax.random.normal(k1, (kw, cin, cout), jnp.float32)
    if groups > 1:
        cin_g, cout_g = cin // groups, cout // groups
        mask = ((jnp.arange(cin) // cin_g)[:, None]
                == (jnp.arange(cout) // cout_g)[None, :]).astype(jnp.float32)
        w = w * mask[None, :, :]           # grouped conv via masked dense weight
    w_res = scale * jax.random.normal(k2, (cin, cout), jnp.float32)
    return {"w": w.reshape(kw * cin, cout).astype(jnp.bfloat16),   # taps folded on K
            "b": jnp.zeros((1, cout), jnp.float32),
            "w_res": w_res.astype(jnp.bfloat16),
            "b_res": jnp.zeros((1, cout), jnp.float32)}


def _init_block(key, d, nhead, l2):
    ks = jax.random.split(key, 4)
    return {
        "wqkv": _dense(ks[0], (d, 3 * d)), "bqkv": jnp.zeros((1, 3 * d), jnp.float32),
        "wo": _dense(ks[1], (d, d)), "bo": jnp.zeros((1, d), jnp.float32),
        "g1": jnp.ones((1, d), jnp.float32), "b1": jnp.zeros((1, d), jnp.float32),
        "wff1": _dense(ks[2], (d, 4 * d)), "bff1": jnp.zeros((1, 4 * d), jnp.float32),
        "wff2": _dense(ks[3], (4 * d, d)), "bff2": jnp.zeros((1, d), jnp.float32),
        "g2": jnp.ones((1, d), jnp.float32), "b2": jnp.zeros((1, d), jnp.float32),
        "rel_bias": jnp.zeros((nhead, l2, l2), jnp.bfloat16),   # zero-init rel. bias
    }


def init_params(key, cfg):
    f1, f2, md = cfg["f1"], cfg["f2"], cfg["md"]
    l2, H = cfg["l2"], cfg["nhead"]
    kw = cfg["conv_kernel_size"]
    n_cnn, exp = cfg["n_cnn_layers"], cfg["expansion_factor"]
    keys = iter(jax.random.split(key, 64))

    dna_ch = exponential_linspace_int(4, f2, n_cnn + 3)
    dna_towers = [_init_conv(next(keys), dna_ch[i], dna_ch[i + 1], kw, groups=1)
                  for i in range(n_cnn + 2)]
    sig_ch = [f1 * exp ** i for i in range(n_cnn)]
    sig_towers = []
    for i in range(n_cnn):
        cout = sig_ch[i + 1] if i + 1 < n_cnn else exp * sig_ch[i]
        sig_towers.append(_init_conv(next(keys), sig_ch[i], cout, kw, groups=f1))

    blocks = [_init_block(next(keys), f2, H, l2) for _ in range(cfg["n_sab_layers"])]

    return {
        "dna_towers": dna_towers,
        "sig_towers": sig_towers,
        "xmd": {"w": _dense(next(keys), (f1, md)),
                "b": jnp.zeros((1, md), jnp.float32)},
        "fusion": {"w": _dense(next(keys), (2 * f2 + md, f2)),
                   "b": jnp.zeros((1, f2), jnp.float32),
                   "g": jnp.ones((1, f2), jnp.float32),
                   "gb": jnp.zeros((1, f2), jnp.float32)},
        "blocks": blocks,
        "attn_pool": {"w": 0.05 * jax.random.normal(next(keys), (1, f2), jnp.float32),
                      "b": jnp.zeros((1, 1), jnp.float32)},
        "proj1": {"w": _dense(next(keys), (f2, f2)),
                  "b": jnp.zeros((1, f2), jnp.float32)},
        "proj2": {"w": _dense(next(keys), (f2, f2)),
                  "b": jnp.zeros((1, f2), jnp.float32)},
    }


# ----------------------------------------------------------------------------
# full forward pass
# ----------------------------------------------------------------------------
def dino_candi_forward(params, src, seq, x_metadata, cfg, return_projected=True):
    B = src.shape[0]
    if seq.ndim != src.ndim:
        seq = jnp.broadcast_to(seq[None], (B,) + seq.shape)

    x_dna = seq.astype(jnp.bfloat16)
    for p, (pt, ps) in zip(params["dna_towers"], cfg["dna_pool"]):
        x_dna = conv_tower(x_dna, p, pt, ps, cfg["conv_kernel_size"])   # -> (B, l2, f2)
    x_sig = src.astype(jnp.bfloat16)
    for p, (pt, ps) in zip(params["sig_towers"], cfg["sig_pool"]):
        x_sig = conv_tower(x_sig, p, pt, ps, cfg["conv_kernel_size"])   # -> (B, l2, f2)

    # metadata embed + broadcast + concat + fusion Linear + LN in one kernel
    x = fuse_inputs(x_sig, x_dna, x_metadata, params["xmd"], params["fusion"])

    for blk in params["blocks"]:
        x = transformer_block(x, blk, cfg)

    if return_projected:
        rep = attention_pool(x, params["attn_pool"])                    # (B, f2)
        return projection_head(rep, params["proj1"], params["proj2"])
    return x


# ----------------------------------------------------------------------------
if __name__ == "__main__":
    cfg = dict(
        f1=4,                       # signal_dim
        md=8,                       # metadata_embedding_dim
        conv_kernel_size=3,
        n_cnn_layers=2,
        nhead=2,
        n_sab_layers=1,
        pool_size=2,
        context_length=16,
        expansion_factor=2,
    )
    cfg["f2"] = cfg["f1"] * cfg["expansion_factor"] ** cfg["n_cnn_layers"]          # 16
    cfg["l2"] = cfg["context_length"] // cfg["pool_size"] ** cfg["n_cnn_layers"]    # 4
    cfg["dna_pool"] = [("max", 5 if i >= cfg["n_cnn_layers"] else cfg["pool_size"])
                       for i in range(cfg["n_cnn_layers"] + 2)]
    cfg["sig_pool"] = [("avg", cfg["pool_size"]) for _ in range(cfg["n_cnn_layers"])]

    key = jax.random.PRNGKey(0)
    kp, k1, k2, k3 = jax.random.split(key, 4)
    params = init_params(kp, cfg)

    B = 2
    L_dna = cfg["context_length"] * 25        # DNA at bp resolution -> pooled to l2
    src = jax.random.normal(k1, (B, cfg["context_length"], cfg["f1"]), jnp.float32)
    seq = jax.nn.one_hot(jax.random.randint(k2, (B, L_dna), 0, 4), 4, dtype=jnp.float32)
    x_metadata = jax.random.normal(k3, (B, cfg["f1"]), jnp.float32)

    @jax.jit
    def run(params, src, seq, x_metadata):
        return dino_candi_forward(params, src, seq, x_metadata, cfg,
                                  return_projected=True)

    out = jax.block_until_ready(run(params, src, seq, x_metadata))
    assert out.shape == (B, cfg["f2"]), out.shape
    assert bool(jnp.all(jnp.isfinite(out)))
    print("KERNEL_OK")
</pallas_src>

<mosaic_0001>
module attributes {stable_mosaic.version = 11 : i64} {
  func.func @_conv_tower_kernel(%arg0: i32, %arg1: i32, %arg2: memref<1x1x10x8xbf16, #tpu.memory_space<vmem>>, %arg3: memref<24x16xbf16, #tpu.memory_space<vmem>>, %arg4: memref<1x16xf32, #tpu.memory_space<vmem>>, %arg5: memref<8x16xbf16, #tpu.memory_space<vmem>>, %arg6: memref<1x16xf32, #tpu.memory_space<vmem>>, %arg7: memref<1x4x16xbf16, #tpu.memory_space<vmem>>, %arg8: memref<10x8xf32, #tpu.memory_space<vmem>>) attributes {dimension_semantics = [#tpu.dimension_semantics<parallel>, #tpu.dimension_semantics<parallel>], iteration_bounds = array<i64: 2, 1>, scalar_prefetch = 0 : i64, scratch_operands = 1 : i64, tpu.core_type = #tpu.core_type<tc>, window_params = [{transform_indices = @transform_0, window_bounds = array<i64: 1, 1, 10, 8>}, {pipeline_mode = #tpu.pipeline_mode<synchronous>, transform_indices = @transform_1, window_bounds = array<i64: 24, 16>}, {pipeline_mode = #tpu.pipeline_mode<synchronous>, transform_indices = @transform_2, window_bounds = array<i64: 1, 16>}, {pipeline_mode = #tpu.pipeline_mode<synchronous>, transform_indices = @transform_3, window_bounds = array<i64: 8, 16>}, {pipeline_mode = #tpu.pipeline_mode<synchronous>, transform_indices = @transform_4, window_bounds = array<i64: 1, 16>}, {transform_indices = @transform_5, window_bounds = array<i64: 1, 4, 16>}]} {
    %c0 = arith.constant 0 : index
    %c0_0 = arith.constant 0 : index
    %c0_1 = arith.constant 0 : index
    %c0_2 = arith.constant 0 : index
    %0 = vector.load %arg2[%c0, %c0_0, %c0_1, %c0_2] : memref<1x1x10x8xbf16, #tpu.memory_space<vmem>>, vector<1x1x10x8xbf16>
    %1 = vector.shape_cast %0 : vector<1x1x10x8xbf16> to vector<10x8xbf16>
    %2 = arith.extf %1 : vector<10x8xbf16> to vector<10x8xf32>
    %c0_3 = arith.constant 0 : index
    %c0_4 = arith.constant 0 : index
    %3 = vector.load %arg8[%c0_3, %c0_4] : memref<10x8xf32, #tpu.memory_space<vmem>>, vector<10x8xf32>
    tpu.vector_store %arg8[%c0_3, %c0_4], %2 {strides = array<i32>} : memref<10x8xf32, #tpu.memory_space<vmem>>, vector<10x8xf32>,
    %c0_5 = arith.constant 0 : index
    %c0_6 = arith.constant 0 : index
    %4 = vector.load %arg4[%c0_5, %c0_6] : memref<1x16xf32, #tpu.memory_space<vmem>>, vector<1x16xf32>
    %c0_7 = arith.constant 0 : index
    %c0_8 = arith.constant 0 : index
    %5 = vector.load %arg6[%c0_7, %c0_8] : memref<1x16xf32, #tpu.memory_space<vmem>>, vector<1x16xf32>
    %c0_9 = arith.constant 0 : index
    %c0_10 = arith.constant 0 : index
    %6 = tpu.strided_load %arg8[%c0_9, %c0_10] {strides = array<i32: 2, 1>} : memref<10x8xf32, #tpu.memory_space<vmem>>, vector<4x8xf32>
    %c1 = arith.constant 1 : index
    %c0_11 = arith.constant 0 : index
    %7 = tpu.strided_load %arg8[%c1, %c0_11] {strides = array<i32: 2, 1>} : memref<10x8xf32, #tpu.memory_space<vmem>>, vector<4x8xf32>
    %c2 = arith.constant 2 : index
    %c0_12 = arith.constant 0 : index
    %8 = tpu.strided_load %arg8[%c2, %c0_12] {strides = array<i32: 2, 1>} : memref<10x8xf32, #tpu.memory_space<vmem>>, vector<4x8xf32>
    %9 = tpu.concatenate %6, %7, %8 in 1 : vector<4x8xf32>, vector<4x8xf32>, vector<4x8xf32> -> vector<4x24xf32>
    %10 = arith.truncf %9 : vector<4x24xf32> to vector<4x24xbf16>
    %c0_13 = arith.constant 0 : index
    %c0_14 = arith.constant 0 : index
    %11 = vector.load %arg3[%c0_13, %c0_14] : memref<24x16xbf16, #tpu.memory_space<vmem>>, vector<24x16xbf16>
    %cst = arith.constant dense<0.000000e+00> : vector<4x16xf32>
    %12 = tpu.matmul %10, %11, %cst {dimension_numbers = #tpu.dot_dimension_numbers<[1], [0], [0], [1], [0, 0, 1, 1], [], []>} : vector<4x24xbf16>, vector<24x16xbf16>, vector<4x16xf32> -> vector<4x16xf32>
    %13 = vector.broadcast %4 : vector<1x16xf32> to vector<4x16xf32>
    %14 = arith.addf %12, %13 : vector<4x16xf32>
    %15 = arith.truncf %7 : vector<4x8xf32> to vector<4x8xbf16>
    %c0_15 = arith.constant 0 : index
    %c0_16 = arith.constant 0 : index
    %16 = vector.load %arg5[%c0_15, %c0_16] : memref<8x16xbf16, #tpu.memory_space<vmem>>, vector<8x16xbf16>
    %cst_17 = arith.constant dense<0.000000e+00> : vector<4x16xf32>
    %17 = tpu.matmul %15, %16, %cst_17 {dimension_numbers = #tpu.dot_dimension_numbers<[1], [0], [0], [1], [0, 0, 1, 1], [], []>} : vector<4x8xbf16>, vector<8x16xbf16>, vector<4x16xf32> -> vector<4x16xf32>
    %18 = vector.broadcast %5 : vector<1x16xf32> to vector<4x16xf32>
    %19 = arith.addf %17, %18 : vector<4x16xf32>
    %cst_18 = arith.constant 5.000000e-01 : f32
    %20 = vector.broadcast %cst_18 : f32 to vector<4x16xf32>
    %21 = arith.mulf %20, %14 : vector<4x16xf32>
    %cst_19 = arith.constant 4.471500e-02 : f32
    %22 = vector.broadcast %cst_19 : f32 to vector<4x16xf32>
    %23 = arith.mulf %22, %14 : vector<4x16xf32>
    %24 = arith.mulf %23, %14 : vector<4x16xf32>
    %25 = arith.mulf %24, %14 : vector<4x16xf32>
    %26 = arith.addf %14, %25 : vector<4x16xf32>
    %cst_20 = arith.constant 0.797884583 : f32
    %27 = vector.broadcast %cst_20 : f32 to vector<4x16xf32>
    %28 = arith.mulf %27, %26 : vector<4x16xf32>
    %29 = math.tanh %28 : vector<4x16xf32>
    %cst_21 = arith.constant 1.000000e+00 : f32
    %30 = vector.broadcast %cst_21 : f32 to vector<4x16xf32>
    %31 = arith.addf %30, %29 : vector<4x16xf32>
    %32 = arith.mulf %21, %31 : vector<4x16xf32>
    %33 = arith.addf %32, %19 : vector<4x16xf32>
    %c1_22 = arith.constant 1 : index
    %c0_23 = arith.constant 0 : index
    %34 = tpu.strided_load %arg8[%c1_22, %c0_23] {strides = array<i32: 2, 1>} : memref<10x8xf32, #tpu.memory_space<vmem>>, vector<4x8xf32>
    %c2_24 = arith.constant 2 : index
    %c0_25 = arith.constant 0 : index
    %35 = tpu.strided_load %arg8[%c2_24, %c0_25] {strides = array<i32: 2, 1>} : memref<10x8xf32, #tpu.memory_space<vmem>>, vector<4x8xf32>
    %c3 = arith.constant 3 : index
    %c0_26 = arith.constant 0 : index
    %36 = tpu.strided_load %arg8[%c3, %c0_26] {strides = array<i32: 2, 1>} : memref<10x8xf32, #tpu.memory_space<vmem>>, vector<4x8xf32>
    %37 = tpu.concatenate %34, %35, %36 in 1 : vector<4x8xf32>, vector<4x8xf32>, vector<4x8xf32> -> vector<4x24xf32>
    %38 = arith.truncf %37 : vector<4x24xf32> to vector<4x24xbf16>
    %c0_27 = arith.constant 0 : index
    %c0_28 = arith.constant 0 : index
    %39 = vector.load %arg3[%c0_27, %c0_28] : memref<24x16xbf16, #tpu.memory_space<vmem>>, vector<24x16xbf16>
    %cst_29 = arith.constant dense<0.000000e+00> : vector<4x16xf32>
    %40 = tpu.matmul %38, %39, %cst_29 {dimension_numbers = #tpu.dot_dimension_numbers<[1], [0], [0], [1], [0, 0, 1, 1], [], []>} : vector<4x24xbf16>, vector<24x16xbf16>, vector<4x16xf32> -> vector<4x16xf32>
    %41 = vector.broadcast %4 : vector<1x16xf32> to vector<4x16xf32>
    %42 = arith.addf %40, %41 : vector<4x16xf32>
    %43 = arith.truncf %35 : vector<4x8xf32> to vector<4x8xbf16>
    %c0_30 = arith.constant 0 : index
    %c0_31 = arith.constant 0 : index
    %44 = vector.load %arg5[%c0_30, %c0_31] : memref<8x16xbf16, #tpu.memory_space<vmem>>, vector<8x16xbf16>
    %cst_32 = arith.constant dense<0.000000e+00> : vector<4x16xf32>
    %45 = tpu.matmul %43, %44, %cst_32 {dimension_numbers = #tpu.dot_dimension_numbers<[1], [0], [0], [1], [0, 0, 1, 1], [], []>} : vector<4x8xbf16>, vector<8x16xbf16>, vector<4x16xf32> -> vector<4x16xf32>
    %46 = vector.broadcast %5 : vector<1x16xf32> to vector<4x16xf32>
    %47 = arith.addf %45, %46 : vector<4x16xf32>
    %cst_33 = arith.constant 5.000000e-01 : f32
    %48 = vector.broadcast %cst_33 : f32 to vector<4x16xf32>
    %49 = arith.mulf %48, %42 : vector<4x16xf32>
    %cst_34 = arith.constant 4.471500e-02 : f32
    %50 = vector.broadcast %cst_34 : f32 to vector<4x16xf32>
    %51 = arith.mulf %50, %42 : vector<4x16xf32>
    %52 = arith.mulf %51, %42 : vector<4x16xf32>
    %53 = arith.mulf %52, %42 : vector<4x16xf32>
    %54 = arith.addf %42, %53 : vector<4x16xf32>
    %cst_35 = arith.constant 0.797884583 : f32
    %55 = vector.broadcast %cst_35 : f32 to vector<4x16xf32>
    %56 = arith.mulf %55, %54 : vector<4x16xf32>
    %57 = math.tanh %56 : vector<4x16xf32>
    %cst_36 = arith.constant 1.000000e+00 : f32
    %58 = vector.broadcast %cst_36 : f32 to vector<4x16xf32>
    %59 = arith.addf %58, %57 : vector<4x16xf32>
    %60 = arith.mulf %49, %59 : vector<4x16xf32>
    %61 = arith.addf %60, %47 : vector<4x16xf32>
    %62 = arith.addf %33, %61 : vector<4x16xf32>
    %cst_37 = arith.constant 5.000000e-01 : f32
    %63 = vector.broadcast %cst_37 : f32 to vector<4x16xf32>
    %64 = arith.mulf %62, %63 : vector<4x16xf32>
    %65 = arith.truncf %64 : vector<4x16xf32> to vector<4x16xbf16>
    %c0_38 = arith.constant 0 : index
    %c0_39 = arith.constant 0 : index
    %c0_40 = arith.constant 0 : index
    %66 = vector.load %arg7[%c0_38, %c0_39, %c0_40] : memref<1x4x16xbf16, #tpu.memory_space<vmem>>, vector<1x4x16xbf16>
    %67 = vector.shape_cast %66 : vector<1x4x16xbf16> to vector<4x16xbf16>
    %68 = vector.shape_cast %65 : vector<4x16xbf16> to vector<1x4x16xbf16>
    tpu.vector_store %arg7[%c0_38, %c0_39, %c0_40], %68 {strides = array<i32>} : memref<1x4x16xbf16, #tpu.memory_space<vmem>>, vector<1x4x16xbf16>,
    return
  }
  func.func @transform_0(%arg0: i32, %arg1: i32) -> (i32, i32, i32, i32) {
    %c0_i32 = arith.constant 0 : i32
    %c0_i32_0 = arith.constant 0 : i32
    %c0_i32_1 = arith.constant 0 : i32
    return %arg0, %arg1, %c0_i32, %c0_i32_0 : i32, i32, i32, i32
  }
  func.func @transform_1(%arg0: i32, %arg1: i32) -> (i32, i32) {
    %c0_i32 = arith.constant 0 : i32
    %c0_i32_0 = arith.constant 0 : i32
    %c0_i32_1 = arith.constant 0 : i32
    return %c0_i32, %c0_i32_0 : i32, i32
  }
  func.func @transform_2(%arg0: i32, %arg1: i32) -> (i32, i32) {
    %c0_i32 = arith.constant 0 : i32
    %c0_i32_0 = arith.constant 0 : i32
    %c0_i32_1 = arith.constant 0 : i32
    return %c0_i32, %c0_i32_0 : i32, i32
  }
  func.func @transform_3(%arg0: i32, %arg1: i32) -> (i32, i32) {
    %c0_i32 = arith.constant 0 : i32
    %c0_i32_0 = arith.constant 0 : i32
    %c0_i32_1 = arith.constant 0 : i32
    return %c0_i32, %c0_i32_0 : i32, i32
  }
  func.func @transform_4(%arg0: i32, %arg1: i32) -> (i32, i32) {
    %c0_i32 = arith.constant 0 : i32
    %c0_i32_0 = arith.constant 0 : i32
    %c0_i32_1 = arith.constant 0 : i32
    return %c0_i32, %c0_i32_0 : i32, i32
  }
  func.func @transform_5(%arg0: i32, %arg1: i32) -> (i32, i32, i32) {
    %c0_i32 = arith.constant 0 : i32
    %c0_i32_0 = arith.constant 0 : i32
    return %arg0, %arg1, %c0_i32 : i32, i32, i32
  }
}

module attributes {stable_mosaic.version = 11 : i64} {
  func.func @_conv_tower_kernel(%arg0: i32, %arg1: i32, %arg2: memref<1x1x18x4xbf16, #tpu.memory_space<vmem>>, %arg3: memref<12x8xbf16, #tpu.memory_space<vmem>>, %arg4: memref<1x8xf32, #tpu.memory_space<vmem>>, %arg5: memref<4x8xbf16, #tpu.memory_space<vmem>>, %arg6: memref<1x8xf32, #tpu.memory_space<vmem>>, %arg7: memref<1x8x8xbf16, #tpu.memory_space<vmem>>, %arg8: memref<18x4xf32, #tpu.memory_space<vmem>>) attributes {dimension_semantics = [#tpu.dimension_semantics<parallel>, #tpu.dimension_semantics<parallel>], iteration_bounds = array<i64: 2, 1>, scalar_prefetch = 0 : i64, scratch_operands = 1 : i64, tpu.core_type = #tpu.core_type<tc>, window_params = [{transform_indices = @transform_0, window_bounds = array<i64: 1, 1, 18, 4>}, {pipeline_mode = #tpu.pipeline_mode<synchronous>, transform_indices = @transform_1, window_bounds = array<i64: 12, 8>}, {pipeline_mode = #tpu.pipeline_mode<synchronous>, transform_indices = @transform_2, window_bounds = array<i64: 1, 8>}, {pipeline_mode = #tpu.pipeline_mode<synchronous>, transform_indices = @transform_3, window_bounds = array<i64: 4, 8>}, {pipeline_mode = #tpu.pipeline_mode<synchronous>, transform_indices = @transform_4, window_bounds = array<i64: 1, 8>}, {transform_indices = @transform_5, window_bounds = array<i64: 1, 8, 8>}]} {
    %c0 = arith.constant 0 : index
    %c0_0 = arith.constant 0 : index
    %c0_1 = arith.constant 0 : index
    %c0_2 = arith.constant 0 : index
    %0 = vector.load %arg2[%c0, %c0_0, %c0_1, %c0_2] : memref<1x1x18x4xbf16, #tpu.memory_space<vmem>>, vector<1x1x18x4xbf16>
    %1 = vector.shape_cast %0 : vector<1x1x18x4xbf16> to vector<18x4xbf16>
    %2 = arith.extf %1 : vector<18x4xbf16> to vector<18x4xf32>
    %c0_3 = arith.constant 0 : index
    %c0_4 = arith.constant 0 : index
    %3 = vector.load %arg8[%c0_3, %c0_4] : memref<18x4xf32, #tpu.memory_space<vmem>>, vector<18x4xf32>
    tpu.vector_store %arg8[%c0_3, %c0_4], %2 {strides = array<i32>} : memref<18x4xf32, #tpu.memory_space<vmem>>, vector<18x4xf32>,
    %c0_5 = arith.constant 0 : index
    %c0_6 = arith.constant 0 : index
    %4 = vector.load %arg4[%c0_5, %c0_6] : memref<1x8xf32, #tpu.memory_space<vmem>>, vector<1x8xf32>
    %c0_7 = arith.constant 0 : index
    %c0_8 = arith.constant 0 : index
    %5 = vector.load %arg6[%c0_7, %c0_8] : memref<1x8xf32, #tpu.memory_space<vmem>>, vector<1x8xf32>
    %c0_9 = arith.constant 0 : index
    %c0_10 = arith.constant 0 : index
    %6 = tpu.strided_load %arg8[%c0_9, %c0_10] {strides = array<i32: 2, 1>} : memref<18x4xf32, #tpu.memory_space<vmem>>, vector<8x4xf32>
    %c1 = arith.constant 1 : index
    %c0_11 = arith.constant 0 : index
    %7 = tpu.strided_load %arg8[%c1, %c0_11] {strides = array<i32: 2, 1>} : memref<18x4xf32, #tpu.memory_space<vmem>>, vector<8x4xf32>
    %c2 = arith.constant 2 : index
    %c0_12 = arith.constant 0 : index
    %8 = tpu.strided_load %arg8[%c2, %c0_12] {strides = array<i32: 2, 1>} : memref<18x4xf32, #tpu.memory_space<vmem>>, vector<8x4xf32>
    %9 = tpu.concatenate %6, %7, %8 in 1 : vector<8x4xf32>, vector<8x4xf32>, vector<8x4xf32> -> vector<8x12xf32>
    %10 = arith.truncf %9 : vector<8x12xf32> to vector<8x12xbf16>
    %c0_13 = arith.constant 0 : index
    %c0_14 = arith.constant 0 : index
    %11 = vector.load %arg3[%c0_13, %c0_14] : memref<12x8xbf16, #tpu.memory_space<vmem>>, vector<12x8xbf16>
    %cst = arith.constant dense<0.000000e+00> : vector<8x8xf32>
    %12 = tpu.matmul %10, %11, %cst {dimension_numbers = #tpu.dot_dimension_numbers<[1], [0], [0], [1], [0, 0, 1, 1], [], []>} : vector<8x12xbf16>, vector<12x8xbf16>, vector<8x8xf32> -> vector<8x8xf32>
    %13 = vector.broadcast %4 : vector<1x8xf32> to vector<8x8xf32>
    %14 = arith.addf %12, %13 : vector<8x8xf32>
    %15 = arith.truncf %7 : vector<8x4xf32> to vector<8x4xbf16>
    %c0_15 = arith.constant 0 : index
    %c0_16 = arith.constant 0 : index
    %16 = vector.load %arg5[%c0_15, %c0_16] : memref<4x8xbf16, #tpu.memory_space<vmem>>, vector<4x8xbf16>
    %cst_17 = arith.constant dense<0.000000e+00> : vector<8x8xf32>
    %17 = tpu.matmul %15, %16, %cst_17 {dimension_numbers = #tpu.dot_dimension_numbers<[1], [0], [0], [1], [0, 0, 1, 1], [], []>} : vector<8x4xbf16>, vector<4x8xbf16>, vector<8x8xf32> -> vector<8x8xf32>
    %18 = vector.broadcast %5 : vector<1x8xf32> to vector<8x8xf32>
    %19 = arith.addf %17, %18 : vector<8x8xf32>
    %cst_18 = arith.constant 5.000000e-01 : f32
    %20 = vector.broadcast %cst_18 : f32 to vector<8x8xf32>
    %21 = arith.mulf %20, %14 : vector<8x8xf32>
    %cst_19 = arith.constant 4.471500e-02 : f32
    %22 = vector.broadcast %cst_19 : f32 to vector<8x8xf32>
    %23 = arith.mulf %22, %14 : vector<8x8xf32>
    %24 = arith.mulf %23, %14 : vector<8x8xf32>
    %25 = arith.mulf %24, %14 : vector<8x8xf32>
    %26 = arith.addf %14, %25 : vector<8x8xf32>
    %cst_20 = arith.constant 0.797884583 : f32
    %27 = vector.broadcast %cst_20 : f32 to vector<8x8xf32>
    %28 = arith.mulf %27, %26 : vector<8x8xf32>
    %29 = math.tanh %28 : vector<8x8xf32>
    %cst_21 = arith.constant 1.000000e+00 : f32
    %30 = vector.broadcast %cst_21 : f32 to vector<8x8xf32>
    %31 = arith.addf %30, %29 : vector<8x8xf32>
    %32 = arith.mulf %21, %31 : vector<8x8xf32>
    %33 = arith.addf %32, %19 : vector<8x8xf32>
    %c1_22 = arith.constant 1 : index
    %c0_23 = arith.constant 0 : index
    %34 = tpu.strided_load %arg8[%c1_22, %c0_23] {strides = array<i32: 2, 1>} : memref<18x4xf32, #tpu.memory_space<vmem>>, vector<8x4xf32>
    %c2_24 = arith.constant 2 : index
    %c0_25 = arith.constant 0 : index
    %35 = tpu.strided_load %arg8[%c2_24, %c0_25] {strides = array<i32: 2, 1>} : memref<18x4xf32, #tpu.memory_space<vmem>>, vector<8x4xf32>
    %c3 = arith.constant 3 : index
    %c0_26 = arith.constant 0 : index
    %36 = tpu.strided_load %arg8[%c3, %c0_26] {strides = array<i32: 2, 1>} : memref<18x4xf32, #tpu.memory_space<vmem>>, vector<8x4xf32>
    %37 = tpu.concatenate %34, %35, %36 in 1 : vector<8x4xf32>, vector<8x4xf32>, vector<8x4xf32> -> vector<8x12xf32>
    %38 = arith.truncf %37 : vector<8x12xf32> to vector<8x12xbf16>
    %c0_27 = arith.constant 0 : index
    %c0_28 = arith.constant 0 : index
    %39 = vector.load %arg3[%c0_27, %c0_28] : memref<12x8xbf16, #tpu.memory_space<vmem>>, vector<12x8xbf16>
    %cst_29 = arith.constant dense<0.000000e+00> : vector<8x8xf32>
    %40 = tpu.matmul %38, %39, %cst_29 {dimension_numbers = #tpu.dot_dimension_numbers<[1], [0], [0], [1], [0, 0, 1, 1], [], []>} : vector<8x12xbf16>, vector<12x8xbf16>, vector<8x8xf32> -> vector<8x8xf32>
    %41 = vector.broadcast %4 : vector<1x8xf32> to vector<8x8xf32>
    %42 = arith.addf %40, %41 : vector<8x8xf32>
    %43 = arith.truncf %35 : vector<8x4xf32> to vector<8x4xbf16>
    %c0_30 = arith.constant 0 : index
    %c0_31 = arith.constant 0 : index
    %44 = vector.load %arg5[%c0_30, %c0_31] : memref<4x8xbf16, #tpu.memory_space<vmem>>, vector<4x8xbf16>
    %cst_32 = arith.constant dense<0.000000e+00> : vector<8x8xf32>
    %45 = tpu.matmul %43, %44, %cst_32 {dimension_numbers = #tpu.dot_dimension_numbers<[1], [0], [0], [1], [0, 0, 1, 1], [], []>} : vector<8x4xbf16>, vector<4x8xbf16>, vector<8x8xf32> -> vector<8x8xf32>
    %46 = vector.broadcast %5 : vector<1x8xf32> to vector<8x8xf32>
    %47 = arith.addf %45, %46 : vector<8x8xf32>
    %cst_33 = arith.constant 5.000000e-01 : f32
    %48 = vector.broadcast %cst_33 : f32 to vector<8x8xf32>
    %49 = arith.mulf %48, %42 : vector<8x8xf32>
    %cst_34 = arith.constant 4.471500e-02 : f32
    %50 = vector.broadcast %cst_34 : f32 to vector<8x8xf32>
    %51 = arith.mulf %50, %42 : vector<8x8xf32>
    %52 = arith.mulf %51, %42 : vector<8x8xf32>
    %53 = arith.mulf %52, %42 : vector<8x8xf32>
    %54 = arith.addf %42, %53 : vector<8x8xf32>
    %cst_35 = arith.constant 0.797884583 : f32
    %55 = vector.broadcast %cst_35 : f32 to vector<8x8xf32>
    %56 = arith.mulf %55, %54 : vector<8x8xf32>
    %57 = math.tanh %56 : vector<8x8xf32>
    %cst_36 = arith.constant 1.000000e+00 : f32
    %58 = vector.broadcast %cst_36 : f32 to vector<8x8xf32>
    %59 = arith.addf %58, %57 : vector<8x8xf32>
    %60 = arith.mulf %49, %59 : vector<8x8xf32>
    %61 = arith.addf %60, %47 : vector<8x8xf32>
    %62 = arith.addf %33, %61 : vector<8x8xf32>
    %cst_37 = arith.constant 5.000000e-01 : f32
    %63 = vector.broadcast %cst_37 : f32 to vector<8x8xf32>
    %64 = arith.mulf %62, %63 : vector<8x8xf32>
    %65 = arith.truncf %64 : vector<8x8xf32> to vector<8x8xbf16>
    %c0_38 = arith.constant 0 : index
    %c0_39 = arith.constant 0 : index
    %c0_40 = arith.constant 0 : index
    %66 = vector.load %arg7[%c0_38, %c0_39, %c0_40] : memref<1x8x8xbf16, #tpu.memory_space<vmem>>, vector<1x8x8xbf16>
    %67 = vector.shape_cast %66 : vector<1x8x8xbf16> to vector<8x8xbf16>
    %68 = vector.shape_cast %65 : vector<8x8xbf16> to vector<1x8x8xbf16>
    tpu.vector_store %arg7[%c0_38, %c0_39, %c0_40], %68 {strides = array<i32>} : memref<1x8x8xbf16, #tpu.memory_space<vmem>>, vector<1x8x8xbf16>,
    return
  }
  func.func @transform_0(%arg0: i32, %arg1: i32) -> (i32, i32, i32, i32) {
    %c0_i32 = arith.constant 0 : i32
    %c0_i32_0 = arith.constant 0 : i32
    %c0_i32_1 = arith.constant 0 : i32
    return %arg0, %arg1, %c0_i32, %c0_i32_0 : i32, i32, i32, i32
  }
  func.func @transform_1(%arg0: i32, %arg1: i32) -> (i32, i32) {
    %c0_i32 = arith.constant 0 : i32
    %c0_i32_0 = arith.constant 0 : i32
    %c0_i32_1 = arith.constant 0 : i32
    return %c0_i32, %c0_i32_0 : i32, i32
  }
  func.func @transform_2(%arg0: i32, %arg1: i32) -> (i32, i32) {
    %c0_i32 = arith.constant 0 : i32
    %c0_i32_0 = arith.constant 0 : i32
    %c0_i32_1 = arith.constant 0 : i32
    return %c0_i32, %c0_i32_0 : i32, i32
  }
  func.func @transform_3(%arg0: i32, %arg1: i32) -> (i32, i32) {
    %c0_i32 = arith.constant 0 : i32
    %c0_i32_0 = arith.constant 0 : i32
    %c0_i32_1 = arith.constant 0 : i32
    return %c0_i32, %c0_i32_0 : i32, i32
  }
  func.func @transform_4(%arg0: i32, %arg1: i32) -> (i32, i32) {
    %c0_i32 = arith.constant 0 : i32
    %c0_i32_0 = arith.constant 0 : i32
    %c0_i32_1 = arith.constant 0 : i32
    return %c0_i32, %c0_i32_0 : i32, i32
  }
  func.func @transform_5(%arg0: i32, %arg1: i32) -> (i32, i32, i32) {
    %c0_i32 = arith.constant 0 : i32
    %c0_i32_0 = arith.constant 0 : i32
    return %arg0, %arg1, %c0_i32 : i32, i32, i32
  }
}

module attributes {stable_mosaic.version = 11 : i64} {
  func.func @_conv_tower_kernel(%arg0: i32, %arg1: i32, %arg2: memref<1x1x402x4xbf16, #tpu.memory_space<vmem>>, %arg3: memref<12x6xbf16, #tpu.memory_space<vmem>>, %arg4: memref<1x6xf32, #tpu.memory_space<vmem>>, %arg5: memref<4x6xbf16, #tpu.memory_space<vmem>>, %arg6: memref<1x6xf32, #tpu.memory_space<vmem>>, %arg7: memref<1x200x6xbf16, #tpu.memory_space<vmem>>, %arg8: memref<402x4xf32, #tpu.memory_space<vmem>>) attributes {dimension_semantics = [#tpu.dimension_semantics<parallel>, #tpu.dimension_semantics<parallel>], iteration_bounds = array<i64: 2, 1>, scalar_prefetch = 0 : i64, scratch_operands = 1 : i64, tpu.core_type = #tpu.core_type<tc>, window_params = [{transform_indices = @transform_0, window_bounds = array<i64: 1, 1, 402, 4>}, {pipeline_mode = #tpu.pipeline_mode<synchronous>, transform_indices = @transform_1, window_bounds = array<i64: 12, 6>}, {pipeline_mode = #tpu.pipeline_mode<synchronous>, transform_indices = @transform_2, window_bounds = array<i64: 1, 6>}, {pipeline_mode = #tpu.pipeline_mode<synchronous>, transform_indices = @transform_3, window_bounds = array<i64: 4, 6>}, {pipeline_mode = #tpu.pipeline_mode<synchronous>, transform_indices = @transform_4, window_bounds = array<i64: 1, 6>}, {transform_indices = @transform_5, window_bounds = array<i64: 1, 200, 6>}]} {
    %c0 = arith.constant 0 : index
    %c0_0 = arith.constant 0 : index
    %c0_1 = arith.constant 0 : index
    %c0_2 = arith.constant 0 : index
    %0 = vector.load %arg2[%c0, %c0_0, %c0_1, %c0_2] : memref<1x1x402x4xbf16, #tpu.memory_space<vmem>>, vector<1x1x402x4xbf16>
    %1 = vector.shape_cast %0 : vector<1x1x402x4xbf16> to vector<402x4xbf16>
    %2 = arith.extf %1 : vector<402x4xbf16> to vector<402x4xf32>
    %c0_3 = arith.constant 0 : index
    %c0_4 = arith.constant 0 : index
    %3 = vector.load %arg8[%c0_3, %c0_4] : memref<402x4xf32, #tpu.memory_space<vmem>>, vector<402x4xf32>
    tpu.vector_store %arg8[%c0_3, %c0_4], %2 {strides = array<i32>} : memref<402x4xf32, #tpu.memory_space<vmem>>, vector<402x4xf32>,
    %c0_5 = arith.constant 0 : index
    %c0_6 = arith.constant 0 : index
    %4 = vector.load %arg4[%c0_5, %c0_6] : memref<1x6xf32, #tpu.memory_space<vmem>>, vector<1x6xf32>
    %c0_7 = arith.constant 0 : index
    %c0_8 = arith.constant 0 : index
    %5 = vector.load %arg6[%c0_7, %c0_8] : memref<1x6xf32, #tpu.memory_space<vmem>>, vector<1x6xf32>
    %c0_9 = arith.constant 0 : index
    %c0_10 = arith.constant 0 : index
    %6 = tpu.strided_load %arg8[%c0_9, %c0_10] {strides = array<i32: 2, 1>} : memref<402x4xf32, #tpu.memory_space<vmem>>, vector<200x4xf32>
    %c1 = arith.constant 1 : index
    %c0_11 = arith.constant 0 : index
    %7 = tpu.strided_load %arg8[%c1, %c0_11] {strides = array<i32: 2, 1>} : memref<402x4xf32, #tpu.memory_space<vmem>>, vector<200x4xf32>
    %c2 = arith.constant 2 : index
    %c0_12 = arith.constant 0 : index
    %8 = tpu.strided_load %arg8[%c2, %c0_12] {strides = array<i32: 2, 1>} : memref<402x4xf32, #tpu.memory_space<vmem>>, vector<200x4xf32>
    %9 = tpu.concatenate %6, %7, %8 in 1 : vector<200x4xf32>, vector<200x4xf32>, vector<200x4xf32> -> vector<200x12xf32>
    %10 = arith.truncf %9 : vector<200x12xf32> to vector<200x12xbf16>
    %c0_13 = arith.constant 0 : index
    %c0_14 = arith.constant 0 : index
    %11 = vector.load %arg3[%c0_13, %c0_14] : memref<12x6xbf16, #tpu.memory_space<vmem>>, vector<12x6xbf16>
    %cst = arith.constant dense<0.000000e+00> : vector<200x6xf32>
    %12 = tpu.matmul %10, %11, %cst {dimension_numbers = #tpu.dot_dimension_numbers<[1], [0], [0], [1], [0, 0, 1, 1], [], []>} : vector<200x12xbf16>, vector<12x6xbf16>, vector<200x6xf32> -> vector<200x6xf32>
    %13 = vector.broadcast %4 : vector<1x6xf32> to vector<200x6xf32>
    %14 = arith.addf %12, %13 : vector<200x6xf32>
    %15 = arith.truncf %7 : vector<200x4xf32> to vector<200x4xbf16>
    %c0_15 = arith.constant 0 : index
    %c0_16 = arith.constant 0 : index
    %16 = vector.load %arg5[%c0_15, %c0_16] : memref<4x6xbf16, #tpu.memory_space<vmem>>, vector<4x6xbf16>
    %cst_17 = arith.constant dense<0.000000e+00> : vector<200x6xf32>
    %17 = tpu.matmul %15, %16, %cst_17 {dimension_numbers = #tpu.dot_dimension_numbers<[1], [0], [0], [1], [0, 0, 1, 1], [], []>} : vector<200x4xbf16>, vector<4x6xbf16>, vector<200x6xf32> -> vector<200x6xf32>
    %18 = vector.broadcast %5 : vector<1x6xf32> to vector<200x6xf32>
    %19 = arith.addf %17, %18 : vector<200x6xf32>
    %cst_18 = arith.constant 5.000000e-01 : f32
    %20 = vector.broadcast %cst_18 : f32 to vector<200x6xf32>
    %21 = arith.mulf %20, %14 : vector<200x6xf32>
    %cst_19 = arith.constant 4.471500e-02 : f32
    %22 = vector.broadcast %cst_19 : f32 to vector<200x6xf32>
    %23 = arith.mulf %22, %14 : vector<200x6xf32>
    %24 = arith.mulf %23, %14 : vector<200x6xf32>
    %25 = arith.mulf %24, %14 : vector<200x6xf32>
    %26 = arith.addf %14, %25 : vector<200x6xf32>
    %cst_20 = arith.constant 0.797884583 : f32
    %27 = vector.broadcast %cst_20 : f32 to vector<200x6xf32>
    %28 = arith.mulf %27, %26 : vector<200x6xf32>
    %29 = math.tanh %28 : vector<200x6xf32>
    %cst_21 = arith.constant 1.000000e+00 : f32
    %30 = vector.broadcast %cst_21 : f32 to vector<200x6xf32>
    %31 = arith.addf %30, %29 : vector<200x6xf32>
    %32 = arith.mulf %21, %31 : vector<200x6xf32>
    %33 = arith.addf %32, %19 : vector<200x6xf32>
    %c1_22 = arith.constant 1 : index
    %c0_23 = arith.constant 0 : index
    %34 = tpu.strided_load %arg8[%c1_22, %c0_23] {strides = array<i32: 2, 1>} : memref<402x4xf32, #tpu.memory_space<vmem>>, vector<200x4xf32>
    %c2_24 = arith.constant 2 : index
    %c0_25 = arith.constant 0 : index
    %35 = tpu.strided_load %arg8[%c2_24, %c0_25] {strides = array<i32: 2, 1>} : memref<402x4xf32, #tpu.memory_space<vmem>>, vector<200x4xf32>
    %c3 = arith.constant 3 : index
    %c0_26 = arith.constant 0 : index
    %36 = tpu.strided_load %arg8[%c3, %c0_26] {strides = array<i32: 2, 1>} : memref<402x4xf32, #tpu.memory_space<vmem>>, vector<200x4xf32>
    %37 = tpu.concatenate %34, %35, %36 in 1 : vector<200x4xf32>, vector<200x4xf32>, vector<200x4xf32> -> vector<200x12xf32>
    %38 = arith.truncf %37 : vector<200x12xf32> to vector<200x12xbf16>
    %c0_27 = arith.constant 0 : index
    %c0_28 = arith.constant 0 : index
    %39 = vector.load %arg3[%c0_27, %c0_28] : memref<12x6xbf16, #tpu.memory_space<vmem>>, vector<12x6xbf16>
    %cst_29 = arith.constant dense<0.000000e+00> : vector<200x6xf32>
    %40 = tpu.matmul %38, %39, %cst_29 {dimension_numbers = #tpu.dot_dimension_numbers<[1], [0], [0], [1], [0, 0, 1, 1], [], []>} : vector<200x12xbf16>, vector<12x6xbf16>, vector<200x6xf32> -> vector<200x6xf32>
    %41 = vector.broadcast %4 : vector<1x6xf32> to vector<200x6xf32>
    %42 = arith.addf %40, %41 : vector<200x6xf32>
    %43 = arith.truncf %35 : vector<200x4xf32> to vector<200x4xbf16>
    %c0_30 = arith.constant 0 : index
    %c0_31 = arith.constant 0 : index
    %44 = vector.load %arg5[%c0_30, %c0_31] : memref<4x6xbf16, #tpu.memory_space<vmem>>, vector<4x6xbf16>
    %cst_32 = arith.constant dense<0.000000e+00> : vector<200x6xf32>
    %45 = tpu.matmul %43, %44, %cst_32 {dimension_numbers = #tpu.dot_dimension_numbers<[1], [0], [0], [1], [0, 0, 1, 1], [], []>} : vector<200x4xbf16>, vector<4x6xbf16>, vector<200x6xf32> -> vector<200x6xf32>
    %46 = vector.broadcast %5 : vector<1x6xf32> to vector<200x6xf32>
    %47 = arith.addf %45, %46 : vector<200x6xf32>
    %cst_33 = arith.constant 5.000000e-01 : f32
    %48 = vector.broadcast %cst_33 : f32 to vector<200x6xf32>
    %49 = arith.mulf %48, %42 : vector<200x6xf32>
    %cst_34 = arith.constant 4.471500e-02 : f32
    %50 = vector.broadcast %cst_34 : f32 to vector<200x6xf32>
    %51 = arith.mulf %50, %42 : vector<200x6xf32>
    %52 = arith.mulf %51, %42 : vector<200x6xf32>
    %53 = arith.mulf %52, %42 : vector<200x6xf32>
    %54 = arith.addf %42, %53 : vector<200x6xf32>
    %cst_35 = arith.constant 0.797884583 : f32
    %55 = vector.broadcast %cst_35 : f32 to vector<200x6xf32>
    %56 = arith.mulf %55, %54 : vector<200x6xf32>
    %57 = math.tanh %56 : vector<200x6xf32>
    %cst_36 = arith.constant 1.000000e+00 : f32
    %58 = vector.broadcast %cst_36 : f32 to vector<200x6xf32>
    %59 = arith.addf %58, %57 : vector<200x6xf32>
    %60 = arith.mulf %49, %59 : vector<200x6xf32>
    %61 = arith.addf %60, %47 : vector<200x6xf32>
    %62 = arith.maximumf %33, %61 : vector<200x6xf32>
    %63 = arith.truncf %62 : vector<200x6xf32> to vector<200x6xbf16>
    %c0_37 = arith.constant 0 : index
    %c0_38 = arith.constant 0 : index
    %c0_39 = arith.constant 0 : index
    %64 = vector.load %arg7[%c0_37, %c0_38, %c0_39] : memref<1x200x6xbf16, #tpu.memory_space<vmem>>, vector<1x200x6xbf16>
    %65 = vector.shape_cast %64 : vector<1x200x6xbf16> to vector<200x6xbf16>
    %66 = vector.shape_cast %63 : vector<200x6xbf16> to vector<1x200x6xbf16>
    tpu.vector_store %arg7[%c0_37, %c0_38, %c0_39], %66 {strides = array<i32>} : memref<1x200x6xbf16, #tpu.memory_space<vmem>>, vector<1x200x6xbf16>,
    return
  }
  func.func @transform_0(%arg0: i32, %arg1: i32) -> (i32, i32, i32, i32) {
    %c0_i32 = arith.constant 0 : i32
    %c0_i32_0 = arith.constant 0 : i32
    %c0_i32_1 = arith.constant 0 : i32
    return %arg0, %arg1, %c0_i32, %c0_i32_0 : i32, i32, i32, i32
  }
  func.func @transform_1(%arg0: i32, %arg1: i32) -> (i32, i32) {
    %c0_i32 = arith.constant 0 : i32
    %c0_i32_0 = arith.constant 0 : i32
    %c0_i32_1 = arith.constant 0 : i32
    return %c0_i32, %c0_i32_0 : i32, i32
  }
  func.func @transform_2(%arg0: i32, %arg1: i32) -> (i32, i32) {
    %c0_i32 = arith.constant 0 : i32
    %c0_i32_0 = arith.constant 0 : i32
    %c0_i32_1 = arith.constant 0 : i32
    return %c0_i32, %c0_i32_0 : i32, i32
  }
  func.func @transform_3(%arg0: i32, %arg1: i32) -> (i32, i32) {
    %c0_i32 = arith.constant 0 : i32
    %c0_i32_0 = arith.constant 0 : i32
    %c0_i32_1 = arith.constant 0 : i32
    return %c0_i32, %c0_i32_0 : i32, i32
  }
  func.func @transform_4(%arg0: i32, %arg1: i32) -> (i32, i32) {
    %c0_i32 = arith.constant 0 : i32
    %c0_i32_0 = arith.constant 0 : i32
    %c0_i32_1 = arith.constant 0 : i32
    return %c0_i32, %c0_i32_0 : i32, i32
  }
  func.func @transform_5(%arg0: i32, %arg1: i32) -> (i32, i32, i32) {
    %c0_i32 = arith.constant 0 : i32
    %c0_i32_0 = arith.constant 0 : i32
    return %arg0, %arg1, %c0_i32 : i32, i32, i32
  }
}

module attributes {stable_mosaic.version = 11 : i64} {
  func.func @_conv_tower_kernel(%arg0: i32, %arg1: i32, %arg2: memref<1x1x202x6xbf16, #tpu.memory_space<vmem>>, %arg3: memref<18x8xbf16, #tpu.memory_space<vmem>>, %arg4: memref<1x8xf32, #tpu.memory_space<vmem>>, %arg5: memref<6x8xbf16, #tpu.memory_space<vmem>>, %arg6: memref<1x8xf32, #tpu.memory_space<vmem>>, %arg7: memref<1x100x8xbf16, #tpu.memory_space<vmem>>, %arg8: memref<202x6xf32, #tpu.memory_space<vmem>>) attributes {dimension_semantics = [#tpu.dimension_semantics<parallel>, #tpu.dimension_semantics<parallel>], iteration_bounds = array<i64: 2, 1>, scalar_prefetch = 0 : i64, scratch_operands = 1 : i64, tpu.core_type = #tpu.core_type<tc>, window_params = [{transform_indices = @transform_0, window_bounds = array<i64: 1, 1, 202, 6>}, {pipeline_mode = #tpu.pipeline_mode<synchronous>, transform_indices = @transform_1, window_bounds = array<i64: 18, 8>}, {pipeline_mode = #tpu.pipeline_mode<synchronous>, transform_indices = @transform_2, window_bounds = array<i64: 1, 8>}, {pipeline_mode = #tpu.pipeline_mode<synchronous>, transform_indices = @transform_3, window_bounds = array<i64: 6, 8>}, {pipeline_mode = #tpu.pipeline_mode<synchronous>, transform_indices = @transform_4, window_bounds = array<i64: 1, 8>}, {transform_indices = @transform_5, window_bounds = array<i64: 1, 100, 8>}]} {
    %c0 = arith.constant 0 : index
    %c0_0 = arith.constant 0 : index
    %c0_1 = arith.constant 0 : index
    %c0_2 = arith.constant 0 : index
    %0 = vector.load %arg2[%c0, %c0_0, %c0_1, %c0_2] : memref<1x1x202x6xbf16, #tpu.memory_space<vmem>>, vector<1x1x202x6xbf16>
    %1 = vector.shape_cast %0 : vector<1x1x202x6xbf16> to vector<202x6xbf16>
    %2 = arith.extf %1 : vector<202x6xbf16> to vector<202x6xf32>
    %c0_3 = arith.constant 0 : index
    %c0_4 = arith.constant 0 : index
    %3 = vector.load %arg8[%c0_3, %c0_4] : memref<202x6xf32, #tpu.memory_space<vmem>>, vector<202x6xf32>
    tpu.vector_store %arg8[%c0_3, %c0_4], %2 {strides = array<i32>} : memref<202x6xf32, #tpu.memory_space<vmem>>, vector<202x6xf32>,
    %c0_5 = arith.constant 0 : index
    %c0_6 = arith.constant 0 : index
    %4 = vector.load %arg4[%c0_5, %c0_6] : memref<1x8xf32, #tpu.memory_space<vmem>>, vector<1x8xf32>
    %c0_7 = arith.constant 0 : index
    %c0_8 = arith.constant 0 : index
    %5 = vector.load %arg6[%c0_7, %c0_8] : memref<1x8xf32, #tpu.memory_space<vmem>>, vector<1x8xf32>
    %c0_9 = arith.constant 0 : index
    %c0_10 = arith.constant 0 : index
    %6 = tpu.strided_load %arg8[%c0_9, %c0_10] {strides = array<i32: 2, 1>} : memref<202x6xf32, #tpu.memory_space<vmem>>, vector<100x6xf32>
    %c1 = arith.constant 1 : index
    %c0_11 = arith.constant 0 : index
    %7 = tpu.strided_load %arg8[%c1, %c0_11] {strides = array<i32: 2, 1>} : memref<202x6xf32, #tpu.memory_space<vmem>>, vector<100x6xf32>
    %c2 = arith.constant 2 : index
    %c0_12 = arith.constant 0 : index
    %8 = tpu.strided_load %arg8[%c2, %c0_12] {strides = array<i32: 2, 1>} : memref<202x6xf32, #tpu.memory_space<vmem>>, vector<100x6xf32>
    %9 = tpu.concatenate %6, %7, %8 in 1 : vector<100x6xf32>, vector<100x6xf32>, vector<100x6xf32> -> vector<100x18xf32>
    %10 = arith.truncf %9 : vector<100x18xf32> to vector<100x18xbf16>
    %c0_13 = arith.constant 0 : index
    %c0_14 = arith.constant 0 : index
    %11 = vector.load %arg3[%c0_13, %c0_14] : memref<18x8xbf16, #tpu.memory_space<vmem>>, vector<18x8xbf16>
    %cst = arith.constant dense<0.000000e+00> : vector<100x8xf32>
    %12 = tpu.matmul %10, %11, %cst {dimension_numbers = #tpu.dot_dimension_numbers<[1], [0], [0], [1], [0, 0, 1, 1], [], []>} : vector<100x18xbf16>, vector<18x8xbf16>, vector<100x8xf32> -> vector<100x8xf32>
    %13 = vector.broadcast %4 : vector<1x8xf32> to vector<100x8xf32>
    %14 = arith.addf %12, %13 : vector<100x8xf32>
    %15 = arith.truncf %7 : vector<100x6xf32> to vector<100x6xbf16>
    %c0_15 = arith.constant 0 : index
    %c0_16 = arith.constant 0 : index
    %16 = vector.load %arg5[%c0_15, %c0_16] : memref<6x8xbf16, #tpu.memory_space<vmem>>, vector<6x8xbf16>
    %cst_17 = arith.constant dense<0.000000e+00> : vector<100x8xf32>
    %17 = tpu.matmul %15, %16, %cst_17 {dimension_numbers = #tpu.dot_dimension_numbers<[1], [0], [0], [1], [0, 0, 1, 1], [], []>} : vector<100x6xbf16>, vector<6x8xbf16>, vector<100x8xf32> -> vector<100x8xf32>
    %18 = vector.broadcast %5 : vector<1x8xf32> to vector<100x8xf32>
    %19 = arith.addf %17, %18 : vector<100x8xf32>
    %cst_18 = arith.constant 5.000000e-01 : f32
    %20 = vector.broadcast %cst_18 : f32 to vector<100x8xf32>
    %21 = arith.mulf %20, %14 : vector<100x8xf32>
    %cst_19 = arith.constant 4.471500e-02 : f32
    %22 = vector.broadcast %cst_19 : f32 to vector<100x8xf32>
    %23 = arith.mulf %22, %14 : vector<100x8xf32>
    %24 = arith.mulf %23, %14 : vector<100x8xf32>
    %25 = arith.mulf %24, %14 : vector<100x8xf32>
    %26 = arith.addf %14, %25 : vector<100x8xf32>
    %cst_20 = arith.constant 0.797884583 : f32
    %27 = vector.broadcast %cst_20 : f32 to vector<100x8xf32>
    %28 = arith.mulf %27, %26 : vector<100x8xf32>
    %29 = math.tanh %28 : vector<100x8xf32>
    %cst_21 = arith.constant 1.000000e+00 : f32
    %30 = vector.broadcast %cst_21 : f32 to vector<100x8xf32>
    %31 = arith.addf %30, %29 : vector<100x8xf32>
    %32 = arith.mulf %21, %31 : vector<100x8xf32>
    %33 = arith.addf %32, %19 : vector<100x8xf32>
    %c1_22 = arith.constant 1 : index
    %c0_23 = arith.constant 0 : index
    %34 = tpu.strided_load %arg8[%c1_22, %c0_23] {strides = array<i32: 2, 1>} : memref<202x6xf32, #tpu.memory_space<vmem>>, vector<100x6xf32>
    %c2_24 = arith.constant 2 : index
    %c0_25 = arith.constant 0 : index
    %35 = tpu.strided_load %arg8[%c2_24, %c0_25] {strides = array<i32: 2, 1>} : memref<202x6xf32, #tpu.memory_space<vmem>>, vector<100x6xf32>
    %c3 = arith.constant 3 : index
    %c0_26 = arith.constant 0 : index
    %36 = tpu.strided_load %arg8[%c3, %c0_26] {strides = array<i32: 2, 1>} : memref<202x6xf32, #tpu.memory_space<vmem>>, vector<100x6xf32>
    %37 = tpu.concatenate %34, %35, %36 in 1 : vector<100x6xf32>, vector<100x6xf32>, vector<100x6xf32> -> vector<100x18xf32>
    %38 = arith.truncf %37 : vector<100x18xf32> to vector<100x18xbf16>
    %c0_27 = arith.constant 0 : index
    %c0_28 = arith.constant 0 : index
    %39 = vector.load %arg3[%c0_27, %c0_28] : memref<18x8xbf16, #tpu.memory_space<vmem>>, vector<18x8xbf16>
    %cst_29 = arith.constant dense<0.000000e+00> : vector<100x8xf32>
    %40 = tpu.matmul %38, %39, %cst_29 {dimension_numbers = #tpu.dot_dimension_numbers<[1], [0], [0], [1], [0, 0, 1, 1], [], []>} : vector<100x18xbf16>, vector<18x8xbf16>, vector<100x8xf32> -> vector<100x8xf32>
    %41 = vector.broadcast %4 : vector<1x8xf32> to vector<100x8xf32>
    %42 = arith.addf %40, %41 : vector<100x8xf32>
    %43 = arith.truncf %35 : vector<100x6xf32> to vector<100x6xbf16>
    %c0_30 = arith.constant 0 : index
    %c0_31 = arith.constant 0 : index
    %44 = vector.load %arg5[%c0_30, %c0_31] : memref<6x8xbf16, #tpu.memory_space<vmem>>, vector<6x8xbf16>
    %cst_32 = arith.constant dense<0.000000e+00> : vector<100x8xf32>
    %45 = tpu.matmul %43, %44, %cst_32 {dimension_numbers = #tpu.dot_dimension_numbers<[1], [0], [0], [1], [0, 0, 1, 1], [], []>} : vector<100x6xbf16>, vector<6x8xbf16>, vector<100x8xf32> -> vector<100x8xf32>
    %46 = vector.broadcast %5 : vector<1x8xf32> to vector<100x8xf32>
    %47 = arith.addf %45, %46 : vector<100x8xf32>
    %cst_33 = arith.constant 5.000000e-01 : f32
    %48 = vector.broadcast %cst_33 : f32 to vector<100x8xf32>
    %49 = arith.mulf %48, %42 : vector<100x8xf32>
    %cst_34 = arith.constant 4.471500e-02 : f32
    %50 = vector.broadcast %cst_34 : f32 to vector<100x8xf32>
    %51 = arith.mulf %50, %42 : vector<100x8xf32>
    %52 = arith.mulf %51, %42 : vector<100x8xf32>
    %53 = arith.mulf %52, %42 : vector<100x8xf32>
    %54 = arith.addf %42, %53 : vector<100x8xf32>
    %cst_35 = arith.constant 0.797884583 : f32
    %55 = vector.broadcast %cst_35 : f32 to vector<100x8xf32>
    %56 = arith.mulf %55, %54 : vector<100x8xf32>
    %57 = math.tanh %56 : vector<100x8xf32>
    %cst_36 = arith.constant 1.000000e+00 : f32
    %58 = vector.broadcast %cst_36 : f32 to vector<100x8xf32>
    %59 = arith.addf %58, %57 : vector<100x8xf32>
    %60 = arith.mulf %49, %59 : vector<100x8xf32>
    %61 = arith.addf %60, %47 : vector<100x8xf32>
    %62 = arith.maximumf %33, %61 : vector<100x8xf32>
    %63 = arith.truncf %62 : vector<100x8xf32> to vector<100x8xbf16>
    %c0_37 = arith.constant 0 : index
    %c0_38 = arith.constant 0 : index
    %c0_39 = arith.constant 0 : index
    %64 = vector.load %arg7[%c0_37, %c0_38, %c0_39] : memref<1x100x8xbf16, #tpu.memory_space<vmem>>, vector<1x100x8xbf16>
    %65 = vector.shape_cast %64 : vector<1x100x8xbf16> to vector<100x8xbf16>
    %66 = vector.shape_cast %63 : vector<100x8xbf16> to vector<1x100x8xbf16>
    tpu.vector_store %arg7[%c0_37, %c0_38, %c0_39], %66 {strides = array<i32>} : memref<1x100x8xbf16, #tpu.memory_space<vmem>>, vector<1x100x8xbf16>,
    return
  }
  func.func @transform_0(%arg0: i32, %arg1: i32) -> (i32, i32, i32, i32) {
    %c0_i32 = arith.constant 0 : i32
    %c0_i32_0 = arith.constant 0 : i32
    %c0_i32_1 = arith.constant 0 : i32
    return %arg0, %arg1, %c0_i32, %c0_i32_0 : i32, i32, i32, i32
  }
  func.func @transform_1(%arg0: i32, %arg1: i32) -> (i32, i32) {
    %c0_i32 = arith.constant 0 : i32
    %c0_i32_0 = arith.constant 0 : i32
    %c0_i32_1 = arith.constant 0 : i32
    return %c0_i32, %c0_i32_0 : i32, i32
  }
  func.func @transform_2(%arg0: i32, %arg1: i32) -> (i32, i32) {
    %c0_i32 = arith.constant 0 : i32
    %c0_i32_0 = arith.constant 0 : i32
    %c0_i32_1 = arith.constant 0 : i32
    return %c0_i32, %c0_i32_0 : i32, i32
  }
  func.func @transform_3(%arg0: i32, %arg1: i32) -> (i32, i32) {
    %c0_i32 = arith.constant 0 : i32
    %c0_i32_0 = arith.constant 0 : i32
    %c0_i32_1 = arith.constant 0 : i32
    return %c0_i32, %c0_i32_0 : i32, i32
  }
  func.func @transform_4(%arg0: i32, %arg1: i32) -> (i32, i32) {
    %c0_i32 = arith.constant 0 : i32
    %c0_i32_0 = arith.constant 0 : i32
    %c0_i32_1 = arith.constant 0 : i32
    return %c0_i32, %c0_i32_0 : i32, i32
  }
  func.func @transform_5(%arg0: i32, %arg1: i32) -> (i32, i32, i32) {
    %c0_i32 = arith.constant 0 : i32
    %c0_i32_0 = arith.constant 0 : i32
    return %arg0, %arg1, %c0_i32 : i32, i32, i32
  }
}

module attributes {stable_mosaic.version = 11 : i64} {
  func.func @_conv_tower_kernel(%arg0: i32, %arg1: i32, %arg2: memref<1x1x102x8xbf16, #tpu.memory_space<vmem>>, %arg3: memref<24x11xbf16, #tpu.memory_space<vmem>>, %arg4: memref<1x11xf32, #tpu.memory_space<vmem>>, %arg5: memref<8x11xbf16, #tpu.memory_space<vmem>>, %arg6: memref<1x11xf32, #tpu.memory_space<vmem>>, %arg7: memref<1x20x11xbf16, #tpu.memory_space<vmem>>, %arg8: memref<102x8xf32, #tpu.memory_space<vmem>>) attributes {dimension_semantics = [#tpu.dimension_semantics<parallel>, #tpu.dimension_semantics<parallel>], iteration_bounds = array<i64: 2, 1>, scalar_prefetch = 0 : i64, scratch_operands = 1 : i64, tpu.core_type = #tpu.core_type<tc>, window_params = [{transform_indices = @transform_0, window_bounds = array<i64: 1, 1, 102, 8>}, {pipeline_mode = #tpu.pipeline_mode<synchronous>, transform_indices = @transform_1, window_bounds = array<i64: 24, 11>}, {pipeline_mode = #tpu.pipeline_mode<synchronous>, transform_indices = @transform_2, window_bounds = array<i64: 1, 11>}, {pipeline_mode = #tpu.pipeline_mode<synchronous>, transform_indices = @transform_3, window_bounds = array<i64: 8, 11>}, {pipeline_mode = #tpu.pipeline_mode<synchronous>, transform_indices = @transform_4, window_bounds = array<i64: 1, 11>}, {transform_indices = @transform_5, window_bounds = array<i64: 1, 20, 11>}]} {
    %c0 = arith.constant 0 : index
    %c0_0 = arith.constant 0 : index
    %c0_1 = arith.constant 0 : index
    %c0_2 = arith.constant 0 : index
    %0 = vector.load %arg2[%c0, %c0_0, %c0_1, %c0_2] : memref<1x1x102x8xbf16, #tpu.memory_space<vmem>>, vector<1x1x102x8xbf16>
    %1 = vector.shape_cast %0 : vector<1x1x102x8xbf16> to vector<102x8xbf16>
    %2 = arith.extf %1 : vector<102x8xbf16> to vector<102x8xf32>
    %c0_3 = arith.constant 0 : index
    %c0_4 = arith.constant 0 : index
    %3 = vector.load %arg8[%c0_3, %c0_4] : memref<102x8xf32, #tpu.memory_space<vmem>>, vector<102x8xf32>
    tpu.vector_store %arg8[%c0_3, %c0_4], %2 {strides = array<i32>} : memref<102x8xf32, #tpu.memory_space<vmem>>, vector<102x8xf32>,
    %c0_5 = arith.constant 0 : index
    %c0_6 = arith.constant 0 : index
    %4 = vector.load %arg4[%c0_5, %c0_6] : memref<1x11xf32, #tpu.memory_space<vmem>>, vector<1x11xf32>
    %c0_7 = arith.constant 0 : index
    %c0_8 = arith.constant 0 : index
    %5 = vector.load %arg6[%c0_7, %c0_8] : memref<1x11xf32, #tpu.memory_space<vmem>>, vector<1x11xf32>
    %c0_9 = arith.constant 0 : index
    %c0_10 = arith.constant 0 : index
    %6 = tpu.strided_load %arg8[%c0_9, %c0_10] {strides = array<i32: 5, 1>} : memref<102x8xf32, #tpu.memory_space<vmem>>, vector<20x8xf32>
    %c1 = arith.constant 1 : index
    %c0_11 = arith.constant 0 : index
    %7 = tpu.strided_load %arg8[%c1, %c0_11] {strides = array<i32: 5, 1>} : memref<102x8xf32, #tpu.memory_space<vmem>>, vector<20x8xf32>
    %c2 = arith.constant 2 : index
    %c0_12 = arith.constant 0 : index
    %8 = tpu.strided_load %arg8[%c2, %c0_12] {strides = array<i32: 5, 1>} : memref<102x8xf32, #tpu.memory_space<vmem>>, vector<20x8xf32>
    %9 = tpu.concatenate %6, %7, %8 in 1 : vector<20x8xf32>, vector<20x8xf32>, vector<20x8xf32> -> vector<20x24xf32>
    %10 = arith.truncf %9 : vector<20x24xf32> to vector<20x24xbf16>
    %c0_13 = arith.constant 0 : index
    %c0_14 = arith.constant 0 : index
    %11 = vector.load %arg3[%c0_13, %c0_14] : memref<24x11xbf16, #tpu.memory_space<vmem>>, vector<24x11xbf16>
    %cst = arith.constant dense<0.000000e+00> : vector<20x11xf32>
    %12 = tpu.matmul %10, %11, %cst {dimension_numbers = #tpu.dot_dimension_numbers<[1], [0], [0], [1], [0, 0, 1, 1], [], []>} : vector<20x24xbf16>, vector<24x11xbf16>, vector<20x11xf32> -> vector<20x11xf32>
    %13 = vector.broadcast %4 : vector<1x11xf32> to vector<20x11xf32>
    %14 = arith.addf %12, %13 : vector<20x11xf32>
    %15 = arith.truncf %7 : vector<20x8xf32> to vector<20x8xbf16>
    %c0_15 = arith.constant 0 : index
    %c0_16 = arith.constant 0 : index
    %16 = vector.load %arg5[%c0_15, %c0_16] : memref<8x11xbf16, #tpu.memory_space<vmem>>, vector<8x11xbf16>
    %cst_17 = arith.constant dense<0.000000e+00> : vector<20x11xf32>
    %17 = tpu.matmul %15, %16, %cst_17 {dimension_numbers = #tpu.dot_dimension_numbers<[1], [0], [0], [1], [0, 0, 1, 1], [], []>} : vector<20x8xbf16>, vector<8x11xbf16>, vector<20x11xf32> -> vector<20x11xf32>
    %18 = vector.broadcast %5 : vector<1x11xf32> to vector<20x11xf32>
    %19 = arith.addf %17, %18 : vector<20x11xf32>
    %cst_18 = arith.constant 5.000000e-01 : f32
    %20 = vector.broadcast %cst_18 : f32 to vector<20x11xf32>
    %21 = arith.mulf %20, %14 : vector<20x11xf32>
    %cst_19 = arith.constant 4.471500e-02 : f32
    %22 = vector.broadcast %cst_19 : f32 to vector<20x11xf32>
    %23 = arith.mulf %22, %14 : vector<20x11xf32>
    %24 = arith.mulf %23, %14 : vector<20x11xf32>
    %25 = arith.mulf %24, %14 : vector<20x11xf32>
    %26 = arith.addf %14, %25 : vector<20x11xf32>
    %cst_20 = arith.constant 0.797884583 : f32
    %27 = vector.broadcast %cst_20 : f32 to vector<20x11xf32>
    %28 = arith.mulf %27, %26 : vector<20x11xf32>
    %29 = math.tanh %28 : vector<20x11xf32>
    %cst_21 = arith.constant 1.000000e+00 : f32
    %30 = vector.broadcast %cst_21 : f32 to vector<20x11xf32>
    %31 = arith.addf %30, %29 : vector<20x11xf32>
    %32 = arith.mulf %21, %31 : vector<20x11xf32>
    %33 = arith.addf %32, %19 : vector<20x11xf32>
    %c1_22 = arith.constant 1 : index
    %c0_23 = arith.constant 0 : index
    %34 = tpu.strided_load %arg8[%c1_22, %c0_23] {strides = array<i32: 5, 1>} : memref<102x8xf32, #tpu.memory_space<vmem>>, vector<20x8xf32>
    %c2_24 = arith.constant 2 : index
    %c0_25 = arith.constant 0 : index
    %35 = tpu.strided_load %arg8[%c2_24, %c0_25] {strides = array<i32: 5, 1>} : memref<102x8xf32, #tpu.memory_space<vmem>>, vector<20x8xf32>
    %c3 = arith.constant 3 : index
    %c0_26 = arith.constant 0 : index
    %36 = tpu.strided_load %arg8[%c3, %c0_26] {strides = array<i32: 5, 1>} : memref<102x8xf32, #tpu.memory_space<vmem>>, vector<20x8xf32>
    %37 = tpu.concatenate %34, %35, %36 in 1 : vector<20x8xf32>, vector<20x8xf32>, vector<20x8xf32> -> vector<20x24xf32>
    %38 = arith.truncf %37 : vector<20x24xf32> to vector<20x24xbf16>
    %c0_27 = arith.constant 0 : index
    %c0_28 = arith.constant 0 : index
    %39 = vector.load %arg3[%c0_27, %c0_28] : memref<24x11xbf16, #tpu.memory_space<vmem>>, vector<24x11xbf16>
    %cst_29 = arith.constant dense<0.000000e+00> : vector<20x11xf32>
    %40 = tpu.matmul %38, %39, %cst_29 {dimension_numbers = #tpu.dot_dimension_numbers<[1], [0], [0], [1], [0, 0, 1, 1], [], []>} : vector<20x24xbf16>, vector<24x11xbf16>, vector<20x11xf32> -> vector<20x11xf32>
    %41 = vector.broadcast %4 : vector<1x11xf32> to vector<20x11xf32>
    %42 = arith.addf %40, %41 : vector<20x11xf32>
    %43 = arith.truncf %35 : vector<20x8xf32> to vector<20x8xbf16>
    %c0_30 = arith.constant 0 : index
    %c0_31 = arith.constant 0 : index
    %44 = vector.load %arg5[%c0_30, %c0_31] : memref<8x11xbf16, #tpu.memory_space<vmem>>, vector<8x11xbf16>
    %cst_32 = arith.constant dense<0.000000e+00> : vector<20x11xf32>
    %45 = tpu.matmul %43, %44, %cst_32 {dimension_numbers = #tpu.dot_dimension_numbers<[1], [0], [0], [1], [0, 0, 1, 1], [], []>} : vector<20x8xbf16>, vector<8x11xbf16>, vector<20x11xf32> -> vector<20x11xf32>
    %46 = vector.broadcast %5 : vector<1x11xf32> to vector<20x11xf32>
    %47 = arith.addf %45, %46 : vector<20x11xf32>
    %cst_33 = arith.constant 5.000000e-01 : f32
    %48 = vector.broadcast %cst_33 : f32 to vector<20x11xf32>
    %49 = arith.mulf %48, %42 : vector<20x11xf32>
    %cst_34 = arith.constant 4.471500e-02 : f32
    %50 = vector.broadcast %cst_34 : f32 to vector<20x11xf32>
    %51 = arith.mulf %50, %42 : vector<20x11xf32>
    %52 = arith.mulf %51, %42 : vector<20x11xf32>
    %53 = arith.mulf %52, %42 : vector<20x11xf32>
    %54 = arith.addf %42, %53 : vector<20x11xf32>
    %cst_35 = arith.constant 0.797884583 : f32
    %55 = vector.broadcast %cst_35 : f32 to vector<20x11xf32>
    %56 = arith.mulf %55, %54 : vector<20x11xf32>
    %57 = math.tanh %56 : vector<20x11xf32>
    %cst_36 = arith.constant 1.000000e+00 : f32
    %58 = vector.broadcast %cst_36 : f32 to vector<20x11xf32>
    %59 = arith.addf %58, %57 : vector<20x11xf32>
    %60 = arith.mulf %49, %59 : vector<20x11xf32>
    %61 = arith.addf %60, %47 : vector<20x11xf32>
    %62 = arith.maximumf %33, %61 : vector<20x11xf32>
    %c2_37 = arith.constant 2 : index
    %c0_38 = arith.constant 0 : index
    %63 = tpu.strided_load %arg8[%c2_37, %c0_38] {strides = array<i32: 5, 1>} : memref<102x8xf32, #tpu.memory_space<vmem>>, vector<20x8xf32>
    %c3_39 = arith.constant 3 : index
    %c0_40 = arith.constant 0 : index
    %64 = tpu.strided_load %arg8[%c3_39, %c0_40] {strides = array<i32: 5, 1>} : memref<102x8xf32, #tpu.memory_space<vmem>>, vector<20x8xf32>
    %c4 = arith.constant 4 : index
    %c0_41 = arith.constant 0 : index
    %65 = tpu.strided_load %arg8[%c4, %c0_41] {strides = array<i32: 5, 1>} : memref<102x8xf32, #tpu.memory_space<vmem>>, vector<20x8xf32>
    %66 = tpu.concatenate %63, %64, %65 in 1 : vector<20x8xf32>, vector<20x8xf32>, vector<20x8xf32> -> vector<20x24xf32>
    %67 = arith.truncf %66 : vector<20x24xf32> to vector<20x24xbf16>
    %c0_42 = arith.constant 0 : index
    %c0_43 = arith.constant 0 : index
    %68 = vector.load %arg3[%c0_42, %c0_43] : memref<24x11xbf16, #tpu.memory_space<vmem>>, vector<24x11xbf16>
    %cst_44 = arith.constant dense<0.000000e+00> : vector<20x11xf32>
    %69 = tpu.matmul %67, %68, %cst_44 {dimension_numbers = #tpu.dot_dimension_numbers<[1], [0], [0], [1], [0, 0, 1, 1], [], []>} : vector<20x24xbf16>, vector<24x11xbf16>, vector<20x11xf32> -> vector<20x11xf32>
    %70 = vector.broadcast %4 : vector<1x11xf32> to vector<20x11xf32>
    %71 = arith.addf %69, %70 : vector<20x11xf32>
    %72 = arith.truncf %64 : vector<20x8xf32> to vector<20x8xbf16>
    %c0_45 = arith.constant 0 : index
    %c0_46 = arith.constant 0 : index
    %73 = vector.load %arg5[%c0_45, %c0_46] : memref<8x11xbf16, #tpu.memory_space<vmem>>, vector<8x11xbf16>
    %cst_47 = arith.constant dense<0.000000e+00> : vector<20x11xf32>
    %74 = tpu.matmul %72, %73, %cst_47 {dimension_numbers = #tpu.dot_dimension_numbers<[1], [0], [0], [1], [0, 0, 1, 1], [], []>} : vector<20x8xbf16>, vector<8x11xbf16>, vector<20x11xf32> -> vector<20x11xf32>
    %75 = vector.broadcast %5 : vector<1x11xf32> to vector<20x11xf32>
    %76 = arith.addf %74, %75 : vector<20x11xf32>
    %cst_48 = arith.constant 5.000000e-01 : f32
    %77 = vector.broadcast %cst_48 : f32 to vector<20x11xf32>
    %78 = arith.mulf %77, %71 : vector<20x11xf32>
    %cst_49 = arith.constant 4.471500e-02 : f32
    %79 = vector.broadcast %cst_49 : f32 to vector<20x11xf32>
    %80 = arith.mulf %79, %71 : vector<20x11xf32>
    %81 = arith.mulf %80, %71 : vector<20x11xf32>
    %82 = arith.mulf %81, %71 : vector<20x11xf32>
    %83 = arith.addf %71, %82 : vector<20x11xf32>
    %cst_50 = arith.constant 0.797884583 : f32
    %84 = vector.broadcast %cst_50 : f32 to vector<20x11xf32>
    %85 = arith.mulf %84, %83 : vector<20x11xf32>
    %86 = math.tanh %85 : vector<20x11xf32>
    %cst_51 = arith.constant 1.000000e+00 : f32
    %87 = vector.broadcast %cst_51 : f32 to vector<20x11xf32>
    %88 = arith.addf %87, %86 : vector<20x11xf32>
    %89 = arith.mulf %78, %88 : vector<20x11xf32>
    %90 = arith.addf %89, %76 : vector<20x11xf32>
    %91 = arith.maximumf %62, %90 : vector<20x11xf32>
    %c3_52 = arith.constant 3 : index
    %c0_53 = arith.constant 0 : index
    %92 = tpu.strided_load %arg8[%c3_52, %c0_53] {strides = array<i32: 5, 1>} : memref<102x8xf32, #tpu.memory_space<vmem>>, vector<20x8xf32>
    %c4_54 = arith.constant 4 : index
    %c0_55 = arith.constant 0 : index
    %93 = tpu.strided_load %arg8[%c4_54, %c0_55] {strides = array<i32: 5, 1>} : memref<102x8xf32, #tpu.memory_space<vmem>>, vector<20x8xf32>
    %c5 = arith.constant 5 : index
    %c0_56 = arith.constant 0 : index
    %94 = tpu.strided_load %arg8[%c5, %c0_56] {strides = array<i32: 5, 1>} : memref<102x8xf32, #tpu.memory_space<vmem>>, vector<20x8xf32>
    %95 = tpu.concatenate %92, %93, %94 in 1 : vector<20x8xf32>, vector<20x8xf32>, vector<20x8xf32> -> vector<20x24xf32>
    %96 = arith.truncf %95 : vector<20x24xf32> to vector<20x24xbf16>
    %c0_57 = arith.constant 0 : index
    %c0_58 = arith.constant 0 : index
    %97 = vector.load %arg3[%c0_57, %c0_58] : memref<24x11xbf16, #tpu.memory_space<vmem>>, vector<24x11xbf16>
    %cst_59 = arith.constant dense<0.000000e+00> : vector<20x11xf32>
    %98 = tpu.matmul %96, %97, %cst_59 {dimension_numbers = #tpu.dot_dimension_numbers<[1], [0], [0], [1], [0, 0, 1, 1], [], []>} : vector<20x24xbf16>, vector<24x11xbf16>, vector<20x11xf32> -> vector<20x11xf32>
    %99 = vector.broadcast %4 : vector<1x11xf32> to vector<20x11xf32>
    %100 = arith.addf %98, %99 : vector<20x11xf32>
    %101 = arith.truncf %93 : vector<20x8xf32> to vector<20x8xbf16>
    %c0_60 = arith.constant 0 : index
    %c0_61 = arith.constant 0 : index
    %102 = vector.load %arg5[%c0_60, %c0_61] : memref<8x11xbf16, #tpu.memory_space<vmem>>, vector<8x11xbf16>
    %cst_62 = arith.constant dense<0.000000e+00> : vector<20x11xf32>
    %103 = tpu.matmul %101, %102, %cst_62 {dimension_numbers = #tpu.dot_dimension_numbers<[1], [0], [0], [1], [0, 0, 1, 1], [], []>} : vector<20x8xbf16>, vector<8x11xbf16>, vector<20x11xf32> -> vector<20x11xf32>
    %104 = vector.broadcast %5 : vector<1x11xf32> to vector<20x11xf32>
    %105 = arith.addf %103, %104 : vector<20x11xf32>
    %cst_63 = arith.constant 5.000000e-01 : f32
    %106 = vector.broadcast %cst_63 : f32 to vector<20x11xf32>
    %107 = arith.mulf %106, %100 : vector<20x11xf32>
    %cst_64 = arith.constant 4.471500e-02 : f32
    %108 = vector.broadcast %cst_64 : f32 to vector<20x11xf32>
    %109 = arith.mulf %108, %100 : vector<20x11xf32>
    %110 = arith.mulf %109, %100 : vector<20x11xf32>
    %111 = arith.mulf %110, %100 : vector<20x11xf32>
    %112 = arith.addf %100, %111 : vector<20x11xf32>
    %cst_65 = arith.constant 0.797884583 : f32
    %113 = vector.broadcast %cst_65 : f32 to vector<20x11xf32>
    %114 = arith.mulf %113, %112 : vector<20x11xf32>
    %115 = math.tanh %114 : vector<20x11xf32>
    %cst_66 = arith.constant 1.000000e+00 : f32
    %116 = vector.broadcast %cst_66 : f32 to vector<20x11xf32>
    %117 = arith.addf %116, %115 : vector<20x11xf32>
    %118 = arith.mulf %107, %117 : vector<20x11xf32>
    %119 = arith.addf %118, %105 : vector<20x11xf32>
    %120 = arith.maximumf %91, %119 : vector<20x11xf32>
    %c4_67 = arith.constant 4 : index
    %c0_68 = arith.constant 0 : index
    %121 = tpu.strided_load %arg8[%c4_67, %c0_68] {strides = array<i32: 5, 1>} : memref<102x8xf32, #tpu.memory_space<vmem>>, vector<20x8xf32>
    %c5_69 = arith.constant 5 : index
    %c0_70 = arith.constant 0 : index
    %122 = tpu.strided_load %arg8[%c5_69, %c0_70] {strides = array<i32: 5, 1>} : memref<102x8xf32, #tpu.memory_space<vmem>>, vector<20x8xf32>
    %c6 = arith.constant 6 : index
    %c0_71 = arith.constant 0 : index
    %123 = tpu.strided_load %arg8[%c6, %c0_71] {strides = array<i32: 5, 1>} : memref<102x8xf32, #tpu.memory_space<vmem>>, vector<20x8xf32>
    %124 = tpu.concatenate %121, %122, %123 in 1 : vector<20x8xf32>, vector<20x8xf32>, vector<20x8xf32> -> vector<20x24xf32>
    %125 = arith.truncf %124 : vector<20x24xf32> to vector<20x24xbf16>
    %c0_72 = arith.constant 0 : index
    %c0_73 = arith.constant 0 : index
    %126 = vector.load %arg3[%c0_72, %c0_73] : memref<24x11xbf16, #tpu.memory_space<vmem>>, vector<24x11xbf16>
    %cst_74 = arith.constant dense<0.000000e+00> : vector<20x11xf32>
    %127 = tpu.matmul %125, %126, %cst_74 {dimension_numbers = #tpu.dot_dimension_numbers<[1], [0], [0], [1], [0, 0, 1, 1], [], []>} : vector<20x24xbf16>, vector<24x11xbf16>, vector<20x11xf32> -> vector<20x11xf32>
    %128 = vector.broadcast %4 : vector<1x11xf32> to vector<20x11xf32>
    %129 = arith.addf %127, %128 : vector<20x11xf32>
    %130 = arith.truncf %122 : vector<20x8xf32> to vector<20x8xbf16>
    %c0_75 = arith.constant 0 : index
    %c0_76 = arith.constant 0 : index
    %131 = vector.load %arg5[%c0_75, %c0_76] : memref<8x11xbf16, #tpu.memory_space<vmem>>, vector<8x11xbf16>
    %cst_77 = arith.constant dense<0.000000e+00> : vector<20x11xf32>
    %132 = tpu.matmul %130, %131, %cst_77 {dimension_numbers = #tpu.dot_dimension_numbers<[1], [0], [0], [1], [0, 0, 1, 1], [], []>} : vector<20x8xbf16>, vector<8x11xbf16>, vector<20x11xf32> -> vector<20x11xf32>
    %133 = vector.broadcast %5 : vector<1x11xf32> to vector<20x11xf32>
    %134 = arith.addf %132, %133 : vector<20x11xf32>
    %cst_78 = arith.constant 5.000000e-01 : f32
    %135 = vector.broadcast %cst_78 : f32 to vector<20x11xf32>
    %136 = arith.mulf %135, %129 : vector<20x11xf32>
    %cst_79 = arith.constant 4.471500e-02 : f32
    %137 = vector.broadcast %cst_79 : f32 to vector<20x11xf32>
    %138 = arith.mulf %137, %129 : vector<20x11xf32>
    %139 = arith.mulf %138, %129 : vector<20x11xf32>
    %140 = arith.mulf %139, %129 : vector<20x11xf32>
    %141 = arith.addf %129, %140 : vector<20x11xf32>
    %cst_80 = arith.constant 0.797884583 : f32
    %142 = vector.broadcast %cst_80 : f32 to vector<20x11xf32>
    %143 = arith.mulf %142, %141 : vector<20x11xf32>
    %144 = math.tanh %143 : vector<20x11xf32>
    %cst_81 = arith.constant 1.000000e+00 : f32
    %145 = vector.broadcast %cst_81 : f32 to vector<20x11xf32>
    %146 = arith.addf %145, %144 : vector<20x11xf32>
    %147 = arith.mulf %136, %146 : vector<20x11xf32>
    %148 = arith.addf %147, %134 : vector<20x11xf32>
    %149 = arith.maximumf %120, %148 : vector<20x11xf32>
    %150 = arith.truncf %149 : vector<20x11xf32> to vector<20x11xbf16>
    %c0_82 = arith.constant 0 : index
    %c0_83 = arith.constant 0 : index
    %c0_84 = arith.constant 0 : index
    %151 = vector.load %arg7[%c0_82, %c0_83, %c0_84] : memref<1x20x11xbf16, #tpu.memory_space<vmem>>, vector<1x20x11xbf16>
    %152 = vector.shape_cast %151 : vector<1x20x11xbf16> to vector<20x11xbf16>
    %153 = vector.shape_cast %150 : vector<20x11xbf16> to vector<1x20x11xbf16>
    tpu.vector_store %arg7[%c0_82, %c0_83, %c0_84], %153 {strides = array<i32>} : memref<1x20x11xbf16, #tpu.memory_space<vmem>>, vector<1x20x11xbf16>,
    return
  }
  func.func @transform_0(%arg0: i32, %arg1: i32) -> (i32, i32, i32, i32) {
    %c0_i32 = arith.constant 0 : i32
    %c0_i32_0 = arith.constant 0 : i32
    %c0_i32_1 = arith.constant 0 : i32
    return %arg0, %arg1, %c0_i32, %c0_i32_0 : i32, i32, i32, i32
  }
  func.func @transform_1(%arg0: i32, %arg1: i32) -> (i32, i32) {
    %c0_i32 = arith.constant 0 : i32
    %c0_i32_0 = arith.constant 0 : i32
    %c0_i32_1 = arith.constant 0 : i32
    return %c0_i32, %c0_i32_0 : i32, i32
  }
  func.func @transform_2(%arg0: i32, %arg1: i32) -> (i32, i32) {
    %c0_i32 = arith.constant 0 : i32
    %c0_i32_0 = arith.constant 0 : i32
    %c0_i32_1 = arith.constant 0 : i32
    return %c0_i32, %c0_i32_0 : i32, i32
  }
  func.func @transform_3(%arg0: i32, %arg1: i32) -> (i32, i32) {
    %c0_i32 = arith.constant 0 : i32
    %c0_i32_0 = arith.constant 0 : i32
    %c0_i32_1 = arith.constant 0 : i32
    return %c0_i32, %c0_i32_0 : i32, i32
  }
  func.func @transform_4(%arg0: i32, %arg1: i32) -> (i32, i32) {
    %c0_i32 = arith.constant 0 : i32
    %c0_i32_0 = arith.constant 0 : i32
    %c0_i32_1 = arith.constant 0 : i32
    return %c0_i32, %c0_i32_0 : i32, i32
  }
  func.func @transform_5(%arg0: i32, %arg1: i32) -> (i32, i32, i32) {
    %c0_i32 = arith.constant 0 : i32
    %c0_i32_0 = arith.constant 0 : i32
    return %arg0, %arg1, %c0_i32 : i32, i32, i32
  }
}

module attributes {stable_mosaic.version = 11 : i64} {
  func.func @_conv_tower_kernel(%arg0: i32, %arg1: i32, %arg2: memref<1x1x22x11xbf16, #tpu.memory_space<vmem>>, %arg3: memref<33x16xbf16, #tpu.memory_space<vmem>>, %arg4: memref<1x16xf32, #tpu.memory_space<vmem>>, %arg5: memref<11x16xbf16, #tpu.memory_space<vmem>>, %arg6: memref<1x16xf32, #tpu.memory_space<vmem>>, %arg7: memref<1x4x16xbf16, #tpu.memory_space<vmem>>, %arg8: memref<22x11xf32, #tpu.memory_space<vmem>>) attributes {dimension_semantics = [#tpu.dimension_semantics<parallel>, #tpu.dimension_semantics<parallel>], iteration_bounds = array<i64: 2, 1>, scalar_prefetch = 0 : i64, scratch_operands = 1 : i64, tpu.core_type = #tpu.core_type<tc>, window_params = [{transform_indices = @transform_0, window_bounds = array<i64: 1, 1, 22, 11>}, {pipeline_mode = #tpu.pipeline_mode<synchronous>, transform_indices = @transform_1, window_bounds = array<i64: 33, 16>}, {pipeline_mode = #tpu.pipeline_mode<synchronous>, transform_indices = @transform_2, window_bounds = array<i64: 1, 16>}, {pipeline_mode = #tpu.pipeline_mode<synchronous>, transform_indices = @transform_3, window_bounds = array<i64: 11, 16>}, {pipeline_mode = #tpu.pipeline_mode<synchronous>, transform_indices = @transform_4, window_bounds = array<i64: 1, 16>}, {transform_indices = @transform_5, window_bounds = array<i64: 1, 4, 16>}]} {
    %c0 = arith.constant 0 : index
    %c0_0 = arith.constant 0 : index
    %c0_1 = arith.constant 0 : index
    %c0_2 = arith.constant 0 : index
    %0 = vector.load %arg2[%c0, %c0_0, %c0_1, %c0_2] : memref<1x1x22x11xbf16, #tpu.memory_space<vmem>>, vector<1x1x22x11xbf16>
    %1 = vector.shape_cast %0 : vector<1x1x22x11xbf16> to vector<22x11xbf16>
    %2 = arith.extf %1 : vector<22x11xbf16> to vector<22x11xf32>
    %c0_3 = arith.constant 0 : index
    %c0_4 = arith.constant 0 : index
    %3 = vector.load %arg8[%c0_3, %c0_4] : memref<22x11xf32, #tpu.memory_space<vmem>>, vector<22x11xf32>
    tpu.vector_store %arg8[%c0_3, %c0_4], %2 {strides = array<i32>} : memref<22x11xf32, #tpu.memory_space<vmem>>, vector<22x11xf32>,
    %c0_5 = arith.constant 0 : index
    %c0_6 = arith.constant 0 : index
    %4 = vector.load %arg4[%c0_5, %c0_6] : memref<1x16xf32, #tpu.memory_space<vmem>>, vector<1x16xf32>
    %c0_7 = arith.constant 0 : index
    %c0_8 = arith.constant 0 : index
    %5 = vector.load %arg6[%c0_7, %c0_8] : memref<1x16xf32, #tpu.memory_space<vmem>>, vector<1x16xf32>
    %c0_9 = arith.constant 0 : index
    %c0_10 = arith.constant 0 : index
    %6 = tpu.strided_load %arg8[%c0_9, %c0_10] {strides = array<i32: 5, 1>} : memref<22x11xf32, #tpu.memory_space<vmem>>, vector<4x11xf32>
    %c1 = arith.constant 1 : index
    %c0_11 = arith.constant 0 : index
    %7 = tpu.strided_load %arg8[%c1, %c0_11] {strides = array<i32: 5, 1>} : memref<22x11xf32, #tpu.memory_space<vmem>>, vector<4x11xf32>
    %c2 = arith.constant 2 : index
    %c0_12 = arith.constant 0 : index
    %8 = tpu.strided_load %arg8[%c2, %c0_12] {strides = array<i32: 5, 1>} : memref<22x11xf32, #tpu.memory_space<vmem>>, vector<4x11xf32>
    %9 = tpu.concatenate %6, %7, %8 in 1 : vector<4x11xf32>, vector<4x11xf32>, vector<4x11xf32> -> vector<4x33xf32>
    %10 = arith.truncf %9 : vector<4x33xf32> to vector<4x33xbf16>
    %c0_13 = arith.constant 0 : index
    %c0_14 = arith.constant 0 : index
    %11 = vector.load %arg3[%c0_13, %c0_14] : memref<33x16xbf16, #tpu.memory_space<vmem>>, vector<33x16xbf16>
    %cst = arith.constant dense<0.000000e+00> : vector<4x16xf32>
    %12 = tpu.matmul %10, %11, %cst {dimension_numbers = #tpu.dot_dimension_numbers<[1], [0], [0], [1], [0, 0, 1, 1], [], []>} : vector<4x33xbf16>, vector<33x16xbf16>, vector<4x16xf32> -> vector<4x16xf32>
    %13 = vector.broadcast %4 : vector<1x16xf32> to vector<4x16xf32>
    %14 = arith.addf %12, %13 : vector<4x16xf32>
    %15 = arith.truncf %7 : vector<4x11xf32> to vector<4x11xbf16>
    %c0_15 = arith.constant 0 : index
    %c0_16 = arith.constant 0 : index
    %16 = vector.load %arg5[%c0_15, %c0_16] : memref<11x16xbf16, #tpu.memory_space<vmem>>, vector<11x16xbf16>
    %cst_17 = arith.constant dense<0.000000e+00> : vector<4x16xf32>
    %17 = tpu.matmul %15, %16, %cst_17 {dimension_numbers = #tpu.dot_dimension_numbers<[1], [0], [0], [1], [0, 0, 1, 1], [], []>} : vector<4x11xbf16>, vector<11x16xbf16>, vector<4x16xf32> -> vector<4x16xf32>
    %18 = vector.broadcast %5 : vector<1x16xf32> to vector<4x16xf32>
    %19 = arith.addf %17, %18 : vector<4x16xf32>
    %cst_18 = arith.constant 5.000000e-01 : f32
    %20 = vector.broadcast %cst_18 : f32 to vector<4x16xf32>
    %21 = arith.mulf %20, %14 : vector<4x16xf32>
    %cst_19 = arith.constant 4.471500e-02 : f32
    %22 = vector.broadcast %cst_19 : f32 to vector<4x16xf32>
    %23 = arith.mulf %22, %14 : vector<4x16xf32>
    %24 = arith.mulf %23, %14 : vector<4x16xf32>
    %25 = arith.mulf %24, %14 : vector<4x16xf32>
    %26 = arith.addf %14, %25 : vector<4x16xf32>
    %cst_20 = arith.constant 0.797884583 : f32
    %27 = vector.broadcast %cst_20 : f32 to vector<4x16xf32>
    %28 = arith.mulf %27, %26 : vector<4x16xf32>
    %29 = math.tanh %28 : vector<4x16xf32>
    %cst_21 = arith.constant 1.000000e+00 : f32
    %30 = vector.broadcast %cst_21 : f32 to vector<4x16xf32>
    %31 = arith.addf %30, %29 : vector<4x16xf32>
    %32 = arith.mulf %21, %31 : vector<4x16xf32>
    %33 = arith.addf %32, %19 : vector<4x16xf32>
    %c1_22 = arith.constant 1 : index
    %c0_23 = arith.constant 0 : index
    %34 = tpu.strided_load %arg8[%c1_22, %c0_23] {strides = array<i32: 5, 1>} : memref<22x11xf32, #tpu.memory_space<vmem>>, vector<4x11xf32>
    %c2_24 = arith.constant 2 : index
    %c0_25 = arith.constant 0 : index
    %35 = tpu.strided_load %arg8[%c2_24, %c0_25] {strides = array<i32: 5, 1>} : memref<22x11xf32, #tpu.memory_space<vmem>>, vector<4x11xf32>
    %c3 = arith.constant 3 : index
    %c0_26 = arith.constant 0 : index
    %36 = tpu.strided_load %arg8[%c3, %c0_26] {strides = array<i32: 5, 1>} : memref<22x11xf32, #tpu.memory_space<vmem>>, vector<4x11xf32>
    %37 = tpu.concatenate %34, %35, %36 in 1 : vector<4x11xf32>, vector<4x11xf32>, vector<4x11xf32> -> vector<4x33xf32>
    %38 = arith.truncf %37 : vector<4x33xf32> to vector<4x33xbf16>
    %c0_27 = arith.constant 0 : index
    %c0_28 = arith.constant 0 : index
    %39 = vector.load %arg3[%c0_27, %c0_28] : memref<33x16xbf16, #tpu.memory_space<vmem>>, vector<33x16xbf16>
    %cst_29 = arith.constant dense<0.000000e+00> : vector<4x16xf32>
    %40 = tpu.matmul %38, %39, %cst_29 {dimension_numbers = #tpu.dot_dimension_numbers<[1], [0], [0], [1], [0, 0, 1, 1], [], []>} : vector<4x33xbf16>, vector<33x16xbf16>, vector<4x16xf32> -> vector<4x16xf32>
    %41 = vector.broadcast %4 : vector<1x16xf32> to vector<4x16xf32>
    %42 = arith.addf %40, %41 : vector<4x16xf32>
    %43 = arith.truncf %35 : vector<4x11xf32> to vector<4x11xbf16>
    %c0_30 = arith.constant 0 : index
    %c0_31 = arith.constant 0 : index
    %44 = vector.load %arg5[%c0_30, %c0_31] : memref<11x16xbf16, #tpu.memory_space<vmem>>, vector<11x16xbf16>
    %cst_32 = arith.constant dense<0.000000e+00> : vector<4x16xf32>
    %45 = tpu.matmul %43, %44, %cst_32 {dimension_numbers = #tpu.dot_dimension_numbers<[1], [0], [0], [1], [0, 0, 1, 1], [], []>} : vector<4x11xbf16>, vector<11x16xbf16>, vector<4x16xf32> -> vector<4x16xf32>
    %46 = vector.broadcast %5 : vector<1x16xf32> to vector<4x16xf32>
    %47 = arith.addf %45, %46 : vector<4x16xf32>
    %cst_33 = arith.constant 5.000000e-01 : f32
    %48 = vector.broadcast %cst_33 : f32 to vector<4x16xf32>
    %49 = arith.mulf %48, %42 : vector<4x16xf32>
    %cst_34 = arith.constant 4.471500e-02 : f32
    %50 = vector.broadcast %cst_34 : f32 to vector<4x16xf32>
    %51 = arith.mulf %50, %42 : vector<4x16xf32>
    %52 = arith.mulf %51, %42 : vector<4x16xf32>
    %53 = arith.mulf %52, %42 : vector<4x16xf32>
    %54 = arith.addf %42, %53 : vector<4x16xf32>
    %cst_35 = arith.constant 0.797884583 : f32
    %55 = vector.broadcast %cst_35 : f32 to vector<4x16xf32>
    %56 = arith.mulf %55, %54 : vector<4x16xf32>
    %57 = math.tanh %56 : vector<4x16xf32>
    %cst_36 = arith.constant 1.000000e+00 : f32
    %58 = vector.broadcast %cst_36 : f32 to vector<4x16xf32>
    %59 = arith.addf %58, %57 : vector<4x16xf32>
    %60 = arith.mulf %49, %59 : vector<4x16xf32>
    %61 = arith.addf %60, %47 : vector<4x16xf32>
    %62 = arith.maximumf %33, %61 : vector<4x16xf32>
    %c2_37 = arith.constant 2 : index
    %c0_38 = arith.constant 0 : index
    %63 = tpu.strided_load %arg8[%c2_37, %c0_38] {strides = array<i32: 5, 1>} : memref<22x11xf32, #tpu.memory_space<vmem>>, vector<4x11xf32>
    %c3_39 = arith.constant 3 : index
    %c0_40 = arith.constant 0 : index
    %64 = tpu.strided_load %arg8[%c3_39, %c0_40] {strides = array<i32: 5, 1>} : memref<22x11xf32, #tpu.memory_space<vmem>>, vector<4x11xf32>
    %c4 = arith.constant 4 : index
    %c0_41 = arith.constant 0 : index
    %65 = tpu.strided_load %arg8[%c4, %c0_41] {strides = array<i32: 5, 1>} : memref<22x11xf32, #tpu.memory_space<vmem>>, vector<4x11xf32>
    %66 = tpu.concatenate %63, %64, %65 in 1 : vector<4x11xf32>, vector<4x11xf32>, vector<4x11xf32> -> vector<4x33xf32>
    %67 = arith.truncf %66 : vector<4x33xf32> to vector<4x33xbf16>
    %c0_42 = arith.constant 0 : index
    %c0_43 = arith.constant 0 : index
    %68 = vector.load %arg3[%c0_42, %c0_43] : memref<33x16xbf16, #tpu.memory_space<vmem>>, vector<33x16xbf16>
    %cst_44 = arith.constant dense<0.000000e+00> : vector<4x16xf32>
    %69 = tpu.matmul %67, %68, %cst_44 {dimension_numbers = #tpu.dot_dimension_numbers<[1], [0], [0], [1], [0, 0, 1, 1], [], []>} : vector<4x33xbf16>, vector<33x16xbf16>, vector<4x16xf32> -> vector<4x16xf32>
    %70 = vector.broadcast %4 : vector<1x16xf32> to vector<4x16xf32>
    %71 = arith.addf %69, %70 : vector<4x16xf32>
    %72 = arith.truncf %64 : vector<4x11xf32> to vector<4x11xbf16>
    %c0_45 = arith.constant 0 : index
    %c0_46 = arith.constant 0 : index
    %73 = vector.load %arg5[%c0_45, %c0_46] : memref<11x16xbf16, #tpu.memory_space<vmem>>, vector<11x16xbf16>
    %cst_47 = arith.constant dense<0.000000e+00> : vector<4x16xf32>
    %74 = tpu.matmul %72, %73, %cst_47 {dimension_numbers = #tpu.dot_dimension_numbers<[1], [0], [0], [1], [0, 0, 1, 1], [], []>} : vector<4x11xbf16>, vector<11x16xbf16>, vector<4x16xf32> -> vector<4x16xf32>
    %75 = vector.broadcast %5 : vector<1x16xf32> to vector<4x16xf32>
    %76 = arith.addf %74, %75 : vector<4x16xf32>
    %cst_48 = arith.constant 5.000000e-01 : f32
    %77 = vector.broadcast %cst_48 : f32 to vector<4x16xf32>
    %78 = arith.mulf %77, %71 : vector<4x16xf32>
    %cst_49 = arith.constant 4.471500e-02 : f32
    %79 = vector.broadcast %cst_49 : f32 to vector<4x16xf32>
    %80 = arith.mulf %79, %71 : vector<4x16xf32>
    %81 = arith.mulf %80, %71 : vector<4x16xf32>
    %82 = arith.mulf %81, %71 : vector<4x16xf32>
    %83 = arith.addf %71, %82 : vector<4x16xf32>
    %cst_50 = arith.constant 0.797884583 : f32
    %84 = vector.broadcast %cst_50 : f32 to vector<4x16xf32>
    %85 = arith.mulf %84, %83 : vector<4x16xf32>
    %86 = math.tanh %85 : vector<4x16xf32>
    %cst_51 = arith.constant 1.000000e+00 : f32
    %87 = vector.broadcast %cst_51 : f32 to vector<4x16xf32>
    %88 = arith.addf %87, %86 : vector<4x16xf32>
    %89 = arith.mulf %78, %88 : vector<4x16xf32>
    %90 = arith.addf %89, %76 : vector<4x16xf32>
    %91 = arith.maximumf %62, %90 : vector<4x16xf32>
    %c3_52 = arith.constant 3 : index
    %c0_53 = arith.constant 0 : index
    %92 = tpu.strided_load %arg8[%c3_52, %c0_53] {strides = array<i32: 5, 1>} : memref<22x11xf32, #tpu.memory_space<vmem>>, vector<4x11xf32>
    %c4_54 = arith.constant 4 : index
    %c0_55 = arith.constant 0 : index
    %93 = tpu.strided_load %arg8[%c4_54, %c0_55] {strides = array<i32: 5, 1>} : memref<22x11xf32, #tpu.memory_space<vmem>>, vector<4x11xf32>
    %c5 = arith.constant 5 : index
    %c0_56 = arith.constant 0 : index
    %94 = tpu.strided_load %arg8[%c5, %c0_56] {strides = array<i32: 5, 1>} : memref<22x11xf32, #tpu.memory_space<vmem>>, vector<4x11xf32>
    %95 = tpu.concatenate %92, %93, %94 in 1 : vector<4x11xf32>, vector<4x11xf32>, vector<4x11xf32> -> vector<4x33xf32>
    %96 = arith.truncf %95 : vector<4x33xf32> to vector<4x33xbf16>
    %c0_57 = arith.constant 0 : index
    %c0_58 = arith.constant 0 : index
    %97 = vector.load %arg3[%c0_57, %c0_58] : memref<33x16xbf16, #tpu.memory_space<vmem>>, vector<33x16xbf16>
    %cst_59 = arith.constant dense<0.000000e+00> : vector<4x16xf32>
    %98 = tpu.matmul %96, %97, %cst_59 {dimension_numbers = #tpu.dot_dimension_numbers<[1], [0], [0], [1], [0, 0, 1, 1], [], []>} : vector<4x33xbf16>, vector<33x16xbf16>, vector<4x16xf32> -> vector<4x16xf32>
    %99 = vector.broadcast %4 : vector<1x16xf32> to vector<4x16xf32>
    %100 = arith.addf %98, %99 : vector<4x16xf32>
    %101 = arith.truncf %93 : vector<4x11xf32> to vector<4x11xbf16>
    %c0_60 = arith.constant 0 : index
    %c0_61 = arith.constant 0 : index
    %102 = vector.load %arg5[%c0_60, %c0_61] : memref<11x16xbf16, #tpu.memory_space<vmem>>, vector<11x16xbf16>
    %cst_62 = arith.constant dense<0.000000e+00> : vector<4x16xf32>
    %103 = tpu.matmul %101, %102, %cst_62 {dimension_numbers = #tpu.dot_dimension_numbers<[1], [0], [0], [1], [0, 0, 1, 1], [], []>} : vector<4x11xbf16>, vector<11x16xbf16>, vector<4x16xf32> -> vector<4x16xf32>
    %104 = vector.broadcast %5 : vector<1x16xf32> to vector<4x16xf32>
    %105 = arith.addf %103, %104 : vector<4x16xf32>
    %cst_63 = arith.constant 5.000000e-01 : f32
    %106 = vector.broadcast %cst_63 : f32 to vector<4x16xf32>
    %107 = arith.mulf %106, %100 : vector<4x16xf32>
    %cst_64 = arith.constant 4.471500e-02 : f32
    %108 = vector.broadcast %cst_64 : f32 to vector<4x16xf32>
    %109 = arith.mulf %108, %100 : vector<4x16xf32>
    %110 = arith.mulf %109, %100 : vector<4x16xf32>
    %111 = arith.mulf %110, %100 : vector<4x16xf32>
    %112 = arith.addf %100, %111 : vector<4x16xf32>
    %cst_65 = arith.constant 0.797884583 : f32
    %113 = vector.broadcast %cst_65 : f32 to vector<4x16xf32>
    %114 = arith.mulf %113, %112 : vector<4x16xf32>
    %115 = math.tanh %114 : vector<4x16xf32>
    %cst_66 = arith.constant 1.000000e+00 : f32
    %116 = vector.broadcast %cst_66 : f32 to vector<4x16xf32>
    %117 = arith.addf %116, %115 : vector<4x16xf32>
    %118 = arith.mulf %107, %117 : vector<4x16xf32>
    %119 = arith.addf %118, %105 : vector<4x16xf32>
    %120 = arith.maximumf %91, %119 : vector<4x16xf32>
    %c4_67 = arith.constant 4 : index
    %c0_68 = arith.constant 0 : index
    %121 = tpu.strided_load %arg8[%c4_67, %c0_68] {strides = array<i32: 5, 1>} : memref<22x11xf32, #tpu.memory_space<vmem>>, vector<4x11xf32>
    %c5_69 = arith.constant 5 : index
    %c0_70 = arith.constant 0 : index
    %122 = tpu.strided_load %arg8[%c5_69, %c0_70] {strides = array<i32: 5, 1>} : memref<22x11xf32, #tpu.memory_space<vmem>>, vector<4x11xf32>
    %c6 = arith.constant 6 : index
    %c0_71 = arith.constant 0 : index
    %123 = tpu.strided_load %arg8[%c6, %c0_71] {strides = array<i32: 5, 1>} : memref<22x11xf32, #tpu.memory_space<vmem>>, vector<4x11xf32>
    %124 = tpu.concatenate %121, %122, %123 in 1 : vector<4x11xf32>, vector<4x11xf32>, vector<4x11xf32> -> vector<4x33xf32>
    %125 = arith.truncf %124 : vector<4x33xf32> to vector<4x33xbf16>
    %c0_72 = arith.constant 0 : index
    %c0_73 = arith.constant 0 : index
    %126 = vector.load %arg3[%c0_72, %c0_73] : memref<33x16xbf16, #tpu.memory_space<vmem>>, vector<33x16xbf16>
    %cst_74 = arith.constant dense<0.000000e+00> : vector<4x16xf32>
    %127 = tpu.matmul %125, %126, %cst_74 {dimension_numbers = #tpu.dot_dimension_numbers<[1], [0], [0], [1], [0, 0, 1, 1], [], []>} : vector<4x33xbf16>, vector<33x16xbf16>, vector<4x16xf32> -> vector<4x16xf32>
    %128 = vector.broadcast %4 : vector<1x16xf32> to vector<4x16xf32>
    %129 = arith.addf %127, %128 : vector<4x16xf32>
    %130 = arith.truncf %122 : vector<4x11xf32> to vector<4x11xbf16>
    %c0_75 = arith.constant 0 : index
    %c0_76 = arith.constant 0 : index
    %131 = vector.load %arg5[%c0_75, %c0_76] : memref<11x16xbf16, #tpu.memory_space<vmem>>, vector<11x16xbf16>
    %cst_77 = arith.constant dense<0.000000e+00> : vector<4x16xf32>
    %132 = tpu.matmul %130, %131, %cst_77 {dimension_numbers = #tpu.dot_dimension_numbers<[1], [0], [0], [1], [0, 0, 1, 1], [], []>} : vector<4x11xbf16>, vector<11x16xbf16>, vector<4x16xf32> -> vector<4x16xf32>
    %133 = vector.broadcast %5 : vector<1x16xf32> to vector<4x16xf32>
    %134 = arith.addf %132, %133 : vector<4x16xf32>
    %cst_78 = arith.constant 5.000000e-01 : f32
    %135 = vector.broadcast %cst_78 : f32 to vector<4x16xf32>
    %136 = arith.mulf %135, %129 : vector<4x16xf32>
    %cst_79 = arith.constant 4.471500e-02 : f32
    %137 = vector.broadcast %cst_79 : f32 to vector<4x16xf32>
    %138 = arith.mulf %137, %129 : vector<4x16xf32>
    %139 = arith.mulf %138, %129 : vector<4x16xf32>
    %140 = arith.mulf %139, %129 : vector<4x16xf32>
    %141 = arith.addf %129, %140 : vector<4x16xf32>
    %cst_80 = arith.constant 0.797884583 : f32
    %142 = vector.broadcast %cst_80 : f32 to vector<4x16xf32>
    %143 = arith.mulf %142, %141 : vector<4x16xf32>
    %144 = math.tanh %143 : vector<4x16xf32>
    %cst_81 = arith.constant 1.000000e+00 : f32
    %145 = vector.broadcast %cst_81 : f32 to vector<4x16xf32>
    %146 = arith.addf %145, %144 : vector<4x16xf32>
    %147 = arith.mulf %136, %146 : vector<4x16xf32>
    %148 = arith.addf %147, %134 : vector<4x16xf32>
    %149 = arith.maximumf %120, %148 : vector<4x16xf32>
    %150 = arith.truncf %149 : vector<4x16xf32> to vector<4x16xbf16>
    %c0_82 = arith.constant 0 : index
    %c0_83 = arith.constant 0 : index
    %c0_84 = arith.constant 0 : index
    %151 = vector.load %arg7[%c0_82, %c0_83, %c0_84] : memref<1x4x16xbf16, #tpu.memory_space<vmem>>, vector<1x4x16xbf16>
    %152 = vector.shape_cast %151 : vector<1x4x16xbf16> to vector<4x16xbf16>
    %153 = vector.shape_cast %150 : vector<4x16xbf16> to vector<1x4x16xbf16>
    tpu.vector_store %arg7[%c0_82, %c0_83, %c0_84], %153 {strides = array<i32>} : memref<1x4x16xbf16, #tpu.memory_space<vmem>>, vector<1x4x16xbf16>,
    return
  }
  func.func @transform_0(%arg0: i32, %arg1: i32) -> (i32, i32, i32, i32) {
    %c0_i32 = arith.constant 0 : i32
    %c0_i32_0 = arith.constant 0 : i32
    %c0_i32_1 = arith.constant 0 : i32
    return %arg0, %arg1, %c0_i32, %c0_i32_0 : i32, i32, i32, i32
  }
  func.func @transform_1(%arg0: i32, %arg1: i32) -> (i32, i32) {
    %c0_i32 = arith.constant 0 : i32
    %c0_i32_0 = arith.constant 0 : i32
    %c0_i32_1 = arith.constant 0 : i32
    return %c0_i32, %c0_i32_0 : i32, i32
  }
  func.func @transform_2(%arg0: i32, %arg1: i32) -> (i32, i32) {
    %c0_i32 = arith.constant 0 : i32
    %c0_i32_0 = arith.constant 0 : i32
    %c0_i32_1 = arith.constant 0 : i32
    return %c0_i32, %c0_i32_0 : i32, i32
  }
  func.func @transform_3(%arg0: i32, %arg1: i32) -> (i32, i32) {
    %c0_i32 = arith.constant 0 : i32
    %c0_i32_0 = arith.constant 0 : i32
    %c0_i32_1 = arith.constant 0 : i32
    return %c0_i32, %c0_i32_0 : i32, i32
  }
  func.func @transform_4(%arg0: i32, %arg1: i32) -> (i32, i32) {
    %c0_i32 = arith.constant 0 : i32
    %c0_i32_0 = arith.constant 0 : i32
    %c0_i32_1 = arith.constant 0 : i32
    return %c0_i32, %c0_i32_0 : i32, i32
  }
  func.func @transform_5(%arg0: i32, %arg1: i32) -> (i32, i32, i32) {
    %c0_i32 = arith.constant 0 : i32
    %c0_i32_0 = arith.constant 0 : i32
    return %arg0, %arg1, %c0_i32 : i32, i32, i32
  }
}

module attributes {stable_mosaic.version = 11 : i64} {
  func.func @_fusion_kernel(%arg0: i32, %arg1: memref<1x4x16xbf16, #tpu.memory_space<vmem>>, %arg2: memref<1x4x16xbf16, #tpu.memory_space<vmem>>, %arg3: memref<1x1x4xf32, #tpu.memory_space<vmem>>, %arg4: memref<4x8xbf16, #tpu.memory_space<vmem>>, %arg5: memref<1x8xf32, #tpu.memory_space<vmem>>, %arg6: memref<16x16xbf16, #tpu.memory_space<vmem>>, %arg7: memref<8x16xbf16, #tpu.memory_space<vmem>>, %arg8: memref<16x16xbf16, #tpu.memory_space<vmem>>, %arg9: memref<1x16xf32, #tpu.memory_space<vmem>>, %arg10: memref<1x16xf32, #tpu.memory_space<vmem>>, %arg11: memref<1x16xf32, #tpu.memory_space<vmem>>, %arg12: memref<1x4x16xbf16, #tpu.memory_space<vmem>>) attributes {dimension_semantics = [#tpu.dimension_semantics<parallel>], iteration_bounds = array<i64: 2>, scalar_prefetch = 0 : i64, scratch_operands = 0 : i64, tpu.core_type = #tpu.core_type<tc>, window_params = [{transform_indices = @transform_0, window_bounds = array<i64: 1, 4, 16>}, {transform_indices = @transform_1, window_bounds = array<i64: 1, 4, 16>}, {transform_indices = @transform_2, window_bounds = array<i64: 1, 1, 4>}, {pipeline_mode = #tpu.pipeline_mode<synchronous>, transform_indices = @transform_3, window_bounds = array<i64: 4, 8>}, {pipeline_mode = #tpu.pipeline_mode<synchronous>, transform_indices = @transform_4, window_bounds = array<i64: 1, 8>}, {pipeline_mode = #tpu.pipeline_mode<synchronous>, transform_indices = @transform_5, window_bounds = array<i64: 16, 16>}, {pipeline_mode = #tpu.pipeline_mode<synchronous>, transform_indices = @transform_6, window_bounds = array<i64: 8, 16>}, {pipeline_mode = #tpu.pipeline_mode<synchronous>, transform_indices = @transform_7, window_bounds = array<i64: 16, 16>}, {pipeline_mode = #tpu.pipeline_mode<synchronous>, transform_indices = @transform_8, window_bounds = array<i64: 1, 16>}, {pipeline_mode = #tpu.pipeline_mode<synchronous>, transform_indices = @transform_9, window_bounds = array<i64: 1, 16>}, {pipeline_mode = #tpu.pipeline_mode<synchronous>, transform_indices = @transform_10, window_bounds = array<i64: 1, 16>}, {transform_indices = @transform_11, window_bounds = array<i64: 1, 4, 16>}]} {
    %c0 = arith.constant 0 : index
    %c0_0 = arith.constant 0 : index
    %c0_1 = arith.constant 0 : index
    %0 = vector.load %arg3[%c0, %c0_0, %c0_1] : memref<1x1x4xf32, #tpu.memory_space<vmem>>, vector<1x1x4xf32>
    %1 = vector.shape_cast %0 : vector<1x1x4xf32> to vector<1x4xf32>
    %2 = arith.truncf %1 : vector<1x4xf32> to vector<1x4xbf16>
    %c0_2 = arith.constant 0 : index
    %c0_3 = arith.constant 0 : index
    %3 = vector.load %arg4[%c0_2, %c0_3] : memref<4x8xbf16, #tpu.memory_space<vmem>>, vector<4x8xbf16>
    %cst = arith.constant dense<0.000000e+00> : vector<1x8xf32>
    %4 = tpu.matmul %2, %3, %cst {dimension_numbers = #tpu.dot_dimension_numbers<[1], [0], [0], [1], [0, 0, 1, 1], [], []>} : vector<1x4xbf16>, vector<4x8xbf16>, vector<1x8xf32> -> vector<1x8xf32>
    %c0_4 = arith.constant 0 : index
    %c0_5 = arith.constant 0 : index
    %5 = vector.load %arg5[%c0_4, %c0_5] : memref<1x8xf32, #tpu.memory_space<vmem>>, vector<1x8xf32>
    %6 = arith.addf %4, %5 : vector<1x8xf32>
    %7 = arith.truncf %6 : vector<1x8xf32> to vector<1x8xbf16>
    %c0_6 = arith.constant 0 : index
    %c0_7 = arith.constant 0 : index
    %8 = vector.load %arg7[%c0_6, %c0_7] : memref<8x16xbf16, #tpu.memory_space<vmem>>, vector<8x16xbf16>
    %cst_8 = arith.constant dense<0.000000e+00> : vector<1x16xf32>
    %9 = tpu.matmul %7, %8, %cst_8 {dimension_numbers = #tpu.dot_dimension_numbers<[1], [0], [0], [1], [0, 0, 1, 1], [], []>} : vector<1x8xbf16>, vector<8x16xbf16>, vector<1x16xf32> -> vector<1x16xf32>
    %c0_9 = arith.constant 0 : index
    %c0_10 = arith.constant 0 : index
    %c0_11 = arith.constant 0 : index
    %10 = vector.load %arg1[%c0_9, %c0_10, %c0_11] : memref<1x4x16xbf16, #tpu.memory_space<vmem>>, vector<1x4x16xbf16>
    %11 = vector.shape_cast %10 : vector<1x4x16xbf16> to vector<4x16xbf16>
    %c0_12 = arith.constant 0 : index
    %c0_13 = arith.constant 0 : index
    %12 = vector.load %arg6[%c0_12, %c0_13] : memref<16x16xbf16, #tpu.memory_space<vmem>>, vector<16x16xbf16>
    %cst_14 = arith.constant dense<0.000000e+00> : vector<4x16xf32>
    %13 = tpu.matmul %11, %12, %cst_14 {dimension_numbers = #tpu.dot_dimension_numbers<[1], [0], [0], [1], [0, 0, 1, 1], [], []>} : vector<4x16xbf16>, vector<16x16xbf16>, vector<4x16xf32> -> vector<4x16xf32>
    %c0_15 = arith.constant 0 : index
    %c0_16 = arith.constant 0 : index
    %c0_17 = arith.constant 0 : index
    %14 = vector.load %arg2[%c0_15, %c0_16, %c0_17] : memref<1x4x16xbf16, #tpu.memory_space<vmem>>, vector<1x4x16xbf16>
    %15 = vector.shape_cast %14 : vector<1x4x16xbf16> to vector<4x16xbf16>
    %c0_18 = arith.constant 0 : index
    %c0_19 = arith.constant 0 : index
    %16 = vector.load %arg8[%c0_18, %c0_19] : memref<16x16xbf16, #tpu.memory_space<vmem>>, vector<16x16xbf16>
    %cst_20 = arith.constant dense<0.000000e+00> : vector<4x16xf32>
    %17 = tpu.matmul %15, %16, %cst_20 {dimension_numbers = #tpu.dot_dimension_numbers<[1], [0], [0], [1], [0, 0, 1, 1], [], []>} : vector<4x16xbf16>, vector<16x16xbf16>, vector<4x16xf32> -> vector<4x16xf32>
    %18 = arith.addf %13, %17 : vector<4x16xf32>
    %19 = vector.broadcast %9 : vector<1x16xf32> to vector<4x16xf32>
    %20 = arith.addf %18, %19 : vector<4x16xf32>
    %c0_21 = arith.constant 0 : index
    %c0_22 = arith.constant 0 : index
    %21 = vector.load %arg9[%c0_21, %c0_22] : memref<1x16xf32, #tpu.memory_space<vmem>>, vector<1x16xf32>
    %22 = vector.broadcast %21 : vector<1x16xf32> to vector<4x16xf32>
    %23 = arith.addf %20, %22 : vector<4x16xf32>
    %c0_23 = arith.constant 0 : index
    %c0_24 = arith.constant 0 : index
    %24 = vector.load %arg10[%c0_23, %c0_24] : memref<1x16xf32, #tpu.memory_space<vmem>>, vector<1x16xf32>
    %c0_25 = arith.constant 0 : index
    %c0_26 = arith.constant 0 : index
    %25 = vector.load %arg11[%c0_25, %c0_26] : memref<1x16xf32, #tpu.memory_space<vmem>>, vector<1x16xf32>
    %cst_27 = arith.constant dense<0.000000e+00> : vector<4xf32>
    %26 = vector.multi_reduction <add>, %23, %cst_27 [1] : vector<4x16xf32> to vector<4xf32>
    %27 = vector.shape_cast %26 : vector<4xf32> to vector<4x1xf32>
    %cst_28 = arith.constant 1.600000e+01 : f32
    %28 = vector.broadcast %cst_28 : f32 to vector<4x1xf32>
    %29 = arith.divf %27, %28 : vector<4x1xf32>
    %30 = vector.broadcast %29 : vector<4x1xf32> to vector<4x16xf32>
    %31 = arith.subf %23, %30 : vector<4x16xf32>
    %32 = arith.mulf %31, %31 : vector<4x16xf32>
    %cst_29 = arith.constant dense<0.000000e+00> : vector<4xf32>
    %33 = vector.multi_reduction <add>, %32, %cst_29 [1] : vector<4x16xf32> to vector<4xf32>
    %34 = vector.shape_cast %33 : vector<4xf32> to vector<4x1xf32>
    %cst_30 = arith.constant 1.600000e+01 : f32
    %35 = vector.broadcast %cst_30 : f32 to vector<4x1xf32>
    %36 = arith.divf %34, %35 : vector<4x1xf32>
    %cst_31 = arith.constant 9.99999974E-6 : f32
    %37 = vector.broadcast %cst_31 : f32 to vector<4x1xf32>
    %38 = arith.addf %36, %37 : vector<4x1xf32>
    %39 = math.rsqrt %38 : vector<4x1xf32>
    %40 = vector.broadcast %39 : vector<4x1xf32> to vector<4x16xf32>
    %41 = arith.mulf %31, %40 : vector<4x16xf32>
    %42 = vector.broadcast %24 : vector<1x16xf32> to vector<4x16xf32>
    %43 = arith.mulf %41, %42 : vector<4x16xf32>
    %44 = vector.broadcast %25 : vector<1x16xf32> to vector<4x16xf32>
    %45 = arith.addf %43, %44 : vector<4x16xf32>
    %46 = arith.truncf %45 : vector<4x16xf32> to vector<4x16xbf16>
    %c0_32 = arith.constant 0 : index
    %c0_33 = arith.constant 0 : index
    %c0_34 = arith.constant 0 : index
    %47 = vector.load %arg12[%c0_32, %c0_33, %c0_34] : memref<1x4x16xbf16, #tpu.memory_space<vmem>>, vector<1x4x16xbf16>
    %48 = vector.shape_cast %47 : vector<1x4x16xbf16> to vector<4x16xbf16>
    %49 = vector.shape_cast %46 : vector<4x16xbf16> to vector<1x4x16xbf16>
    tpu.vector_store %arg12[%c0_32, %c0_33, %c0_34], %49 {strides = array<i32>} : memref<1x4x16xbf16, #tpu.memory_space<vmem>>, vector<1x4x16xbf16>,
    return
  }
  func.func @transform_0(%arg0: i32) -> (i32, i32, i32) {
    %c0_i32 = arith.constant 0 : i32
    %c0_i32_0 = arith.constant 0 : i32
    %c0_i32_1 = arith.constant 0 : i32
    return %arg0, %c0_i32, %c0_i32_0 : i32, i32, i32
  }
  func.func @transform_1(%arg0: i32) -> (i32, i32, i32) {
    %c0_i32 = arith.constant 0 : i32
    %c0_i32_0 = arith.constant 0 : i32
    %c0_i32_1 = arith.constant 0 : i32
    return %arg0, %c0_i32, %c0_i32_0 : i32, i32, i32
  }
  func.func @transform_2(%arg0: i32) -> (i32, i32, i32) {
    %c0_i32 = arith.constant 0 : i32
    %c0_i32_0 = arith.constant 0 : i32
    %c0_i32_1 = arith.constant 0 : i32
    return %arg0, %c0_i32, %c0_i32_0 : i32, i32, i32
  }
  func.func @transform_3(%arg0: i32) -> (i32, i32) {
    %c0_i32 = arith.constant 0 : i32
    %c0_i32_0 = arith.constant 0 : i32
    %c0_i32_1 = arith.constant 0 : i32
    return %c0_i32, %c0_i32_0 : i32, i32
  }
  func.func @transform_4(%arg0: i32) -> (i32, i32) {
    %c0_i32 = arith.constant 0 : i32
    %c0_i32_0 = arith.constant 0 : i32
    %c0_i32_1 = arith.constant 0 : i32
    return %c0_i32, %c0_i32_0 : i32, i32
  }
  func.func @transform_5(%arg0: i32) -> (i32, i32) {
    %c0_i32 = arith.constant 0 : i32
    %c0_i32_0 = arith.constant 0 : i32
    %c0_i32_1 = arith.constant 0 : i32
    return %c0_i32, %c0_i32_0 : i32, i32
  }
  func.func @transform_6(%arg0: i32) -> (i32, i32) {
    %c0_i32 = arith.constant 0 : i32
    %c0_i32_0 = arith.constant 0 : i32
    %c0_i32_1 = arith.constant 0 : i32
    return %c0_i32, %c0_i32_0 : i32, i32
  }
  func.func @transform_7(%arg0: i32) -> (i32, i32) {
    %c0_i32 = arith.constant 0 : i32
    %c0_i32_0 = arith.constant 0 : i32
    %c0_i32_1 = arith.constant 0 : i32
    return %c0_i32, %c0_i32_0 : i32, i32
  }
  func.func @transform_8(%arg0: i32) -> (i32, i32) {
    %c0_i32 = arith.constant 0 : i32
    %c0_i32_0 = arith.constant 0 : i32
    %c0_i32_1 = arith.constant 0 : i32
    return %c0_i32, %c0_i32_0 : i32, i32
  }
  func.func @transform_9(%arg0: i32) -> (i32, i32) {
    %c0_i32 = arith.constant 0 : i32
    %c0_i32_0 = arith.constant 0 : i32
    %c0_i32_1 = arith.constant 0 : i32
    return %c0_i32, %c0_i32_0 : i32, i32
  }
  func.func @transform_10(%arg0: i32) -> (i32, i32) {
    %c0_i32 = arith.constant 0 : i32
    %c0_i32_0 = arith.constant 0 : i32
    %c0_i32_1 = arith.constant 0 : i32
    return %c0_i32, %c0_i32_0 : i32, i32
  }
  func.func @transform_11(%arg0: i32) -> (i32, i32, i32) {
    %c0_i32 = arith.constant 0 : i32
    %c0_i32_0 = arith.constant 0 : i32
    %c0_i32_1 = arith.constant 0 : i32
    return %arg0, %c0_i32, %c0_i32_0 : i32, i32, i32
  }
}

module attributes {stable_mosaic.version = 11 : i64} {
  func.func @_attn_pool_kernel(%arg0: i32, %arg1: memref<1x4x16xbf16, #tpu.memory_space<vmem>>, %arg2: memref<1x16xf32, #tpu.memory_space<vmem>>, %arg3: memref<1x1xf32, #tpu.memory_space<vmem>>, %arg4: memref<1x1x16xf32, #tpu.memory_space<vmem>>) attributes {dimension_semantics = [#tpu.dimension_semantics<parallel>], iteration_bounds = array<i64: 2>, scalar_prefetch = 0 : i64, scratch_operands = 0 : i64, tpu.core_type = #tpu.core_type<tc>, window_params = [{transform_indices = @transform_0, window_bounds = array<i64: 1, 4, 16>}, {pipeline_mode = #tpu.pipeline_mode<synchronous>, transform_indices = @transform_1, window_bounds = array<i64: 1, 16>}, {pipeline_mode = #tpu.pipeline_mode<synchronous>, transform_indices = @transform_2, window_bounds = array<i64: 1, 1>}, {transform_indices = @transform_3, window_bounds = array<i64: 1, 1, 16>}]} {
    %c0 = arith.constant 0 : index
    %c0_0 = arith.constant 0 : index
    %c0_1 = arith.constant 0 : index
    %0 = vector.load %arg1[%c0, %c0_0, %c0_1] : memref<1x4x16xbf16, #tpu.memory_space<vmem>>, vector<1x4x16xbf16>
    %1 = vector.shape_cast %0 : vector<1x4x16xbf16> to vector<4x16xbf16>
    %2 = arith.extf %1 : vector<4x16xbf16> to vector<4x16xf32>
    %c0_2 = arith.constant 0 : index
    %c0_3 = arith.constant 0 : index
    %3 = vector.load %arg2[%c0_2, %c0_3] : memref<1x16xf32, #tpu.memory_space<vmem>>, vector<1x16xf32>
    %4 = vector.broadcast %3 : vector<1x16xf32> to vector<4x16xf32>
    %5 = arith.mulf %2, %4 : vector<4x16xf32>
    %cst = arith.constant dense<0.000000e+00> : vector<4xf32>
    %6 = vector.multi_reduction <add>, %5, %cst [1] : vector<4x16xf32> to vector<4xf32>
    %7 = vector.shape_cast %6 : vector<4xf32> to vector<4x1xf32>
    %c0_4 = arith.constant 0 : index
    %c0_5 = arith.constant 0 : index
    %8 = vector.load %arg3[%c0_4, %c0_5] : memref<1x1xf32, #tpu.memory_space<vmem>>, vector<1x1xf32>
    %9 = vector.broadcast %8 : vector<1x1xf32> to vector<4x1xf32>
    %10 = arith.addf %7, %9 : vector<4x1xf32>
    %cst_6 = arith.constant dense<0xFF800000> : vector<1xf32>
    %11 = vector.multi_reduction <maximumf>, %10, %cst_6 [0] : vector<4x1xf32> to vector<1xf32>
    %12 = vector.shape_cast %11 : vector<1xf32> to vector<1x1xf32>
    %13 = vector.broadcast %12 : vector<1x1xf32> to vector<4x1xf32>
    %14 = arith.subf %10, %13 : vector<4x1xf32>
    %15 = math.exp %14 : vector<4x1xf32>
    %cst_7 = arith.constant dense<0.000000e+00> : vector<1xf32>
    %16 = vector.multi_reduction <add>, %15, %cst_7 [0] : vector<4x1xf32> to vector<1xf32>
    %17 = vector.shape_cast %16 : vector<1xf32> to vector<1x1xf32>
    %18 = tpu.reciprocal %17 {approx = true} : vector<1x1xf32> -> vector<1x1xf32>
    %19 = vector.broadcast %18 : vector<1x1xf32> to vector<4x1xf32>
    %20 = arith.mulf %15, %19 : vector<4x1xf32>
    %21 = vector.broadcast %20 : vector<4x1xf32> to vector<4x16xf32>
    %22 = arith.mulf %21, %2 : vector<4x16xf32>
    %cst_8 = arith.constant dense<0.000000e+00> : vector<16xf32>
    %23 = vector.multi_reduction <add>, %22, %cst_8 [0] : vector<4x16xf32> to vector<16xf32>
    %24 = vector.shape_cast %23 : vector<16xf32> to vector<1x16xf32>
    %c0_9 = arith.constant 0 : index
    %c0_10 = arith.constant 0 : index
    %c0_11 = arith.constant 0 : index
    %25 = vector.load %arg4[%c0_9, %c0_10, %c0_11] : memref<1x1x16xf32, #tpu.memory_space<vmem>>, vector<1x1x16xf32>
    %26 = vector.shape_cast %25 : vector<1x1x16xf32> to vector<1x16xf32>
    %27 = vector.shape_cast %24 : vector<1x16xf32> to vector<1x1x16xf32>
    tpu.vector_store %arg4[%c0_9, %c0_10, %c0_11], %27 {strides = array<i32>} : memref<1x1x16xf32, #tpu.memory_space<vmem>>, vector<1x1x16xf32>,
    return
  }
  func.func @transform_0(%arg0: i32) -> (i32, i32, i32) {
    %c0_i32 = arith.constant 0 : i32
    %c0_i32_0 = arith.constant 0 : i32
    %c0_i32_1 = arith.constant 0 : i32
    return %arg0, %c0_i32, %c0_i32_0 : i32, i32, i32
  }
  func.func @transform_1(%arg0: i32) -> (i32, i32) {
    %c0_i32 = arith.constant 0 : i32
    %c0_i32_0 = arith.constant 0 : i32
    %c0_i32_1 = arith.constant 0 : i32
    return %c0_i32, %c0_i32_0 : i32, i32
  }
  func.func @transform_2(%arg0: i32) -> (i32, i32) {
    %c0_i32 = arith.constant 0 : i32
    %c0_i32_0 = arith.constant 0 : i32
    %c0_i32_1 = arith.constant 0 : i32
    return %c0_i32, %c0_i32_0 : i32, i32
  }
  func.func @transform_3(%arg0: i32) -> (i32, i32, i32) {
    %c0_i32 = arith.constant 0 : i32
    %c0_i32_0 = arith.constant 0 : i32
    %c0_i32_1 = arith.constant 0 : i32
    return %arg0, %c0_i32, %c0_i32_0 : i32, i32, i32
  }
}

module attributes {stable_mosaic.version = 11 : i64} {
  func.func @_proj_head_kernel(%arg0: memref<2x16xf32, #tpu.memory_space<vmem>>, %arg1: memref<16x16xbf16, #tpu.memory_space<vmem>>, %arg2: memref<1x16xf32, #tpu.memory_space<vmem>>, %arg3: memref<16x16xbf16, #tpu.memory_space<vmem>>, %arg4: memref<1x16xf32, #tpu.memory_space<vmem>>, %arg5: memref<2x16xf32, #tpu.memory_space<vmem>>) attributes {dimension_semantics = [], scalar_prefetch = 0 : i64, scratch_operands = 0 : i64, tpu.core_type = #tpu.core_type<tc>} {
    %c0 = arith.constant 0 : index
    %c0_0 = arith.constant 0 : index
    %0 = vector.load %arg0[%c0, %c0_0] : memref<2x16xf32, #tpu.memory_space<vmem>>, vector<2x16xf32>
    %1 = arith.truncf %0 : vector<2x16xf32> to vector<2x16xbf16>
    %c0_1 = arith.constant 0 : index
    %c0_2 = arith.constant 0 : index
    %2 = vector.load %arg1[%c0_1, %c0_2] : memref<16x16xbf16, #tpu.memory_space<vmem>>, vector<16x16xbf16>
    %cst = arith.constant dense<0.000000e+00> : vector<2x16xf32>
    %3 = tpu.matmul %1, %2, %cst {dimension_numbers = #tpu.dot_dimension_numbers<[1], [0], [0], [1], [0, 0, 1, 1], [], []>} : vector<2x16xbf16>, vector<16x16xbf16>, vector<2x16xf32> -> vector<2x16xf32>
    %c0_3 = arith.constant 0 : index
    %c0_4 = arith.constant 0 : index
    %4 = vector.load %arg2[%c0_3, %c0_4] : memref<1x16xf32, #tpu.memory_space<vmem>>, vector<1x16xf32>
    %5 = vector.broadcast %4 : vector<1x16xf32> to vector<2x16xf32>
    %6 = arith.addf %3, %5 : vector<2x16xf32>
    %cst_5 = arith.constant 5.000000e-01 : f32
    %7 = vector.broadcast %cst_5 : f32 to vector<2x16xf32>
    %8 = arith.mulf %7, %6 : vector<2x16xf32>
    %cst_6 = arith.constant 4.471500e-02 : f32
    %9 = vector.broadcast %cst_6 : f32 to vector<2x16xf32>
    %10 = arith.mulf %9, %6 : vector<2x16xf32>
    %11 = arith.mulf %10, %6 : vector<2x16xf32>
    %12 = arith.mulf %11, %6 : vector<2x16xf32>
    %13 = arith.addf %6, %12 : vector<2x16xf32>
    %cst_7 = arith.constant 0.797884583 : f32
    %14 = vector.broadcast %cst_7 : f32 to vector<2x16xf32>
    %15 = arith.mulf %14, %13 : vector<2x16xf32>
    %16 = math.tanh %15 : vector<2x16xf32>
    %cst_8 = arith.constant 1.000000e+00 : f32
    %17 = vector.broadcast %cst_8 : f32 to vector<2x16xf32>
    %18 = arith.addf %17, %16 : vector<2x16xf32>
    %19 = arith.mulf %8, %18 : vector<2x16xf32>
    %20 = arith.truncf %19 : vector<2x16xf32> to vector<2x16xbf16>
    %c0_9 = arith.constant 0 : index
    %c0_10 = arith.constant 0 : index
    %21 = vector.load %arg3[%c0_9, %c0_10] : memref<16x16xbf16, #tpu.memory_space<vmem>>, vector<16x16xbf16>
    %cst_11 = arith.constant dense<0.000000e+00> : vector<2x16xf32>
    %22 = tpu.matmul %20, %21, %cst_11 {dimension_numbers = #tpu.dot_dimension_numbers<[1], [0], [0], [1], [0, 0, 1, 1], [], []>} : vector<2x16xbf16>, vector<16x16xbf16>, vector<2x16xf32> -> vector<2x16xf32>
    %c0_12 = arith.constant 0 : index
    %c0_13 = arith.constant 0 : index
    %23 = vector.load %arg4[%c0_12, %c0_13] : memref<1x16xf32, #tpu.memory_space<vmem>>, vector<1x16xf32>
    %24 = vector.broadcast %23 : vector<1x16xf32> to vector<2x16xf32>
    %25 = arith.addf %22, %24 : vector<2x16xf32>
    %c0_14 = arith.constant 0 : index
    %c0_15 = arith.constant 0 : index
    %26 = vector.load %arg5[%c0_14, %c0_15] : memref<2x16xf32, #tpu.memory_space<vmem>>, vector<2x16xf32>
    tpu.vector_store %arg5[%c0_14, %c0_15], %25 {strides = array<i32>} : memref<2x16xf32, #tpu.memory_space<vmem>>, vector<2x16xf32>,
    return
  }
}

module attributes {stable_mosaic.version = 11 : i64} {
  func.func @_block_kernel(%arg0: i32, %arg1: memref<1x4x16xbf16, #tpu.memory_space<vmem>>, %arg2: memref<16x48xbf16, #tpu.memory_space<vmem>>, %arg3: memref<1x48xf32, #tpu.memory_space<vmem>>, %arg4: memref<16x16xbf16, #tpu.memory_space<vmem>>, %arg5: memref<1x16xf32, #tpu.memory_space<vmem>>, %arg6: memref<1x16xf32, #tpu.memory_space<vmem>>, %arg7: memref<1x16xf32, #tpu.memory_space<vmem>>, %arg8: memref<16x64xbf16, #tpu.memory_space<vmem>>, %arg9: memref<1x64xf32, #tpu.memory_space<vmem>>, %arg10: memref<64x16xbf16, #tpu.memory_space<vmem>>, %arg11: memref<1x16xf32, #tpu.memory_space<vmem>>, %arg12: memref<1x16xf32, #tpu.memory_space<vmem>>, %arg13: memref<1x16xf32, #tpu.memory_space<vmem>>, %arg14: memref<2x4x4xbf16, #tpu.memory_space<vmem>>, %arg15: memref<1x4x16xbf16, #tpu.memory_space<vmem>>) attributes {dimension_semantics = [#tpu.dimension_semantics<parallel>], iteration_bounds = array<i64: 2>, scalar_prefetch = 0 : i64, scratch_operands = 0 : i64, tpu.core_type = #tpu.core_type<tc>, window_params = [{transform_indices = @transform_0, window_bounds = array<i64: 1, 4, 16>}, {pipeline_mode = #tpu.pipeline_mode<synchronous>, transform_indices = @transform_1, window_bounds = array<i64: 16, 48>}, {pipeline_mode = #tpu.pipeline_mode<synchronous>, transform_indices = @transform_2, window_bounds = array<i64: 1, 48>}, {pipeline_mode = #tpu.pipeline_mode<synchronous>, transform_indices = @transform_3, window_bounds = array<i64: 16, 16>}, {pipeline_mode = #tpu.pipeline_mode<synchronous>, transform_indices = @transform_4, window_bounds = array<i64: 1, 16>}, {pipeline_mode = #tpu.pipeline_mode<synchronous>, transform_indices = @transform_5, window_bounds = array<i64: 1, 16>}, {pipeline_mode = #tpu.pipeline_mode<synchronous>, transform_indices = @transform_6, window_bounds = array<i64: 1, 16>}, {pipeline_mode = #tpu.pipeline_mode<synchronous>, transform_indices = @transform_7, window_bounds = array<i64: 16, 64>}, {pipeline_mode = #tpu.pipeline_mode<synchronous>, transform_indices = @transform_8, window_bounds = array<i64: 1, 64>}, {pipeline_mode = #tpu.pipeline_mode<synchronous>, transform_indices = @transform_9, window_bounds = array<i64: 64, 16>}, {pipeline_mode = #tpu.pipeline_mode<synchronous>, transform_indices = @transform_10, window_bounds = array<i64: 1, 16>}, {pipeline_mode = #tpu.pipeline_mode<synchronous>, transform_indices = @transform_11, window_bounds = array<i64: 1, 16>}, {pipeline_mode = #tpu.pipeline_mode<synchronous>, transform_indices = @transform_12, window_bounds = array<i64: 1, 16>}, {pipeline_mode = #tpu.pipeline_mode<synchronous>, transform_indices = @transform_13, window_bounds = array<i64: 2, 4, 4>}, {transform_indices = @transform_14, window_bounds = array<i64: 1, 4, 16>}]} {
    %c0 = arith.constant 0 : index
    %c0_0 = arith.constant 0 : index
    %c0_1 = arith.constant 0 : index
    %0 = vector.load %arg1[%c0, %c0_0, %c0_1] : memref<1x4x16xbf16, #tpu.memory_space<vmem>>, vector<1x4x16xbf16>
    %1 = vector.shape_cast %0 : vector<1x4x16xbf16> to vector<4x16xbf16>
    %2 = arith.extf %1 : vector<4x16xbf16> to vector<4x16xf32>
    %c0_2 = arith.constant 0 : index
    %c0_3 = arith.constant 0 : index
    %3 = vector.load %arg2[%c0_2, %c0_3] : memref<16x48xbf16, #tpu.memory_space<vmem>>, vector<16x48xbf16>
    %cst = arith.constant dense<0.000000e+00> : vector<4x48xf32>
    %4 = tpu.matmul %1, %3, %cst {dimension_numbers = #tpu.dot_dimension_numbers<[1], [0], [0], [1], [0, 0, 1, 1], [], []>} : vector<4x16xbf16>, vector<16x48xbf16>, vector<4x48xf32> -> vector<4x48xf32>
    %c0_4 = arith.constant 0 : index
    %c0_5 = arith.constant 0 : index
    %5 = vector.load %arg3[%c0_4, %c0_5] : memref<1x48xf32, #tpu.memory_space<vmem>>, vector<1x48xf32>
    %6 = vector.broadcast %5 : vector<1x48xf32> to vector<4x48xf32>
    %7 = arith.addf %4, %6 : vector<4x48xf32>
    %8 = vector.extract_strided_slice %7 {offsets = [0, 0], sizes = [4, 8], strides = [1, 1]} : vector<4x48xf32> to vector<4x8xf32>
    %9 = arith.truncf %8 : vector<4x8xf32> to vector<4x8xbf16>
    %10 = vector.extract_strided_slice %7 {offsets = [0, 16], sizes = [4, 8], strides = [1, 1]} : vector<4x48xf32> to vector<4x8xf32>
    %11 = arith.truncf %10 : vector<4x8xf32> to vector<4x8xbf16>
    %12 = vector.extract_strided_slice %7 {offsets = [0, 32], sizes = [4, 8], strides = [1, 1]} : vector<4x48xf32> to vector<4x8xf32>
    %13 = arith.truncf %12 : vector<4x8xf32> to vector<4x8xbf16>
    %cst_6 = arith.constant dense<0.000000e+00> : vector<4x4xf32>
    %14 = tpu.matmul %9, %11, %cst_6 {dimension_numbers = #tpu.dot_dimension_numbers<[1], [1], [0], [0], [0, 0, 1, 0], [], []>} : vector<4x8xbf16>, vector<4x8xbf16>, vector<4x4xf32> -> vector<4x4xf32>
    %cst_7 = arith.constant 0.353553385 : f32
    %15 = vector.broadcast %cst_7 : f32 to vector<4x4xf32>
    %16 = arith.mulf %14, %15 : vector<4x4xf32>
    %c0_8 = arith.constant 0 : index
    %c0_9 = arith.constant 0 : index
    %c0_10 = arith.constant 0 : index
    %17 = vector.load %arg14[%c0_8, %c0_9, %c0_10] : memref<2x4x4xbf16, #tpu.memory_space<vmem>>, vector<1x4x4xbf16>
    %18 = vector.shape_cast %17 : vector<1x4x4xbf16> to vector<4x4xbf16>
    %19 = arith.extf %18 : vector<4x4xbf16> to vector<4x4xf32>
    %20 = arith.addf %16, %19 : vector<4x4xf32>
    %cst_11 = arith.constant dense<0xFF800000> : vector<4xf32>
    %21 = vector.multi_reduction <maximumf>, %20, %cst_11 [1] : vector<4x4xf32> to vector<4xf32>
    %22 = vector.shape_cast %21 : vector<4xf32> to vector<4x1xf32>
    %23 = vector.broadcast %22 : vector<4x1xf32> to vector<4x4xf32>
    %24 = arith.subf %20, %23 : vector<4x4xf32>
    %25 = math.exp %24 : vector<4x4xf32>
    %cst_12 = arith.constant dense<0.000000e+00> : vector<4xf32>
    %26 = vector.multi_reduction <add>, %25, %cst_12 [1] : vector<4x4xf32> to vector<4xf32>
    %27 = vector.shape_cast %26 : vector<4xf32> to vector<4x1xf32>
    %28 = tpu.reciprocal %27 {approx = true} : vector<4x1xf32> -> vector<4x1xf32>
    %29 = vector.broadcast %28 : vector<4x1xf32> to vector<4x4xf32>
    %30 = arith.mulf %25, %29 : vector<4x4xf32>
    %31 = arith.truncf %30 : vector<4x4xf32> to vector<4x4xbf16>
    %cst_13 = arith.constant dense<0.000000e+00> : vector<4x8xf32>
    %32 = tpu.matmul %31, %13, %cst_13 {dimension_numbers = #tpu.dot_dimension_numbers<[1], [0], [0], [1], [0, 0, 1, 1], [], []>} : vector<4x4xbf16>, vector<4x8xbf16>, vector<4x8xf32> -> vector<4x8xf32>
    %33 = vector.extract_strided_slice %7 {offsets = [0, 8], sizes = [4, 8], strides = [1, 1]} : vector<4x48xf32> to vector<4x8xf32>
    %34 = arith.truncf %33 : vector<4x8xf32> to vector<4x8xbf16>
    %35 = vector.extract_strided_slice %7 {offsets = [0, 24], sizes = [4, 8], strides = [1, 1]} : vector<4x48xf32> to vector<4x8xf32>
    %36 = arith.truncf %35 : vector<4x8xf32> to vector<4x8xbf16>
    %37 = vector.extract_strided_slice %7 {offsets = [0, 40], sizes = [4, 8], strides = [1, 1]} : vector<4x48xf32> to vector<4x8xf32>
    %38 = arith.truncf %37 : vector<4x8xf32> to vector<4x8xbf16>
    %cst_14 = arith.constant dense<0.000000e+00> : vector<4x4xf32>
    %39 = tpu.matmul %34, %36, %cst_14 {dimension_numbers = #tpu.dot_dimension_numbers<[1], [1], [0], [0], [0, 0, 1, 0], [], []>} : vector<4x8xbf16>, vector<4x8xbf16>, vector<4x4xf32> -> vector<4x4xf32>
    %cst_15 = arith.constant 0.353553385 : f32
    %40 = vector.broadcast %cst_15 : f32 to vector<4x4xf32>
    %41 = arith.mulf %39, %40 : vector<4x4xf32>
    %c1 = arith.constant 1 : index
    %c0_16 = arith.constant 0 : index
    %c0_17 = arith.constant 0 : index
    %42 = vector.load %arg14[%c1, %c0_16, %c0_17] : memref<2x4x4xbf16, #tpu.memory_space<vmem>>, vector<1x4x4xbf16>
    %43 = vector.shape_cast %42 : vector<1x4x4xbf16> to vector<4x4xbf16>
    %44 = arith.extf %43 : vector<4x4xbf16> to vector<4x4xf32>
    %45 = arith.addf %41, %44 : vector<4x4xf32>
    %cst_18 = arith.constant dense<0xFF800000> : vector<4xf32>
    %46 = vector.multi_reduction <maximumf>, %45, %cst_18 [1] : vector<4x4xf32> to vector<4xf32>
    %47 = vector.shape_cast %46 : vector<4xf32> to vector<4x1xf32>
    %48 = vector.broadcast %47 : vector<4x1xf32> to vector<4x4xf32>
    %49 = arith.subf %45, %48 : vector<4x4xf32>
    %50 = math.exp %49 : vector<4x4xf32>
    %cst_19 = arith.constant dense<0.000000e+00> : vector<4xf32>
    %51 = vector.multi_reduction <add>, %50, %cst_19 [1] : vector<4x4xf32> to vector<4xf32>
    %52 = vector.shape_cast %51 : vector<4xf32> to vector<4x1xf32>
    %53 = tpu.reciprocal %52 {approx = true} : vector<4x1xf32> -> vector<4x1xf32>
    %54 = vector.broadcast %53 : vector<4x1xf32> to vector<4x4xf32>
    %55 = arith.mulf %50, %54 : vector<4x4xf32>
    %56 = arith.truncf %55 : vector<4x4xf32> to vector<4x4xbf16>
    %cst_20 = arith.constant dense<0.000000e+00> : vector<4x8xf32>
    %57 = tpu.matmul %56, %38, %cst_20 {dimension_numbers = #tpu.dot_dimension_numbers<[1], [0], [0], [1], [0, 0, 1, 1], [], []>} : vector<4x4xbf16>, vector<4x8xbf16>, vector<4x8xf32> -> vector<4x8xf32>
    %58 = tpu.concatenate %32, %57 in 1 : vector<4x8xf32>, vector<4x8xf32> -> vector<4x16xf32>
    %59 = arith.truncf %58 : vector<4x16xf32> to vector<4x16xbf16>
    %c0_21 = arith.constant 0 : index
    %c0_22 = arith.constant 0 : index
    %60 = vector.load %arg4[%c0_21, %c0_22] : memref<16x16xbf16, #tpu.memory_space<vmem>>, vector<16x16xbf16>
    %cst_23 = arith.constant dense<0.000000e+00> : vector<4x16xf32>
    %61 = tpu.matmul %59, %60, %cst_23 {dimension_numbers = #tpu.dot_dimension_numbers<[1], [0], [0], [1], [0, 0, 1, 1], [], []>} : vector<4x16xbf16>, vector<16x16xbf16>, vector<4x16xf32> -> vector<4x16xf32>
    %c0_24 = arith.constant 0 : index
    %c0_25 = arith.constant 0 : index
    %62 = vector.load %arg5[%c0_24, %c0_25] : memref<1x16xf32, #tpu.memory_space<vmem>>, vector<1x16xf32>
    %63 = vector.broadcast %62 : vector<1x16xf32> to vector<4x16xf32>
    %64 = arith.addf %61, %63 : vector<4x16xf32>
    %65 = arith.addf %2, %64 : vector<4x16xf32>
    %c0_26 = arith.constant 0 : index
    %c0_27 = arith.constant 0 : index
    %66 = vector.load %arg6[%c0_26, %c0_27] : memref<1x16xf32, #tpu.memory_space<vmem>>, vector<1x16xf32>
    %c0_28 = arith.constant 0 : index
    %c0_29 = arith.constant 0 : index
    %67 = vector.load %arg7[%c0_28, %c0_29] : memref<1x16xf32, #tpu.memory_space<vmem>>, vector<1x16xf32>
    %cst_30 = arith.constant dense<0.000000e+00> : vector<4xf32>
    %68 = vector.multi_reduction <add>, %65, %cst_30 [1] : vector<4x16xf32> to vector<4xf32>
    %69 = vector.shape_cast %68 : vector<4xf32> to vector<4x1xf32>
    %cst_31 = arith.constant 1.600000e+01 : f32
    %70 = vector.broadcast %cst_31 : f32 to vector<4x1xf32>
    %71 = arith.divf %69, %70 : vector<4x1xf32>
    %72 = vector.broadcast %71 : vector<4x1xf32> to vector<4x16xf32>
    %73 = arith.subf %65, %72 : vector<4x16xf32>
    %74 = arith.mulf %73, %73 : vector<4x16xf32>
    %cst_32 = arith.constant dense<0.000000e+00> : vector<4xf32>
    %75 = vector.multi_reduction <add>, %74, %cst_32 [1] : vector<4x16xf32> to vector<4xf32>
    %76 = vector.shape_cast %75 : vector<4xf32> to vector<4x1xf32>
    %cst_33 = arith.constant 1.600000e+01 : f32
    %77 = vector.broadcast %cst_33 : f32 to vector<4x1xf32>
    %78 = arith.divf %76, %77 : vector<4x1xf32>
    %cst_34 = arith.constant 9.99999974E-6 : f32
    %79 = vector.broadcast %cst_34 : f32 to vector<4x1xf32>
    %80 = arith.addf %78, %79 : vector<4x1xf32>
    %81 = math.rsqrt %80 : vector<4x1xf32>
    %82 = vector.broadcast %81 : vector<4x1xf32> to vector<4x16xf32>
    %83 = arith.mulf %73, %82 : vector<4x16xf32>
    %84 = vector.broadcast %66 : vector<1x16xf32> to vector<4x16xf32>
    %85 = arith.mulf %83, %84 : vector<4x16xf32>
    %86 = vector.broadcast %67 : vector<1x16xf32> to vector<4x16xf32>
    %87 = arith.addf %85, %86 : vector<4x16xf32>
    %88 = arith.truncf %87 : vector<4x16xf32> to vector<4x16xbf16>
    %c0_35 = arith.constant 0 : index
    %c0_36 = arith.constant 0 : index
    %89 = vector.load %arg8[%c0_35, %c0_36] : memref<16x64xbf16, #tpu.memory_space<vmem>>, vector<16x64xbf16>
    %cst_37 = arith.constant dense<0.000000e+00> : vector<4x64xf32>
    %90 = tpu.matmul %88, %89, %cst_37 {dimension_numbers = #tpu.dot_dimension_numbers<[1], [0], [0], [1], [0, 0, 1, 1], [], []>} : vector<4x16xbf16>, vector<16x64xbf16>, vector<4x64xf32> -> vector<4x64xf32>
    %c0_38 = arith.constant 0 : index
    %c0_39 = arith.constant 0 : index
    %91 = vector.load %arg9[%c0_38, %c0_39] : memref<1x64xf32, #tpu.memory_space<vmem>>, vector<1x64xf32>
    %92 = vector.broadcast %91 : vector<1x64xf32> to vector<4x64xf32>
    %93 = arith.addf %90, %92 : vector<4x64xf32>
    %cst_40 = arith.constant 5.000000e-01 : f32
    %94 = vector.broadcast %cst_40 : f32 to vector<4x64xf32>
    %95 = arith.mulf %94, %93 : vector<4x64xf32>
    %cst_41 = arith.constant 4.471500e-02 : f32
    %96 = vector.broadcast %cst_41 : f32 to vector<4x64xf32>
    %97 = arith.mulf %96, %93 : vector<4x64xf32>
    %98 = arith.mulf %97, %93 : vector<4x64xf32>
    %99 = arith.mulf %98, %93 : vector<4x64xf32>
    %100 = arith.addf %93, %99 : vector<4x64xf32>
    %cst_42 = arith.constant 0.797884583 : f32
    %101 = vector.broadcast %cst_42 : f32 to vector<4x64xf32>
    %102 = arith.mulf %101, %100 : vector<4x64xf32>
    %103 = math.tanh %102 : vector<4x64xf32>
    %cst_43 = arith.constant 1.000000e+00 : f32
    %104 = vector.broadcast %cst_43 : f32 to vector<4x64xf32>
    %105 = arith.addf %104, %103 : vector<4x64xf32>
    %106 = arith.mulf %95, %105 : vector<4x64xf32>
    %107 = arith.truncf %106 : vector<4x64xf32> to vector<4x64xbf16>
    %c0_44 = arith.constant 0 : index
    %c0_45 = arith.constant 0 : index
    %108 = vector.load %arg10[%c0_44, %c0_45] : memref<64x16xbf16, #tpu.memory_space<vmem>>, vector<64x16xbf16>
    %cst_46 = arith.constant dense<0.000000e+00> : vector<4x16xf32>
    %109 = tpu.matmul %107, %108, %cst_46 {dimension_numbers = #tpu.dot_dimension_numbers<[1], [0], [0], [1], [0, 0, 1, 1], [], []>} : vector<4x64xbf16>, vector<64x16xbf16>, vector<4x16xf32> -> vector<4x16xf32>
    %c0_47 = arith.constant 0 : index
    %c0_48 = arith.constant 0 : index
    %110 = vector.load %arg11[%c0_47, %c0_48] : memref<1x16xf32, #tpu.memory_space<vmem>>, vector<1x16xf32>
    %111 = vector.broadcast %110 : vector<1x16xf32> to vector<4x16xf32>
    %112 = arith.addf %109, %111 : vector<4x16xf32>
    %113 = arith.addf %87, %112 : vector<4x16xf32>
    %c0_49 = arith.constant 0 : index
    %c0_50 = arith.constant 0 : index
    %114 = vector.load %arg12[%c0_49, %c0_50] : memref<1x16xf32, #tpu.memory_space<vmem>>, vector<1x16xf32>
    %c0_51 = arith.constant 0 : index
    %c0_52 = arith.constant 0 : index
    %115 = vector.load %arg13[%c0_51, %c0_52] : memref<1x16xf32, #tpu.memory_space<vmem>>, vector<1x16xf32>
    %cst_53 = arith.constant dense<0.000000e+00> : vector<4xf32>
    %116 = vector.multi_reduction <add>, %113, %cst_53 [1] : vector<4x16xf32> to vector<4xf32>
    %117 = vector.shape_cast %116 : vector<4xf32> to vector<4x1xf32>
    %cst_54 = arith.constant 1.600000e+01 : f32
    %118 = vector.broadcast %cst_54 : f32 to vector<4x1xf32>
    %119 = arith.divf %117, %118 : vector<4x1xf32>
    %120 = vector.broadcast %119 : vector<4x1xf32> to vector<4x16xf32>
    %121 = arith.subf %113, %120 : vector<4x16xf32>
    %122 = arith.mulf %121, %121 : vector<4x16xf32>
    %cst_55 = arith.constant dense<0.000000e+00> : vector<4xf32>
    %123 = vector.multi_reduction <add>, %122, %cst_55 [1] : vector<4x16xf32> to vector<4xf32>
    %124 = vector.shape_cast %123 : vector<4xf32> to vector<4x1xf32>
    %cst_56 = arith.constant 1.600000e+01 : f32
    %125 = vector.broadcast %cst_56 : f32 to vector<4x1xf32>
    %126 = arith.divf %124, %125 : vector<4x1xf32>
    %cst_57 = arith.constant 9.99999974E-6 : f32
    %127 = vector.broadcast %cst_57 : f32 to vector<4x1xf32>
    %128 = arith.addf %126, %127 : vector<4x1xf32>
    %129 = math.rsqrt %128 : vector<4x1xf32>
    %130 = vector.broadcast %129 : vector<4x1xf32> to vector<4x16xf32>
    %131 = arith.mulf %121, %130 : vector<4x16xf32>
    %132 = vector.broadcast %114 : vector<1x16xf32> to vector<4x16xf32>
    %133 = arith.mulf %131, %132 : vector<4x16xf32>
    %134 = vector.broadcast %115 : vector<1x16xf32> to vector<4x16xf32>
    %135 = arith.addf %133, %134 : vector<4x16xf32>
    %136 = arith.truncf %135 : vector<4x16xf32> to vector<4x16xbf16>
    %c0_58 = arith.constant 0 : index
    %c0_59 = arith.constant 0 : index
    %c0_60 = arith.constant 0 : index
    %137 = vector.load %arg15[%c0_58, %c0_59, %c0_60] : memref<1x4x16xbf16, #tpu.memory_space<vmem>>, vector<1x4x16xbf16>
    %138 = vector.shape_cast %137 : vector<1x4x16xbf16> to vector<4x16xbf16>
    %139 = vector.shape_cast %136 : vector<4x16xbf16> to vector<1x4x16xbf16>
    tpu.vector_store %arg15[%c0_58, %c0_59, %c0_60], %139 {strides = array<i32>} : memref<1x4x16xbf16, #tpu.memory_space<vmem>>, vector<1x4x16xbf16>,
    return
  }
  func.func @transform_0(%arg0: i32) -> (i32, i32, i32) {
    %c0_i32 = arith.constant 0 : i32
    %c0_i32_0 = arith.constant 0 : i32
    %c0_i32_1 = arith.constant 0 : i32
    return %arg0, %c0_i32, %c0_i32_0 : i32, i32, i32
  }
  func.func @transform_1(%arg0: i32) -> (i32, i32) {
    %c0_i32 = arith.constant 0 : i32
    %c0_i32_0 = arith.constant 0 : i32
    %c0_i32_1 = arith.constant 0 : i32
    return %c0_i32, %c0_i32_0 : i32, i32
  }
  func.func @transform_2(%arg0: i32) -> (i32, i32) {
    %c0_i32 = arith.constant 0 : i32
    %c0_i32_0 = arith.constant 0 : i32
    %c0_i32_1 = arith.constant 0 : i32
    return %c0_i32, %c0_i32_0 : i32, i32
  }
  func.func @transform_3(%arg0: i32) -> (i32, i32) {
    %c0_i32 = arith.constant 0 : i32
    %c0_i32_0 = arith.constant 0 : i32
    %c0_i32_1 = arith.constant 0 : i32
    return %c0_i32, %c0_i32_0 : i32, i32
  }
  func.func @transform_4(%arg0: i32) -> (i32, i32) {
    %c0_i32 = arith.constant 0 : i32
    %c0_i32_0 = arith.constant 0 : i32
    %c0_i32_1 = arith.constant 0 : i32
    return %c0_i32, %c0_i32_0 : i32, i32
  }
  func.func @transform_5(%arg0: i32) -> (i32, i32) {
    %c0_i32 = arith.constant 0 : i32
    %c0_i32_0 = arith.constant 0 : i32
    %c0_i32_1 = arith.constant 0 : i32
    return %c0_i32, %c0_i32_0 : i32, i32
  }
  func.func @transform_6(%arg0: i32) -> (i32, i32) {
    %c0_i32 = arith.constant 0 : i32
    %c0_i32_0 = arith.constant 0 : i32
    %c0_i32_1 = arith.constant 0 : i32
    return %c0_i32, %c0_i32_0 : i32, i32
  }
  func.func @transform_7(%arg0: i32) -> (i32, i32) {
    %c0_i32 = arith.constant 0 : i32
    %c0_i32_0 = arith.constant 0 : i32
    %c0_i32_1 = arith.constant 0 : i32
    return %c0_i32, %c0_i32_0 : i32, i32
  }
  func.func @transform_8(%arg0: i32) -> (i32, i32) {
    %c0_i32 = arith.constant 0 : i32
    %c0_i32_0 = arith.constant 0 : i32
    %c0_i32_1 = arith.constant 0 : i32
    return %c0_i32, %c0_i32_0 : i32, i32
  }
  func.func @transform_9(%arg0: i32) -> (i32, i32) {
    %c0_i32 = arith.constant 0 : i32
    %c0_i32_0 = arith.constant 0 : i32
    %c0_i32_1 = arith.constant 0 : i32
    return %c0_i32, %c0_i32_0 : i32, i32
  }
  func.func @transform_10(%arg0: i32) -> (i32, i32) {
    %c0_i32 = arith.constant 0 : i32
    %c0_i32_0 = arith.constant 0 : i32
    %c0_i32_1 = arith.constant 0 : i32
    return %c0_i32, %c0_i32_0 : i32, i32
  }
  func.func @transform_11(%arg0: i32) -> (i32, i32) {
    %c0_i32 = arith.constant 0 : i32
    %c0_i32_0 = arith.constant 0 : i32
    %c0_i32_1 = arith.constant 0 : i32
    return %c0_i32, %c0_i32_0 : i32, i32
  }
  func.func @transform_12(%arg0: i32) -> (i32, i32) {
    %c0_i32 = arith.constant 0 : i32
    %c0_i32_0 = arith.constant 0 : i32
    %c0_i32_1 = arith.constant 0 : i32
    return %c0_i32, %c0_i32_0 : i32, i32
  }
  func.func @transform_13(%arg0: i32) -> (i32, i32, i32) {
    %c0_i32 = arith.constant 0 : i32
    %c0_i32_0 = arith.constant 0 : i32
    %c0_i32_1 = arith.constant 0 : i32
    %c0_i32_2 = arith.constant 0 : i32
    return %c0_i32, %c0_i32_0, %c0_i32_1 : i32, i32, i32
  }
  func.func @transform_14(%arg0: i32) -> (i32, i32, i32) {
    %c0_i32 = arith.constant 0 : i32
    %c0_i32_0 = arith.constant 0 : i32
    %c0_i32_1 = arith.constant 0 : i32
    return %arg0, %c0_i32, %c0_i32_0 : i32, i32, i32
  }
}

</mosaic_0001>

<bundles_post_ra>
// kernel: run.15
= control target key start
LH: loop header
LB: loop body
LE: loop exit
PB: predicated region body
PF: predicated region fallthrough
CT: control target
= control target key end

     0   :  { %s763_s18 = smov 0   ;;  %s765_s19 = smov 0   ;;  %s826_s0 = inlined_call_operand.vmem [shape: bf16[2,1,10,8], index: 0, kind: input, shape index: {}]   ;;  %s827_s1 = inlined_call_operand.vmem [shape: bf16[24,16], index: 1, kind: input, shape index: {}]   ;;  %s828_s2 = inlined_call_operand.vmem [shape: f32[1,16], index: 2, kind: input, shape index: {}]   ;;  %s829_s3 = inlined_call_operand.vmem [shape: bf16[8,16], index: 3, kind: input, shape index: {}]   ;;  %s830_s4 = inlined_call_operand.vmem [shape: f32[1,16], index: 4, kind: input, shape index: {}]   ;;  %s831_s5 = inlined_call_operand.vmem [shape: bf16[2,4,16], index: 5, kind: output, shape index: {}]  }
   0x1   :  { %s767_s20 = smov 0  }
   0x2 LB: > { %s27_s21 = sadd.s32 1, %s723_s19  ;;  %p613_p0 = scmp.ge.s32.totalorder %s727_s20, 1  ;;  %s727_s20 = sphi %s767_s20, %s15_s20   ;;  %s723_s19 = sphi %s765_s19, %s833_s19   ;;  %s719_s18 = sphi %s763_s18, %s832_s18  }
   0x3   : > { %p29_p1 = scmp.ge.s32.totalorder %s27_s21, 2  ;;  %p207_p2 = scmp.lt.s32.totalorder %s727_s20, 3 }
   0x5   : > { %s835_s21 = smov (%p29_p1, %s27_s21), 0  ;;  %p208_p3 = pnand %p613_p0, %p207_p2 }
   0x6   : > { %p241_p4 = scmp.lt.s32.totalorder (!%p208_p3), %s719_s18, 1  ;;  %v729_v0 = vmov (!%p208_p3), 0.0   ;;  %v699_v1 = vld [vmem:[%s827_s1] sm:$0xff] (!%p208_p3)   ;;  %vm262_vm0 = vcmask (!%p208_p3), 64512   ;;  %v700_v2 = vld [vmem:[%s827_s1 + $0x8] ss:$0 sps:$4 sm:$0xff] (!%p208_p3)  }
   0x7   : > { %211 = sbr.rel (%p208_p3) target bundleno = 400 (0x190), region = 40  ;;  %638 = vmatprep.subr.bf16.mxu0 (!%p208_p3), %v729_v0  ;;  %652 = vmatprep.subr.bf16.mxu1 (!%p208_p3), %v729_v0  ;;  %vm264_vm1 = vcmask (!%p208_p3), 58368   ;;  %vm307_vm2 = vcmask (!%p208_p3), 1043456   ;;  %vm730_vm3 = vmmov (!%p208_p3), 0   ;;  %s731_s30 = smov (!%p208_p3), 8   ;;  %vm282_vm4 = vcmask (!%p208_p3), 130048  }
   0x8   : > { %639 = vmatpush3.bf16.msra.mxu0 (!%p208_p3), %v699_v1  ;;  %653 = vmatpush3.bf16.msra.mxu1 (!%p208_p3), %v699_v1  ;;  %v309_v7 = vsel (!%p208_p3), %vm307_vm2, %v700_v2, 0  ;;  %s732_s6 = smov (!%p208_p3), 16   ;;  %v352_v15 = vld [vmem:[%s829_s3] sm:$0xf] (!%p208_p3)  ;;  %vm303_vm5 = vcmask (!%p208_p3), 195584   ;;  %vm527_vm6 = vcmask (!%p208_p3), 123904  }
   0x9   : > { %640 = vmatprep.subr.bf16.mxu0 (!%p208_p3), %v729_v0  ;;  %654 = vmatprep.subr.bf16.mxu1 (!%p208_p3), %v729_v0  ;;  %v363_v23 = vsel (!%p208_p3), %vm307_vm2, %v352_v15, 0  ;;  %v617_v26 = vld [vmem:[%s828_s2] ss:$0 sm:$0xff] (!%p208_p3) }
   0xa   : > { %642 = vmatprep.mubr.msk.bf16.mxu0 (!%p208_p3), %vm730_vm3, %v729_v0  ;;  %656 = vmatprep.mubr.msk.bf16.mxu1 (!%p208_p3), %vm730_vm3, %v729_v0  ;;  %v621_v55 = vld [vmem:[%s830_s4] ss:$0 sm:$0xff] (!%p208_p3) }
   0xb   : > { %v666_v56 = vadd.f32 (!%p208_p3), %v621_v55, %v621_v55 }
   0xc   : > { %641 = vmatpush3.bf16.msra.mxu0 (!%p208_p3), %v309_v7  ;;  %655 = vmatpush3.bf16.msra.mxu1 (!%p208_p3), %v309_v7 }
   0xd   : > { %646 = vmatprep.subr.bf16.mxu0 (!%p208_p3), %v729_v0  ;;  %660 = vmatprep.subr.bf16.mxu1 (!%p208_p3), %v729_v0 }
   0xe   : > { %s837_s18 = smov (!%p241_p4, %s719_s18), 1 }
   0xf   : > { %s627_s24 = sshll.u32 %s837_s18, 3  ;;  %s616_s13 = sshll.u32 %s837_s18, 1 }
  0x10   : > { %s249_s27 = scalar_lea.vmem %s826_s0, %s627_s24  ;;  %s256_s16 = scalar_lea.vmem %s831_s5, %s616_s13 }
  0x11   : > { %v258_v3 = vld [vmem:[%s249_s27] sm:$0xf]  ;;  %v259_v4 = vld [vmem:[%s249_s27 + $0x4] sm:$0x1] }
  0x12   : > { %v260_v5 = vunpack.c.l.bf16 %v258_v3  ;;  %v261_v6 = vunpack.c.l.bf16 %v259_v4 }
  0x14   : > { %263 = vst.msk [vmem:[#allocation2] sm:$0xff] %vm262_vm0, %v260_v5 }
  0x15   : > { %265 = vst.msk [vmem:[#allocation2 + $0x8] sm:$0x3] %vm264_vm1, %v261_v6 }
  0x1b   : > { %v270_v9 = vld [vmem:[#allocation2 + $0x1] ss:$2 sm:$0xf]  ;;  %v268_v13 = vld [vmem:[#allocation2] ss:$2 sm:$0xf] }
  0x1c   : > { %v272_v8 = vld [vmem:[#allocation2 + $0x2] ss:$2 sm:$0xf]  ;;  %274 = vrot.lane.b32.xlu0 %v270_v9, %s731_s30  ;;  %v416_v10 = vld [vmem:[#allocation2 + $0x3] ss:$2 sm:$0xf]  ;;  %v351_v25 = vpack.c.bf16 %v270_v9, %v270_v9 }
  0x1d   : > { %417 = vrot.lane.b32.xlu1 %v272_v8, %s731_s30  ;;  %v470_v24 = vpack.c.bf16 %v272_v8, %v272_v8 }
  0x20   : > { %278 = vrot.lane.b32.xlu0 %v272_v8, %s732_s6 }
  0x21   : > { %421 = vrot.lane.b32.xlu1 %v416_v10, %s732_s6 }
  0x8e   : > { %v275_v12 = vpop.permute.xlu0 %274 }
  0x8f   : > { %v418_v11 = vpop.permute.xlu1 %417  ;;  %v281_v16 = vsel %vm262_vm0, %v268_v13, %v275_v12 }
  0x90   : > { %v424_v14 = vsel %vm262_vm0, %v270_v9, %v418_v11 }
  0x92   : > { %v279_v18 = vpop.permute.xlu0 %278 }
  0x93   : > { %v422_v17 = vpop.permute.xlu1 %421  ;;  %v283_v20 = vsel %vm282_vm4, %v281_v16, %v279_v18 }
  0x94   : > { %v425_v19 = vsel %vm282_vm4, %v424_v14, %v422_v17  ;;  %v284_v22 = vpack.c.bf16 %v283_v20, %v283_v20 }
  0x95   : > { %v426_v21 = vpack.c.bf16 %v425_v19, %v425_v19 }
  0x96   : > { %643 = vmatmul.mubr.msk.bf16.vlgmr.msra.gmra.mrb[0].mxu0 %vm303_vm5, %v284_v22 }
  0x97   : > { %657 = vmatmul.mubr.msk.bf16.vlgmr.msra.gmra.mrb[0].mxu1 %vm303_vm5, %v426_v21  ;;  %647 = vmatpush3.bf16.msra.mxu0 %v363_v23 }
  0x98   : > { %648 = vmatprep.mubr.msk.bf16.mxu0 %vm730_vm3, %v729_v0  ;;  %661 = vmatpush3.bf16.msra.mxu1 %v363_v23 }
  0x99   : > { %662 = vmatprep.mubr.msk.bf16.mxu1 %vm730_vm3, %v729_v0 }
  0x9e   : > { %649 = vmatmul.mubr.msk.bf16.vlgmr.msra.gmra.mrb[4].mxu0 %vm262_vm0, %v351_v25 }
  0x9f   : > { %663 = vmatmul.mubr.msk.bf16.vlgmr.msra.gmra.mrb[4].mxu1 %vm262_vm0, %v470_v24 }
 0x169   : > { %v345_v27 = vpop.f32.mrb[0].mxu0 }
 0x16a   : > { %v464_v28 = vpop.f32.mrb[0].mxu1  ;;  %v346_v29 = vadd.f32 %v617_v26, %v345_v27  ;;  %v644_v31 = vpop.f32.mrb[1].mxu0 }
 0x16b   : > { %v465_v30 = vadd.f32 %v617_v26, %v464_v28  ;;  %v658_v32 = vpop.f32.mrb[1].mxu1  ;;  %v348_v33 = vpop.f32.mrb[2].mxu0 }
 0x16c   : > { %v467_v34 = vpop.f32.mrb[2].mxu1  ;;  %v406_v35 = vmul.f32 0.044715, %v346_v29  ;;  %v645_v37 = vpop.f32.mrb[3].mxu0  ;;  %v405_v60 = vmul.f32 0.5, %v346_v29 }
 0x16d   : > { %v515_v36 = vmul.f32 0.044715, %v465_v30  ;;  %v659_v38 = vpop.f32.mrb[3].mxu1  ;;  %v514_v0 = vmul.f32 0.5, %v465_v30 }
 0x16e   : > { %v407_v39 = vmul.f32 %v406_v35, %v346_v29 }
 0x16f   : > { %v516_v40 = vmul.f32 %v515_v36, %v465_v30 }
 0x170   : > { %v408_v41 = vmul.f32 %v407_v39, %v346_v29 }
 0x171   : > { %v517_v42 = vmul.f32 %v516_v40, %v465_v30  ;;  %v399_v43 = vpop.f32.mrb[4].mxu0 }
 0x172   : > { %v508_v44 = vpop.f32.mrb[4].mxu1  ;;  %v650_v45 = vpop.f32.mrb[5].mxu0  ;;  %v409_v46 = vadd.f32 %v408_v41, %v346_v29  ;;  %v667_v59 = vadd.f32 %v666_v56, %v399_v43 }
 0x173   : > { %v518_v47 = vadd.f32 %v517_v42, %v465_v30  ;;  %v664_v48 = vpop.f32.mrb[5].mxu1  ;;  %v402_v49 = vpop.f32.mrb[6].mxu0 }
 0x174   : > { %v511_v50 = vpop.f32.mrb[6].mxu1  ;;  %v651_v51 = vpop.f32.mrb[7].mxu0  ;;  %v410_v52 = vmul.f32 0.7978846, %v409_v46 }
 0x175   : > { %v519_v53 = vmul.f32 0.7978846, %v518_v47  ;;  %v665_v54 = vpop.f32.mrb[7].mxu1 }
 0x176   : > { %701 = vtanh.f32 %v410_v52 }
 0x177   : > { %703 = vtanh.f32 %v519_v53 }
 0x180   : > { %v702_v57 = vpop.eup %701 }
 0x181   : > { %v704_v58 = vpop.eup %703  ;;  %v412_v61 = vadd.f32 1.0, %v702_v57 }
 0x182   : > { %v521_v63 = vadd.f32 1.0, %v704_v58 }
 0x183   : > { %v413_v62 = vmul.f32 %v412_v61, %v405_v60 }
 0x184   : > { %v522_v2 = vmul.f32 %v521_v63, %v514_v0 }
 0x185   : > { %v668_v1 = vadd.f32 %v667_v59, %v413_v62 }
 0x187   : > { %v669_v3 = vadd.f32 %v668_v1, %v508_v44 }
 0x189   : > { %v670_v4 = vadd.f32 %v669_v3, %v522_v2 }
 0x18b   : > { %v525_v5 = vmul.f32 0.5, %v670_v4 }
 0x18d   : > { %v526_v6 = vpack.c.bf16 %v525_v5, %v525_v5 }
 0x18f   : > { %528 = vst.msk [vmem:[%s256_s16] sm:$0x3] %vm527_vm6, %v526_v6 }
 0x190 PF: > { %s15_s20 = sadd.s32 1, %s727_s20   ;;  %s832_s18 = smov %s723_s19 }
 0x191   : > { %p12_p5 = scmp.ge.s32.totalorder %s15_s20, 4   ;;  %s833_s19 = smov %s835_s21 }
 0x193   :  { %14 = sbr.rel (!%p12_p5) target bundleno = 2 (0x2), region = 73 }

// kernel: run.14
= control target key start
LH: loop header
LB: loop body
LE: loop exit
PB: predicated region body
PF: predicated region fallthrough
CT: control target
= control target key end

     0   :  { %s760_s18 = smov 0   ;;  %s762_s19 = smov 0   ;;  %s819_s0 = inlined_call_operand.vmem [shape: bf16[2,1,18,4], index: 0, kind: input, shape index: {}]   ;;  %s820_s1 = inlined_call_operand.vmem [shape: bf16[12,8], index: 1, kind: input, shape index: {}]   ;;  %s821_s2 = inlined_call_operand.vmem [shape: f32[1,8], index: 2, kind: input, shape index: {}]   ;;  %s822_s3 = inlined_call_operand.vmem [shape: bf16[4,8], index: 3, kind: input, shape index: {}]   ;;  %s823_s4 = inlined_call_operand.vmem [shape: f32[1,8], index: 4, kind: input, shape index: {}]   ;;  %s824_s5 = inlined_call_operand.vmem [shape: bf16[2,8,8], index: 5, kind: output, shape index: {}]  }
   0x1   :  { %s764_s20 = smov 0  }
   0x2 LB: > { %s27_s21 = sadd.s32 1, %s720_s19  ;;  %p612_p0 = scmp.ge.s32.totalorder %s724_s20, 1  ;;  %s724_s20 = sphi %s764_s20, %s15_s20   ;;  %s720_s19 = sphi %s762_s19, %s826_s19   ;;  %s716_s18 = sphi %s760_s18, %s825_s18  }
   0x3   : > { %p29_p1 = scmp.ge.s32.totalorder %s27_s21, 2  ;;  %p207_p2 = scmp.lt.s32.totalorder %s724_s20, 3 }
   0x5   : > { %s828_s21 = smov (%p29_p1, %s27_s21), 0  ;;  %p208_p3 = pnand %p612_p0, %p207_p2 }
   0x6   : > { %p241_p4 = scmp.lt.s32.totalorder (!%p208_p3), %s716_s18, 1  ;;  %v697_v0 = vld [vmem:[%s820_s1] sm:$0x3f] (!%p208_p3)   ;;  %vm305_vm0 = vcmask (!%p208_p3), 1045504   ;;  %v726_v1 = vmov (!%p208_p3), 0.0   ;;  %vm264_vm1 = vcmask (!%p208_p3), 31744  }
   0x7   : > { %211 = sbr.rel (%p208_p3) target bundleno = 405 (0x195), region = 40  ;;  %636 = vmatprep.subr.bf16.mxu0 (!%p208_p3), %v726_v1  ;;  %642 = vmatprep.subr.bf16.mxu1 (!%p208_p3), %v726_v1  ;;  %vm267_vm2 = vcmask (!%p208_p3), 25600   ;;  %v307_v4 = vsel (!%p208_p3), %vm305_vm0, %v697_v0, 0  ;;  %vm727_vm3 = vmmov (!%p208_p3), 0   ;;  %v350_v8 = vld [vmem:[%s822_s3] sm:$0x3] (!%p208_p3) }
   0x8   : > { %637 = vmatpush3.bf16.msra.mxu0 (!%p208_p3), %v307_v4  ;;  %638 = vmatprep.mubr.msk.bf16.mxu0 (!%p208_p3), %vm727_vm3, %v726_v1  ;;  %vm360_vm4 = vcmask (!%p208_p3), 1041408   ;;  %s728_s30 = smov (!%p208_p3), 4   ;;  %s729_s6 = smov (!%p208_p3), 8   ;;  %vm285_vm5 = vcmask (!%p208_p3), 64512   ;;  %vm301_vm6 = vcmask (!%p208_p3), 97280   ;;  %vm526_vm7 = vcmask (!%p208_p3), 60416  }
   0x9   : > { %648 = vmatprep.subr.bf16.mxu0 (!%p208_p3), %v726_v1  ;;  %644 = vmatprep.mubr.msk.bf16.mxu1 (!%p208_p3), %vm727_vm3, %v726_v1  ;;  %v362_v9 = vsel (!%p208_p3), %vm360_vm4, %v350_v8, 0  ;;  %v615_v30 = vld [vmem:[%s821_s2] ss:$0 sm:$0xff] (!%p208_p3) }
   0xa   : > { %643 = vmatpush3.bf16.msra.mxu1 (!%p208_p3), %v362_v9  ;;  %v618_v51 = vld [vmem:[%s823_s4] ss:$0 sm:$0xff] (!%p208_p3) }
   0xb   : > { %654 = vmatprep.subr.bf16.mxu1 (!%p208_p3), %v726_v1  ;;  %v660_v55 = vadd.f32 (!%p208_p3), %v618_v51, %v618_v51 }
   0xe   : > { %s830_s18 = smov (!%p241_p4, %s716_s18), 1 }
   0xf   : > { %s668_s22 = smul.u32 12, %s830_s18  ;;  %s614_s11 = sshll.u32 %s830_s18, 2 }
  0x10   : > { %s256_s14 = scalar_lea.vmem %s824_s5, %s614_s11 }
  0x11   : > { %s249_s27 = scalar_lea.vmem %s819_s0, %s668_s22 }
  0x12   : > { %v625_v2 = vld [vmem:[%s249_s27] sm:$0xff]   ;;  %v260_v3 = vld [vmem:[%s249_s27 + $0x8] sm:$0x1] }
  0x13   : > { %v626_v5 = vunpack.c.l.bf16 %v625_v2  ;;  %v627_v6 = vunpack.c.h.bf16 %v625_v2  ;;  %v263_v7 = vunpack.c.l.bf16 %v260_v3 }
  0x15   : > { %265 = vst.msk [vmem:[#allocation2] sm:$0xff] %vm264_vm1, %v626_v5  ;;  %266 = vst.msk [vmem:[#allocation2 + $0x8] sm:$0xff] %vm264_vm1, %v627_v6 }
  0x16   : > { %268 = vst.msk [vmem:[#allocation2 + $0x10] sm:$0x3] %vm267_vm2, %v263_v7 }
  0x1c   : > { %v273_v10 = vld [vmem:[#allocation2 + $0x1] ss:$2 sm:$0xff]  ;;  %v271_v16 = vld [vmem:[#allocation2] ss:$2 sm:$0xff] }
  0x1d   : > { %v275_v11 = vld [vmem:[#allocation2 + $0x2] ss:$2 sm:$0xff]  ;;  %277 = vrot.lane.b32.xlu0 %v273_v10, %s728_s30  ;;  %v349_v12 = vpack.c.bf16 %v273_v10, %v273_v10  ;;  %v415_v13 = vld [vmem:[#allocation2 + $0x3] ss:$2 sm:$0xff] }
  0x1e   : > { %416 = vrot.lane.b32.xlu1 %v275_v11, %s728_s30  ;;  %v469_v14 = vpack.c.bf16 %v275_v11, %v275_v11 }
  0x1f   : > { %645 = vmatmul.mubr.msk.bf16.vlgmr.msra.gmra.mrb[0].mxu1 %vm264_vm1, %v349_v12 }
  0x20   : > { %655 = vmatpush3.bf16.msra.mxu1 %v362_v9  ;;  %656 = vmatprep.mubr.msk.bf16.mxu1 %vm727_vm3, %v726_v1 }
  0x21   : > { %281 = vrot.lane.b32.xlu0 %v275_v11, %s729_s6 }
  0x22   : > { %420 = vrot.lane.b32.xlu1 %v415_v13, %s729_s6 }
  0x2b   : > { %657 = vmatmul.mubr.msk.bf16.vlgmr.msra.gmra.mrb[0].mxu1 %vm264_vm1, %v469_v14 }
  0x8f   : > { %v278_v15 = vpop.permute.xlu0 %277 }
  0x90   : > { %v417_v17 = vpop.permute.xlu1 %416  ;;  %v284_v18 = vsel %vm264_vm1, %v271_v16, %v278_v15 }
  0x91   : > { %v423_v22 = vsel %vm264_vm1, %v273_v10, %v417_v17 }
  0x93   : > { %v282_v19 = vpop.permute.xlu0 %281 }
  0x94   : > { %v286_v20 = vsel %vm285_vm5, %v284_v18, %v282_v19  ;;  %v421_v23 = vpop.permute.xlu1 %420 }
  0x95   : > { %v287_v21 = vpack.c.bf16 %v286_v20, %v286_v20  ;;  %v424_v24 = vsel %vm285_vm5, %v423_v22, %v421_v23 }
  0x96   : > { %v425_v25 = vpack.c.bf16 %v424_v24, %v424_v24 }
  0x97   : > { %639 = vmatmul.mubr.msk.bf16.vlgmr.msra.gmra.mrb[0].mxu0 %vm301_vm6, %v287_v21 }
  0x98   : > { %649 = vmatpush3.bf16.msra.mxu0 %v307_v4  ;;  %650 = vmatprep.mubr.msk.bf16.mxu0 %vm727_vm3, %v726_v1 }
  0x9f   : > { %651 = vmatmul.mubr.msk.bf16.vlgmr.msra.gmra.mrb[4].mxu0 %vm301_vm6, %v425_v25 }
  0xfe   : > { %v507_v26 = vpop.f32.mrb[0].mxu1 }
  0xff   : > { %v658_v27 = vpop.f32.mrb[1].mxu1 }
 0x100   : > { %v510_v28 = vpop.f32.mrb[2].mxu1 }
 0x101   : > { %v659_v29 = vpop.f32.mrb[3].mxu1 }
 0x16a   : > { %v343_v31 = vpop.f32.mrb[0].mxu0 }
 0x16b   : > { %v344_v32 = vadd.f32 %v615_v30, %v343_v31  ;;  %v640_v33 = vpop.f32.mrb[1].mxu0 }
 0x16c   : > { %v346_v34 = vpop.f32.mrb[2].mxu0 }
 0x16d   : > { %v405_v35 = vmul.f32 0.044715, %v344_v32  ;;  %v641_v36 = vpop.f32.mrb[3].mxu0  ;;  %v404_v53 = vmul.f32 0.5, %v344_v32 }
 0x16f   : > { %v406_v37 = vmul.f32 %v405_v35, %v344_v32 }
 0x171   : > { %v407_v38 = vmul.f32 %v406_v37, %v344_v32 }
 0x172   : > { %v463_v39 = vpop.f32.mrb[4].mxu0 }
 0x173   : > { %v464_v40 = vadd.f32 %v615_v30, %v463_v39  ;;  %v652_v41 = vpop.f32.mrb[5].mxu0  ;;  %v408_v42 = vadd.f32 %v407_v38, %v344_v32 }
 0x174   : > { %v466_v43 = vpop.f32.mrb[6].mxu0 }
 0x175   : > { %v514_v44 = vmul.f32 0.044715, %v464_v40  ;;  %v653_v45 = vpop.f32.mrb[7].mxu0  ;;  %v409_v46 = vmul.f32 0.7978846, %v408_v42  ;;  %v513_v60 = vmul.f32 0.5, %v464_v40 }
 0x177   : > { %v515_v47 = vmul.f32 %v514_v44, %v464_v40  ;;  %698 = vtanh.f32 %v409_v46 }
 0x179   : > { %v516_v48 = vmul.f32 %v515_v47, %v464_v40 }
 0x17b   : > { %v517_v49 = vadd.f32 %v516_v48, %v464_v40 }
 0x17d   : > { %v518_v50 = vmul.f32 0.7978846, %v517_v49 }
 0x17f   : > { %700 = vtanh.f32 %v518_v50 }
 0x181   : > { %v699_v52 = vpop.eup %698 }
 0x182   : > { %v411_v54 = vadd.f32 1.0, %v699_v52 }
 0x184   : > { %v412_v56 = vmul.f32 %v411_v54, %v404_v53 }
 0x186   : > { %v661_v57 = vadd.f32 %v660_v55, %v412_v56 }
 0x188   : > { %v662_v58 = vadd.f32 %v661_v57, %v507_v26 }
 0x189   : > { %v701_v59 = vpop.eup %700 }
 0x18a   : > { %v520_v61 = vadd.f32 1.0, %v701_v59 }
 0x18c   : > { %v521_v62 = vmul.f32 %v520_v61, %v513_v60 }
 0x18e   : > { %v663_v63 = vadd.f32 %v662_v58, %v521_v62 }
 0x190   : > { %v524_v0 = vmul.f32 0.5, %v663_v63 }
 0x192   : > { %v525_v1 = vpack.c.bf16 %v524_v0, %v524_v0 }
 0x194   : > { %527 = vst.msk [vmem:[%s256_s14] sm:$0xf] %vm526_vm7, %v525_v1 }
 0x195 PF: > { %s15_s20 = sadd.s32 1, %s724_s20   ;;  %s825_s18 = smov %s720_s19 }
 0x196   : > { %p12_p5 = scmp.ge.s32.totalorder %s15_s20, 4   ;;  %s826_s19 = smov %s828_s21 }
 0x198   :  { %14 = sbr.rel (!%p12_p5) target bundleno = 2 (0x2), region = 73 }

// kernel: run.10
= control target key start
LH: loop header
LB: loop body
LE: loop exit
PB: predicated region body
PF: predicated region fallthrough
CT: control target
= control target key end

     0   :  { %s3567_s18 = smov 0   ;;  %s3569_s19 = smov 0   ;;  %s5015_s0 = inlined_call_operand.vmem [shape: bf16[2,1,402,4], index: 0, kind: input, shape index: {}]   ;;  %s5016_s1 = inlined_call_operand.vmem [shape: bf16[12,6], index: 1, kind: input, shape index: {}]   ;;  %s5017_s2 = inlined_call_operand.vmem [shape: f32[1,6], index: 2, kind: input, shape index: {}]   ;;  %s5018_s3 = inlined_call_operand.vmem [shape: bf16[4,6], index: 3, kind: input, shape index: {}]   ;;  %s5019_s4 = inlined_call_operand.vmem [shape: f32[1,6], index: 4, kind: input, shape index: {}]   ;;  %s5020_s5 = inlined_call_operand.vmem [shape: bf16[2,200,6], index: 5, kind: output, shape index: {}]  }
   0x1   :  { %s3571_s20 = smov 0  }
   0x2 LB: > { %s27_s21 = sadd.s32 1, %s3527_s19  ;;  %p2622_p0 = scmp.ge.s32.totalorder %s3531_s20, 1  ;;  %s3531_s20 = sphi %s3571_s20, %s15_s20   ;;  %s3527_s19 = sphi %s3569_s19, %s5080_s19   ;;  %s3523_s18 = sphi %s3567_s18, %s5079_s18  }
   0x3   : > { %p29_p1 = scmp.ge.s32.totalorder %s27_s21, 2  ;;  %p207_p2 = scmp.lt.s32.totalorder %s3531_s20, 3 }
   0x5   : > { %s5082_s21 = smov (%p29_p1, %s27_s21), 0  ;;  %p208_p3 = pnand %p2622_p0, %p207_p2 }
   0x7   : > { %211 = sbr.rel (%p208_p3) target bundleno = 604 (0x25c), region = 40 }
   0xe   : > { %p243_p4 = scmp.lt.s32.totalorder %s3523_s18, 1  ;;  %vm365_vm0 = vcmask 31744   ;;  %s3533_s26 = smov 4   ;;  %vm416_vm1 = vcmask 25600   ;;  %vm886_vm2 = vcmask 1045504   ;;  %vm3536_vm3 = vmmov 0  }
   0xf   : > { %s3534_s27 = smov 8   ;;  %vm1085_vm4 = vcmask 1041408   ;;  %vm794_vm5 = vcmask 64512   ;;  %vm846_vm6 = vcmask 97280   ;;  %vm2502_vm7 = vcmask 44032  }
  0x10   : > { %s5084_s18 = smov (!%p243_p4, %s3523_s18), 1 }
  0x11   : > { %s3128_s22 = smul.u32 204, %s5084_s18 }
  0x12   : > { %s3129_s11 = smul.u32 100, %s5084_s18 }
  0x13   : > { %s3591_s25 = scalar_lea.vmem %s5015_s0, %s3128_s22 }
  0x14   : > { %v2733_v0 = vld [vmem:[%s3591_s25] sm:$0xff]   ;;  %v2832_v1 = vld [vmem:[%s3591_s25 + $0x8] sm:$0xff]   ;;  %v2833_v2 = vld [vmem:[%s3591_s25 + $0x10] sm:$0xff]   ;;  %s4727_s14 = scalar_lea.vmem %s5020_s5, %s3129_s11 }
  0x15   : > { %v2734_v3 = vunpack.c.l.bf16 %v2733_v0  ;;  %v2735_v4 = vunpack.c.h.bf16 %v2733_v0  ;;  %v2738_v5 = vunpack.c.l.bf16 %v2832_v1  ;;  %v2739_v6 = vunpack.c.h.bf16 %v2832_v1  ;;  %v2834_v7 = vld [vmem:[%s3591_s25 + $0x18] sm:$0xff]   ;;  %v2835_v8 = vld [vmem:[%s3591_s25 + $0x20] sm:$0xff]   ;;  %v2836_v9 = vld [vmem:[%s3591_s25 + $0x28] sm:$0xff]  }
  0x16   : > { %v2742_v10 = vunpack.c.l.bf16 %v2833_v2  ;;  %v2743_v11 = vunpack.c.h.bf16 %v2833_v2  ;;  %v2746_v12 = vunpack.c.l.bf16 %v2834_v7  ;;  %v2747_v13 = vunpack.c.h.bf16 %v2834_v7  ;;  %v2837_v14 = vld [vmem:[%s3591_s25 + $0x30] sm:$0xff]   ;;  %v2838_v15 = vld [vmem:[%s3591_s25 + $0x38] sm:$0xff]   ;;  %v2839_v16 = vld [vmem:[%s3591_s25 + $0x40] sm:$0xff]  }
  0x17   : > { %366 = vst.msk [vmem:[#allocation2] sm:$0xff] %vm365_vm0, %v2734_v3  ;;  %367 = vst.msk [vmem:[#allocation2 + $0x8] sm:$0xff] %vm365_vm0, %v2735_v4  ;;  %v2750_v17 = vunpack.c.l.bf16 %v2835_v8  ;;  %v2751_v18 = vunpack.c.h.bf16 %v2835_v8  ;;  %v2754_v19 = vunpack.c.l.bf16 %v2836_v9  ;;  %v2755_v20 = vunpack.c.h.bf16 %v2836_v9  ;;  %v2840_v21 = vld [vmem:[%s3591_s25 + $0x48] sm:$0xff]   ;;  %v2841_v22 = vld [vmem:[%s3591_s25 + $0x50] sm:$0xff]  }
  0x18   : > { %368 = vst.msk [vmem:[#allocation2 + $0x10] sm:$0xff] %vm365_vm0, %v2738_v5  ;;  %369 = vst.msk [vmem:[#allocation2 + $0x18] sm:$0xff] %vm365_vm0, %v2739_v6  ;;  %v2842_v23 = vld [vmem:[%s3591_s25 + $0x58] sm:$0xff]   ;;  %v2758_v24 = vunpack.c.l.bf16 %v2837_v14  ;;  %v2759_v25 = vunpack.c.h.bf16 %v2837_v14  ;;  %v2762_v26 = vunpack.c.l.bf16 %v2838_v15  ;;  %v2763_v27 = vunpack.c.h.bf16 %v2838_v15  ;;  %v2843_v28 = vld [vmem:[%s3591_s25 + $0x60] sm:$0xff]  }
  0x19   : > { %370 = vst.msk [vmem:[#allocation2 + $0x20] sm:$0xff] %vm365_vm0, %v2742_v10  ;;  %371 = vst.msk [vmem:[#allocation2 + $0x28] sm:$0xff] %vm365_vm0, %v2743_v11  ;;  %v2844_v29 = vld [vmem:[%s3591_s25 + $0x68] sm:$0xff]   ;;  %v2766_v30 = vunpack.c.l.bf16 %v2839_v16  ;;  %v2767_v31 = vunpack.c.h.bf16 %v2839_v16  ;;  %v2770_v32 = vunpack.c.l.bf16 %v2840_v21  ;;  %v2771_v33 = vunpack.c.h.bf16 %v2840_v21  ;;  %v2845_v34 = vld [vmem:[%s3591_s25 + $0x70] sm:$0xff]  }
  0x1a   : > { %372 = vst.msk [vmem:[#allocation2 + $0x30] sm:$0xff] %vm365_vm0, %v2746_v12  ;;  %373 = vst.msk [vmem:[#allocation2 + $0x38] sm:$0xff] %vm365_vm0, %v2747_v13  ;;  %v2846_v35 = vld [vmem:[%s3591_s25 + $0x78] sm:$0xff]   ;;  %v2774_v36 = vunpack.c.l.bf16 %v2841_v22  ;;  %v2775_v37 = vunpack.c.h.bf16 %v2841_v22  ;;  %v2778_v38 = vunpack.c.l.bf16 %v2842_v23  ;;  %v2779_v39 = vunpack.c.h.bf16 %v2842_v23  ;;  %v2847_v40 = vld [vmem:[%s3591_s25 + $0x80] sm:$0xff]  }
  0x1b   : > { %374 = vst.msk [vmem:[#allocation2 + $0x40] sm:$0xff] %vm365_vm0, %v2750_v17  ;;  %375 = vst.msk [vmem:[#allocation2 + $0x48] sm:$0xff] %vm365_vm0, %v2751_v18  ;;  %v2848_v41 = vld [vmem:[%s3591_s25 + $0x88] sm:$0xff]   ;;  %v2782_v42 = vunpack.c.l.bf16 %v2843_v28  ;;  %v2783_v43 = vunpack.c.h.bf16 %v2843_v28  ;;  %v2786_v44 = vunpack.c.l.bf16 %v2844_v29  ;;  %v2787_v45 = vunpack.c.h.bf16 %v2844_v29  ;;  %v2849_v46 = vld [vmem:[%s3591_s25 + $0x90] sm:$0xff]  }
  0x1c   : > { %376 = vst.msk [vmem:[#allocation2 + $0x50] sm:$0xff] %vm365_vm0, %v2754_v19  ;;  %377 = vst.msk [vmem:[#allocation2 + $0x58] sm:$0xff] %vm365_vm0, %v2755_v20  ;;  %v2850_v47 = vld [vmem:[%s3591_s25 + $0x98] sm:$0xff]   ;;  %v2790_v48 = vunpack.c.l.bf16 %v2845_v34  ;;  %v2791_v49 = vunpack.c.h.bf16 %v2845_v34  ;;  %v2794_v50 = vunpack.c.l.bf16 %v2846_v35  ;;  %v2795_v51 = vunpack.c.h.bf16 %v2846_v35  ;;  %v2851_v52 = vld [vmem:[%s3591_s25 + $0xa0] sm:$0xff]  }
  0x1d   : > { %378 = vst.msk [vmem:[#allocation2 + $0x60] sm:$0xff] %vm365_vm0, %v2758_v24  ;;  %379 = vst.msk [vmem:[#allocation2 + $0x68] sm:$0xff] %vm365_vm0, %v2759_v25  ;;  %v2798_v53 = vunpack.c.l.bf16 %v2847_v40  ;;  %v2799_v54 = vunpack.c.h.bf16 %v2847_v40  ;;  %v2802_v55 = vunpack.c.l.bf16 %v2848_v41  ;;  %v2803_v56 = vunpack.c.h.bf16 %v2848_v41  ;;  %v2852_v57 = vld [vmem:[%s3591_s25 + $0xa8] sm:$0xff]   ;;  %v2853_v58 = vld [vmem:[%s3591_s25 + $0xb0] sm:$0xff]  }
  0x1e   : > { %380 = vst.msk [vmem:[#allocation2 + $0x70] sm:$0xff] %vm365_vm0, %v2762_v26  ;;  %381 = vst.msk [vmem:[#allocation2 + $0x78] sm:$0xff] %vm365_vm0, %v2763_v27  ;;  %v2854_v59 = vld [vmem:[%s3591_s25 + $0xb8] sm:$0xff]   ;;  %v3645_v60 = vld [vmem:[#allocation2 + $0x1] ss:$2 sm:$0xff]  ;;  %v2806_v63 = vunpack.c.l.bf16 %v2849_v46  ;;  %v2807_v0 = vunpack.c.h.bf16 %v2849_v46  ;;  %v2810_v1 = vunpack.c.l.bf16 %v2850_v47  ;;  %v2811_v2 = vunpack.c.h.bf16 %v2850_v47 }
  0x1f   : > { %382 = vst.msk [vmem:[#allocation2 + $0x80] sm:$0xff] %vm365_vm0, %v2766_v30  ;;  %383 = vst.msk [vmem:[#allocation2 + $0x88] sm:$0xff] %vm365_vm0, %v2767_v31  ;;  %v3647_v61 = vld [vmem:[#allocation2 + $0x11] ss:$2 sm:$0xff]  ;;  %v3649_v62 = vld [vmem:[#allocation2 + $0x2] ss:$2 sm:$0xff]  ;;  %v2814_v7 = vunpack.c.l.bf16 %v2851_v52  ;;  %v2815_v8 = vunpack.c.h.bf16 %v2851_v52  ;;  %v2818_v15 = vunpack.c.l.bf16 %v2852_v57  ;;  %v2819_v16 = vunpack.c.h.bf16 %v2852_v57 }
  0x20   : > { %384 = vst.msk [vmem:[#allocation2 + $0x90] sm:$0xff] %vm365_vm0, %v2770_v32  ;;  %385 = vst.msk [vmem:[#allocation2 + $0x98] sm:$0xff] %vm365_vm0, %v2771_v33  ;;  %v3158_v3 = vpack.i.bf16 %v3647_v61, %v3645_v60  ;;  %v3657_v4 = vld [vmem:[#allocation2 + $0x12] ss:$2 sm:$0xff]  ;;  %v3659_v5 = vld [vmem:[#allocation2 + $0x21] ss:$2 sm:$0xff]  ;;  %v2822_v17 = vunpack.c.l.bf16 %v2853_v58  ;;  %v2823_v22 = vunpack.c.h.bf16 %v2853_v58  ;;  %v2826_v23 = vunpack.c.l.bf16 %v2854_v59 }
  0x21   : > { %386 = vst.msk [vmem:[#allocation2 + $0xa0] sm:$0xff] %vm365_vm0, %v2774_v36  ;;  %387 = vst.msk [vmem:[#allocation2 + $0xa8] sm:$0xff] %vm365_vm0, %v2775_v37  ;;  %v3661_v6 = vld [vmem:[#allocation2 + $0x31] ss:$2 sm:$0xff]  ;;  %v3671_v11 = vld [vmem:[#allocation2 + $0x22] ss:$2 sm:$0xff]  ;;  %v3683_v14 = vpack.i.bf16 %v3657_v4, %v3649_v62  ;;  %v2827_v26 = vunpack.c.h.bf16 %v2854_v59 }
  0x22   : > { %388 = vst.msk [vmem:[#allocation2 + $0xb0] sm:$0xff] %vm365_vm0, %v2778_v38  ;;  %389 = vst.msk [vmem:[#allocation2 + $0xb8] sm:$0xff] %vm365_vm0, %v2779_v39  ;;  %v3168_v10 = vpack.i.bf16 %v3661_v6, %v3659_v5  ;;  %v3673_v12 = vld [vmem:[#allocation2 + $0x32] ss:$2 sm:$0xff]  ;;  %3159 = vrot.lane.b32.xlu0 %v3158_v3, %s3533_s26  ;;  %v313_v18 = vld [vmem:[%s3591_s25 + $0xc8] sm:$0x1] }
  0x23   : > { %390 = vst.msk [vmem:[#allocation2 + $0xc0] sm:$0xff] %vm365_vm0, %v2782_v42  ;;  %391 = vst.msk [vmem:[#allocation2 + $0xc8] sm:$0xff] %vm365_vm0, %v2783_v43  ;;  %v2855_v13 = vld [vmem:[%s3591_s25 + $0xc0] sm:$0xff]   ;;  %v3691_v19 = vpack.i.bf16 %v3673_v12, %v3671_v11  ;;  %v3695_v21 = vld [vmem:[#allocation2 + $0x51] ss:$2 sm:$0xff]  ;;  %v364_v29 = vunpack.c.l.bf16 %v313_v18 }
  0x24   : > { %392 = vst.msk [vmem:[#allocation2 + $0xd0] sm:$0xff] %vm365_vm0, %v2786_v44  ;;  %393 = vst.msk [vmem:[#allocation2 + $0xd8] sm:$0xff] %vm365_vm0, %v2787_v45  ;;  %3169 = vrot.lane.b32.xlu1 %v3168_v10, %s3533_s26  ;;  %v3693_v20 = vld [vmem:[#allocation2 + $0x41] ss:$2 sm:$0xff]  ;;  %v3697_v24 = vld [vmem:[#allocation2 + $0x42] ss:$2 sm:$0xff]  ;;  %v2830_v27 = vunpack.c.l.bf16 %v2855_v13  ;;  %v2831_v28 = vunpack.c.h.bf16 %v2855_v13 }
  0x25   : > { %5033 = vst [vmem:[#allocation3_spill] sm:$0xff] %v3645_v60  ;;  %5034 = vst [vmem:[#allocation4_spill] sm:$0xff] %v3647_v61  ;;  %v3699_v25 = vld [vmem:[#allocation2 + $0x52] ss:$2 sm:$0xff]  ;;  %v3178_v30 = vpack.i.bf16 %v3695_v21, %v3693_v20  ;;  %v3719_v32 = vld [vmem:[#allocation2 + $0x61] ss:$2 sm:$0xff] }
  0x26   : > { %394 = vst.msk [vmem:[#allocation2 + $0xe0] sm:$0xff] %vm365_vm0, %v2790_v48  ;;  %395 = vst.msk [vmem:[#allocation2 + $0xe8] sm:$0xff] %vm365_vm0, %v2791_v49  ;;  %3164 = vrot.lane.b32.xlu0 %v3683_v14, %s3534_s27  ;;  %v3717_v31 = vpack.i.bf16 %v3699_v25, %v3697_v24  ;;  %v3721_v33 = vld [vmem:[#allocation2 + $0x71] ss:$2 sm:$0xff]  ;;  %v3723_v34 = vld [vmem:[#allocation2 + $0x62] ss:$2 sm:$0xff] }
  0x27   : > { %396 = vst.msk [vmem:[#allocation2 + $0xf0] sm:$0xff] %vm365_vm0, %v2794_v50  ;;  %397 = vst.msk [vmem:[#allocation2 + $0xf8] sm:$0xff] %vm365_vm0, %v2795_v51  ;;  %v3725_v35 = vld [vmem:[#allocation2 + $0x72] ss:$2 sm:$0xff]  ;;  %v3188_v36 = vpack.i.bf16 %v3721_v33, %v3719_v32  ;;  %v3736_v38 = vld [vmem:[#allocation2 + $0x81] ss:$2 sm:$0xff] }
  0x28   : > { %5035 = vst [vmem:[#allocation5_spill] sm:$0xff] %v3659_v5  ;;  %5036 = vst [vmem:[#allocation6_spill] sm:$0xff] %v3661_v6  ;;  %3174 = vrot.lane.b32.xlu1 %v3691_v19, %s3534_s27  ;;  %v3734_v37 = vpack.i.bf16 %v3725_v35, %v3723_v34  ;;  %v3738_v39 = vld [vmem:[#allocation2 + $0x91] ss:$2 sm:$0xff]  ;;  %v3740_v40 = vld [vmem:[#allocation2 + $0x82] ss:$2 sm:$0xff] }
  0x29   : > { %398 = vst.msk [vmem:[#allocation2 + $0x100] sm:$0xff] %vm365_vm0, %v2798_v53  ;;  %399 = vst.msk [vmem:[#allocation2 + $0x108] sm:$0xff] %vm365_vm0, %v2799_v54  ;;  %v3742_v41 = vld [vmem:[#allocation2 + $0x92] ss:$2 sm:$0xff]  ;;  %v3198_v42 = vpack.i.bf16 %v3738_v39, %v3736_v38  ;;  %v3753_v44 = vld [vmem:[#allocation2 + $0xa1] ss:$2 sm:$0xff] }
  0x2a   : > { %400 = vst.msk [vmem:[#allocation2 + $0x110] sm:$0xff] %vm365_vm0, %v2802_v55  ;;  %401 = vst.msk [vmem:[#allocation2 + $0x118] sm:$0xff] %vm365_vm0, %v2803_v56  ;;  %3179 = vrot.lane.b32.xlu0 %v3178_v30, %s3533_s26  ;;  %v3751_v43 = vpack.i.bf16 %v3742_v41, %v3740_v40  ;;  %v3755_v45 = vld [vmem:[#allocation2 + $0xb1] ss:$2 sm:$0xff]  ;;  %v3398_v46 = vld [vmem:[%s5016_s1] sm:$0x3f]  }
  0x2b   : > { %402 = vst.msk [vmem:[#allocation2 + $0x120] sm:$0xff] %vm365_vm0, %v2806_v63  ;;  %403 = vst.msk [vmem:[#allocation2 + $0x128] sm:$0xff] %vm365_vm0, %v2807_v0  ;;  %v3760_v47 = vld [vmem:[#allocation2 + $0xa2] ss:$2 sm:$0xff]  ;;  %v3762_v48 = vld [vmem:[#allocation2 + $0xb2] ss:$2 sm:$0xff]  ;;  %v3208_v49 = vpack.i.bf16 %v3755_v45, %v3753_v44 }
  0x2c   : > { %404 = vst.msk [vmem:[#allocation2 + $0x130] sm:$0xff] %vm365_vm0, %v2810_v1  ;;  %405 = vst.msk [vmem:[#allocation2 + $0x138] sm:$0xff] %vm365_vm0, %v2811_v2  ;;  %3184 = vrot.lane.b32.xlu1 %v3717_v31, %s3534_s27  ;;  %v5021_v50 = vmov 0.0   ;;  %v3772_v51 = vpack.i.bf16 %v3762_v48, %v3760_v47  ;;  %v3774_v52 = vld [vmem:[#allocation2 + $0xc1] ss:$2 sm:$0xff]  ;;  %v3778_v54 = vsel %vm886_vm2, %v3398_v46, 0  ;;  %v1026_v1 = vpack.c.bf16 %v3647_v61, %v3645_v60 }
  0x2d   : > { %406 = vst.msk [vmem:[#allocation2 + $0x140] sm:$0xff] %vm365_vm0, %v2814_v7  ;;  %407 = vst.msk [vmem:[#allocation2 + $0x148] sm:$0xff] %vm365_vm0, %v2815_v8  ;;  %2912 = vmatprep.subr.bf16.mxu0 %v5021_v50  ;;  %v3776_v53 = vld [vmem:[#allocation2 + $0xd1] ss:$2 sm:$0xff]  ;;  %2914 = vmatprep.mubr.msk.bf16.mxu0 %vm3536_vm3, %v5021_v50  ;;  %v3782_v55 = vld [vmem:[#allocation2 + $0xc2] ss:$2 sm:$0xff]  ;;  %v1029_v60 = vpack.c.bf16 %v3721_v33, %v3719_v32 }
  0x2e   : > { %5037 = vst [vmem:[#allocation7_spill] sm:$0xff] %v3693_v20  ;;  %5038 = vst [vmem:[#allocation8_spill] sm:$0xff] %v3695_v21  ;;  %3189 = vrot.lane.b32.xlu0 %v3188_v36, %s3533_s26  ;;  %v3784_v56 = vld [vmem:[#allocation2 + $0xd2] ss:$2 sm:$0xff]  ;;  %2913 = vmatpush3.bf16.msra.mxu0 %v3778_v54  ;;  %v3218_v57 = vpack.i.bf16 %v3776_v53, %v3774_v52  ;;  %v3803_v63 = vld [vmem:[#allocation2 + $0xe1] ss:$2 sm:$0xff] }
  0x2f   : > { %408 = vst.msk [vmem:[#allocation2 + $0x150] sm:$0xff] %vm365_vm0, %v2818_v15  ;;  %409 = vst.msk [vmem:[#allocation2 + $0x158] sm:$0xff] %vm365_vm0, %v2819_v16  ;;  %2966 = vmatprep.subr.bf16.mxu1 %v5021_v50  ;;  %3020 = vmatprep.subr.bf16.mxu0 %v5021_v50  ;;  %v1039_v58 = vld [vmem:[%s5018_s3] sm:$0x3]  ;;  %v3801_v59 = vpack.i.bf16 %v3784_v56, %v3782_v55  ;;  %v3805_v0 = vld [vmem:[#allocation2 + $0xf1] ss:$2 sm:$0xff] }
  0x30   : > { %410 = vst.msk [vmem:[#allocation2 + $0x160] sm:$0xff] %vm365_vm0, %v2822_v17  ;;  %411 = vst.msk [vmem:[#allocation2 + $0x168] sm:$0xff] %vm365_vm0, %v2823_v22  ;;  %3194 = vrot.lane.b32.xlu1 %v3734_v37, %s3534_s27  ;;  %2968 = vmatprep.mubr.msk.bf16.mxu1 %vm3536_vm3, %v5021_v50  ;;  %v3809_v2 = vld [vmem:[#allocation2 + $0xe2] ss:$2 sm:$0xff]  ;;  %v3811_v3 = vld [vmem:[#allocation2 + $0xf2] ss:$2 sm:$0xff]  ;;  %v3228_v8 = vpack.i.bf16 %v3805_v0, %v3803_v63 }
  0x31   : > { %412 = vst.msk [vmem:[#allocation2 + $0x170] sm:$0xff] %vm365_vm0, %v2826_v23  ;;  %413 = vst.msk [vmem:[#allocation2 + $0x178] sm:$0xff] %vm365_vm0, %v2827_v26  ;;  %v1087_v7 = vsel %vm1085_vm4, %v1039_v58, 0  ;;  %v3821_v10 = vpack.i.bf16 %v3811_v3, %v3809_v2  ;;  %v3823_v13 = vld [vmem:[#allocation2 + $0x101] ss:$2 sm:$0xff] }
  0x32   : > { %414 = vst.msk [vmem:[#allocation2 + $0x180] sm:$0xff] %vm365_vm0, %v2830_v27  ;;  %415 = vst.msk [vmem:[#allocation2 + $0x188] sm:$0xff] %vm365_vm0, %v2831_v28  ;;  %3199 = vrot.lane.b32.xlu0 %v3198_v42, %s3533_s26  ;;  %2967 = vmatpush3.bf16.msra.mxu1 %v1087_v7  ;;  %v3825_v15 = vld [vmem:[#allocation2 + $0x111] ss:$2 sm:$0xff]  ;;  %v3827_v16 = vld [vmem:[#allocation2 + $0x102] ss:$2 sm:$0xff]  ;;  %v1027_v27 = vpack.c.bf16 %v3661_v6, %v3659_v5 }
  0x33   : > { %5039 = vst [vmem:[#allocation9_spill] sm:$0xff] %v3719_v32  ;;  %5040 = vst [vmem:[#allocation10_spill] sm:$0xff] %v3721_v33  ;;  %3074 = vmatprep.subr.bf16.mxu1 %v5021_v50  ;;  %v3829_v17 = vld [vmem:[#allocation2 + $0x112] ss:$2 sm:$0xff]  ;;  %v3238_v18 = vpack.i.bf16 %v3825_v15, %v3823_v13  ;;  %v3843_v23 = vld [vmem:[#allocation2 + $0x121] ss:$2 sm:$0xff] }
  0x34   : > { %417 = vst.msk [vmem:[#allocation2 + $0x190] sm:$0x3] %vm416_vm1, %v364_v29  ;;  %3204 = vrot.lane.b32.xlu1 %v3751_v43, %s3534_s27  ;;  %v3841_v22 = vpack.i.bf16 %v3829_v17, %v3827_v16  ;;  %v3845_v26 = vld [vmem:[#allocation2 + $0x131] ss:$2 sm:$0xff]  ;;  %v3849_v28 = vld [vmem:[#allocation2 + $0x122] ss:$2 sm:$0xff] }
  0x35   : > { %2969 = vmatmul.mubr.msk.bf16.vlgmr.msra.gmra.mrb[0].mxu1 %vm365_vm0, %v1026_v1  ;;  %v3851_v29 = vld [vmem:[#allocation2 + $0x132] ss:$2 sm:$0xff]  ;;  %v3248_v30 = vpack.i.bf16 %v3845_v26, %v3843_v23  ;;  %v3862_v42 = vld [vmem:[#allocation2 + $0x141] ss:$2 sm:$0xff]  ;;  %v5043_v5 = vmov 0.0  }
  0x36   : > { %3209 = vrot.lane.b32.xlu0 %v3208_v49, %s3533_s26  ;;  %3075 = vmatpush3.bf16.msra.mxu1 %v1087_v7  ;;  %v3860_v36 = vpack.i.bf16 %v3851_v29, %v3849_v28  ;;  %v3864_v46 = vld [vmem:[#allocation2 + $0x151] ss:$2 sm:$0xff]  ;;  %v3866_v49 = vld [vmem:[#allocation2 + $0x142] ss:$2 sm:$0xff] }
  0x37   : > { %2972 = vmatprep.mubr.msk.bf16.mxu1 %vm3536_vm3, %v5021_v50  ;;  %v3258_v58 = vpack.i.bf16 %v3864_v46, %v3862_v42  ;;  %v3882_v7 = vld [vmem:[#allocation2 + $0x161] ss:$2 sm:$0xff] }
  0x38   : > { %3214 = vrot.lane.b32.xlu1 %v3772_v51, %s3534_s27  ;;  %v1478_v6 = vld [vmem:[#allocation2 + $0x13] ss:$2 sm:$0xff]  ;;  %v1484_v33 = vld [vmem:[#allocation2 + $0x43] ss:$2 sm:$0xff] }
  0x39   : > { %v1482_v61 = vld [vmem:[#allocation2 + $0x33] ss:$2 sm:$0xff] }
  0x3a   : > { %3219 = vrot.lane.b32.xlu0 %v3218_v57, %s3533_s26  ;;  %v3868_v57 = vld [vmem:[#allocation2 + $0x152] ss:$2 sm:$0xff] }
  0x3b   : > { %v3880_v1 = vpack.i.bf16 %v3868_v57, %v3866_v49 }
  0x3c   : > { %3224 = vrot.lane.b32.xlu1 %v3801_v59, %s3534_s27 }
  0x3d   : > { %2973 = vmatmul.mubr.msk.bf16.gmra.mrb[4].mxu1 %vm365_vm0, %v1027_v27  ;;  %v3888_v27 = vld [vmem:[#allocation2 + $0x172] ss:$2 sm:$0xff] }
  0x3e   : > { %3229 = vrot.lane.b32.xlu0 %v3228_v8, %s3533_s26  ;;  %2976 = vmatprep.mubr.msk.bf16.mxu1 %vm3536_vm3, %v5021_v50  ;;  %v3884_v8 = vld [vmem:[#allocation2 + $0x171] ss:$2 sm:$0xff]  ;;  %5042 = vst [vmem:[#allocation12_spill] sm:$0xff] %v3888_v27 }
  0x3f   : > { %v3268_v9 = vpack.i.bf16 %v3884_v8, %v3882_v7 }
  0x40   : > { %3234 = vrot.lane.b32.xlu1 %v3821_v10, %s3534_s27 }
  0x42   : > { %3239 = vrot.lane.b32.xlu0 %v3238_v18, %s3533_s26  ;;  %v3886_v18 = vld [vmem:[#allocation2 + $0x162] ss:$2 sm:$0xff] }
  0x43   : > { %5041 = vst [vmem:[#allocation11_spill] sm:$0xff] %v3886_v18  ;;  %v3899_v50 = vpack.i.bf16 %v3888_v27, %v3886_v18  ;;  %v1486_v27 = vld [vmem:[#allocation2 + $0x53] ss:$2 sm:$0xff]  ;;  %v1030_v18 = vpack.c.bf16 %v3738_v39, %v3736_v38 }
  0x44   : > { %3244 = vrot.lane.b32.xlu1 %v3841_v22, %s3534_s27 }
  0x46   : > { %3249 = vrot.lane.b32.xlu0 %v3248_v30, %s3533_s26  ;;  %v1028_v30 = vpack.c.bf16 %v3695_v21, %v3693_v20  ;;  %v3909_v20 = vld [vmem:[#allocation2 + $0x182] ss:$2 sm:$0xff]  ;;  %v1476_v21 = vld [vmem:[#allocation2 + $0x3] ss:$2 sm:$0xff] }
  0x48   : > { %3254 = vrot.lane.b32.xlu1 %v3860_v36, %s3534_s27  ;;  %2977 = vmatmul.mubr.msk.bf16.gmra.mrb[8].mxu1 %vm365_vm0, %v1028_v30  ;;  %v3283_v30 = vpack.i.bf16 %v1478_v6, %v1476_v21  ;;  %v1488_v6 = vld [vmem:[#allocation2 + $0x63] ss:$2 sm:$0xff]  ;;  %v1490_v21 = vld [vmem:[#allocation2 + $0x73] ss:$2 sm:$0xff] }
  0x49   : > { %2980 = vmatprep.mubr.msk.bf16.mxu1 %vm3536_vm3, %v5043_v5 }
  0x4a   : > { %3259 = vrot.lane.b32.xlu0 %v3258_v58, %s3533_s26  ;;  %v3907_v58 = vld [vmem:[#allocation2 + $0x181] ss:$2 sm:$0xff] }
  0x4c   : > { %3264 = vrot.lane.b32.xlu1 %v3880_v1, %s3534_s27 }
  0x4e   : > { %3269 = vrot.lane.b32.xlu0 %v3268_v9, %s3533_s26  ;;  %v1480_v9 = vld [vmem:[#allocation2 + $0x23] ss:$2 sm:$0xff] }
  0x4f   : > { %v3293_v32 = vpack.i.bf16 %v1482_v61, %v1480_v9  ;;  %v3313_v61 = vpack.i.bf16 %v1490_v21, %v1488_v6  ;;  %v1502_v9 = vld [vmem:[#allocation2 + $0xd3] ss:$2 sm:$0xff]  ;;  %v1504_v6 = vld [vmem:[#allocation2 + $0xe3] ss:$2 sm:$0xff] }
  0x50   : > { %3274 = vrot.lane.b32.xlu1 %v3899_v50, %s3534_s27  ;;  %2981 = vmatmul.mubr.msk.bf16.gmra.mrb[12].mxu1 %vm365_vm0, %v1029_v60  ;;  %v3303_v60 = vpack.i.bf16 %v1486_v27, %v1484_v33  ;;  %v1496_v33 = vld [vmem:[#allocation2 + $0xa3] ss:$2 sm:$0xff]  ;;  %v1506_v21 = vld [vmem:[#allocation2 + $0xf3] ss:$2 sm:$0xff] }
  0x51   : > { %2984 = vmatprep.mubr.msk.bf16.mxu1 %vm3536_vm3, %v5043_v5  ;;  %v1500_v27 = vld [vmem:[#allocation2 + $0xc3] ss:$2 sm:$0xff] }
  0x52   : > { %642 = vrot.lane.b32.xlu0 %v3907_v58, %s3533_s26 }
  0x54   : > { %742 = vrot.lane.b32.xlu1 %v3909_v20, %s3534_s27 }
  0x56   : > { %3279 = vrot.lane.b32.xlu0 %v3683_v14, %s3533_s26  ;;  %v1492_v14 = vld [vmem:[#allocation2 + $0x83] ss:$2 sm:$0xff] }
  0x58   : > { %3284 = vrot.lane.b32.xlu1 %v3283_v30, %s3534_s27  ;;  %2985 = vmatmul.mubr.msk.bf16.gmra.mrb[16].mxu1 %vm365_vm0, %v1030_v18  ;;  %v1494_v30 = vld [vmem:[#allocation2 + $0x93] ss:$2 sm:$0xff] }
  0x59   : > { %2988 = vmatprep.mubr.msk.bf16.mxu1 %vm3536_vm3, %v5043_v5  ;;  %v1498_v18 = vld [vmem:[#allocation2 + $0xb3] ss:$2 sm:$0xff] }
  0x5a   : > { %3289 = vrot.lane.b32.xlu0 %v3691_v19, %s3533_s26  ;;  %v1031_v19 = vpack.c.bf16 %v3755_v45, %v3753_v44 }
  0x5c   : > { %3294 = vrot.lane.b32.xlu1 %v3293_v32, %s3534_s27  ;;  %v3323_v32 = vpack.i.bf16 %v1494_v30, %v1492_v14  ;;  %v1510_v14 = vld [vmem:[#allocation2 + $0x113] ss:$2 sm:$0xff] }
  0x5e   : > { %3299 = vrot.lane.b32.xlu0 %v3717_v31, %s3533_s26  ;;  %v3333_v31 = vpack.i.bf16 %v1498_v18, %v1496_v33  ;;  %v1516_v33 = vld [vmem:[#allocation2 + $0x143] ss:$2 sm:$0xff]  ;;  %v1518_v18 = vld [vmem:[#allocation2 + $0x153] ss:$2 sm:$0xff] }
  0x60   : > { %3304 = vrot.lane.b32.xlu1 %v3303_v60, %s3534_s27  ;;  %2989 = vmatmul.mubr.msk.bf16.gmra.mrb[20].mxu1 %vm365_vm0, %v1031_v19  ;;  %v3343_v60 = vpack.i.bf16 %v1502_v9, %v1500_v27  ;;  %v1512_v19 = vld [vmem:[#allocation2 + $0x123] ss:$2 sm:$0xff]  ;;  %v1522_v9 = vld [vmem:[#allocation2 + $0x173] ss:$2 sm:$0xff] }
  0x61   : > { %2992 = vmatprep.mubr.msk.bf16.mxu1 %vm3536_vm3, %v5043_v5  ;;  %v1520_v27 = vld [vmem:[#allocation2 + $0x163] ss:$2 sm:$0xff] }
  0x62   : > { %3309 = vrot.lane.b32.xlu0 %v3734_v37, %s3533_s26  ;;  %v1032_v37 = vpack.c.bf16 %v3776_v53, %v3774_v52 }
  0x64   : > { %3314 = vrot.lane.b32.xlu1 %v3313_v61, %s3534_s27  ;;  %v1508_v61 = vld [vmem:[#allocation2 + $0x103] ss:$2 sm:$0xff] }
  0x65   : > { %v3363_v30 = vpack.i.bf16 %v1510_v14, %v1508_v61 }
  0x66   : > { %3319 = vrot.lane.b32.xlu0 %v3751_v43, %s3533_s26  ;;  %v3353_v43 = vpack.i.bf16 %v1506_v21, %v1504_v6  ;;  %v422_v6 = vld [vmem:[#allocation2 + $0x10] ss:$2 sm:$0xff]  ;;  %v420_v21 = vld [vmem:[#allocation2] ss:$2 sm:$0xff] }
  0x68   : > { %3324 = vrot.lane.b32.xlu1 %v3323_v32, %s3534_s27  ;;  %2993 = vmatmul.mubr.msk.bf16.gmra.mrb[24].mxu1 %vm365_vm0, %v1032_v37  ;;  %v1514_v32 = vld [vmem:[#allocation2 + $0x133] ss:$2 sm:$0xff] }
  0x69   : > { %2996 = vmatprep.mubr.msk.bf16.mxu1 %vm3536_vm3, %v5043_v5 }
  0x6a   : > { %3329 = vrot.lane.b32.xlu0 %v3772_v51, %s3533_s26  ;;  %v1033_v51 = vpack.c.bf16 %v3805_v0, %v3803_v63 }
  0x6c   : > { %3334 = vrot.lane.b32.xlu1 %v3333_v31, %s3534_s27  ;;  %v3383_v31 = vpack.i.bf16 %v1518_v18, %v1516_v33  ;;  %v424_v33 = vld [vmem:[#allocation2 + $0x20] ss:$2 sm:$0xff] }
  0x6e   : > { %3339 = vrot.lane.b32.xlu0 %v3801_v59, %s3533_s26  ;;  %v3373_v59 = vpack.i.bf16 %v1514_v32, %v1512_v19 }
  0x70   : > { %3344 = vrot.lane.b32.xlu1 %v3343_v60, %s3534_s27  ;;  %2997 = vmatmul.mubr.msk.bf16.gmra.mrb[28].mxu1 %vm365_vm0, %v1033_v51 }
  0x71   : > { %3000 = vmatprep.mubr.msk.bf16.mxu1 %vm3536_vm3, %v5043_v5 }
  0x72   : > { %3349 = vrot.lane.b32.xlu0 %v3821_v10, %s3533_s26  ;;  %v1034_v10 = vpack.c.bf16 %v3825_v15, %v3823_v13  ;;  %v1035_v13 = vpack.c.bf16 %v3845_v26, %v3843_v23 }
  0x74   : > { %3354 = vrot.lane.b32.xlu1 %v3353_v43, %s3534_s27 }
  0x76   : > { %3359 = vrot.lane.b32.xlu0 %v3841_v22, %s3533_s26  ;;  %v3393_v22 = vpack.i.bf16 %v1522_v9, %v1520_v27 }
  0x78   : > { %3364 = vrot.lane.b32.xlu1 %v3363_v30, %s3534_s27  ;;  %3001 = vmatmul.mubr.msk.bf16.gmra.mrb[32].mxu1 %vm365_vm0, %v1034_v10 }
  0x79   : > { %3004 = vmatprep.mubr.msk.bf16.mxu1 %vm3536_vm3, %v5043_v5 }
  0x7a   : > { %3369 = vrot.lane.b32.xlu0 %v3860_v36, %s3533_s26  ;;  %v1524_v36 = vld [vmem:[#allocation2 + $0x183] ss:$2 sm:$0xff] }
  0x7c   : > { %3374 = vrot.lane.b32.xlu1 %v3373_v59, %s3534_s27  ;;  %v426_v59 = vld [vmem:[#allocation2 + $0x30] ss:$2 sm:$0xff] }
  0x7e   : > { %3379 = vrot.lane.b32.xlu0 %v3880_v1, %s3533_s26  ;;  %v1036_v1 = vpack.c.bf16 %v3864_v46, %v3862_v42  ;;  %v1038_v42 = vpack.c.bf16 %v3907_v58, %v3907_v58 }
  0x80   : > { %3384 = vrot.lane.b32.xlu1 %v3383_v31, %s3534_s27  ;;  %3005 = vmatmul.mubr.msk.bf16.gmra.mrb[36].mxu1 %vm365_vm0, %v1035_v13 }
  0x81   : > { %3008 = vmatprep.mubr.msk.bf16.mxu1 %vm3536_vm3, %v5043_v5 }
  0x82   : > { %3389 = vrot.lane.b32.xlu0 %v3899_v50, %s3533_s26  ;;  %v1037_v50 = vpack.c.bf16 %v3884_v8, %v3882_v7 }
  0x84   : > { %3394 = vrot.lane.b32.xlu1 %v3393_v22, %s3534_s27 }
  0x86   : > { %1573 = vrot.lane.b32.xlu0 %v3909_v20, %s3533_s26 }
  0x88   : > { %1673 = vrot.lane.b32.xlu1 %v1524_v36, %s3534_s27  ;;  %3009 = vmatmul.mubr.msk.bf16.gmra.mrb[40].mxu1 %vm365_vm0, %v1036_v1 }
  0x89   : > { %3012 = vmatprep.mubr.msk.bf16.mxu1 %vm3536_vm3, %v5043_v5 }
  0x90   : > { %3013 = vmatmul.mubr.msk.bf16.gmra.mrb[44].mxu1 %vm365_vm0, %v1037_v50 }
  0x91   : > { %3016 = vmatprep.mubr.msk.bf16.mxu1 %vm3536_vm3, %v5043_v5 }
  0x94   : > { %v3160_v23 = vpop.permute.xlu0 %3159 }
  0x95   : > { %v3162_v37 = vunpack.i.h.bf16 %v3160_v23  ;;  %v3161_v60 = vunpack.i.l.bf16 %v3160_v23  ;;  %v428_v23 = vld [vmem:[#allocation2 + $0x40] ss:$2 sm:$0xff] }
  0x96   : > { %v3170_v26 = vpop.permute.xlu1 %3169 }
  0x97   : > { %v770_v7 = vsel %vm365_vm0, %v422_v6, %v3162_v37  ;;  %v769_v8 = vsel %vm365_vm0, %v420_v21, %v3161_v60  ;;  %v3172_v14 = vunpack.i.h.bf16 %v3170_v26  ;;  %v3171_v51 = vunpack.i.l.bf16 %v3170_v26  ;;  %v430_v26 = vld [vmem:[#allocation2 + $0x50] ss:$2 sm:$0xff] }
  0x98   : > { %v3165_v46 = vpop.permute.xlu0 %3164  ;;  %3017 = vmatmul.mubr.msk.bf16.gmra.mrb[48].mxu1 %vm365_vm0, %v1038_v42 }
  0x99   : > { %v3167_v43 = vunpack.i.h.bf16 %v3165_v46  ;;  %v3166_v61 = vunpack.i.l.bf16 %v3165_v46  ;;  %3076 = vmatprep.mubr.msk.bf16.mxu1 %vm3536_vm3, %v5043_v5  ;;  %v772_v27 = vsel %vm365_vm0, %v426_v59, %v3172_v14  ;;  %v771_v9 = vsel %vm365_vm0, %v424_v33, %v3171_v51  ;;  %v434_v51 = vld [vmem:[#allocation2 + $0x70] ss:$2 sm:$0xff] }
  0x9a   : > { %v3175_v30 = vpop.permute.xlu1 %3174 }
  0x9b   : > { %v795_v19 = vsel %vm794_vm5, %v769_v8, %v3166_v61  ;;  %v796_v32 = vsel %vm794_vm5, %v770_v7, %v3167_v43  ;;  %v3177_v58 = vunpack.i.h.bf16 %v3175_v30  ;;  %v3176_v10 = vunpack.i.l.bf16 %v3175_v30 }
  0x9c   : > { %v820_v18 = vpack.c.bf16 %v796_v32, %v795_v19  ;;  %v3180_v31 = vpop.permute.xlu0 %3179 }
  0x9d   : > { %v3182_v22 = vunpack.i.h.bf16 %v3180_v31  ;;  %v3181_v13 = vunpack.i.l.bf16 %v3180_v31  ;;  %v797_v1 = vsel %vm794_vm5, %v771_v9, %v3176_v10  ;;  %v798_v50 = vsel %vm794_vm5, %v772_v27, %v3177_v58  ;;  %v436_v9 = vld [vmem:[#allocation2 + $0x80] ss:$2 sm:$0xff] }
  0x9e   : > { %2915 = vmatmul.mubr.msk.bf16.vlgmr.msra.gmra.mrb[0].mxu0 %vm846_vm6, %v820_v18  ;;  %v3185_v36 = vpop.permute.xlu1 %3184  ;;  %v821_v6 = vpack.c.bf16 %v798_v50, %v797_v1  ;;  %v1940_v27 = vpack.c.bf16 %v3699_v25, %v3697_v24 }
  0x9f   : > { %3021 = vmatpush3.bf16.msra.mxu0 %v3778_v54  ;;  %2918 = vmatprep.mubr.msk.bf16.mxu0 %vm3536_vm3, %v5043_v5  ;;  %v3187_v37 = vunpack.i.h.bf16 %v3185_v36  ;;  %v3186_v60 = vunpack.i.l.bf16 %v3185_v36  ;;  %v774_v21 = vsel %vm365_vm0, %v430_v26, %v3182_v22  ;;  %v773_v42 = vsel %vm365_vm0, %v428_v23, %v3181_v13  ;;  %v438_v22 = vld [vmem:[#allocation2 + $0x90] ss:$2 sm:$0xff] }
  0xa0   : > { %v5044_v54 = vpack.c.bf16 %v3657_v4, %v3649_v62  ;;  %v3190_v46 = vpop.permute.xlu0 %3189  ;;  %v1939_v62 = vpack.c.bf16 %v3673_v12, %v3671_v11  ;;  %v432_v4 = vld [vmem:[#allocation2 + $0x60] ss:$2 sm:$0xff] }
  0xa1   : > { %v799_v43 = vsel %vm794_vm5, %v773_v42, %v3186_v60  ;;  %v800_v61 = vsel %vm794_vm5, %v774_v21, %v3187_v37  ;;  %v3192_v7 = vunpack.i.h.bf16 %v3190_v46  ;;  %v3191_v8 = vunpack.i.l.bf16 %v3190_v46  ;;  %v440_v42 = vld [vmem:[#allocation2 + $0xa0] ss:$2 sm:$0xff] }
  0xa2   : > { %3077 = vmatmul.mubr.msk.bf16.vlgmr.msra.gmra.mrb[52].mxu1 %vm365_vm0, %v5044_v54  ;;  %v3195_v14 = vpop.permute.xlu1 %3194  ;;  %v822_v30 = vpack.c.bf16 %v800_v61, %v799_v43  ;;  %v1941_v21 = vpack.c.bf16 %v3725_v35, %v3723_v34  ;;  %v442_v54 = vld [vmem:[#allocation2 + $0xb0] ss:$2 sm:$0xff] }
  0xa3   : > { %3080 = vmatprep.mubr.msk.bf16.mxu1 %vm3536_vm3, %v5043_v5  ;;  %v3197_v19 = vunpack.i.h.bf16 %v3195_v14  ;;  %v3196_v32 = vunpack.i.l.bf16 %v3195_v14  ;;  %v776_v59 = vsel %vm365_vm0, %v434_v51, %v3192_v7  ;;  %v775_v33 = vsel %vm365_vm0, %v432_v4, %v3191_v8 }
  0xa4   : > { %v3200_v18 = vpop.permute.xlu0 %3199 }
  0xa5   : > { %v801_v58 = vsel %vm794_vm5, %v775_v33, %v3196_v32  ;;  %v802_v11 = vsel %vm794_vm5, %v776_v59, %v3197_v19  ;;  %v3202_v12 = vunpack.i.h.bf16 %v3200_v18  ;;  %v3201_v10 = vunpack.i.l.bf16 %v3200_v18  ;;  %v444_v19 = vld [vmem:[#allocation2 + $0xc0] ss:$2 sm:$0xff]  ;;  %v446_v32 = vld [vmem:[#allocation2 + $0xd0] ss:$2 sm:$0xff] }
  0xa6   : > { %2919 = vmatmul.mubr.msk.bf16.gmra.mrb[4].mxu0 %vm846_vm6, %v821_v6  ;;  %v3205_v31 = vpop.permute.xlu1 %3204  ;;  %v823_v13 = vpack.c.bf16 %v802_v11, %v801_v58 }
  0xa7   : > { %2922 = vmatprep.mubr.msk.bf16.mxu0 %vm3536_vm3, %v5043_v5  ;;  %v3207_v36 = vunpack.i.h.bf16 %v3205_v31  ;;  %v3206_v1 = vunpack.i.l.bf16 %v3205_v31  ;;  %v778_v50 = vsel %vm365_vm0, %v438_v22, %v3202_v12  ;;  %v777_v23 = vsel %vm365_vm0, %v436_v9, %v3201_v10  ;;  %v448_v22 = vld [vmem:[#allocation2 + $0xe0] ss:$2 sm:$0xff] }
  0xa8   : > { %v3210_v26 = vpop.permute.xlu0 %3209  ;;  %v1943_v9 = vpack.c.bf16 %v3762_v48, %v3760_v47 }
  0xa9   : > { %v803_v37 = vsel %vm794_vm5, %v777_v23, %v3206_v1  ;;  %v804_v24 = vsel %vm794_vm5, %v778_v50, %v3207_v36  ;;  %v3212_v25 = vunpack.i.h.bf16 %v3210_v26  ;;  %v3211_v60 = vunpack.i.l.bf16 %v3210_v26 }
  0xaa   : > { %3081 = vmatmul.mubr.msk.bf16.gmra.mrb[56].mxu1 %vm365_vm0, %v1939_v62  ;;  %v3215_v6 = vpop.permute.xlu1 %3214  ;;  %v824_v46 = vpack.c.bf16 %v804_v24, %v803_v37 }
  0xab   : > { %3084 = vmatprep.mubr.msk.bf16.mxu1 %vm3536_vm3, %v5043_v5  ;;  %v3217_v43 = vunpack.i.h.bf16 %v3215_v6  ;;  %v3216_v61 = vunpack.i.l.bf16 %v3215_v6  ;;  %v780_v7 = vsel %vm365_vm0, %v442_v54, %v3212_v25  ;;  %v779_v8 = vsel %vm365_vm0, %v440_v42, %v3211_v60  ;;  %v454_v42 = vld [vmem:[#allocation2 + $0x110] ss:$2 sm:$0xff] }
  0xac   : > { %v3220_v14 = vpop.permute.xlu0 %3219  ;;  %v1944_v6 = vpack.c.bf16 %v3784_v56, %v3782_v55 }
  0xad   : > { %v805_v62 = vsel %vm794_vm5, %v779_v8, %v3216_v61  ;;  %v806_v34 = vsel %vm794_vm5, %v780_v7, %v3217_v43  ;;  %v3222_v35 = vunpack.i.h.bf16 %v3220_v14  ;;  %v3221_v4 = vunpack.i.l.bf16 %v3220_v14 }
  0xae   : > { %2923 = vmatmul.mubr.msk.bf16.gmra.mrb[8].mxu0 %vm846_vm6, %v822_v30  ;;  %v3225_v51 = vpop.permute.xlu1 %3224  ;;  %v1942_v30 = vpack.c.bf16 %v3742_v41, %v3740_v40  ;;  %v825_v59 = vpack.c.bf16 %v806_v34, %v805_v62 }
  0xaf   : > { %2926 = vmatprep.mubr.msk.bf16.mxu0 %vm3536_vm3, %v5043_v5  ;;  %v3227_v33 = vunpack.i.h.bf16 %v3225_v51  ;;  %v3226_v18 = vunpack.i.l.bf16 %v3225_v51  ;;  %v782_v58 = vsel %vm365_vm0, %v446_v32, %v3222_v35  ;;  %v781_v11 = vsel %vm365_vm0, %v444_v19, %v3221_v4  ;;  %v456_v4 = vld [vmem:[#allocation2 + $0x120] ss:$2 sm:$0xff]  ;;  %v458_v51 = vld [vmem:[#allocation2 + $0x130] ss:$2 sm:$0xff] }
  0xb0   : > { %v3230_v12 = vpop.permute.xlu0 %3229  ;;  %v1945_v35 = vpack.c.bf16 %v3811_v3, %v3809_v2 }
  0xb1   : > { %v807_v10 = vsel %vm794_vm5, %v781_v11, %v3226_v18  ;;  %v808_v40 = vsel %vm794_vm5, %v782_v58, %v3227_v33  ;;  %v3232_v41 = vunpack.i.h.bf16 %v3230_v12  ;;  %v3231_v31 = vunpack.i.l.bf16 %v3230_v12 }
  0xb2   : > { %3085 = vmatmul.mubr.msk.bf16.gmra.mrb[60].mxu1 %vm365_vm0, %v1940_v27  ;;  %v3235_v27 = vpop.permute.xlu1 %3234  ;;  %v826_v36 = vpack.c.bf16 %v808_v40, %v807_v10  ;;  %v1946_v10 = vpack.c.bf16 %v3829_v17, %v3827_v16  ;;  %v460_v40 = vld [vmem:[#allocation2 + $0x140] ss:$2 sm:$0xff] }
  0xb3   : > { %3088 = vmatprep.mubr.msk.bf16.mxu1 %vm3536_vm3, %v5043_v5  ;;  %v3237_v1 = vunpack.i.h.bf16 %v3235_v27  ;;  %v3236_v50 = vunpack.i.l.bf16 %v3235_v27  ;;  %v783_v26 = vsel %vm365_vm0, %v448_v22, %v3231_v31 }
  0xb4   : > { %v3240_v37 = vpop.permute.xlu0 %3239 }
  0xb5   : > { %v809_v24 = vsel %vm794_vm5, %v783_v26, %v3236_v50  ;;  %v3242_v48 = vunpack.i.h.bf16 %v3240_v37  ;;  %v3241_v25 = vunpack.i.l.bf16 %v3240_v37  ;;  %v1947_v26 = vpack.c.bf16 %v3851_v29, %v3849_v28  ;;  %v464_v37 = vld [vmem:[#allocation2 + $0x160] ss:$2 sm:$0xff] }
  0xb6   : > { %2927 = vmatmul.mubr.msk.bf16.gmra.mrb[12].mxu0 %vm846_vm6, %v823_v13  ;;  %v450_v13 = vld [vmem:[#allocation2 + $0xf0] ss:$2 sm:$0xff]  ;;  %v3245_v60 = vpop.permute.xlu1 %3244  ;;  %v1948_v29 = vpack.c.bf16 %v3868_v57, %v3866_v49 }
  0xb7   : > { %2930 = vmatprep.mubr.msk.bf16.mxu0 %vm3536_vm3, %v5043_v5  ;;  %v784_v23 = vsel %vm365_vm0, %v450_v13, %v3232_v41  ;;  %v3246_v43 = vunpack.i.l.bf16 %v3245_v60  ;;  %v786_v61 = vsel %vm365_vm0, %v454_v42, %v3242_v48  ;;  %v462_v41 = vld [vmem:[#allocation2 + $0x150] ss:$2 sm:$0xff]  ;;  %v468_v42 = vld [vmem:[#allocation2 + $0x180] ss:$2 sm:$0xff] }
  0xb8   : > { %v810_v47 = vsel %vm794_vm5, %v784_v23, %v3237_v1  ;;  %v3250_v8 = vpop.permute.xlu0 %3249 }
  0xb9   : > { %v827_v54 = vpack.c.bf16 %v810_v47, %v809_v24  ;;  %v3252_v56 = vunpack.i.h.bf16 %v3250_v8  ;;  %v3251_v62 = vunpack.i.l.bf16 %v3250_v8  ;;  %v466_v24 = vld [vmem:[#allocation2 + $0x170] ss:$2 sm:$0xff] }
  0xba   : > { %3089 = vmatmul.mubr.msk.bf16.gmra.mrb[64].mxu1 %vm365_vm0, %v1941_v21  ;;  %v452_v21 = vld [vmem:[#allocation2 + $0x100] ss:$2 sm:$0xff]  ;;  %v3255_v34 = vpop.permute.xlu1 %3254 }
  0xbb   : > { %3092 = vmatprep.mubr.msk.bf16.mxu1 %vm3536_vm3, %v5043_v5  ;;  %v785_v7 = vsel %vm365_vm0, %v452_v21, %v3241_v25  ;;  %v3257_v19 = vunpack.i.h.bf16 %v3255_v34  ;;  %v3256_v32 = vunpack.i.l.bf16 %v3255_v34  ;;  %v787_v33 = vsel %vm365_vm0, %v456_v4, %v3251_v62 }
  0xbc   : > { %v811_v14 = vsel %vm794_vm5, %v785_v7, %v3246_v43  ;;  %v3260_v18 = vpop.permute.xlu0 %3259 }
  0xbd   : > { %v813_v58 = vsel %vm794_vm5, %v787_v33, %v3256_v32  ;;  %v3262_v3 = vunpack.i.h.bf16 %v3260_v18  ;;  %v3261_v11 = vunpack.i.l.bf16 %v3260_v18 }
  0xbe   : > { %2931 = vmatmul.mubr.msk.bf16.gmra.mrb[16].mxu0 %vm846_vm6, %v824_v46  ;;  %v3247_v46 = vunpack.i.h.bf16 %v3245_v60  ;;  %v3265_v12 = vpop.permute.xlu1 %3264 }
  0xbf   : > { %2934 = vmatprep.mubr.msk.bf16.mxu0 %vm3536_vm3, %v5043_v5  ;;  %v3267_v27 = vunpack.i.h.bf16 %v3265_v12  ;;  %v790_v22 = vsel %vm365_vm0, %v462_v41, %v3262_v3  ;;  %v789_v13 = vsel %vm365_vm0, %v460_v40, %v3261_v11  ;;  %v5049_v41 = vld [vmem:[#allocation6_spill] sm:$0xff] }
  0xc0   : > { %v812_v55 = vsel %vm794_vm5, %v786_v61, %v3247_v46 }
  0xc1   : > { %v816_v16 = vsel %vm794_vm5, %v790_v22, %v3267_v27  ;;  %v5050_v27 = vld [vmem:[#allocation5_spill] sm:$0xff] }
  0xc2   : > { %3093 = vmatmul.mubr.msk.bf16.gmra.mrb[68].mxu1 %vm365_vm0, %v1942_v30  ;;  %v828_v30 = vpack.c.bf16 %v812_v55, %v811_v14  ;;  %v3275_v23 = vpop.permute.xlu1 %3274  ;;  %v5045_v55 = vld [vmem:[#allocation11_spill] sm:$0xff] }
  0xc3   : > { %3096 = vmatprep.mubr.msk.bf16.mxu1 %vm3536_vm3, %v5043_v5  ;;  %v3277_v48 = vunpack.i.h.bf16 %v3275_v23  ;;  %v3276_v25 = vunpack.i.l.bf16 %v3275_v23 }
  0xc6   : > { %2935 = vmatmul.mubr.msk.bf16.gmra.mrb[20].mxu0 %vm846_vm6, %v825_v59  ;;  %v788_v59 = vsel %vm365_vm0, %v458_v51, %v3252_v56  ;;  %v743_v61 = vpop.permute.xlu1 %742  ;;  %v5046_v56 = vld [vmem:[#allocation12_spill] sm:$0xff] }
  0xc7   : > { %2938 = vmatprep.mubr.msk.bf16.mxu0 %vm3536_vm3, %v5043_v5  ;;  %v814_v2 = vsel %vm794_vm5, %v788_v59, %v3257_v19  ;;  %v1949_v62 = vpack.c.bf16 %v5046_v56, %v5045_v55  ;;  %v5047_v51 = vld [vmem:[#allocation4_spill] sm:$0xff]  ;;  %v5048_v19 = vld [vmem:[#allocation3_spill] sm:$0xff] }
  0xc8   : > { %v829_v31 = vpack.c.bf16 %v814_v2, %v813_v58  ;;  %v1950_v58 = vpack.c.bf16 %v3909_v20, %v3909_v20 }
  0xca   : > { %3097 = vmatmul.mubr.msk.bf16.gmra.mrb[72].mxu1 %vm365_vm0, %v1943_v9  ;;  %v3266_v9 = vunpack.i.l.bf16 %v3265_v12  ;;  %v3285_v14 = vpop.permute.xlu1 %3284 }
  0xcb   : > { %3100 = vmatprep.mubr.msk.bf16.mxu1 %vm3536_vm3, %v5043_v5  ;;  %v3286_v4 = vunpack.i.l.bf16 %v3285_v14 }
  0xcc   : > { %v815_v1 = vsel %vm794_vm5, %v789_v13, %v3266_v9 }
  0xcd   : > { %v830_v47 = vpack.c.bf16 %v816_v16, %v815_v1 }
  0xce   : > { %2939 = vmatmul.mubr.msk.bf16.gmra.mrb[24].mxu0 %vm846_vm6, %v826_v36  ;;  %v3270_v36 = vpop.permute.xlu0 %3269  ;;  %v3295_v11 = vpop.permute.xlu1 %3294 }
  0xcf   : > { %2942 = vmatprep.mubr.msk.bf16.mxu0 %vm3536_vm3, %v5043_v5  ;;  %v3272_v17 = vunpack.i.h.bf16 %v3270_v36  ;;  %v3271_v50 = vunpack.i.l.bf16 %v3270_v36  ;;  %v3296_v40 = vunpack.i.l.bf16 %v3295_v11 }
  0xd1   : > { %v792_v60 = vsel %vm365_vm0, %v466_v24, %v3272_v17  ;;  %v5052_v24 = vld [vmem:[#allocation7_spill] sm:$0xff] }
  0xd2   : > { %3101 = vmatmul.mubr.msk.bf16.gmra.mrb[76].mxu1 %vm365_vm0, %v1944_v6  ;;  %v791_v6 = vsel %vm365_vm0, %v464_v37, %v3271_v50  ;;  %v818_v28 = vsel %vm794_vm5, %v792_v60, %v3277_v48  ;;  %v3305_v16 = vpop.permute.xlu1 %3304 }
  0xd3   : > { %3104 = vmatprep.mubr.msk.bf16.mxu1 %vm3536_vm3, %v5043_v5  ;;  %v817_v21 = vsel %vm794_vm5, %v791_v6, %v3276_v25  ;;  %v3307_v50 = vunpack.i.h.bf16 %v3305_v16  ;;  %v3306_v23 = vunpack.i.l.bf16 %v3305_v16 }
  0xd4   : > { %v831_v46 = vpack.c.bf16 %v818_v28, %v817_v21 }
  0xd6   : > { %2943 = vmatmul.mubr.msk.bf16.gmra.mrb[28].mxu0 %vm846_vm6, %v827_v54  ;;  %v643_v54 = vpop.permute.xlu0 %642 }
  0xd7   : > { %2946 = vmatprep.mubr.msk.bf16.mxu0 %vm3536_vm3, %v5043_v5  ;;  %v793_v43 = vsel %vm365_vm0, %v468_v42, %v643_v54 }
  0xd8   : > { %v819_v8 = vsel %vm794_vm5, %v793_v43, %v743_v61 }
  0xd9   : > { %v832_v34 = vpack.c.bf16 %v819_v8, %v819_v8  ;;  %v5053_v8 = vld [vmem:[#allocation10_spill] sm:$0xff] }
  0xda   : > { %3105 = vmatmul.mubr.msk.bf16.gmra.mrb[80].mxu1 %vm365_vm0, %v1945_v35  ;;  %v3280_v7 = vpop.permute.xlu0 %3279  ;;  %v3287_v35 = vunpack.i.h.bf16 %v3285_v14 }
  0xdb   : > { %3108 = vmatprep.mubr.msk.bf16.mxu1 %vm3536_vm3, %v5043_v5  ;;  %v3282_v49 = vunpack.i.h.bf16 %v3280_v7  ;;  %v3281_v57 = vunpack.i.l.bf16 %v3280_v7 }
  0xdd   : > { %v1700_v32 = vsel %vm365_vm0, %v5048_v19, %v3281_v57  ;;  %v5054_v57 = vld [vmem:[#allocation9_spill] sm:$0xff] }
  0xde   : > { %2947 = vmatmul.mubr.msk.bf16.gmra.mrb[32].mxu0 %vm846_vm6, %v828_v30  ;;  %v1701_v30 = vsel %vm365_vm0, %v5047_v51, %v3282_v49  ;;  %v3290_v59 = vpop.permute.xlu0 %3289  ;;  %v1725_v33 = vsel %vm794_vm5, %v1700_v32, %v3286_v4 }
  0xdf   : > { %2950 = vmatprep.mubr.msk.bf16.mxu0 %vm3536_vm3, %v5043_v5  ;;  %v1726_v18 = vsel %vm794_vm5, %v1701_v30, %v3287_v35  ;;  %v3292_v2 = vunpack.i.h.bf16 %v3290_v59  ;;  %v3291_v3 = vunpack.i.l.bf16 %v3290_v59 }
  0xe0   : > { %v1750_v12 = vpack.c.bf16 %v1726_v18, %v1725_v33 }
  0xe1   : > { %v1702_v9 = vsel %vm365_vm0, %v5050_v27, %v3291_v3 }
  0xe2   : > { %3109 = vmatmul.mubr.msk.bf16.gmra.mrb[84].mxu1 %vm365_vm0, %v1946_v10  ;;  %v3297_v10 = vunpack.i.h.bf16 %v3295_v11  ;;  %v3300_v22 = vpop.permute.xlu0 %3299  ;;  %v1727_v13 = vsel %vm794_vm5, %v1702_v9, %v3296_v40 }
  0xe3   : > { %3112 = vmatprep.mubr.msk.bf16.mxu1 %vm3536_vm3, %v5043_v5  ;;  %v3302_v36 = vunpack.i.h.bf16 %v3300_v22  ;;  %v3301_v1 = vunpack.i.l.bf16 %v3300_v22 }
  0xe6   : > { %2951 = vmatmul.mubr.msk.bf16.gmra.mrb[36].mxu0 %vm846_vm6, %v829_v31  ;;  %v1703_v31 = vsel %vm365_vm0, %v5049_v41, %v3292_v2  ;;  %v3310_v48 = vpop.permute.xlu0 %3309 }
  0xe7   : > { %2954 = vmatprep.mubr.msk.bf16.mxu0 %vm3536_vm3, %v5043_v5  ;;  %v1728_v20 = vsel %vm794_vm5, %v1703_v31, %v3297_v10  ;;  %v3312_v21 = vunpack.i.h.bf16 %v3310_v48  ;;  %v3311_v28 = vunpack.i.l.bf16 %v3310_v48 }
  0xe8   : > { %v1751_v17 = vpack.c.bf16 %v1728_v20, %v1727_v13 }
  0xe9   : > { %v1707_v49 = vsel %vm365_vm0, %v5053_v8, %v3312_v21  ;;  %v1706_v14 = vsel %vm365_vm0, %v5054_v57, %v3311_v28 }
  0xea   : > { %3113 = vmatmul.mubr.msk.bf16.gmra.mrb[88].mxu1 %vm365_vm0, %v1947_v26  ;;  %v5051_v26 = vld [vmem:[#allocation8_spill] sm:$0xff]  ;;  %v3320_v55 = vpop.permute.xlu0 %3319 }
  0xeb   : > { %3116 = vmatprep.mubr.msk.bf16.mxu1 %vm3536_vm3, %v5043_v5  ;;  %v1705_v37 = vsel %vm365_vm0, %v5051_v26, %v3302_v36  ;;  %v3322_v35 = vunpack.i.h.bf16 %v3320_v55  ;;  %v3321_v4 = vunpack.i.l.bf16 %v3320_v55 }
  0xec   : > { %v1730_v60 = vsel %vm794_vm5, %v1705_v37, %v3307_v50 }
  0xed   : > { %v1708_v2 = vsel %vm365_vm0, %v3736_v38, %v3321_v4 }
  0xee   : > { %2955 = vmatmul.mubr.msk.bf16.gmra.mrb[40].mxu0 %vm846_vm6, %v830_v47  ;;  %v1704_v47 = vsel %vm365_vm0, %v5052_v24, %v3301_v1  ;;  %v3330_v3 = vpop.permute.xlu0 %3329 }
  0xef   : > { %2958 = vmatprep.mubr.msk.bf16.mxu0 %vm3536_vm3, %v5043_v5  ;;  %v1729_v25 = vsel %vm794_vm5, %v1704_v47, %v3306_v23  ;;  %v3332_v40 = vunpack.i.h.bf16 %v3330_v3  ;;  %v3331_v41 = vunpack.i.l.bf16 %v3330_v3 }
  0xf1   : > { %v1711_v20 = vsel %vm365_vm0, %v3755_v45, %v3332_v40  ;;  %v1710_v36 = vsel %vm365_vm0, %v3753_v44, %v3331_v41 }
  0xf2   : > { %3117 = vmatmul.mubr.msk.bf16.gmra.mrb[92].mxu1 %vm365_vm0, %v1948_v29  ;;  %v3315_v29 = vpop.permute.xlu1 %3314  ;;  %v3340_v1 = vpop.permute.xlu0 %3339 }
  0xf3   : > { %3120 = vmatprep.mubr.msk.bf16.mxu1 %vm3536_vm3, %v5043_v5  ;;  %v3317_v61 = vunpack.i.h.bf16 %v3315_v29  ;;  %v3316_v7 = vunpack.i.l.bf16 %v3315_v29  ;;  %v3342_v23 = vunpack.i.h.bf16 %v3340_v1  ;;  %v3341_v26 = vunpack.i.l.bf16 %v3340_v1 }
  0xf5   : > { %v1731_v56 = vsel %vm794_vm5, %v1706_v14, %v3316_v7  ;;  %v1712_v21 = vsel %vm365_vm0, %v3774_v52, %v3341_v26  ;;  %v3501_v26 = vld [vmem:[#allocation2 + $0x121] ss:$2 sm:$0xff] }
  0xf6   : > { %2959 = vmatmul.mubr.msk.bf16.gmra.mrb[44].mxu0 %vm846_vm6, %v831_v46  ;;  %v1752_v46 = vpack.c.bf16 %v1730_v60, %v1729_v25  ;;  %v3325_v51 = vpop.permute.xlu1 %3324  ;;  %v1713_v60 = vsel %vm365_vm0, %v3776_v53, %v3342_v23  ;;  %v3350_v28 = vpop.permute.xlu0 %3349 }
  0xf7   : > { %2962 = vmatprep.mubr.msk.bf16.mxu0 %vm3536_vm3, %v5043_v5  ;;  %v3327_v33 = vunpack.i.h.bf16 %v3325_v51  ;;  %v3326_v18 = vunpack.i.l.bf16 %v3325_v51 }
  0xf9   : > { %v1733_v11 = vsel %vm794_vm5, %v1708_v2, %v3326_v18 }
  0xfa   : > { %3121 = vmatmul.mubr.msk.bf16.gmra.mrb[96].mxu1 %vm365_vm0, %v1949_v62  ;;  %v1732_v62 = vsel %vm794_vm5, %v1707_v49, %v3317_v61  ;;  %v3335_v31 = vpop.permute.xlu1 %3334  ;;  %v3351_v61 = vunpack.i.l.bf16 %v3350_v28 }
  0xfb   : > { %3124 = vmatprep.mubr.msk.bf16.mxu1 %vm3536_vm3, %v5043_v5  ;;  %v1753_v32 = vpack.c.bf16 %v1732_v62, %v1731_v56  ;;  %v3337_v22 = vunpack.i.h.bf16 %v3335_v31  ;;  %v3336_v13 = vunpack.i.l.bf16 %v3335_v31  ;;  %v3360_v62 = vpop.permute.xlu0 %3359 }
  0xfc   : > { %v1714_v56 = vsel %vm365_vm0, %v3803_v63, %v3351_v61 }
  0xfd   : > { %v1735_v16 = vsel %vm794_vm5, %v1710_v36, %v3336_v13 }
  0xfe   : > { %2963 = vmatmul.mubr.msk.bf16.gmra.mrb[48].mxu0 %vm846_vm6, %v832_v34  ;;  %v3345_v37 = vpop.permute.xlu1 %3344 }
  0xff   : > { %3022 = vmatprep.mubr.msk.bf16.mxu0 %vm3536_vm3, %v5043_v5  ;;  %v3347_v48 = vunpack.i.h.bf16 %v3345_v37  ;;  %v3346_v25 = vunpack.i.l.bf16 %v3345_v37  ;;  %v3370_v40 = vpop.permute.xlu0 %3369 }
 0x101   : > { %v1737_v29 = vsel %vm794_vm5, %v1712_v21, %v3346_v25 }
 0x102   : > { %3125 = vmatmul.mubr.msk.bf16.gmra.mrb[100].mxu1 %vm365_vm0, %v1950_v58  ;;  %v1709_v58 = vsel %vm365_vm0, %v3738_v39, %v3322_v35  ;;  %v3355_v7 = vpop.permute.xlu1 %3354 }
 0x103   : > { %v3357_v57 = vunpack.i.h.bf16 %v3355_v7  ;;  %v3356_v14 = vunpack.i.l.bf16 %v3355_v7 }
 0x105   : > { %v1739_v35 = vsel %vm794_vm5, %v1714_v56, %v3356_v14 }
 0x106   : > { %3023 = vmatmul.mubr.msk.bf16.vlgmr.msra.gmra.mrb[52].mxu0 %vm846_vm6, %v1750_v12  ;;  %v1734_v12 = vsel %vm794_vm5, %v1709_v58, %v3327_v33 }
 0x107   : > { %3026 = vmatprep.mubr.msk.bf16.mxu0 %vm3536_vm3, %v5043_v5  ;;  %v1754_v9 = vpack.c.bf16 %v1734_v12, %v1733_v11  ;;  %v3499_v11 = vld [vmem:[#allocation2 + $0x101] ss:$2 sm:$0xff] }
 0x108   : > { %v4182_v6 = vpop.f32.mrb[0].mxu1 }
 0x109   : > { %v2970_v42 = vpop.f32.mrb[1].mxu1 }
 0x10a   : > { %v4184_v54 = vpop.f32.mrb[2].mxu1  ;;  %v1738_v42 = vsel %vm794_vm5, %v1713_v60, %v3347_v48 }
 0x10b   : > { %v2971_v43 = vpop.f32.mrb[3].mxu1  ;;  %v1756_v49 = vpack.c.bf16 %v1738_v42, %v1737_v29 }
 0x10c   : > { %v3352_v43 = vunpack.i.h.bf16 %v3350_v28 }
 0x10e   : > { %3027 = vmatmul.mubr.msk.bf16.gmra.mrb[56].mxu0 %vm846_vm6, %v1751_v17  ;;  %v1736_v17 = vsel %vm794_vm5, %v1711_v20, %v3337_v22  ;;  %v1715_v55 = vsel %vm365_vm0, %v3805_v0, %v3352_v43 }
 0x10f   : > { %3030 = vmatprep.mubr.msk.bf16.mxu0 %vm3536_vm3, %v5043_v5  ;;  %v1755_v47 = vpack.c.bf16 %v1736_v17, %v1735_v16  ;;  %v1740_v4 = vsel %vm794_vm5, %v1715_v55, %v3357_v57  ;;  %v3500_v17 = vld [vmem:[#allocation2 + $0x131] ss:$2 sm:$0xff] }
 0x110   : > { %v4195_v34 = vpop.f32.mrb[4].mxu1  ;;  %v1757_v18 = vpack.c.bf16 %v1740_v4, %v1739_v35 }
 0x111   : > { %v2974_v30 = vpop.f32.mrb[5].mxu1 }
 0x112   : > { %v4197_v19 = vpop.f32.mrb[6].mxu1  ;;  %v3362_v30 = vunpack.i.h.bf16 %v3360_v62 }
 0x113   : > { %v2975_v59 = vpop.f32.mrb[7].mxu1 }
 0x114   : > { %v3365_v59 = vpop.permute.xlu1 %3364  ;;  %v1717_v3 = vsel %vm365_vm0, %v3825_v15, %v3362_v30 }
 0x115   : > { %v3367_v58 = vunpack.i.h.bf16 %v3365_v59  ;;  %v3366_v2 = vunpack.i.l.bf16 %v3365_v59 }
 0x116   : > { %3031 = vmatmul.mubr.msk.bf16.gmra.mrb[60].mxu0 %vm846_vm6, %v1752_v46 }
 0x117   : > { %3034 = vmatprep.mubr.msk.bf16.mxu0 %vm3536_vm3, %v5043_v5  ;;  %v1742_v31 = vsel %vm794_vm5, %v1717_v3, %v3367_v58 }
 0x118   : > { %v3375_v22 = vpop.permute.xlu1 %3374 }
 0x119   : > { %v3377_v1 = vunpack.i.h.bf16 %v3375_v22  ;;  %v3376_v16 = vunpack.i.l.bf16 %v3375_v22 }
 0x11b   : > { %v4208_v10 = vpop.f32.mrb[8].mxu1 }
 0x11c   : > { %v2978_v27 = vpop.f32.mrb[9].mxu1  ;;  %v3385_v21 = vpop.permute.xlu1 %3384 }
 0x11d   : > { %v4210_v39 = vpop.f32.mrb[10].mxu1  ;;  %v3387_v61 = vunpack.i.h.bf16 %v3385_v21  ;;  %v3386_v7 = vunpack.i.l.bf16 %v3385_v21 }
 0x11e   : > { %3035 = vmatmul.mubr.msk.bf16.gmra.mrb[64].mxu0 %vm846_vm6, %v1753_v32  ;;  %v2979_v38 = vpop.f32.mrb[11].mxu1  ;;  %v3361_v32 = vunpack.i.l.bf16 %v3360_v62 }
 0x11f   : > { %3038 = vmatprep.mubr.msk.bf16.mxu0 %vm3536_vm3, %v5043_v5  ;;  %v3371_v38 = vunpack.i.l.bf16 %v3370_v40 }
 0x120   : > { %v1716_v12 = vsel %vm365_vm0, %v3499_v11, %v3361_v32  ;;  %v3395_v30 = vpop.permute.xlu1 %3394  ;;  %v3505_v11 = vld [vmem:[#allocation2 + $0x161] ss:$2 sm:$0xff] }
 0x121   : > { %v1741_v41 = vsel %vm794_vm5, %v1716_v12, %v3366_v2  ;;  %v1718_v37 = vsel %vm365_vm0, %v3501_v26, %v3371_v38  ;;  %v3396_v58 = vunpack.i.l.bf16 %v3395_v30  ;;  %v3504_v2 = vld [vmem:[#allocation2 + $0x171] ss:$2 sm:$0xff] }
 0x122   : > { %v1758_v20 = vpack.c.bf16 %v1742_v31, %v1741_v41 }
 0x123   : > { %v4221_v50 = vpop.f32.mrb[12].mxu1 }
 0x124   : > { %v2982_v24 = vpop.f32.mrb[13].mxu1 }
 0x125   : > { %v4223_v45 = vpop.f32.mrb[14].mxu1  ;;  %v3380_v24 = vpop.permute.xlu0 %3379 }
 0x126   : > { %3039 = vmatmul.mubr.msk.bf16.gmra.mrb[68].mxu0 %vm846_vm6, %v1754_v9  ;;  %v2983_v44 = vpop.f32.mrb[15].mxu1  ;;  %v3372_v9 = vunpack.i.h.bf16 %v3370_v40  ;;  %v3382_v25 = vunpack.i.h.bf16 %v3380_v24  ;;  %v3381_v60 = vunpack.i.l.bf16 %v3380_v24 }
 0x127   : > { %3042 = vmatprep.mubr.msk.bf16.mxu0 %vm3536_vm3, %v5043_v5 }
 0x128   : > { %v1719_v23 = vsel %vm365_vm0, %v3500_v17, %v3372_v9 }
 0x129   : > { %v1744_v44 = vsel %vm794_vm5, %v1719_v23, %v3377_v1  ;;  %v3390_v14 = vpop.permute.xlu0 %3389 }
 0x12a   : > { %v3392_v35 = vunpack.i.h.bf16 %v3390_v14  ;;  %v3391_v4 = vunpack.i.l.bf16 %v3390_v14 }
 0x12b   : > { %v4234_v46 = vpop.f32.mrb[16].mxu1 }
 0x12c   : > { %v2986_v8 = vpop.f32.mrb[17].mxu1  ;;  %v1723_v3 = vsel %vm365_vm0, %v3504_v2, %v3392_v35  ;;  %v1722_v12 = vsel %vm365_vm0, %v3505_v11, %v3391_v4 }
 0x12d   : > { %v4236_v53 = vpop.f32.mrb[18].mxu1  ;;  %v3502_v8 = vld [vmem:[#allocation2 + $0x151] ss:$2 sm:$0xff]  ;;  %v1747_v40 = vsel %vm794_vm5, %v1722_v12, %v3396_v58  ;;  %v1574_v38 = vpop.permute.xlu0 %1573 }
 0x12e   : > { %3043 = vmatmul.mubr.msk.bf16.gmra.mrb[72].mxu0 %vm846_vm6, %v1755_v47  ;;  %v2987_v52 = vpop.f32.mrb[19].mxu1  ;;  %v1743_v47 = vsel %vm794_vm5, %v1718_v37, %v3376_v16  ;;  %v1674_v16 = vpop.permute.xlu1 %1673 }
 0x12f   : > { %3046 = vmatprep.mubr.msk.bf16.mxu0 %vm3536_vm3, %v5043_v5  ;;  %v1759_v42 = vpack.c.bf16 %v1744_v44, %v1743_v47  ;;  %v3503_v52 = vld [vmem:[#allocation2 + $0x141] ss:$2 sm:$0xff] }
 0x130   : > { %v1720_v57 = vsel %vm365_vm0, %v3503_v52, %v3381_v60 }
 0x131   : > { %v1745_v55 = vsel %vm794_vm5, %v1720_v57, %v3386_v7 }
 0x133   : > { %v4247_v51 = vpop.f32.mrb[20].mxu1 }
 0x134   : > { %v2990_v33 = vpop.f32.mrb[21].mxu1 }
 0x135   : > { %v4249_v0 = vpop.f32.mrb[22].mxu1 }
 0x136   : > { %3047 = vmatmul.mubr.msk.bf16.gmra.mrb[76].mxu0 %vm846_vm6, %v1756_v49  ;;  %v2991_v63 = vpop.f32.mrb[23].mxu1  ;;  %v1721_v49 = vsel %vm365_vm0, %v3502_v8, %v3382_v25 }
 0x137   : > { %3050 = vmatprep.mubr.msk.bf16.mxu0 %vm3536_vm3, %v5043_v5  ;;  %v1746_v56 = vsel %vm794_vm5, %v1721_v49, %v3387_v61  ;;  %v3397_v63 = vunpack.i.h.bf16 %v3395_v30 }
 0x138   : > { %v1760_v33 = vpack.c.bf16 %v1746_v56, %v1745_v55 }
 0x139   : > { %v1748_v41 = vsel %vm794_vm5, %v1723_v3, %v3397_v63 }
 0x13b   : > { %v4259_v27 = vpop.f32.mrb[24].mxu1 }
 0x13c   : > { %v2994_v13 = vpop.f32.mrb[25].mxu1 }
 0x13d   : > { %v4261_v15 = vpop.f32.mrb[26].mxu1  ;;  %v1761_v13 = vpack.c.bf16 %v1748_v41, %v1747_v40 }
 0x13e   : > { %3051 = vmatmul.mubr.msk.bf16.gmra.mrb[80].mxu0 %vm846_vm6, %v1757_v18  ;;  %v2995_v36 = vpop.f32.mrb[27].mxu1 }
 0x13f   : > { %3054 = vmatprep.mubr.msk.bf16.mxu0 %vm3536_vm3, %v5043_v5  ;;  %v3506_v36 = vld [vmem:[#allocation2 + $0x181] ss:$2 sm:$0xff] }
 0x140   : > { %v1724_v1 = vsel %vm365_vm0, %v3506_v36, %v1574_v38 }
 0x141   : > { %v1749_v17 = vsel %vm794_vm5, %v1724_v1, %v1674_v16 }
 0x142   : > { %v1762_v24 = vpack.c.bf16 %v1749_v17, %v1749_v17 }
 0x143   : > { %v4270_v48 = vpop.f32.mrb[28].mxu1 }
 0x144   : > { %v2998_v28 = vpop.f32.mrb[29].mxu1 }
 0x145   : > { %v4272_v29 = vpop.f32.mrb[30].mxu1  ;;  %v4313_v28 = vld [vmem:[%s5017_s2] ss:$0 sm:$0xff] }
 0x146   : > { %3055 = vmatmul.mubr.msk.bf16.gmra.mrb[84].mxu0 %vm846_vm6, %v1758_v20  ;;  %v2999_v43 = vpop.f32.mrb[31].mxu1 }
 0x147   : > { %3058 = vmatprep.mubr.msk.bf16.mxu0 %vm3536_vm3, %v5043_v5 }
 0x14b   : > { %v4281_v62 = vpop.f32.mrb[32].mxu1 }
 0x14c   : > { %v3002_v32 = vpop.f32.mrb[33].mxu1 }
 0x14d   : > { %v4283_v59 = vpop.f32.mrb[34].mxu1 }
 0x14e   : > { %3059 = vmatmul.mubr.msk.bf16.gmra.mrb[88].mxu0 %vm846_vm6, %v1759_v42  ;;  %v3003_v18 = vpop.f32.mrb[35].mxu1 }
 0x14f   : > { %3062 = vmatprep.mubr.msk.bf16.mxu0 %vm3536_vm3, %v5043_v5 }
 0x153   : > { %v4292_v31 = vpop.f32.mrb[36].mxu1 }
 0x154   : > { %v3006_v9 = vpop.f32.mrb[37].mxu1 }
 0x155   : > { %v4294_v22 = vpop.f32.mrb[38].mxu1 }
 0x156   : > { %3063 = vmatmul.mubr.msk.bf16.gmra.mrb[92].mxu0 %vm846_vm6, %v1760_v33  ;;  %v3007_v20 = vpop.f32.mrb[39].mxu1 }
 0x157   : > { %3066 = vmatprep.mubr.msk.bf16.mxu0 %vm3536_vm3, %v5043_v5 }
 0x15b   : > { %v4301_v23 = vpop.f32.mrb[40].mxu1 }
 0x15c   : > { %v3010_v26 = vpop.f32.mrb[41].mxu1 }
 0x15d   : > { %v4303_v37 = vpop.f32.mrb[42].mxu1 }
 0x15e   : > { %3067 = vmatmul.mubr.msk.bf16.gmra.mrb[96].mxu0 %vm846_vm6, %v1761_v13  ;;  %v3011_v47 = vpop.f32.mrb[43].mxu1 }
 0x15f   : > { %3070 = vmatprep.mubr.msk.bf16.mxu0 %vm3536_vm3, %v5043_v5 }
 0x163   : > { %v4306_v44 = vpop.f32.mrb[44].mxu1 }
 0x164   : > { %v3014_v25 = vpop.f32.mrb[45].mxu1 }
 0x165   : > { %v4308_v60 = vpop.f32.mrb[46].mxu1 }
 0x166   : > { %3071 = vmatmul.mubr.msk.bf16.gmra.mrb[100].mxu0 %vm846_vm6, %v1762_v24  ;;  %v3015_v21 = vpop.f32.mrb[47].mxu1 }
 0x16b   : > { %v4315_v5 = vpop.f32.mrb[48].mxu1 }
 0x16c   : > { %v3018_v42 = vpop.f32.mrb[49].mxu1 }
 0x16d   : > { %v1222_v61 = vpop.f32.mrb[50].mxu1 }
 0x16e   : > { %v3019_v49 = vpop.f32.mrb[51].mxu1 }
 0x171   : > { %v924_v43 = vpop.f32.mrb[0].mxu0 }
 0x172   : > { %v925_v7 = vadd.f32 %v4313_v28, %v924_v43  ;;  %v2916_v8 = vpop.f32.mrb[1].mxu0 }
 0x173   : > { %v927_v52 = vpop.f32.mrb[2].mxu0 }
 0x174   : > { %v1250_v57 = vmul.f32 0.044715, %v925_v7  ;;  %v4319_v14 = vadd.f32 %v4313_v28, %v927_v52  ;;  %v2917_v55 = vpop.f32.mrb[3].mxu0 }
 0x175   : > { %v4322_v4 = vpop.f32.mrb[52].mxu1 }
 0x176   : > { %v1275_v56 = vmul.f32 %v1250_v57, %v925_v7  ;;  %v1251_v35 = vmul.f32 0.044715, %v4319_v14  ;;  %v3078_v33 = vpop.f32.mrb[53].mxu1 }
 0x177   : > { %v4325_v63 = vpop.f32.mrb[54].mxu1 }
 0x178   : > { %v1276_v30 = vmul.f32 %v1251_v35, %v4319_v14  ;;  %v1300_v32 = vmul.f32 %v1275_v56, %v925_v7  ;;  %v3079_v12 = vpop.f32.mrb[55].mxu1 }
 0x179   : > { %v932_v18 = vpop.f32.mrb[4].mxu0 }
 0x17a   : > { %v4328_v58 = vadd.f32 %v4313_v28, %v932_v18  ;;  %v2920_v2 = vpop.f32.mrb[5].mxu0  ;;  %v1325_v3 = vadd.f32 %v1300_v32, %v925_v7  ;;  %v1301_v11 = vmul.f32 %v1276_v30, %v4319_v14  ;;  %v4359_v18 = vld [vmem:[%s5019_s4] ss:$0 sm:$0xff] }
 0x17b   : > { %v935_v40 = vpop.f32.mrb[6].mxu0 }
 0x17c   : > { %v1252_v41 = vmul.f32 0.044715, %v4328_v58  ;;  %v4333_v9 = vadd.f32 %v4313_v28, %v935_v40  ;;  %v2921_v38 = vpop.f32.mrb[7].mxu0  ;;  %v1350_v13 = vmul.f32 0.7978846, %v1325_v3  ;;  %v1326_v20 = vadd.f32 %v1301_v11, %v4319_v14 }
 0x17d   : > { %v4338_v17 = vpop.f32.mrb[56].mxu1  ;;  %v1124_v38 = vadd.f32 %v4359_v18, %v4182_v6 }
 0x17e   : > { %v1277_v36 = vmul.f32 %v1252_v41, %v4328_v58  ;;  %v1253_v1 = vmul.f32 0.044715, %v4333_v9  ;;  %3399 = vtanh.f32 %v1350_v13  ;;  %v1351_v16 = vmul.f32 0.7978846, %v1326_v20  ;;  %v3082_v47 = vpop.f32.mrb[57].mxu1 }
 0x17f   : > { %v4342_v21 = vpop.f32.mrb[58].mxu1  ;;  %v1225_v13 = vmul.f32 0.5, %v925_v7 }
 0x180   : > { %v1278_v26 = vmul.f32 %v1253_v1, %v4333_v9  ;;  %3401 = vtanh.f32 %v1351_v16  ;;  %v1302_v24 = vmul.f32 %v1277_v36, %v4328_v58  ;;  %v3083_v49 = vpop.f32.mrb[59].mxu1 }
 0x181   : > { %v940_v25 = vpop.f32.mrb[8].mxu0 }
 0x182   : > { %v4345_v42 = vadd.f32 %v4313_v28, %v940_v25  ;;  %v2924_v43 = vpop.f32.mrb[9].mxu0  ;;  %v1327_v61 = vadd.f32 %v1302_v24, %v4328_v58  ;;  %v1303_v8 = vmul.f32 %v1278_v26, %v4333_v9 }
 0x183   : > { %v943_v52 = vpop.f32.mrb[10].mxu0 }
 0x184   : > { %v1254_v57 = vmul.f32 0.044715, %v4345_v42  ;;  %v4351_v55 = vadd.f32 %v4313_v28, %v943_v52  ;;  %v2925_v56 = vpop.f32.mrb[11].mxu0  ;;  %v1352_v35 = vmul.f32 0.7978846, %v1327_v61  ;;  %v1328_v30 = vadd.f32 %v1303_v8, %v4333_v9 }
 0x185   : > { %v4361_v3 = vpop.f32.mrb[60].mxu1  ;;  %v1226_v8 = vmul.f32 0.5, %v4319_v14 }
 0x186   : > { %v1279_v32 = vmul.f32 %v1254_v57, %v4345_v42  ;;  %v1255_v33 = vmul.f32 0.044715, %v4351_v55  ;;  %3403 = vtanh.f32 %v1352_v35  ;;  %v1353_v2 = vmul.f32 0.7978846, %v1328_v30  ;;  %v3086_v41 = vpop.f32.mrb[61].mxu1 }
 0x187   : > { %v4367_v1 = vpop.f32.mrb[62].mxu1 }
 0x188   : > { %v3400_v11 = vpop.eup %3399  ;;  %v1280_v12 = vmul.f32 %v1255_v33, %v4351_v55  ;;  %3405 = vtanh.f32 %v1353_v2  ;;  %v1304_v40 = vmul.f32 %v1279_v32, %v4345_v42  ;;  %v3087_v43 = vpop.f32.mrb[63].mxu1  ;;  %v1127_v32 = vadd.f32 %v4359_v18, %v4184_v54 }
 0x189   : > { %v1400_v20 = vadd.f32 1.0, %v3400_v11  ;;  %v948_v36 = vpop.f32.mrb[12].mxu0  ;;  %v1132_v54 = vadd.f32 %v4359_v18, %v4195_v34 }
 0x18a   : > { %v3402_v16 = vpop.eup %3401  ;;  %v4370_v26 = vadd.f32 %v4313_v28, %v948_v36  ;;  %v2928_v24 = vpop.f32.mrb[13].mxu0  ;;  %v1329_v47 = vadd.f32 %v1304_v40, %v4345_v42  ;;  %v1305_v25 = vmul.f32 %v1280_v12, %v4351_v55  ;;  %v1227_v36 = vmul.f32 0.5, %v4328_v58 }
 0x18b   : > { %v1425_v61 = vmul.f32 %v1400_v20, %v1225_v13  ;;  %v1401_v49 = vadd.f32 1.0, %v3402_v16  ;;  %v951_v6 = vpop.f32.mrb[14].mxu0 }
 0x18c   : > { %v1256_v7 = vmul.f32 0.044715, %v4370_v26  ;;  %v4377_v52 = vadd.f32 %v4313_v28, %v951_v6  ;;  %v2929_v57 = vpop.f32.mrb[15].mxu0  ;;  %v1354_v56 = vmul.f32 0.7978846, %v1329_v47  ;;  %v1330_v35 = vadd.f32 %v1305_v25, %v4351_v55 }
 0x18d   : > { %v4380_v30 = vadd.f32 %v1425_v61, %v1124_v38  ;;  %v1426_v33 = vmul.f32 %v1401_v49, %v1226_v8  ;;  %v4388_v40 = vpop.f32.mrb[64].mxu1  ;;  %v1228_v57 = vmul.f32 0.5, %v4333_v9 }
 0x18e   : > { %v1281_v2 = vmul.f32 %v1256_v7, %v4370_v26  ;;  %v1257_v14 = vmul.f32 0.044715, %v4377_v52  ;;  %3407 = vtanh.f32 %v1354_v56  ;;  %v1355_v11 = vmul.f32 0.7978846, %v1330_v35  ;;  %v3090_v20 = vpop.f32.mrb[65].mxu1 }
 0x18f   : > { %v4386_v12 = vadd.f32 %v1426_v33, %v1127_v32  ;;  %v4395_v47 = vpop.f32.mrb[66].mxu1 }
 0x190   : > { %v3404_v41 = vpop.eup %3403  ;;  %v1282_v13 = vmul.f32 %v1257_v14, %v4377_v52  ;;  %3409 = vtanh.f32 %v1355_v11  ;;  %v1306_v38 = vmul.f32 %v1281_v2, %v4370_v26  ;;  %v3091_v6 = vpop.f32.mrb[67].mxu1  ;;  %v1135_v11 = vadd.f32 %v4359_v18, %v4197_v19 }
 0x191   : > { %v1402_v16 = vadd.f32 1.0, %v3404_v41  ;;  %v956_v24 = vpop.f32.mrb[16].mxu0  ;;  %v1140_v19 = vadd.f32 %v4359_v18, %v4208_v10 }
 0x192   : > { %v3406_v25 = vpop.eup %3405  ;;  %v4398_v43 = vadd.f32 %v4313_v28, %v956_v24  ;;  %v2932_v61 = vpop.f32.mrb[17].mxu0  ;;  %v1331_v8 = vadd.f32 %v1306_v38, %v4370_v26  ;;  %v1307_v49 = vmul.f32 %v1282_v13, %v4377_v52 }
 0x193   : > { %v1427_v7 = vmul.f32 %v1402_v16, %v1227_v36  ;;  %v1403_v34 = vadd.f32 1.0, %v3406_v25  ;;  %v959_v56 = vpop.f32.mrb[18].mxu0  ;;  %v1229_v61 = vmul.f32 0.5, %v4345_v42 }
 0x194   : > { %v1258_v58 = vmul.f32 0.044715, %v4398_v43  ;;  %v4405_v35 = vadd.f32 %v4313_v28, %v959_v56  ;;  %v2933_v32 = vpop.f32.mrb[19].mxu0  ;;  %v1356_v33 = vmul.f32 0.7978846, %v1331_v8  ;;  %v1332_v2 = vadd.f32 %v1307_v49, %v4377_v52 }
 0x195   : > { %v4408_v14 = vadd.f32 %v1427_v7, %v1132_v54  ;;  %v1428_v41 = vmul.f32 %v1403_v34, %v1228_v57  ;;  %v4416_v36 = vpop.f32.mrb[68].mxu1 }
 0x196   : > { %v1283_v13 = vmul.f32 %v1258_v58, %v4398_v43  ;;  %v1259_v9 = vmul.f32 0.044715, %v4405_v35  ;;  %3411 = vtanh.f32 %v1356_v33  ;;  %v1357_v38 = vmul.f32 0.7978846, %v1332_v2  ;;  %v3094_v25 = vpop.f32.mrb[69].mxu1 }
 0x197   : > { %v4414_v20 = vadd.f32 %v1428_v41, %v1135_v11  ;;  %v4423_v6 = vpop.f32.mrb[70].mxu1  ;;  %v1230_v2 = vmul.f32 0.5, %v4351_v55 }
 0x198   : > { %v3408_v16 = vpop.eup %3407  ;;  %v1284_v24 = vmul.f32 %v1259_v9, %v4405_v35  ;;  %3413 = vtanh.f32 %v1357_v38  ;;  %v1308_v54 = vmul.f32 %v1283_v13, %v4398_v43  ;;  %v3095_v32 = vpop.f32.mrb[71].mxu1 }
 0x199   : > { %v1404_v8 = vadd.f32 1.0, %v3408_v16  ;;  %v964_v49 = vpop.f32.mrb[20].mxu0 }
 0x19a   : > { %v3410_v7 = vpop.eup %3409  ;;  %v4426_v57 = vadd.f32 %v4313_v28, %v964_v49  ;;  %v2936_v34 = vpop.f32.mrb[21].mxu0  ;;  %v1333_v56 = vadd.f32 %v1308_v54, %v4398_v43  ;;  %v1309_v58 = vmul.f32 %v1284_v24, %v4405_v35  ;;  %v1143_v24 = vadd.f32 %v4359_v18, %v4210_v39 }
 0x19b   : > { %v1429_v33 = vmul.f32 %v1404_v8, %v1229_v61  ;;  %v1405_v10 = vadd.f32 1.0, %v3410_v7  ;;  %v967_v11 = vpop.f32.mrb[22].mxu0  ;;  %v1148_v39 = vadd.f32 %v4359_v18, %v4221_v50 }
 0x19c   : > { %v1260_v42 = vmul.f32 0.044715, %v4426_v57  ;;  %v4433_v41 = vadd.f32 %v4313_v28, %v967_v11  ;;  %v2937_v13 = vpop.f32.mrb[23].mxu0  ;;  %v1358_v9 = vmul.f32 0.7978846, %v1333_v56  ;;  %v1334_v38 = vadd.f32 %v1309_v58, %v4405_v35 }
 0x19d   : > { %v4436_v16 = vadd.f32 %v1429_v33, %v1140_v19  ;;  %v1430_v54 = vmul.f32 %v1405_v10, %v1230_v2  ;;  %v4444_v49 = vpop.f32.mrb[72].mxu1  ;;  %v1231_v58 = vmul.f32 0.5, %v4370_v26 }
 0x19e   : > { %v1285_v25 = vmul.f32 %v1260_v42, %v4426_v57  ;;  %v1261_v55 = vmul.f32 0.044715, %v4433_v41  ;;  %3415 = vtanh.f32 %v1358_v9  ;;  %v1359_v61 = vmul.f32 0.7978846, %v1334_v38  ;;  %v3098_v56 = vpop.f32.mrb[73].mxu1 }
 0x19f   : > { %v4442_v8 = vadd.f32 %v1430_v54, %v1143_v24  ;;  %v4451_v2 = vpop.f32.mrb[74].mxu1  ;;  %v1232_v54 = vmul.f32 0.5, %v4377_v52 }
 0x1a0   : > { %v3412_v7 = vpop.eup %3411  ;;  %v1286_v34 = vmul.f32 %v1261_v55, %v4433_v41  ;;  %3417 = vtanh.f32 %v1359_v61  ;;  %v1310_v19 = vmul.f32 %v1285_v25, %v4426_v57  ;;  %v3099_v38 = vpop.f32.mrb[75].mxu1 }
 0x1a1   : > { %v1406_v32 = vadd.f32 1.0, %v3412_v7  ;;  %v972_v33 = vpop.f32.mrb[24].mxu0 }
 0x1a2   : > { %v3414_v10 = vpop.eup %3413  ;;  %v4454_v11 = vadd.f32 %v4313_v28, %v972_v33  ;;  %v2940_v42 = vpop.f32.mrb[25].mxu0  ;;  %v1335_v13 = vadd.f32 %v1310_v19, %v4426_v57  ;;  %v1311_v9 = vmul.f32 %v1286_v34, %v4433_v41  ;;  %v1151_v34 = vadd.f32 %v4359_v18, %v4223_v45 }
 0x1a3   : > { %v1431_v24 = vmul.f32 %v1406_v32, %v1231_v58  ;;  %v1407_v50 = vadd.f32 1.0, %v3414_v10  ;;  %v975_v25 = vpop.f32.mrb[26].mxu0  ;;  %v1156_v45 = vadd.f32 %v4359_v18, %v4234_v46 }
 0x1a4   : > { %v1262_v26 = vmul.f32 0.044715, %v4454_v11  ;;  %v4461_v55 = vadd.f32 %v4313_v28, %v975_v25  ;;  %v2941_v61 = vpop.f32.mrb[27].mxu0  ;;  %v1360_v7 = vmul.f32 0.7978846, %v1335_v13  ;;  %v1336_v56 = vadd.f32 %v1311_v9, %v4433_v41 }
 0x1a5   : > { %v4464_v33 = vadd.f32 %v1431_v24, %v1148_v39  ;;  %v1432_v19 = vmul.f32 %v1407_v50, %v1232_v54  ;;  %v4472_v42 = vpop.f32.mrb[76].mxu1  ;;  %v1233_v24 = vmul.f32 0.5, %v4398_v43 }
 0x1a6   : > { %v1287_v58 = vmul.f32 %v1262_v26, %v4454_v11  ;;  %v1263_v52 = vmul.f32 0.044715, %v4461_v55  ;;  %3419 = vtanh.f32 %v1360_v7  ;;  %v1361_v32 = vmul.f32 0.7978846, %v1336_v56  ;;  %v3102_v9 = vpop.f32.mrb[77].mxu1 }
 0x1a7   : > { %v4470_v10 = vadd.f32 %v1432_v19, %v1151_v34  ;;  %v4479_v25 = vpop.f32.mrb[78].mxu1 }
 0x1a8   : > { %v3416_v38 = vpop.eup %3415  ;;  %v1288_v13 = vmul.f32 %v1263_v52, %v4461_v55  ;;  %3421 = vtanh.f32 %v1361_v32  ;;  %v1312_v39 = vmul.f32 %v1287_v58, %v4454_v11  ;;  %5055 = vst [vmem:[#allocation11_spill] sm:$0xff] %v4479_v25  ;;  %v3103_v19 = vpop.f32.mrb[79].mxu1  ;;  %v1234_v52 = vmul.f32 0.5, %v4405_v35 }
 0x1a9   : > { %v1408_v54 = vadd.f32 1.0, %v3416_v38  ;;  %v980_v50 = vpop.f32.mrb[28].mxu0 }
 0x1aa   : > { %v3418_v26 = vpop.eup %3417  ;;  %v4482_v61 = vadd.f32 %v4313_v28, %v980_v50  ;;  %v2944_v7 = vpop.f32.mrb[29].mxu0  ;;  %v1337_v56 = vadd.f32 %v1312_v39, %v4454_v11  ;;  %v1313_v34 = vmul.f32 %v1288_v13, %v4461_v55  ;;  %v1159_v13 = vadd.f32 %v4359_v18, %v4236_v53 }
 0x1ab   : > { %v1433_v58 = vmul.f32 %v1408_v54, %v1233_v24  ;;  %v1409_v46 = vadd.f32 1.0, %v3418_v26  ;;  %v983_v32 = vpop.f32.mrb[30].mxu0  ;;  %v1164_v53 = vadd.f32 %v4359_v18, %v4247_v51 }
 0x1ac   : > { %v1264_v43 = vmul.f32 0.044715, %v4482_v61  ;;  %v4489_v38 = vadd.f32 %v4313_v28, %v983_v32  ;;  %v2945_v9 = vpop.f32.mrb[31].mxu0  ;;  %v1362_v25 = vmul.f32 0.7978846, %v1337_v56  ;;  %v1338_v50 = vadd.f32 %v1313_v34, %v4461_v55 }
 0x1ad   : > { %v4492_v7 = vadd.f32 %v1433_v58, %v1156_v45  ;;  %v1434_v39 = vmul.f32 %v1409_v46, %v1234_v52  ;;  %v4500_v19 = vpop.f32.mrb[80].mxu1  ;;  %v1235_v58 = vmul.f32 0.5, %v4426_v57 }
 0x1ae   : > { %v1289_v24 = vmul.f32 %v1264_v43, %v4482_v61  ;;  %v1265_v35 = vmul.f32 0.044715, %v4489_v38  ;;  %3423 = vtanh.f32 %v1362_v25  ;;  %v1363_v54 = vmul.f32 0.7978846, %v1338_v50  ;;  %5056 = vst [vmem:[#allocation12_spill] sm:$0xff] %v4500_v19  ;;  %v3106_v34 = vpop.f32.mrb[81].mxu1 }
 0x1af   : > { %v4498_v26 = vadd.f32 %v1434_v39, %v1159_v13  ;;  %v4507_v25 = vpop.f32.mrb[82].mxu1 }
 0x1b0   : > { %v3420_v32 = vpop.eup %3419  ;;  %v1290_v56 = vmul.f32 %v1265_v35, %v4489_v38  ;;  %3425 = vtanh.f32 %v1363_v54  ;;  %v1314_v45 = vmul.f32 %v1289_v24, %v4482_v61  ;;  %5057 = vst [vmem:[#allocation4_spill] sm:$0xff] %v4507_v25  ;;  %v3107_v24 = vpop.f32.mrb[83].mxu1  ;;  %v1236_v54 = vmul.f32 0.5, %v4433_v41 }
 0x1b1   : > { %v1410_v52 = vadd.f32 1.0, %v3420_v32  ;;  %v988_v46 = vpop.f32.mrb[32].mxu0 }
 0x1b2   : > { %v3422_v43 = vpop.eup %3421  ;;  %v4510_v9 = vadd.f32 %v4313_v28, %v988_v46  ;;  %v2948_v50 = vpop.f32.mrb[33].mxu0  ;;  %v1339_v13 = vadd.f32 %v1314_v45, %v4482_v61  ;;  %v1315_v39 = vmul.f32 %v1290_v56, %v4489_v38  ;;  %v1167_v56 = vadd.f32 %v4359_v18, %v4249_v0 }
 0x1b3   : > { %v1435_v35 = vmul.f32 %v1410_v52, %v1235_v58  ;;  %v1411_v51 = vadd.f32 1.0, %v3422_v43  ;;  %v991_v34 = vpop.f32.mrb[34].mxu0  ;;  %v1172_v0 = vadd.f32 %v4359_v18, %v4259_v27 }
 0x1b4   : > { %v1266_v57 = vmul.f32 0.044715, %v4510_v9  ;;  %v4517_v32 = vadd.f32 %v4313_v28, %v991_v34  ;;  %v2949_v25 = vpop.f32.mrb[35].mxu0  ;;  %v1364_v19 = vmul.f32 0.7978846, %v1339_v13  ;;  %v1340_v46 = vadd.f32 %v1315_v39, %v4489_v38 }
 0x1b5   : > { %v4520_v50 = vadd.f32 %v1435_v35, %v1164_v53  ;;  %v1436_v45 = vmul.f32 %v1411_v51, %v1236_v54  ;;  %v4528_v24 = vpop.f32.mrb[84].mxu1  ;;  %v1237_v35 = vmul.f32 0.5, %v4454_v11 }
 0x1b6   : > { %v1291_v58 = vmul.f32 %v1266_v57, %v4510_v9  ;;  %v1267_v41 = vmul.f32 0.044715, %v4517_v32  ;;  %3427 = vtanh.f32 %v1364_v19  ;;  %v1365_v52 = vmul.f32 0.7978846, %v1340_v46  ;;  %5058 = vst [vmem:[#allocation3_spill] sm:$0xff] %v4528_v24  ;;  %v3110_v39 = vpop.f32.mrb[85].mxu1 }
 0x1b7   : > { %v4526_v43 = vadd.f32 %v1436_v45, %v1167_v56  ;;  %v4535_v19 = vpop.f32.mrb[86].mxu1 }
 0x1b8   : > { %v3424_v25 = vpop.eup %3423  ;;  %v1292_v13 = vmul.f32 %v1267_v41, %v4517_v32  ;;  %3429 = vtanh.f32 %v1365_v52  ;;  %v1316_v53 = vmul.f32 %v1291_v58, %v4510_v9  ;;  %5059 = vst [vmem:[#allocation6_spill] sm:$0xff] %v4535_v19  ;;  %v3111_v58 = vpop.f32.mrb[87].mxu1  ;;  %v1238_v52 = vmul.f32 0.5, %v4461_v55 }
 0x1b9   : > { %v1412_v54 = vadd.f32 1.0, %v3424_v25  ;;  %v996_v51 = vpop.f32.mrb[36].mxu0 }
 0x1ba   : > { %v3426_v34 = vpop.eup %3425  ;;  %v4538_v57 = vadd.f32 %v4313_v28, %v996_v51  ;;  %v2952_v46 = vpop.f32.mrb[37].mxu0  ;;  %v1341_v56 = vadd.f32 %v1316_v53, %v4510_v9  ;;  %v1317_v45 = vmul.f32 %v1292_v13, %v4517_v32  ;;  %v1175_v13 = vadd.f32 %v4359_v18, %v4261_v15 }
 0x1bb   : > { %v1437_v41 = vmul.f32 %v1412_v54, %v1237_v35  ;;  %v1413_v27 = vadd.f32 1.0, %v3426_v34  ;;  %v999_v39 = vpop.f32.mrb[38].mxu0  ;;  %v1180_v15 = vadd.f32 %v4359_v18, %v4270_v48 }
 0x1bc   : > { %v1268_v11 = vmul.f32 0.044715, %v4538_v57  ;;  %v4545_v25 = vadd.f32 %v4313_v28, %v999_v39  ;;  %v2953_v19 = vpop.f32.mrb[39].mxu0  ;;  %v1366_v24 = vmul.f32 0.7978846, %v1341_v56  ;;  %v1342_v51 = vadd.f32 %v1317_v45, %v4517_v32 }
 0x1bd   : > { %v4548_v46 = vadd.f32 %v1437_v41, %v1172_v0  ;;  %v1438_v53 = vmul.f32 %v1413_v27, %v1238_v52  ;;  %v4556_v58 = vpop.f32.mrb[88].mxu1  ;;  %v1239_v41 = vmul.f32 0.5, %v4482_v61 }
 0x1be   : > { %v1293_v35 = vmul.f32 %v1268_v11, %v4538_v57  ;;  %v1269_v55 = vmul.f32 0.044715, %v4545_v25  ;;  %3431 = vtanh.f32 %v1366_v24  ;;  %v1367_v54 = vmul.f32 0.7978846, %v1342_v51  ;;  %5060 = vst [vmem:[#allocation5_spill] sm:$0xff] %v4556_v58  ;;  %v3114_v45 = vpop.f32.mrb[89].mxu1 }
 0x1bf   : > { %v4554_v34 = vadd.f32 %v1438_v53, %v1175_v13  ;;  %v4563_v24 = vpop.f32.mrb[90].mxu1 }
 0x1c0   : > { %v3428_v19 = vpop.eup %3427  ;;  %v1294_v56 = vmul.f32 %v1269_v55, %v4545_v25  ;;  %3433 = vtanh.f32 %v1367_v54  ;;  %v1318_v0 = vmul.f32 %v1293_v35, %v4538_v57  ;;  %5061 = vst [vmem:[#allocation8_spill] sm:$0xff] %v4563_v24  ;;  %v3115_v35 = vpop.f32.mrb[91].mxu1  ;;  %v1240_v54 = vmul.f32 0.5, %v4489_v38 }
 0x1c1   : > { %v1414_v52 = vadd.f32 1.0, %v3428_v19  ;;  %v1004_v27 = vpop.f32.mrb[40].mxu0 }
 0x1c2   : > { %v3430_v39 = vpop.eup %3429  ;;  %v4566_v11 = vadd.f32 %v4313_v28, %v1004_v27  ;;  %v2956_v51 = vpop.f32.mrb[41].mxu0  ;;  %v1343_v13 = vadd.f32 %v1318_v0, %v4538_v57  ;;  %v1319_v53 = vmul.f32 %v1294_v56, %v4545_v25  ;;  %v1183_v56 = vadd.f32 %v4359_v18, %v4272_v29 }
 0x1c3   : > { %v1439_v55 = vmul.f32 %v1414_v52, %v1239_v41  ;;  %v1415_v48 = vadd.f32 1.0, %v3430_v39  ;;  %v1007_v45 = vpop.f32.mrb[42].mxu0  ;;  %v1188_v29 = vadd.f32 %v4359_v18, %v4281_v62 }
 0x1c4   : > { %v1270_v61 = vmul.f32 0.044715, %v4566_v11  ;;  %v4573_v19 = vadd.f32 %v4313_v28, %v1007_v45  ;;  %v2957_v24 = vpop.f32.mrb[43].mxu0  ;;  %v1368_v58 = vmul.f32 0.7978846, %v1343_v13  ;;  %v1344_v27 = vadd.f32 %v1319_v53, %v4545_v25 }
 0x1c5   : > { %v4576_v51 = vadd.f32 %v1439_v55, %v1180_v15  ;;  %v1440_v0 = vmul.f32 %v1415_v48, %v1240_v54  ;;  %v4584_v35 = vpop.f32.mrb[92].mxu1  ;;  %v1241_v55 = vmul.f32 0.5, %v4510_v9 }
 0x1c6   : > { %v1295_v41 = vmul.f32 %v1270_v61, %v4566_v11  ;;  %v1271_v38 = vmul.f32 0.044715, %v4573_v19  ;;  %3435 = vtanh.f32 %v1368_v58  ;;  %v1369_v52 = vmul.f32 0.7978846, %v1344_v27  ;;  %5062 = vst [vmem:[#allocation7_spill] sm:$0xff] %v4584_v35  ;;  %v3118_v53 = vpop.f32.mrb[93].mxu1 }
 0x1c7   : > { %v4582_v39 = vadd.f32 %v1440_v0, %v1183_v56  ;;  %v4591_v58 = vpop.f32.mrb[94].mxu1 }
 0x1c8   : > { %v3432_v24 = vpop.eup %3431  ;;  %v1296_v13 = vmul.f32 %v1271_v38, %v4573_v19  ;;  %3437 = vtanh.f32 %v1369_v52  ;;  %v1320_v15 = vmul.f32 %v1295_v41, %v4566_v11  ;;  %5063 = vst [vmem:[#allocation10_spill] sm:$0xff] %v4591_v58  ;;  %v3119_v41 = vpop.f32.mrb[95].mxu1  ;;  %v1242_v52 = vmul.f32 0.5, %v4517_v32 }
 0x1c9   : > { %v1416_v54 = vadd.f32 1.0, %v3432_v24  ;;  %v1012_v48 = vpop.f32.mrb[44].mxu0 }
 0x1ca   : > { %v3434_v45 = vpop.eup %3433  ;;  %v4594_v61 = vadd.f32 %v4313_v28, %v1012_v48  ;;  %v2960_v27 = vpop.f32.mrb[45].mxu0  ;;  %v1345_v56 = vadd.f32 %v1320_v15, %v4566_v11  ;;  %v1321_v0 = vmul.f32 %v1296_v13, %v4573_v19  ;;  %v1191_v13 = vadd.f32 %v4359_v18, %v4283_v59 }
 0x1cb   : > { %v1441_v38 = vmul.f32 %v1416_v54, %v1241_v55  ;;  %v1417_v62 = vadd.f32 1.0, %v3434_v45  ;;  %v1015_v53 = vpop.f32.mrb[46].mxu0  ;;  %v1196_v59 = vadd.f32 %v4359_v18, %v4292_v31 }
 0x1cc   : > { %v1272_v9 = vmul.f32 0.044715, %v4594_v61  ;;  %v4601_v24 = vadd.f32 %v4313_v28, %v1015_v53  ;;  %v2961_v58 = vpop.f32.mrb[47].mxu0  ;;  %v1370_v35 = vmul.f32 0.7978846, %v1345_v56  ;;  %v1346_v48 = vadd.f32 %v1321_v0, %v4573_v19 }
 0x1cd   : > { %v4604_v27 = vadd.f32 %v1441_v38, %v1188_v29  ;;  %v1442_v15 = vmul.f32 %v1417_v62, %v1242_v52  ;;  %v4612_v41 = vpop.f32.mrb[96].mxu1  ;;  %v1243_v38 = vmul.f32 0.5, %v4538_v57 }
 0x1ce   : > { %v1297_v55 = vmul.f32 %v1272_v9, %v4594_v61  ;;  %v1273_v32 = vmul.f32 0.044715, %v4601_v24  ;;  %3439 = vtanh.f32 %v1370_v35  ;;  %v1371_v54 = vmul.f32 0.7978846, %v1346_v48  ;;  %5065 = vst [vmem:[#allocation13_spill] sm:$0xff] %v4612_v41  ;;  %v3122_v0 = vpop.f32.mrb[97].mxu1 }
 0x1cf   : > { %v4610_v45 = vadd.f32 %v1442_v15, %v1191_v13  ;;  %v4619_v35 = vpop.f32.mrb[98].mxu1 }
 0x1d0   : > { %v3436_v58 = vpop.eup %3435  ;;  %v1298_v56 = vmul.f32 %v1273_v32, %v4601_v24  ;;  %3441 = vtanh.f32 %v1371_v54  ;;  %v1322_v29 = vmul.f32 %v1297_v55, %v4594_v61  ;;  %5066 = vst [vmem:[#allocation14_spill] sm:$0xff] %v4619_v35  ;;  %v3123_v55 = vpop.f32.mrb[99].mxu1  ;;  %v1244_v54 = vmul.f32 0.5, %v4545_v25 }
 0x1d1   : > { %5064 = vst [vmem:[#allocation9_spill] sm:$0xff] %v4610_v45  ;;  %v1418_v52 = vadd.f32 1.0, %v3436_v58  ;;  %v1020_v62 = vpop.f32.mrb[48].mxu0 }
 0x1d2   : > { %v3438_v53 = vpop.eup %3437  ;;  %v4622_v9 = vadd.f32 %v4313_v28, %v1020_v62  ;;  %v2964_v48 = vpop.f32.mrb[49].mxu0  ;;  %v1347_v13 = vadd.f32 %v1322_v29, %v4594_v61  ;;  %v1323_v15 = vmul.f32 %v1298_v56, %v4601_v24  ;;  %v1199_v62 = vadd.f32 %v4359_v18, %v4294_v22 }
 0x1d3   : > { %v1443_v32 = vmul.f32 %v1418_v52, %v1243_v38  ;;  %v1419_v31 = vadd.f32 1.0, %v3438_v53  ;;  %v1023_v0 = vpop.f32.mrb[50].mxu0 }
 0x1d4   : > { %v1274_v57 = vmul.f32 0.044715, %v4622_v9  ;;  %v2965_v58 = vpop.f32.mrb[51].mxu0  ;;  %v1372_v41 = vmul.f32 0.7978846, %v1347_v13  ;;  %v1348_v35 = vadd.f32 %v1323_v15, %v4601_v24  ;;  %v1245_v15 = vmul.f32 0.5, %v4566_v11 }
 0x1d5   : > { %v4629_v45 = vadd.f32 %v1443_v32, %v1196_v59  ;;  %v1444_v29 = vmul.f32 %v1419_v31, %v1244_v54  ;;  %v4636_v25 = vpop.f32.mrb[100].mxu1  ;;  %v1204_v59 = vadd.f32 %v4359_v18, %v4301_v23  ;;  %v1246_v58 = vmul.f32 0.5, %v4573_v19 }
 0x1d6   : > { %v1299_v56 = vmul.f32 %v1274_v57, %v4622_v9  ;;  %3443 = vtanh.f32 %v1372_v41  ;;  %v1373_v38 = vmul.f32 0.7978846, %v1348_v35  ;;  %v3126_v13 = vpop.f32.mrb[101].mxu1 }
 0x1d7   : > { %v4634_v52 = vadd.f32 %v1444_v29, %v1199_v62  ;;  %v2123_v32 = vpop.f32.mrb[102].mxu1  ;;  %v1207_v13 = vadd.f32 %v4359_v18, %v4303_v37 }
 0x1d8   : > { %v3440_v53 = vpop.eup %3439  ;;  %3445 = vtanh.f32 %v1373_v38  ;;  %v1324_v48 = vmul.f32 %v1299_v56, %v4622_v9  ;;  %v3127_v0 = vpop.f32.mrb[103].mxu1 }
 0x1d9   : > { %v1420_v22 = vadd.f32 1.0, %v3440_v53  ;;  %v1836_v55 = vpop.f32.mrb[52].mxu0 }
 0x1da   : > { %v3442_v54 = vpop.eup %3441  ;;  %v4643_v41 = vadd.f32 %v4313_v28, %v1836_v55  ;;  %v3024_v35 = vpop.f32.mrb[53].mxu0  ;;  %v1349_v31 = vadd.f32 %v1324_v48, %v4622_v9 }
 0x1db   : > { %v1445_v57 = vmul.f32 %v1420_v22, %v1245_v15  ;;  %v1421_v62 = vadd.f32 1.0, %v3442_v54  ;;  %v1839_v29 = vpop.f32.mrb[54].mxu0  ;;  %v1247_v35 = vmul.f32 0.5, %v4594_v61 }
 0x1dc   : > { %v2151_v23 = vmul.f32 0.044715, %v4643_v41  ;;  %v4649_v11 = vadd.f32 %v4313_v28, %v1839_v29  ;;  %v3025_v56 = vpop.f32.mrb[55].mxu0  ;;  %v1374_v38 = vmul.f32 0.7978846, %v1349_v31 }
 0x1dd   : > { %v4651_v53 = vadd.f32 %v1445_v57, %v1204_v59  ;;  %v1446_v55 = vmul.f32 %v1421_v62, %v1246_v58  ;;  %v1212_v59 = vadd.f32 %v4359_v18, %v4306_v44  ;;  %v1248_v56 = vmul.f32 0.5, %v4601_v24 }
 0x1de   : > { %v2176_v48 = vmul.f32 %v2151_v23, %v4643_v41  ;;  %v2152_v15 = vmul.f32 0.044715, %v4649_v11  ;;  %3447 = vtanh.f32 %v1374_v38 }
 0x1df   : > { %v4657_v19 = vadd.f32 %v1446_v55, %v1207_v13 }
 0x1e0   : > { %v3444_v22 = vpop.eup %3443  ;;  %v2177_v32 = vmul.f32 %v2152_v15, %v4649_v11  ;;  %v2201_v54 = vmul.f32 %v2176_v48, %v4643_v41 }
 0x1e1   : > { %v1422_v31 = vadd.f32 1.0, %v3444_v22  ;;  %v1844_v37 = vpop.f32.mrb[56].mxu0 }
 0x1e2   : > { %v3446_v0 = vpop.eup %3445  ;;  %v4665_v57 = vadd.f32 %v4313_v28, %v1844_v37  ;;  %v3028_v58 = vpop.f32.mrb[57].mxu0  ;;  %v2226_v62 = vadd.f32 %v2201_v54, %v4643_v41  ;;  %v2202_v29 = vmul.f32 %v2177_v32, %v4649_v11  ;;  %v1215_v54 = vadd.f32 %v4359_v18, %v4308_v60 }
 0x1e3   : > { %v1447_v23 = vmul.f32 %v1422_v31, %v1247_v35  ;;  %v1423_v38 = vadd.f32 1.0, %v3446_v0  ;;  %v1847_v13 = vpop.f32.mrb[58].mxu0  ;;  %v1249_v60 = vmul.f32 0.5, %v4622_v9 }
 0x1e4   : > { %v2153_v44 = vmul.f32 0.044715, %v4665_v57  ;;  %v4672_v61 = vadd.f32 %v4313_v28, %v1847_v13  ;;  %v3029_v55 = vpop.f32.mrb[59].mxu0  ;;  %v2251_v48 = vmul.f32 0.7978846, %v2226_v62  ;;  %v2227_v15 = vadd.f32 %v2202_v29, %v4649_v11 }
 0x1e5   : > { %v4675_v22 = vadd.f32 %v1447_v23, %v1212_v59  ;;  %v1448_v32 = vmul.f32 %v1423_v38, %v1248_v56  ;;  %v1220_v59 = vadd.f32 %v4359_v18, %v4315_v5 }
 0x1e6   : > { %v2178_v35 = vmul.f32 %v2153_v44, %v4665_v57  ;;  %v2154_v24 = vmul.f32 0.044715, %v4672_v61  ;;  %3449 = vtanh.f32 %v2251_v48  ;;  %v2252_v31 = vmul.f32 0.7978846, %v2227_v15 }
 0x1e7   : > { %v4681_v37 = vadd.f32 %v1448_v32, %v1215_v54 }
 0x1e8   : > { %v3448_v0 = vpop.eup %3447  ;;  %v2179_v58 = vmul.f32 %v2154_v24, %v4672_v61  ;;  %3451 = vtanh.f32 %v2252_v31  ;;  %v2203_v62 = vmul.f32 %v2178_v35, %v4665_v57 }
 0x1e9   : > { %v1424_v29 = vadd.f32 1.0, %v3448_v0  ;;  %v1852_v23 = vpop.f32.mrb[60].mxu0 }
 0x1ea   : > { %v4689_v56 = vadd.f32 %v4313_v28, %v1852_v23  ;;  %v3032_v38 = vpop.f32.mrb[61].mxu0  ;;  %v2228_v13 = vadd.f32 %v2203_v62, %v4665_v57  ;;  %v2204_v44 = vmul.f32 %v2179_v58, %v4672_v61  ;;  %v2126_v23 = vmul.f32 0.5, %v4643_v41 }
 0x1eb   : > { %v1449_v55 = vmul.f32 %v1424_v29, %v1249_v60  ;;  %v1855_v48 = vpop.f32.mrb[62].mxu0  ;;  %v2025_v29 = vadd.f32 %v4359_v18, %v4322_v4 }
 0x1ec   : > { %v2155_v15 = vmul.f32 0.044715, %v4689_v56  ;;  %v4695_v54 = vadd.f32 %v4313_v28, %v1855_v48  ;;  %v3033_v5 = vpop.f32.mrb[63].mxu0  ;;  %v2253_v32 = vmul.f32 0.7978846, %v2228_v13  ;;  %v2229_v9 = vadd.f32 %v2204_v44, %v4672_v61 }
 0x1ed   : > { %v4698_v35 = vadd.f32 %v1449_v55, %v1220_v59 }
 0x1ee   : > { %v2180_v24 = vmul.f32 %v2155_v15, %v4689_v56  ;;  %v2156_v31 = vmul.f32 0.044715, %v4695_v54  ;;  %3453 = vtanh.f32 %v2253_v32  ;;  %v2254_v0 = vmul.f32 0.7978846, %v2229_v9 }
 0x1ef   : > { %v2127_v32 = vmul.f32 0.5, %v4649_v11 }
 0x1f0   : > { %v3450_v58 = vpop.eup %3449  ;;  %v2181_v62 = vmul.f32 %v2156_v31, %v4695_v54  ;;  %3455 = vtanh.f32 %v2254_v0  ;;  %v2205_v60 = vmul.f32 %v2180_v24, %v4689_v56 }
 0x1f1   : > { %v2301_v59 = vadd.f32 1.0, %v3450_v58  ;;  %v1860_v38 = vpop.f32.mrb[64].mxu0 }
 0x1f2   : > { %v3452_v13 = vpop.eup %3451  ;;  %v4708_v44 = vadd.f32 %v4313_v28, %v1860_v38  ;;  %v3036_v55 = vpop.f32.mrb[65].mxu0  ;;  %v2230_v48 = vadd.f32 %v2205_v60, %v4689_v56  ;;  %v2206_v15 = vmul.f32 %v2181_v62, %v4695_v54  ;;  %v2028_v60 = vadd.f32 %v4359_v18, %v4325_v63 }
 0x1f3   : > { %v2326_v5 = vmul.f32 %v2301_v59, %v2126_v23  ;;  %v2302_v9 = vadd.f32 1.0, %v3452_v13  ;;  %v1863_v24 = vpop.f32.mrb[66].mxu0 }
 0x1f4   : > { %v2157_v4 = vmul.f32 0.044715, %v4708_v44  ;;  %v4716_v41 = vadd.f32 %v4313_v28, %v1863_v24  ;;  %v3037_v31 = vpop.f32.mrb[67].mxu0  ;;  %v2255_v0 = vmul.f32 0.7978846, %v2230_v48  ;;  %v2231_v58 = vadd.f32 %v2206_v15, %v4695_v54 }
 0x1f5   : > { %v2351_v38 = vadd.f32 %v2326_v5, %v2025_v29  ;;  %v2327_v62 = vmul.f32 %v2302_v9, %v2127_v32  ;;  %v2033_v29 = vadd.f32 %v4359_v18, %v4338_v17  ;;  %v2128_v5 = vmul.f32 0.5, %v4665_v57 }
 0x1f6   : > { %v2182_v23 = vmul.f32 %v2157_v4, %v4708_v44  ;;  %v2158_v11 = vmul.f32 0.044715, %v4716_v41  ;;  %3457 = vtanh.f32 %v2255_v0  ;;  %v2256_v59 = vmul.f32 0.7978846, %v2231_v58  ;;  %v4738_v4 = vld [vmem:[%s5017_s2] ss:$0 sm:$0xff] }
 0x1f7   : > { %v2376_v13 = vmax.f32 %v4380_v30, %v2351_v38  ;;  %v2352_v28 = vadd.f32 %v2327_v62, %v2028_v60  ;;  %v2129_v38 = vmul.f32 0.5, %v4672_v61 }
 0x1f8   : > { %v3454_v55 = vpop.eup %3453  ;;  %v2183_v63 = vmul.f32 %v2158_v11, %v4716_v41  ;;  %3459 = vtanh.f32 %v2256_v59  ;;  %v2207_v48 = vmul.f32 %v2182_v23, %v4708_v44 }
 0x1f9   : > { %v2707_v15 = vpack.c.bf16 %v2376_v13, %v2376_v13  ;;  %v2377_v30 = vmax.f32 %v4386_v12, %v2352_v28  ;;  %v2303_v32 = vadd.f32 1.0, %v3454_v55  ;;  %v1868_v9 = vpop.f32.mrb[68].mxu0 }
 0x1fa   : > { %v3456_v24 = vpop.eup %3455  ;;  %v4741_v31 = vadd.f32 %v4738_v4, %v1868_v9  ;;  %v3040_v17 = vpop.f32.mrb[69].mxu0  ;;  %v2232_v0 = vadd.f32 %v2207_v48, %v4708_v44  ;;  %v2208_v58 = vmul.f32 %v2183_v63, %v4716_v41  ;;  %v2036_v63 = vadd.f32 %v4359_v18, %v4342_v21 }
 0x1fb   : > { %2503 = vst.msk [vmem:[%s4727_s14] sm:$0xf] %vm2502_vm7, %v2707_v15  ;;  %v2708_v12 = vpack.c.bf16 %v2377_v30, %v2377_v30  ;;  %v2328_v57 = vmul.f32 %v2303_v32, %v2128_v5  ;;  %v2304_v60 = vadd.f32 1.0, %v3456_v24  ;;  %v1871_v62 = vpop.f32.mrb[70].mxu0 }
 0x1fc   : > { %v2159_v23 = vmul.f32 0.044715, %v4741_v31  ;;  %v4750_v11 = vadd.f32 %v4738_v4, %v1871_v62  ;;  %v3041_v59 = vpop.f32.mrb[71].mxu0  ;;  %v2257_v13 = vmul.f32 0.7978846, %v2232_v0  ;;  %v2233_v28 = vadd.f32 %v2208_v58, %v4716_v41 }
 0x1fd   : > { %2504 = vst.msk [vmem:[%s4727_s14 + $0x4] sm:$0xf] %vm2502_vm7, %v2708_v12  ;;  %v2353_v55 = vadd.f32 %v2328_v57, %v2033_v29  ;;  %v2329_v48 = vmul.f32 %v2304_v60, %v2129_v38  ;;  %v2041_v29 = vadd.f32 %v4359_v18, %v4361_v3  ;;  %v2130_v58 = vmul.f32 0.5, %v4689_v56 }
 0x1fe   : > { %v2184_v61 = vmul.f32 %v2159_v23, %v4741_v31  ;;  %v2160_v15 = vmul.f32 0.044715, %v4750_v11  ;;  %3461 = vtanh.f32 %v2257_v13  ;;  %v2258_v30 = vmul.f32 0.7978846, %v2233_v28 }
 0x1ff   : > { %v2378_v5 = vmax.f32 %v4408_v14, %v2353_v55  ;;  %v2354_v32 = vadd.f32 %v2329_v48, %v2036_v63 }
 0x200   : > { %v3458_v9 = vpop.eup %3457  ;;  %v2185_v24 = vmul.f32 %v2160_v15, %v4750_v11  ;;  %3463 = vtanh.f32 %v2258_v30  ;;  %v2209_v21 = vmul.f32 %v2184_v61, %v4741_v31  ;;  %v4784_v15 = vld [vmem:[%s5019_s4] ss:$0 sm:$0xff] }
 0x201   : > { %v2709_v17 = vpack.c.bf16 %v2378_v5, %v2378_v5  ;;  %v2379_v0 = vmax.f32 %v4414_v20, %v2354_v32  ;;  %v2305_v12 = vadd.f32 1.0, %v3458_v9  ;;  %v1876_v57 = vpop.f32.mrb[72].mxu0  ;;  %v2131_v20 = vmul.f32 0.5, %v4695_v54 }
 0x202   : > { %v3460_v38 = vpop.eup %3459  ;;  %v4767_v14 = vadd.f32 %v4738_v4, %v1876_v57  ;;  %v3044_v60 = vpop.f32.mrb[73].mxu0  ;;  %v2234_v62 = vadd.f32 %v2209_v21, %v4741_v31  ;;  %v2210_v18 = vmul.f32 %v2185_v24, %v4750_v11  ;;  %v2044_v54 = vadd.f32 %v4784_v15, %v4367_v1 }
 0x203   : > { %2505 = vst.msk [vmem:[%s4727_s14 + $0x8] sm:$0xf] %vm2502_vm7, %v2709_v17  ;;  %v2710_v3 = vpack.c.bf16 %v2379_v0, %v2379_v0  ;;  %v2330_v23 = vmul.f32 %v2305_v12, %v2130_v58  ;;  %v2306_v59 = vadd.f32 1.0, %v3460_v38  ;;  %v1879_v56 = vpop.f32.mrb[74].mxu0  ;;  %v2049_v0 = vadd.f32 %v4784_v15, %v4388_v40 }
 0x204   : > { %v2161_v13 = vmul.f32 0.044715, %v4767_v14  ;;  %v4776_v28 = vadd.f32 %v4738_v4, %v1879_v56  ;;  %v3045_v55 = vpop.f32.mrb[75].mxu0  ;;  %v2259_v63 = vmul.f32 0.7978846, %v2234_v62  ;;  %v2235_v48 = vadd.f32 %v2210_v18, %v4750_v11 }
 0x205   : > { %2506 = vst.msk [vmem:[%s4727_s14 + $0xc] sm:$0xf] %vm2502_vm7, %v2710_v3  ;;  %v2355_v61 = vadd.f32 %v2330_v23, %v2041_v29  ;;  %v2331_v30 = vmul.f32 %v2306_v59, %v2131_v20  ;;  %v2132_v57 = vmul.f32 0.5, %v4708_v44 }
 0x206   : > { %v2186_v5 = vmul.f32 %v2161_v13, %v4767_v14  ;;  %v2162_v32 = vmul.f32 0.044715, %v4776_v28  ;;  %3465 = vtanh.f32 %v2259_v63  ;;  %v2260_v9 = vmul.f32 0.7978846, %v2235_v48 }
 0x207   : > { %v2380_v24 = vmax.f32 %v4436_v16, %v2355_v61  ;;  %v2356_v21 = vadd.f32 %v2331_v30, %v2044_v54  ;;  %v2052_v54 = vadd.f32 %v4784_v15, %v4395_v47 }
 0x208   : > { %v3462_v29 = vpop.eup %3461  ;;  %v2187_v17 = vmul.f32 %v2162_v32, %v4776_v28  ;;  %3467 = vtanh.f32 %v2260_v9  ;;  %v2211_v1 = vmul.f32 %v2186_v5, %v4767_v14 }
 0x209   : > { %v2711_v58 = vpack.c.bf16 %v2380_v24, %v2380_v24  ;;  %v2381_v12 = vmax.f32 %v4442_v8, %v2356_v21  ;;  %v2307_v38 = vadd.f32 1.0, %v3462_v29  ;;  %v1884_v60 = vpop.f32.mrb[76].mxu0  ;;  %v2133_v8 = vmul.f32 0.5, %v4716_v41 }
 0x20a   : > { %v3464_v62 = vpop.eup %3463  ;;  %v4798_v16 = vadd.f32 %v4738_v4, %v1884_v60  ;;  %v3048_v18 = vpop.f32.mrb[77].mxu0  ;;  %v2236_v3 = vadd.f32 %v2211_v1, %v4767_v14  ;;  %v2212_v40 = vmul.f32 %v2187_v17, %v4776_v28  ;;  %v2057_v17 = vadd.f32 %v4784_v15, %v4416_v36 }
 0x20b   : > { %2507 = vst.msk [vmem:[%s4727_s14 + $0x10] sm:$0xf] %vm2502_vm7, %v2711_v58  ;;  %v2712_v23 = vpack.c.bf16 %v2381_v12, %v2381_v12  ;;  %v2332_v20 = vmul.f32 %v2307_v38, %v2132_v57  ;;  %v2308_v59 = vadd.f32 1.0, %v3464_v62  ;;  %v1887_v44 = vpop.f32.mrb[78].mxu0  ;;  %v2134_v58 = vmul.f32 0.5, %v4741_v31 }
 0x20c   : > { %v2163_v56 = vmul.f32 0.044715, %v4798_v16  ;;  %v4807_v13 = vadd.f32 %v4738_v4, %v1887_v44  ;;  %v3049_v55 = vpop.f32.mrb[79].mxu0  ;;  %v2261_v63 = vmul.f32 0.7978846, %v2236_v3  ;;  %v2237_v48 = vadd.f32 %v2212_v40, %v4776_v28 }
 0x20d   : > { %2508 = vst.msk [vmem:[%s4727_s14 + $0x14] sm:$0xf] %vm2502_vm7, %v2712_v23  ;;  %v2357_v61 = vadd.f32 %v2332_v20, %v2049_v0  ;;  %v2333_v30 = vmul.f32 %v2308_v59, %v2133_v8  ;;  %v2060_v55 = vadd.f32 %v4784_v15, %v4423_v6 }
 0x20e   : > { %v2188_v41 = vmul.f32 %v2163_v56, %v4798_v16  ;;  %v2164_v5 = vmul.f32 0.044715, %v4807_v13  ;;  %3469 = vtanh.f32 %v2261_v63  ;;  %v2262_v32 = vmul.f32 0.7978846, %v2237_v48 }
 0x20f   : > { %v2382_v9 = vmax.f32 %v4464_v33, %v2357_v61  ;;  %v2358_v24 = vadd.f32 %v2333_v30, %v2052_v54 }
 0x210   : > { %v3466_v21 = vpop.eup %3465  ;;  %v2189_v29 = vmul.f32 %v2164_v5, %v4807_v13  ;;  %3471 = vtanh.f32 %v2262_v32  ;;  %v2213_v47 = vmul.f32 %v2188_v41, %v4798_v16  ;;  %v2065_v32 = vadd.f32 %v4784_v15, %v4444_v49 }
 0x211   : > { %v2713_v0 = vpack.c.bf16 %v2382_v9, %v2382_v9  ;;  %v2383_v1 = vmax.f32 %v4470_v10, %v2358_v24  ;;  %v2309_v12 = vadd.f32 1.0, %v3466_v21  ;;  %v1892_v57 = vpop.f32.mrb[80].mxu0  ;;  %v2135_v10 = vmul.f32 0.5, %v4750_v11 }
 0x212   : > { %v3468_v38 = vpop.eup %3467  ;;  %v4824_v33 = vadd.f32 %v4738_v4, %v1892_v57  ;;  %v3052_v60 = vpop.f32.mrb[81].mxu0  ;;  %v2238_v62 = vadd.f32 %v2213_v47, %v4798_v16  ;;  %v2214_v36 = vmul.f32 %v2189_v29, %v4807_v13  ;;  %v2136_v21 = vmul.f32 0.5, %v4767_v14 }
 0x213   : > { %2509 = vst.msk [vmem:[%s4727_s14 + $0x18] sm:$0xf] %vm2502_vm7, %v2713_v0  ;;  %v2714_v18 = vpack.c.bf16 %v2383_v1, %v2383_v1  ;;  %v2334_v3 = vmul.f32 %v2309_v12, %v2134_v58  ;;  %v2310_v40 = vadd.f32 1.0, %v3468_v38  ;;  %v1895_v31 = vpop.f32.mrb[82].mxu0 }
 0x214   : > { %v2165_v23 = vmul.f32 0.044715, %v4824_v33  ;;  %v4833_v20 = vadd.f32 %v4738_v4, %v1895_v31  ;;  %v3053_v8 = vpop.f32.mrb[83].mxu0  ;;  %v2263_v59 = vmul.f32 0.7978846, %v2238_v62  ;;  %v2239_v44 = vadd.f32 %v2214_v36, %v4807_v13 }
 0x215   : > { %2510 = vst.msk [vmem:[%s4727_s14 + $0x1c] sm:$0xf] %vm2502_vm7, %v2714_v18  ;;  %v2359_v56 = vadd.f32 %v2334_v3, %v2057_v17  ;;  %v2335_v63 = vmul.f32 %v2310_v40, %v2135_v10  ;;  %v2068_v10 = vadd.f32 %v4784_v15, %v4451_v2 }
 0x216   : > { %v2190_v11 = vmul.f32 %v2165_v23, %v4824_v33  ;;  %v2166_v48 = vmul.f32 0.044715, %v4833_v20  ;;  %3473 = vtanh.f32 %v2263_v59  ;;  %v2264_v61 = vmul.f32 0.7978846, %v2239_v44 }
 0x217   : > { %v2384_v54 = vmax.f32 %v4492_v7, %v2359_v56  ;;  %v2360_v30 = vadd.f32 %v2335_v63, %v2060_v55  ;;  %v2073_v55 = vadd.f32 %v4784_v15, %v4472_v42 }
 0x218   : > { %v3470_v41 = vpop.eup %3469  ;;  %v2191_v5 = vmul.f32 %v2166_v48, %v4833_v20  ;;  %3475 = vtanh.f32 %v2264_v61  ;;  %v2215_v6 = vmul.f32 %v2190_v11, %v4824_v33  ;;  %v2138_v48 = vmul.f32 0.5, %v4798_v16 }
 0x219   : > { %v2715_v9 = vpack.c.bf16 %v2384_v54, %v2384_v54  ;;  %v2385_v24 = vmax.f32 %v4498_v26, %v2360_v30  ;;  %v2311_v29 = vadd.f32 1.0, %v3470_v41  ;;  %v1900_v17 = vpop.f32.mrb[84].mxu0  ;;  %v2137_v26 = vmul.f32 0.5, %v4776_v28 }
 0x21a   : > { %v3472_v47 = vpop.eup %3471  ;;  %v4850_v7 = vadd.f32 %v4738_v4, %v1900_v17  ;;  %v3056_v0 = vpop.f32.mrb[85].mxu0  ;;  %v2240_v1 = vadd.f32 %v2215_v6, %v4824_v33  ;;  %v2216_v49 = vmul.f32 %v2191_v5, %v4833_v20 }
 0x21b   : > { %2511 = vst.msk [vmem:[%s4727_s14 + $0x20] sm:$0xf] %vm2502_vm7, %v2715_v9  ;;  %v2716_v58 = vpack.c.bf16 %v2385_v24, %v2385_v24  ;;  %v2336_v12 = vmul.f32 %v2311_v29, %v2136_v21  ;;  %v2312_v57 = vadd.f32 1.0, %v3472_v47  ;;  %v1903_v14 = vpop.f32.mrb[86].mxu0 }
 0x21c   : > { %v2167_v38 = vmul.f32 0.044715, %v4850_v7  ;;  %v4859_v60 = vadd.f32 %v4738_v4, %v1903_v14  ;;  %v3057_v62 = vpop.f32.mrb[87].mxu0  ;;  %v2265_v36 = vmul.f32 0.7978846, %v2240_v1  ;;  %v2241_v18 = vadd.f32 %v2216_v49, %v4833_v20  ;;  %v5067_v1 = vld [vmem:[#allocation11_spill] sm:$0xff] }
 0x21d   : > { %2512 = vst.msk [vmem:[%s4727_s14 + $0x24] sm:$0xf] %vm2502_vm7, %v2716_v58  ;;  %v2361_v3 = vadd.f32 %v2336_v12, %v2065_v32  ;;  %v2337_v40 = vmul.f32 %v2312_v57, %v2137_v26  ;;  %v2076_v49 = vadd.f32 %v4784_v15, %v5067_v1 }
 0x21e   : > { %v2192_v28 = vmul.f32 %v2167_v38, %v4850_v7  ;;  %v2168_v31 = vmul.f32 0.044715, %v4859_v60  ;;  %3477 = vtanh.f32 %v2265_v36  ;;  %v2266_v23 = vmul.f32 0.7978846, %v2241_v18  ;;  %v5068_v36 = vld [vmem:[#allocation12_spill] sm:$0xff] }
 0x21f   : > { %v2386_v8 = vmax.f32 %v4520_v50, %v2361_v3  ;;  %v2362_v59 = vadd.f32 %v2337_v40, %v2068_v10  ;;  %v2081_v18 = vadd.f32 %v4784_v15, %v5068_v36 }
 0x220   : > { %v3474_v44 = vpop.eup %3473  ;;  %v2193_v56 = vmul.f32 %v2168_v31, %v4859_v60  ;;  %3479 = vtanh.f32 %v2266_v23  ;;  %v2217_v2 = vmul.f32 %v2192_v28, %v4850_v7  ;;  %v2140_v28 = vmul.f32 0.5, %v4824_v33 }
 0x221   : > { %v2717_v63 = vpack.c.bf16 %v2386_v8, %v2386_v8  ;;  %v2387_v11 = vmax.f32 %v4526_v43, %v2362_v59  ;;  %v2313_v61 = vadd.f32 1.0, %v3474_v44  ;;  %v1908_v54 = vpop.f32.mrb[88].mxu0  ;;  %v2139_v43 = vmul.f32 0.5, %v4807_v13 }
 0x222   : > { %v3476_v30 = vpop.eup %3475  ;;  %v4876_v50 = vadd.f32 %v4738_v4, %v1908_v54  ;;  %v3060_v41 = vpop.f32.mrb[89].mxu0  ;;  %v2242_v5 = vadd.f32 %v2217_v2, %v4850_v7  ;;  %v2218_v42 = vmul.f32 %v2193_v56, %v4859_v60 }
 0x223   : > { %2513 = vst.msk [vmem:[%s4727_s14 + $0x28] sm:$0xf] %vm2502_vm7, %v2717_v63  ;;  %v2718_v32 = vpack.c.bf16 %v2387_v11, %v2387_v11  ;;  %v2338_v6 = vmul.f32 %v2313_v61, %v2138_v48  ;;  %v2314_v9 = vadd.f32 1.0, %v3476_v30  ;;  %v1911_v16 = vpop.f32.mrb[90].mxu0 }
 0x224   : > { %v2169_v24 = vmul.f32 0.044715, %v4876_v50  ;;  %v4885_v21 = vadd.f32 %v4738_v4, %v1911_v16  ;;  %v3061_v29 = vpop.f32.mrb[91].mxu0  ;;  %v2267_v17 = vmul.f32 0.7978846, %v2242_v5  ;;  %v2243_v47 = vadd.f32 %v2218_v42, %v4859_v60  ;;  %v5069_v5 = vld [vmem:[#allocation4_spill] sm:$0xff] }
 0x225   : > { %2514 = vst.msk [vmem:[%s4727_s14 + $0x2c] sm:$0xf] %vm2502_vm7, %v2718_v32  ;;  %v2363_v0 = vadd.f32 %v2338_v6, %v2073_v55  ;;  %v2339_v58 = vmul.f32 %v2314_v9, %v2139_v43  ;;  %v2084_v42 = vadd.f32 %v4784_v15, %v5069_v5 }
 0x226   : > { %v2194_v13 = vmul.f32 %v2169_v24, %v4876_v50  ;;  %v2170_v12 = vmul.f32 0.044715, %v4885_v21  ;;  %3481 = vtanh.f32 %v2267_v17  ;;  %v2268_v26 = vmul.f32 0.7978846, %v2243_v47  ;;  %v5070_v17 = vld [vmem:[#allocation3_spill] sm:$0xff] }
 0x227   : > { %v2388_v57 = vmax.f32 %v4548_v46, %v2363_v0  ;;  %v2364_v14 = vadd.f32 %v2339_v58, %v2076_v49  ;;  %v2089_v47 = vadd.f32 %v4784_v15, %v5070_v17  ;;  %v2142_v58 = vmul.f32 0.5, %v4850_v7 }
 0x228   : > { %v3478_v38 = vpop.eup %3477  ;;  %v2195_v62 = vmul.f32 %v2170_v12, %v4885_v21  ;;  %3483 = vtanh.f32 %v2268_v26  ;;  %v2219_v3 = vmul.f32 %v2194_v13, %v4876_v50  ;;  %v2145_v17 = vmul.f32 0.5, %v4885_v21 }
 0x229   : > { %v2719_v10 = vpack.c.bf16 %v2388_v57, %v2388_v57  ;;  %v2389_v40 = vmax.f32 %v4554_v34, %v2364_v14  ;;  %v2315_v31 = vadd.f32 1.0, %v3478_v38  ;;  %v1916_v23 = vpop.f32.mrb[92].mxu0  ;;  %v2141_v34 = vmul.f32 0.5, %v4833_v20 }
 0x22a   : > { %v3480_v8 = vpop.eup %3479  ;;  %v4902_v46 = vadd.f32 %v4738_v4, %v1916_v23  ;;  %v3064_v59 = vpop.f32.mrb[93].mxu0  ;;  %v2244_v44 = vadd.f32 %v2219_v3, %v4876_v50  ;;  %v2220_v56 = vmul.f32 %v2195_v62, %v4885_v21 }
 0x22b   : > { %2515 = vst.msk [vmem:[%s4727_s14 + $0x30] sm:$0xf] %vm2502_vm7, %v2719_v10  ;;  %v2720_v55 = vpack.c.bf16 %v2389_v40, %v2389_v40  ;;  %v2340_v2 = vmul.f32 %v2315_v31, %v2140_v28  ;;  %v2316_v63 = vadd.f32 1.0, %v3480_v8  ;;  %v1919_v33 = vpop.f32.mrb[94].mxu0  ;;  %v5071_v8 = vld [vmem:[#allocation6_spill] sm:$0xff] }
 0x22c   : > { %v2171_v11 = vmul.f32 0.044715, %v4902_v46  ;;  %v4911_v48 = vadd.f32 %v4738_v4, %v1919_v33  ;;  %v3065_v61 = vpop.f32.mrb[95].mxu0  ;;  %v2269_v54 = vmul.f32 0.7978846, %v2244_v44  ;;  %v2245_v30 = vadd.f32 %v2220_v56, %v4885_v21 }
 0x22d   : > { %2516 = vst.msk [vmem:[%s4727_s14 + $0x34] sm:$0xf] %vm2502_vm7, %v2720_v55  ;;  %v2365_v41 = vadd.f32 %v2340_v2, %v2081_v18  ;;  %v2341_v32 = vmul.f32 %v2316_v63, %v2141_v34  ;;  %v2092_v59 = vadd.f32 %v4784_v15, %v5071_v8 }
 0x22e   : > { %v2196_v20 = vmul.f32 %v2171_v11, %v4902_v46  ;;  %v2172_v6 = vmul.f32 0.044715, %v4911_v48  ;;  %3485 = vtanh.f32 %v2269_v54  ;;  %v2270_v43 = vmul.f32 0.7978846, %v2245_v30  ;;  %v5072_v11 = vld [vmem:[#allocation5_spill] sm:$0xff] }
 0x22f   : > { %v2390_v9 = vmax.f32 %v4576_v51, %v2365_v41  ;;  %v2366_v16 = vadd.f32 %v2341_v32, %v2084_v42  ;;  %v2097_v61 = vadd.f32 %v4784_v15, %v5072_v11  ;;  %v5073_v41 = vld [vmem:[#allocation9_spill] sm:$0xff]  ;;  %v2144_v42 = vmul.f32 0.5, %v4876_v50 }
 0x230   : > { %v3482_v24 = vpop.eup %3481  ;;  %v2197_v29 = vmul.f32 %v2172_v6, %v4911_v48  ;;  %3487 = vtanh.f32 %v2270_v43  ;;  %v2221_v0 = vmul.f32 %v2196_v20, %v4902_v46 }
 0x231   : > { %v2721_v1 = vpack.c.bf16 %v2390_v9, %v2390_v9  ;;  %v2391_v49 = vmax.f32 %v4582_v39, %v2366_v16  ;;  %v2317_v13 = vadd.f32 1.0, %v3482_v24  ;;  %v1924_v12 = vpop.f32.mrb[96].mxu0  ;;  %v2143_v39 = vmul.f32 0.5, %v4859_v60 }
 0x232   : > { %v3484_v26 = vpop.eup %3483  ;;  %v4928_v51 = vadd.f32 %v4738_v4, %v1924_v12  ;;  %v3068_v57 = vpop.f32.mrb[97].mxu0  ;;  %v2246_v14 = vadd.f32 %v2221_v0, %v4902_v46  ;;  %v2222_v38 = vmul.f32 %v2197_v29, %v4911_v48 }
 0x233   : > { %2517 = vst.msk [vmem:[%s4727_s14 + $0x38] sm:$0xf] %vm2502_vm7, %v2721_v1  ;;  %v2722_v62 = vpack.c.bf16 %v2391_v49, %v2391_v49  ;;  %v2342_v36 = vmul.f32 %v2317_v13, %v2142_v58  ;;  %v2318_v18 = vadd.f32 1.0, %v3484_v26  ;;  %v1927_v7 = vpop.f32.mrb[98].mxu0  ;;  %v5074_v13 = vld [vmem:[#allocation8_spill] sm:$0xff] }
 0x234   : > { %v2173_v3 = vmul.f32 0.044715, %v4928_v51  ;;  %v4937_v10 = vadd.f32 %v4738_v4, %v1927_v7  ;;  %v3069_v40 = vpop.f32.mrb[99].mxu0  ;;  %v2271_v28 = vmul.f32 0.7978846, %v2246_v14  ;;  %v2247_v31 = vadd.f32 %v2222_v38, %v4911_v48 }
 0x235   : > { %2518 = vst.msk [vmem:[%s4727_s14 + $0x3c] sm:$0xf] %vm2502_vm7, %v2722_v62  ;;  %v2367_v23 = vadd.f32 %v2342_v36, %v2089_v47  ;;  %v2343_v44 = vmul.f32 %v2318_v18, %v2143_v39  ;;  %v2100_v12 = vadd.f32 %v4784_v15, %v5074_v13  ;;  %v5075_v36 = vld [vmem:[#allocation7_spill] sm:$0xff]  ;;  %v2146_v40 = vmul.f32 0.5, %v4902_v46 }
 0x236   : > { %v2198_v60 = vmul.f32 %v2173_v3, %v4928_v51  ;;  %v2174_v56 = vmul.f32 0.044715, %v4937_v10  ;;  %3489 = vtanh.f32 %v2271_v28  ;;  %v2272_v55 = vmul.f32 0.7978846, %v2247_v31 }
 0x237   : > { %v2392_v2 = vmax.f32 %v4604_v27, %v2367_v23  ;;  %v2368_v34 = vadd.f32 %v2343_v44, %v2092_v59  ;;  %v2105_v39 = vadd.f32 %v4784_v15, %v5075_v36  ;;  %v2147_v59 = vmul.f32 0.5, %v4911_v48 }
 0x238   : > { %v3486_v63 = vpop.eup %3485  ;;  %v2199_v33 = vmul.f32 %v2174_v56, %v4937_v10  ;;  %3491 = vtanh.f32 %v2272_v55  ;;  %v2223_v54 = vmul.f32 %v2198_v60, %v4928_v51  ;;  %v5076_v55 = vld [vmem:[#allocation10_spill] sm:$0xff] }
 0x239   : > { %v2723_v30 = vpack.c.bf16 %v2392_v2, %v2392_v2  ;;  %v2393_v5 = vmax.f32 %v5073_v41, %v2368_v34  ;;  %v2319_v32 = vadd.f32 1.0, %v3486_v63  ;;  %v1932_v20 = vpop.f32.mrb[100].mxu0 }
 0x23a   : > { %v3488_v27 = vpop.eup %3487  ;;  %v4954_v6 = vadd.f32 %v4738_v4, %v1932_v20  ;;  %v3072_v43 = vpop.f32.mrb[101].mxu0  ;;  %v2248_v9 = vadd.f32 %v2223_v54, %v4928_v51  ;;  %v2224_v16 = vmul.f32 %v2199_v33, %v4937_v10  ;;  %v5077_v33 = vld [vmem:[#allocation13_spill] sm:$0xff]  ;;  %v2148_v54 = vmul.f32 0.5, %v4928_v51 }
 0x23b   : > { %2519 = vst.msk [vmem:[%s4727_s14 + $0x40] sm:$0xf] %vm2502_vm7, %v2723_v30  ;;  %v2724_v24 = vpack.c.bf16 %v2393_v5, %v2393_v5  ;;  %v2344_v29 = vmul.f32 %v2319_v32, %v2144_v42  ;;  %v2320_v47 = vadd.f32 1.0, %v3488_v27  ;;  %v1935_v50 = vpop.f32.mrb[102].mxu0  ;;  %v2113_v11 = vadd.f32 %v4784_v15, %v5077_v33  ;;  %v5078_v27 = vld [vmem:[#allocation14_spill] sm:$0xff] }
 0x23c   : > { %v2175_v0 = vmul.f32 0.044715, %v4954_v6  ;;  %v3073_v1 = vpop.f32.mrb[103].mxu0  ;;  %v2273_v49 = vmul.f32 0.7978846, %v2248_v9  ;;  %v2249_v4 = vadd.f32 %v2224_v16, %v4937_v10  ;;  %v2149_v32 = vmul.f32 0.5, %v4937_v10 }
 0x23d   : > { %2520 = vst.msk [vmem:[%s4727_s14 + $0x44] sm:$0xf] %vm2502_vm7, %v2724_v24  ;;  %v2369_v58 = vadd.f32 %v2344_v29, %v2097_v61  ;;  %v2345_v26 = vmul.f32 %v2320_v47, %v2145_v17  ;;  %v2116_v43 = vadd.f32 %v4784_v15, %v5078_v27  ;;  %v2121_v24 = vadd.f32 %v4784_v15, %v4636_v25 }
 0x23e   : > { %v2200_v57 = vmul.f32 %v2175_v0, %v4954_v6  ;;  %3493 = vtanh.f32 %v2273_v49  ;;  %v2274_v21 = vmul.f32 0.7978846, %v2249_v4  ;;  %v2150_v17 = vmul.f32 0.5, %v4954_v6 }
 0x23f   : > { %v2394_v14 = vmax.f32 %v4629_v45, %v2369_v58  ;;  %v2370_v38 = vadd.f32 %v2345_v26, %v2100_v12 }
 0x240   : > { %v3490_v62 = vpop.eup %3489  ;;  %3495 = vtanh.f32 %v2274_v21  ;;  %v2225_v18 = vmul.f32 %v2200_v57, %v4954_v6 }
 0x241   : > { %v2725_v7 = vpack.c.bf16 %v2394_v14, %v2394_v14  ;;  %v2395_v3 = vmax.f32 %v4634_v52, %v2370_v38  ;;  %v2321_v28 = vadd.f32 1.0, %v3490_v62  ;;  %v2108_v52 = vadd.f32 %v4784_v15, %v5076_v55 }
 0x242   : > { %v3492_v31 = vpop.eup %3491  ;;  %v2250_v23 = vadd.f32 %v2225_v18, %v4954_v6 }
 0x243   : > { %2521 = vst.msk [vmem:[%s4727_s14 + $0x48] sm:$0xf] %vm2502_vm7, %v2725_v7  ;;  %v2726_v45 = vpack.c.bf16 %v2395_v3, %v2395_v3  ;;  %v2346_v8 = vmul.f32 %v2321_v28, %v2146_v40  ;;  %v2322_v44 = vadd.f32 1.0, %v3492_v31 }
 0x244   : > { %v2275_v60 = vmul.f32 0.7978846, %v2250_v23 }
 0x245   : > { %2522 = vst.msk [vmem:[%s4727_s14 + $0x4c] sm:$0xf] %vm2502_vm7, %v2726_v45  ;;  %v2371_v56 = vadd.f32 %v2346_v8, %v2105_v39  ;;  %v2347_v46 = vmul.f32 %v2322_v44, %v2147_v59 }
 0x246   : > { %3497 = vtanh.f32 %v2275_v60 }
 0x247   : > { %v2396_v2 = vmax.f32 %v4651_v53, %v2371_v56  ;;  %v2372_v34 = vadd.f32 %v2347_v46, %v2108_v52 }
 0x248   : > { %v3494_v63 = vpop.eup %3493 }
 0x249   : > { %v2727_v48 = vpack.c.bf16 %v2396_v2, %v2396_v2  ;;  %v2397_v61 = vmax.f32 %v4657_v19, %v2372_v34  ;;  %v2323_v30 = vadd.f32 1.0, %v3494_v63 }
 0x24a   : > { %v3496_v41 = vpop.eup %3495 }
 0x24b   : > { %2523 = vst.msk [vmem:[%s4727_s14 + $0x50] sm:$0xf] %vm2502_vm7, %v2727_v48  ;;  %v2728_v5 = vpack.c.bf16 %v2397_v61, %v2397_v61  ;;  %v2348_v42 = vmul.f32 %v2323_v30, %v2148_v54  ;;  %v2324_v53 = vadd.f32 1.0, %v3496_v41 }
 0x24d   : > { %2524 = vst.msk [vmem:[%s4727_s14 + $0x54] sm:$0xf] %vm2502_vm7, %v2728_v5  ;;  %v2373_v20 = vadd.f32 %v2348_v42, %v2113_v11  ;;  %v2349_v19 = vmul.f32 %v2324_v53, %v2149_v32 }
 0x24f   : > { %v2398_v51 = vmax.f32 %v4675_v22, %v2373_v20  ;;  %v2374_v9 = vadd.f32 %v2349_v19, %v2116_v43 }
 0x250   : > { %v3498_v16 = vpop.eup %3497 }
 0x251   : > { %v2729_v29 = vpack.c.bf16 %v2398_v51, %v2398_v51  ;;  %v2399_v10 = vmax.f32 %v4681_v37, %v2374_v9  ;;  %v2325_v47 = vadd.f32 1.0, %v3498_v16 }
 0x253   : > { %2525 = vst.msk [vmem:[%s4727_s14 + $0x58] sm:$0xf] %vm2502_vm7, %v2729_v29  ;;  %v2730_v50 = vpack.c.bf16 %v2399_v10, %v2399_v10  ;;  %v2350_v0 = vmul.f32 %v2325_v47, %v2150_v17 }
 0x255   : > { %2526 = vst.msk [vmem:[%s4727_s14 + $0x5c] sm:$0xf] %vm2502_vm7, %v2730_v50  ;;  %v2375_v1 = vadd.f32 %v2350_v0, %v2121_v24 }
 0x257   : > { %v2400_v22 = vmax.f32 %v4698_v35, %v2375_v1 }
 0x259   : > { %v2731_v49 = vpack.c.bf16 %v2400_v22, %v2400_v22 }
 0x25b   : > { %2527 = vst.msk [vmem:[%s4727_s14 + $0x60] sm:$0xf] %vm2502_vm7, %v2731_v49 }
 0x25c PF: > { %s15_s20 = sadd.s32 1, %s3531_s20   ;;  %s5079_s18 = smov %s3527_s19 }
 0x25d   : > { %p12_p5 = scmp.ge.s32.totalorder %s15_s20, 4   ;;  %s5080_s19 = smov %s5082_s21 }
 0x25f   :  { %14 = sbr.rel (!%p12_p5) target bundleno = 2 (0x2), region = 169 }

// kernel: run.11
= control target key start
LH: loop header
LB: loop body
LE: loop exit
PB: predicated region body
PF: predicated region fallthrough
CT: control target
= control target key end

     0   :  { %s2171_s18 = smov 0   ;;  %s2173_s19 = smov 0   ;;  %s2963_s0 = inlined_call_operand.vmem [shape: bf16[2,1,202,6], index: 0, kind: input, shape index: {}]   ;;  %s2964_s1 = inlined_call_operand.vmem [shape: bf16[18,8], index: 1, kind: input, shape index: {}]   ;;  %s2965_s2 = inlined_call_operand.vmem [shape: f32[1,8], index: 2, kind: input, shape index: {}]   ;;  %s2966_s3 = inlined_call_operand.vmem [shape: bf16[6,8], index: 3, kind: input, shape index: {}]   ;;  %s2967_s4 = inlined_call_operand.vmem [shape: f32[1,8], index: 4, kind: input, shape index: {}]   ;;  %s2968_s5 = inlined_call_operand.vmem [shape: bf16[2,100,8], index: 5, kind: output, shape index: {}]  }
   0x1   :  { %s2175_s20 = smov 0  }
   0x2 LB: > { %s27_s21 = sadd.s32 1, %s2131_s19  ;;  %p1629_p0 = scmp.ge.s32.totalorder %s2135_s20, 1  ;;  %s2135_s20 = sphi %s2175_s20, %s15_s20   ;;  %s2131_s19 = sphi %s2173_s19, %s2970_s19   ;;  %s2127_s18 = sphi %s2171_s18, %s2969_s18  }
   0x3   : > { %p29_p1 = scmp.ge.s32.totalorder %s27_s21, 2  ;;  %p207_p2 = scmp.lt.s32.totalorder %s2135_s20, 3 }
   0x5   : > { %s2972_s21 = smov (%p29_p1, %s27_s21), 0  ;;  %p208_p3 = pnand %p1629_p0, %p207_p2 }
   0x6   : > { %p243_p4 = scmp.lt.s32.totalorder (!%p208_p3), %s2127_s18, 1  ;;  %vm727_vm0 = vcmask (!%p208_p3), 1042432   ;;  %v2137_v0 = vmov (!%p208_p3), 0.0   ;;  %v699_v1 = vld [vmem:[%s2966_s3] sm:$0x7] (!%p208_p3)  ;;  %vm2138_vm1 = vmmov (!%p208_p3), 0  }
   0x7   : > { %211 = sbr.rel (%p208_p3) target bundleno = 481 (0x1e1), region = 40  ;;  %1817 = vmatprep.subr.bf16.mxu1 (!%p208_p3), %v2137_v0  ;;  %1785 = vmatprep.subr.bf16.mxu0 (!%p208_p3), %v2137_v0  ;;  %v2196_v2 = vsel (!%p208_p3), %vm727_vm0, %v699_v1, 0  ;;  %v2203_v3 = vld [vmem:[%s2964_s1] sm:$0xff] (!%p208_p3)   ;;  %vm315_vm2 = vcmask (!%p208_p3), 48128   ;;  %vm341_vm3 = vcmask (!%p208_p3), 41984   ;;  %vm600_vm4 = vcmask (!%p208_p3), 1040384  }
   0x8   : > { %1819 = vmatprep.mubr.msk.bf16.mxu1 (!%p208_p3), %vm2138_vm1, %v2137_v0  ;;  %1789 = vmatprep.mubr.msk.bf16.mxu0 (!%p208_p3), %vm2138_vm1, %v2137_v0  ;;  %v2060_v38 = vld [vmem:[%s2964_s1 + $0x8] ss:$0 sps:$4 sm:$0x11] (!%p208_p3)   ;;  %s2139_s7 = smov (!%p208_p3), 6   ;;  %s2140_s8 = smov (!%p208_p3), 12   ;;  %vm539_vm5 = vcmask (!%p208_p3), 97280  }
   0x9   : > { %1818 = vmatpush3.bf16.msra.mxu1 (!%p208_p3), %v2196_v2  ;;  %1786 = vmatpush3.bf16.msra.mxu0 (!%p208_p3), %v2203_v3  ;;  %v602_v45 = vsel (!%p208_p3), %vm600_vm4, %v2060_v38, 0  ;;  %vm578_vm6 = vcmask (!%p208_p3), 146432   ;;  %vm1520_vm7 = vcmask (!%p208_p3), 60416   ;;  %vm1533_vm8 = vcmask (!%p208_p3), 58368  }
   0xa   : > { %1847 = vmatprep.subr.bf16.mxu1 (!%p208_p3), %v2137_v0  ;;  %1787 = vmatprep.subr.bf16.mxu0 (!%p208_p3), %v2137_v0 }
   0xd   : > { %1788 = vmatpush3.bf16.msra.mxu0 (!%p208_p3), %v602_v45 }
   0xe   : > { %s2974_s18 = smov (!%p243_p4, %s2127_s18), 1  ;;  %1879 = vmatprep.subr.bf16.mxu0 %v2137_v0 }
   0xf   : > { %s1909_s26 = smul.u32 104, %s2974_s18 }
  0x10   : > { %s1910_s13 = smul.u32 52, %s2974_s18 }
  0x11   : > { %s2215_s29 = scalar_lea.vmem %s2963_s0, %s1909_s26 }
  0x12   : > { %v1693_v4 = vld [vmem:[%s2215_s29] sm:$0xff]   ;;  %v1740_v5 = vld [vmem:[%s2215_s29 + $0x8] sm:$0xff]   ;;  %v1741_v6 = vld [vmem:[%s2215_s29 + $0x10] sm:$0xff]   ;;  %s2853_s16 = scalar_lea.vmem %s2968_s5, %s1910_s13 }
  0x13   : > { %v1694_v7 = vunpack.c.l.bf16 %v1693_v4  ;;  %v1695_v8 = vunpack.c.h.bf16 %v1693_v4  ;;  %v1698_v9 = vunpack.c.l.bf16 %v1740_v5  ;;  %v1699_v10 = vunpack.c.h.bf16 %v1740_v5  ;;  %v1742_v11 = vld [vmem:[%s2215_s29 + $0x18] sm:$0xff]   ;;  %v1743_v12 = vld [vmem:[%s2215_s29 + $0x20] sm:$0xff]   ;;  %v1744_v13 = vld [vmem:[%s2215_s29 + $0x28] sm:$0xff]  }
  0x14   : > { %v1702_v14 = vunpack.c.l.bf16 %v1741_v6  ;;  %v1703_v15 = vunpack.c.h.bf16 %v1741_v6  ;;  %v1706_v16 = vunpack.c.l.bf16 %v1742_v11  ;;  %v1707_v17 = vunpack.c.h.bf16 %v1742_v11  ;;  %v1745_v18 = vld [vmem:[%s2215_s29 + $0x30] sm:$0xff]   ;;  %v1746_v19 = vld [vmem:[%s2215_s29 + $0x38] sm:$0xff]   ;;  %v1747_v20 = vld [vmem:[%s2215_s29 + $0x40] sm:$0xff]  }
  0x15   : > { %316 = vst.msk [vmem:[#allocation2] sm:$0xff] %vm315_vm2, %v1694_v7  ;;  %317 = vst.msk [vmem:[#allocation2 + $0x8] sm:$0xff] %vm315_vm2, %v1695_v8  ;;  %v1710_v21 = vunpack.c.l.bf16 %v1743_v12  ;;  %v1711_v22 = vunpack.c.h.bf16 %v1743_v12  ;;  %v1714_v23 = vunpack.c.l.bf16 %v1744_v13  ;;  %v1715_v24 = vunpack.c.h.bf16 %v1744_v13  ;;  %v1748_v25 = vld [vmem:[%s2215_s29 + $0x48] sm:$0xff]   ;;  %v1749_v26 = vld [vmem:[%s2215_s29 + $0x50] sm:$0xff]  }
  0x16   : > { %318 = vst.msk [vmem:[#allocation2 + $0x10] sm:$0xff] %vm315_vm2, %v1698_v9  ;;  %319 = vst.msk [vmem:[#allocation2 + $0x18] sm:$0xff] %vm315_vm2, %v1699_v10  ;;  %v1750_v27 = vld [vmem:[%s2215_s29 + $0x58] sm:$0xff]   ;;  %v1718_v28 = vunpack.c.l.bf16 %v1745_v18  ;;  %v1719_v29 = vunpack.c.h.bf16 %v1745_v18  ;;  %v1722_v30 = vunpack.c.l.bf16 %v1746_v19  ;;  %v1723_v31 = vunpack.c.h.bf16 %v1746_v19  ;;  %v287_v32 = vld [vmem:[%s2215_s29 + $0x60] sm:$0xf] }
  0x17   : > { %320 = vst.msk [vmem:[#allocation2 + $0x20] sm:$0xff] %vm315_vm2, %v1702_v14  ;;  %321 = vst.msk [vmem:[#allocation2 + $0x28] sm:$0xff] %vm315_vm2, %v1703_v15  ;;  %v288_v33 = vld [vmem:[%s2215_s29 + $0x64] sm:$0x1]  ;;  %v1726_v34 = vunpack.c.l.bf16 %v1747_v20  ;;  %v1727_v35 = vunpack.c.h.bf16 %v1747_v20  ;;  %v1730_v36 = vunpack.c.l.bf16 %v1748_v25  ;;  %v1731_v37 = vunpack.c.h.bf16 %v1748_v25 }
  0x18   : > { %322 = vst.msk [vmem:[#allocation2 + $0x30] sm:$0xff] %vm315_vm2, %v1706_v16  ;;  %323 = vst.msk [vmem:[#allocation2 + $0x38] sm:$0xff] %vm315_vm2, %v1707_v17  ;;  %v1734_v39 = vunpack.c.l.bf16 %v1749_v26  ;;  %v1735_v40 = vunpack.c.h.bf16 %v1749_v26  ;;  %v1738_v41 = vunpack.c.l.bf16 %v1750_v27  ;;  %v1739_v42 = vunpack.c.h.bf16 %v1750_v27 }
  0x19   : > { %324 = vst.msk [vmem:[#allocation2 + $0x40] sm:$0xff] %vm315_vm2, %v1710_v21  ;;  %325 = vst.msk [vmem:[#allocation2 + $0x48] sm:$0xff] %vm315_vm2, %v1711_v22  ;;  %v313_v43 = vunpack.c.l.bf16 %v287_v32  ;;  %v314_v44 = vunpack.c.l.bf16 %v288_v33 }
  0x1a   : > { %326 = vst.msk [vmem:[#allocation2 + $0x50] sm:$0xff] %vm315_vm2, %v1714_v23  ;;  %327 = vst.msk [vmem:[#allocation2 + $0x58] sm:$0xff] %vm315_vm2, %v1715_v24 }
  0x1b   : > { %328 = vst.msk [vmem:[#allocation2 + $0x60] sm:$0xff] %vm315_vm2, %v1718_v28  ;;  %329 = vst.msk [vmem:[#allocation2 + $0x68] sm:$0xff] %vm315_vm2, %v1719_v29 }
  0x1c   : > { %330 = vst.msk [vmem:[#allocation2 + $0x70] sm:$0xff] %vm315_vm2, %v1722_v30  ;;  %331 = vst.msk [vmem:[#allocation2 + $0x78] sm:$0xff] %vm315_vm2, %v1723_v31  ;;  %v2260_v46 = vld [vmem:[#allocation2 + $0x1] ss:$2 sm:$0xff] }
  0x1d   : > { %332 = vst.msk [vmem:[#allocation2 + $0x80] sm:$0xff] %vm315_vm2, %v1726_v34  ;;  %333 = vst.msk [vmem:[#allocation2 + $0x88] sm:$0xff] %vm315_vm2, %v1727_v35  ;;  %v2262_v47 = vld [vmem:[#allocation2 + $0x11] ss:$2 sm:$0xff]  ;;  %v2264_v48 = vld [vmem:[#allocation2 + $0x2] ss:$2 sm:$0xff] }
  0x1e   : > { %334 = vst.msk [vmem:[#allocation2 + $0x90] sm:$0xff] %vm315_vm2, %v1730_v36  ;;  %335 = vst.msk [vmem:[#allocation2 + $0x98] sm:$0xff] %vm315_vm2, %v1731_v37  ;;  %v1939_v49 = vpack.i.bf16 %v2262_v47, %v2260_v46  ;;  %v692_v50 = vpack.c.bf16 %v2262_v47, %v2260_v46  ;;  %v2271_v51 = vld [vmem:[#allocation2 + $0x21] ss:$2 sm:$0xff]  ;;  %v2275_v53 = vld [vmem:[#allocation2 + $0x12] ss:$2 sm:$0xff] }
  0x1f   : > { %336 = vst.msk [vmem:[#allocation2 + $0xa0] sm:$0xff] %vm315_vm2, %v1734_v39  ;;  %337 = vst.msk [vmem:[#allocation2 + $0xa8] sm:$0xff] %vm315_vm2, %v1735_v40  ;;  %v2273_v52 = vld [vmem:[#allocation2 + $0x31] ss:$2 sm:$0xff]  ;;  %v1208_v55 = vpack.c.bf16 %v2275_v53, %v2264_v48  ;;  %v2281_v56 = vld [vmem:[#allocation2 + $0x22] ss:$2 sm:$0xff]  ;;  %v1944_v58 = vpack.i.bf16 %v2275_v53, %v2264_v48 }
  0x20   : > { %338 = vst.msk [vmem:[#allocation2 + $0xb0] sm:$0xff] %vm315_vm2, %v1738_v41  ;;  %339 = vst.msk [vmem:[#allocation2 + $0xb8] sm:$0xff] %vm315_vm2, %v1739_v42  ;;  %v1949_v54 = vpack.i.bf16 %v2273_v52, %v2271_v51  ;;  %v2283_v57 = vld [vmem:[#allocation2 + $0x32] ss:$2 sm:$0xff]  ;;  %1940 = vrot.lane.b32.xlu0 %v1939_v49, %s2139_s7  ;;  %1820 = vmatmul.mubr.msk.bf16.vlgmr.msra.gmra.mrb[0].mxu1 %vm315_vm2, %v692_v50  ;;  %v2292_v60 = vld [vmem:[#allocation2 + $0x41] ss:$2 sm:$0xff]  ;;  %v693_v1 = vpack.c.bf16 %v2273_v52, %v2271_v51 }
  0x21   : > { %340 = vst.msk [vmem:[#allocation2 + $0xc0] sm:$0xff] %vm315_vm2, %v313_v43  ;;  %v1954_v59 = vpack.i.bf16 %v2283_v57, %v2281_v56  ;;  %v2294_v61 = vld [vmem:[#allocation2 + $0x51] ss:$2 sm:$0xff]  ;;  %1823 = vmatprep.mubr.msk.bf16.mxu1 %vm2138_vm1, %v2137_v0  ;;  %v2298_v62 = vld [vmem:[#allocation2 + $0x42] ss:$2 sm:$0xff]  ;;  %1848 = vmatpush3.bf16.msra.mxu1 %v2203_v3 }
  0x22   : > { %342 = vst.msk [vmem:[#allocation2 + $0xc8] sm:$0x3] %vm341_vm3, %v314_v44  ;;  %1950 = vrot.lane.b32.xlu1 %v1949_v54, %s2139_s7  ;;  %v2300_v63 = vld [vmem:[#allocation2 + $0x52] ss:$2 sm:$0xff]  ;;  %1849 = vmatprep.subr.bf16.mxu1 %v2137_v0  ;;  %v1959_v4 = vpack.i.bf16 %v2294_v61, %v2292_v60  ;;  %v2312_v6 = vld [vmem:[#allocation2 + $0x61] ss:$2 sm:$0xff]  ;;  %v694_v13 = vpack.c.bf16 %v2294_v61, %v2292_v60 }
  0x23   : > { %v1964_v5 = vpack.i.bf16 %v2300_v63, %v2298_v62  ;;  %v2314_v7 = vld [vmem:[#allocation2 + $0x71] ss:$2 sm:$0xff]  ;;  %v2316_v3 = vld [vmem:[#allocation2 + $0x62] ss:$2 sm:$0xff] }
  0x24   : > { %1945 = vrot.lane.b32.xlu0 %v1944_v58, %s2140_s8  ;;  %v2318_v8 = vld [vmem:[#allocation2 + $0x72] ss:$2 sm:$0xff]  ;;  %v1969_v9 = vpack.i.bf16 %v2314_v7, %v2312_v6  ;;  %v2329_v11 = vld [vmem:[#allocation2 + $0x81] ss:$2 sm:$0xff]  ;;  %v695_v23 = vpack.c.bf16 %v2314_v7, %v2312_v6 }
  0x25   : > { %1850 = vmatpush3.bf16.msra.mxu1 %v602_v45  ;;  %v1974_v10 = vpack.i.bf16 %v2318_v8, %v2316_v3  ;;  %v2331_v12 = vld [vmem:[#allocation2 + $0x91] ss:$2 sm:$0xff]  ;;  %v2339_v17 = vld [vmem:[#allocation2 + $0x82] ss:$2 sm:$0xff]  ;;  %v1211_v48 = vpack.c.bf16 %v2318_v8, %v2316_v3 }
  0x26   : > { %1955 = vrot.lane.b32.xlu1 %v1954_v59, %s2140_s8  ;;  %v1984_v14 = vpack.i.bf16 %v2331_v12, %v2329_v11  ;;  %v950_v15 = vld [vmem:[#allocation2 + $0x3] ss:$2 sm:$0xff]  ;;  %v952_v16 = vld [vmem:[#allocation2 + $0x13] ss:$2 sm:$0xff]  ;;  %v2341_v18 = vld [vmem:[#allocation2 + $0x92] ss:$2 sm:$0xff]  ;;  %v696_v31 = vpack.c.bf16 %v2331_v12, %v2329_v11 }
  0x27   : > { %v1989_v19 = vpack.i.bf16 %v952_v16, %v950_v15  ;;  %v1994_v20 = vpack.i.bf16 %v2341_v18, %v2339_v17  ;;  %v2350_v21 = vld [vmem:[#allocation2 + $0xa1] ss:$2 sm:$0xff]  ;;  %v2352_v22 = vld [vmem:[#allocation2 + $0xb1] ss:$2 sm:$0xff]  ;;  %v2360_v27 = vld [vmem:[#allocation2 + $0xa2] ss:$2 sm:$0xff]  ;;  %v1212_v53 = vpack.c.bf16 %v2341_v18, %v2339_v17 }
  0x28   : > { %1960 = vrot.lane.b32.xlu0 %v1959_v4, %s2139_s7  ;;  %1824 = vmatmul.mubr.msk.bf16.gmra.mrb[4].mxu1 %vm315_vm2, %v693_v1  ;;  %v2004_v24 = vpack.i.bf16 %v2352_v22, %v2350_v21  ;;  %v954_v25 = vld [vmem:[#allocation2 + $0x23] ss:$2 sm:$0xff]  ;;  %v956_v26 = vld [vmem:[#allocation2 + $0x33] ss:$2 sm:$0xff]  ;;  %v2362_v28 = vld [vmem:[#allocation2 + $0xb2] ss:$2 sm:$0xff]  ;;  %v697_v39 = vpack.c.bf16 %v2352_v22, %v2350_v21 }
  0x29   : > { %1827 = vmatprep.mubr.msk.bf16.mxu1 %vm2138_vm1, %v2137_v0  ;;  %v2009_v29 = vpack.i.bf16 %v956_v26, %v954_v25  ;;  %v2014_v30 = vpack.i.bf16 %v2362_v28, %v2360_v27  ;;  %v958_v32 = vld [vmem:[#allocation2 + $0x43] ss:$2 sm:$0xff]  ;;  %v960_v33 = vld [vmem:[#allocation2 + $0x53] ss:$2 sm:$0xff]  ;;  %v351_v26 = vld [vmem:[#allocation2 + $0x30] ss:$2 sm:$0xff] }
  0x2a   : > { %1965 = vrot.lane.b32.xlu1 %v1964_v5, %s2140_s8  ;;  %v2375_v34 = vld [vmem:[#allocation2 + $0xc1] ss:$2 sm:$0xf]  ;;  %v2024_v35 = vpack.i.bf16 %v960_v33, %v958_v32  ;;  %v2383_v37 = vld [vmem:[#allocation2 + $0xc2] ss:$2 sm:$0xf] }
  0x2b   : > { %v962_v36 = vld [vmem:[#allocation2 + $0x63] ss:$2 sm:$0xff]  ;;  %v964_v38 = vld [vmem:[#allocation2 + $0x73] ss:$2 sm:$0xff]  ;;  %v698_v49 = vpack.c.bf16 %v2375_v34, %v2375_v34 }
  0x2c   : > { %1970 = vrot.lane.b32.xlu0 %v1969_v9, %s2139_s7  ;;  %v2034_v40 = vpack.i.bf16 %v964_v38, %v962_v36  ;;  %v966_v41 = vld [vmem:[#allocation2 + $0x83] ss:$2 sm:$0xff]  ;;  %v968_v42 = vld [vmem:[#allocation2 + $0x93] ss:$2 sm:$0xff] }
  0x2d   : > { %v2044_v43 = vpack.i.bf16 %v968_v42, %v966_v41  ;;  %v970_v44 = vld [vmem:[#allocation2 + $0xa3] ss:$2 sm:$0xff]  ;;  %v972_v45 = vld [vmem:[#allocation2 + $0xb3] ss:$2 sm:$0xff] }
  0x2e   : > { %1975 = vrot.lane.b32.xlu1 %v1974_v10, %s2140_s8  ;;  %v2054_v50 = vpack.i.bf16 %v972_v45, %v970_v44  ;;  %v974_v54 = vld [vmem:[#allocation2 + $0xc3] ss:$2 sm:$0xf] }
  0x30   : > { %1980 = vrot.lane.b32.xlu0 %v1944_v58, %s2139_s7  ;;  %1828 = vmatmul.mubr.msk.bf16.gmra.mrb[8].mxu1 %vm315_vm2, %v694_v13  ;;  %v1209_v58 = vpack.c.bf16 %v2283_v57, %v2281_v56  ;;  %v345_v13 = vld [vmem:[#allocation2] ss:$2 sm:$0xff] }
  0x31   : > { %1831 = vmatprep.mubr.msk.bf16.mxu1 %vm2138_vm1, %v2137_v0 }
  0x32   : > { %1985 = vrot.lane.b32.xlu1 %v1984_v14, %s2139_s7 }
  0x34   : > { %1990 = vrot.lane.b32.xlu0 %v1989_v19, %s2140_s8 }
  0x36   : > { %1995 = vrot.lane.b32.xlu1 %v1994_v20, %s2140_s8 }
  0x38   : > { %2000 = vrot.lane.b32.xlu0 %v1954_v59, %s2139_s7  ;;  %1832 = vmatmul.mubr.msk.bf16.gmra.mrb[12].mxu1 %vm315_vm2, %v695_v23  ;;  %v1210_v59 = vpack.c.bf16 %v2300_v63, %v2298_v62  ;;  %v1213_v63 = vpack.c.bf16 %v2362_v28, %v2360_v27 }
  0x39   : > { %1835 = vmatprep.mubr.msk.bf16.mxu1 %vm2138_vm1, %v2137_v0 }
  0x3a   : > { %2005 = vrot.lane.b32.xlu1 %v2004_v24, %s2139_s7 }
  0x3c   : > { %2010 = vrot.lane.b32.xlu0 %v2009_v29, %s2140_s8  ;;  %v349_v29 = vld [vmem:[#allocation2 + $0x20] ss:$2 sm:$0xff] }
  0x3e   : > { %2015 = vrot.lane.b32.xlu1 %v2014_v30, %s2140_s8 }
  0x40   : > { %2020 = vrot.lane.b32.xlu0 %v1964_v5, %s2139_s7  ;;  %1836 = vmatmul.mubr.msk.bf16.gmra.mrb[16].mxu1 %vm315_vm2, %v696_v31 }
  0x41   : > { %1839 = vmatprep.mubr.msk.bf16.mxu1 %vm2138_vm1, %v2137_v0 }
  0x42   : > { %459 = vrot.lane.b32.xlu1 %v2375_v34, %s2139_s7 }
  0x44   : > { %2025 = vrot.lane.b32.xlu0 %v2024_v35, %s2140_s8 }
  0x46   : > { %511 = vrot.lane.b32.xlu1 %v2383_v37, %s2140_s8 }
  0x48   : > { %2030 = vrot.lane.b32.xlu0 %v1974_v10, %s2139_s7  ;;  %1840 = vmatmul.mubr.msk.bf16.gmra.mrb[20].mxu1 %vm315_vm2, %v697_v39  ;;  %v347_v10 = vld [vmem:[#allocation2 + $0x10] ss:$2 sm:$0xff] }
  0x49   : > { %1843 = vmatprep.mubr.msk.bf16.mxu1 %vm2138_vm1, %v2137_v0 }
  0x4a   : > { %2035 = vrot.lane.b32.xlu1 %v2034_v40, %s2140_s8 }
  0x4c   : > { %2040 = vrot.lane.b32.xlu0 %v1994_v20, %s2139_s7 }
  0x4e   : > { %2045 = vrot.lane.b32.xlu1 %v2044_v43, %s2140_s8 }
  0x50   : > { %2050 = vrot.lane.b32.xlu0 %v2014_v30, %s2139_s7  ;;  %1844 = vmatmul.mubr.msk.bf16.gmra.mrb[24].mxu1 %vm315_vm2, %v698_v49  ;;  %v353_v49 = vld [vmem:[#allocation2 + $0x40] ss:$2 sm:$0xff] }
  0x51   : > { %1851 = vmatprep.mubr.msk.bf16.mxu1 %vm2138_vm1, %v2137_v0 }
  0x52   : > { %2055 = vrot.lane.b32.xlu1 %v2054_v50, %s2140_s8  ;;  %v355_v50 = vld [vmem:[#allocation2 + $0x50] ss:$2 sm:$0xff] }
  0x54   : > { %999 = vrot.lane.b32.xlu0 %v2383_v37, %s2139_s7 }
  0x56   : > { %1051 = vrot.lane.b32.xlu1 %v974_v54, %s2140_s8 }
  0x92   : > { %v1941_v1 = vpop.permute.xlu0 %1940 }
  0x93   : > { %v1943_v5 = vunpack.i.h.bf16 %v1941_v1  ;;  %v1942_v9 = vunpack.i.l.bf16 %v1941_v1 }
  0x94   : > { %v1951_v4 = vpop.permute.xlu1 %1950 }
  0x95   : > { %v527_v20 = vsel %vm315_vm2, %v347_v10, %v1943_v5  ;;  %v526_v23 = vsel %vm315_vm2, %v345_v13, %v1942_v9  ;;  %v1953_v24 = vunpack.i.h.bf16 %v1951_v4  ;;  %v1952_v25 = vunpack.i.l.bf16 %v1951_v4 }
  0x96   : > { %v1946_v14 = vpop.permute.xlu0 %1945 }
  0x97   : > { %v1948_v15 = vunpack.i.h.bf16 %v1946_v14  ;;  %v1947_v16 = vunpack.i.l.bf16 %v1946_v14  ;;  %v529_v39 = vsel %vm315_vm2, %v351_v26, %v1953_v24  ;;  %v528_v40 = vsel %vm315_vm2, %v349_v29, %v1952_v25  ;;  %v357_v29 = vld [vmem:[#allocation2 + $0x60] ss:$2 sm:$0xff] }
  0x98   : > { %v1956_v19 = vpop.permute.xlu1 %1955 }
  0x99   : > { %v540_v30 = vsel %vm539_vm5, %v526_v23, %v1947_v16  ;;  %v541_v31 = vsel %vm539_vm5, %v527_v20, %v1948_v15  ;;  %v1958_v35 = vunpack.i.h.bf16 %v1956_v19  ;;  %v1957_v36 = vunpack.i.l.bf16 %v1956_v19 }
  0x9a   : > { %v553_v32 = vpack.c.bf16 %v541_v31, %v540_v30  ;;  %v1961_v33 = vpop.permute.xlu0 %1960  ;;  %v359_v30 = vld [vmem:[#allocation2 + $0x70] ss:$2 sm:$0xff] }
  0x9b   : > { %v1963_v41 = vunpack.i.h.bf16 %v1961_v33  ;;  %v1962_v42 = vunpack.i.l.bf16 %v1961_v33  ;;  %v542_v44 = vsel %vm539_vm5, %v528_v40, %v1957_v36  ;;  %v543_v45 = vsel %vm539_vm5, %v529_v39, %v1958_v35 }
  0x9c   : > { %v1966_v38 = vpop.permute.xlu1 %1965  ;;  %1790 = vmatmul.mubr.msk.bf16.vlgmr.msra.gmra.mrb[0].mxu0 %vm578_vm6, %v553_v32  ;;  %v554_v5 = vpack.c.bf16 %v543_v45, %v542_v44 }
  0x9d   : > { %1880 = vmatpush3.bf16.msra.mxu0 %v2196_v2  ;;  %1793 = vmatprep.mubr.msk.bf16.mxu0 %vm2138_vm1, %v2137_v0  ;;  %v1968_v1 = vunpack.i.h.bf16 %v1966_v38  ;;  %v1967_v4 = vunpack.i.l.bf16 %v1966_v38  ;;  %v531_v9 = vsel %vm315_vm2, %v355_v50, %v1963_v41  ;;  %v530_v2 = vsel %vm315_vm2, %v353_v49, %v1962_v42 }
  0x9e   : > { %v1971_v43 = vpop.permute.xlu0 %1970 }
  0x9f   : > { %v544_v16 = vsel %vm539_vm5, %v530_v2, %v1967_v4  ;;  %v545_v19 = vsel %vm539_vm5, %v531_v9, %v1968_v1  ;;  %v1973_v20 = vunpack.i.h.bf16 %v1971_v43  ;;  %v1972_v23 = vunpack.i.l.bf16 %v1971_v43 }
  0xa0   : > { %v1976_v54 = vpop.permute.xlu1 %1975  ;;  %v555_v35 = vpack.c.bf16 %v545_v19, %v544_v16  ;;  %v361_v16 = vld [vmem:[#allocation2 + $0x80] ss:$2 sm:$0xff]  ;;  %v363_v19 = vld [vmem:[#allocation2 + $0x90] ss:$2 sm:$0xff] }
  0xa1   : > { %v1978_v36 = vunpack.i.h.bf16 %v1976_v54  ;;  %v1977_v38 = vunpack.i.l.bf16 %v1976_v54  ;;  %v533_v41 = vsel %vm315_vm2, %v359_v30, %v1973_v20 }
  0xa2   : > { %v1981_v10 = vpop.permute.xlu0 %1980 }
  0xa3   : > { %v1983_v13 = vunpack.i.h.bf16 %v1981_v10  ;;  %v1982_v14 = vunpack.i.l.bf16 %v1981_v10  ;;  %v547_v50 = vsel %vm539_vm5, %v533_v41, %v1978_v36 }
  0xa4   : > { %v1986_v15 = vpop.permute.xlu1 %1985  ;;  %1794 = vmatmul.mubr.msk.bf16.gmra.mrb[4].mxu0 %vm578_vm6, %v554_v5 }
  0xa5   : > { %1797 = vmatprep.mubr.msk.bf16.mxu0 %vm2138_vm1, %v2137_v0  ;;  %v1067_v24 = vsel %vm315_vm2, %v2262_v47, %v1983_v13  ;;  %v1066_v25 = vsel %vm315_vm2, %v2260_v46, %v1982_v14  ;;  %v532_v47 = vsel %vm315_vm2, %v357_v29, %v1972_v23  ;;  %v1988_v13 = vunpack.i.h.bf16 %v1986_v15 }
  0xa6   : > { %v1991_v26 = vpop.permute.xlu0 %1990  ;;  %v546_v49 = vsel %vm539_vm5, %v532_v47, %v1977_v38  ;;  %v1987_v14 = vunpack.i.l.bf16 %v1986_v15 }
  0xa7   : > { %v1993_v31 = vunpack.i.h.bf16 %v1991_v26  ;;  %v1992_v32 = vunpack.i.l.bf16 %v1991_v26  ;;  %v556_v10 = vpack.c.bf16 %v547_v50, %v546_v49 }
  0xa8   : > { %v1996_v33 = vpop.permute.xlu1 %1995 }
  0xa9   : > { %v1079_v39 = vsel %vm539_vm5, %v1066_v25, %v1992_v32  ;;  %v1080_v40 = vsel %vm539_vm5, %v1067_v24, %v1993_v31  ;;  %v1998_v26 = vunpack.i.h.bf16 %v1996_v33  ;;  %v535_v31 = vsel %vm315_vm2, %v363_v19, %v1988_v13 }
  0xaa   : > { %v1092_v42 = vpack.c.bf16 %v1080_v40, %v1079_v39  ;;  %v2001_v43 = vpop.permute.xlu0 %2000  ;;  %v534_v32 = vsel %vm315_vm2, %v361_v16, %v1987_v14 }
  0xab   : > { %v2003_v46 = vunpack.i.h.bf16 %v2001_v43  ;;  %v2002_v44 = vunpack.i.l.bf16 %v2001_v43  ;;  %v549_v38 = vsel %vm539_vm5, %v535_v31, %v1998_v26  ;;  %v365_v43 = vld [vmem:[#allocation2 + $0xa0] ss:$2 sm:$0xff] }
  0xac   : > { %v2006_v45 = vpop.permute.xlu1 %2005  ;;  %1798 = vmatmul.mubr.msk.bf16.gmra.mrb[8].mxu0 %vm578_vm6, %v555_v35  ;;  %1852 = vmatmul.mubr.msk.bf16.vlgmr.msra.gmra.mrb[28].mxu1 %vm578_vm6, %v1092_v42 }
  0xad   : > { %1801 = vmatprep.mubr.msk.bf16.mxu0 %vm2138_vm1, %v2137_v0  ;;  %1855 = vmatprep.mubr.msk.bf16.mxu1 %vm2138_vm1, %v2137_v0  ;;  %v1069_v54 = vsel %vm315_vm2, %v2273_v52, %v2003_v46  ;;  %v1068_v1 = vsel %vm315_vm2, %v2271_v51, %v2002_v44  ;;  %v1997_v52 = vunpack.i.l.bf16 %v1996_v33  ;;  %v2008_v47 = vunpack.i.h.bf16 %v2006_v45  ;;  %v367_v46 = vld [vmem:[#allocation2 + $0xb0] ss:$2 sm:$0xff] }
  0xae   : > { %v2011_v4 = vpop.permute.xlu0 %2010  ;;  %v2007_v42 = vunpack.i.l.bf16 %v2006_v45 }
  0xaf   : > { %v2013_v5 = vunpack.i.h.bf16 %v2011_v4  ;;  %v2012_v9 = vunpack.i.l.bf16 %v2011_v4  ;;  %v548_v36 = vsel %vm539_vm5, %v534_v32, %v1997_v52 }
  0xb0   : > { %v2016_v2 = vpop.permute.xlu1 %2015  ;;  %v536_v13 = vsel %vm315_vm2, %v365_v43, %v2007_v42 }
  0xb1   : > { %v1081_v20 = vsel %vm539_vm5, %v1068_v1, %v2012_v9  ;;  %v1082_v23 = vsel %vm539_vm5, %v1069_v54, %v2013_v5  ;;  %v2017_v1 = vunpack.i.l.bf16 %v2016_v2 }
  0xb2   : > { %v1093_v24 = vpack.c.bf16 %v1082_v23, %v1081_v20  ;;  %v2021_v25 = vpop.permute.xlu0 %2020 }
  0xb3   : > { %v2023_v29 = vunpack.i.h.bf16 %v2021_v25  ;;  %v2022_v30 = vunpack.i.l.bf16 %v2021_v25 }
  0xb4   : > { %v460_v51 = vpop.permute.xlu1 %459  ;;  %1802 = vmatmul.mubr.msk.bf16.gmra.mrb[12].mxu0 %vm578_vm6, %v556_v10  ;;  %1856 = vmatmul.mubr.msk.bf16.gmra.mrb[32].mxu1 %vm578_vm6, %v1093_v24  ;;  %v537_v10 = vsel %vm315_vm2, %v367_v46, %v2008_v47  ;;  %v550_v24 = vsel %vm539_vm5, %v536_v13, %v2017_v1 }
  0xb5   : > { %1805 = vmatprep.mubr.msk.bf16.mxu0 %vm2138_vm1, %v2137_v0  ;;  %1859 = vmatprep.mubr.msk.bf16.mxu1 %vm2138_vm1, %v2137_v0  ;;  %v1071_v15 = vsel %vm315_vm2, %v2294_v61, %v2023_v29  ;;  %v1070_v33 = vsel %vm315_vm2, %v2292_v60, %v2022_v30  ;;  %v557_v61 = vpack.c.bf16 %v549_v38, %v548_v36  ;;  %v2018_v60 = vunpack.i.h.bf16 %v2016_v2 }
  0xb6   : > { %v2026_v35 = vpop.permute.xlu0 %2025 }
  0xb7   : > { %v2028_v39 = vunpack.i.h.bf16 %v2026_v35  ;;  %v2027_v40 = vunpack.i.l.bf16 %v2026_v35  ;;  %v551_v25 = vsel %vm539_vm5, %v537_v10, %v2018_v60 }
  0xb8   : > { %v512_v41 = vpop.permute.xlu1 %511  ;;  %v558_v32 = vpack.c.bf16 %v551_v25, %v550_v24 }
  0xb9   : > { %v1083_v44 = vsel %vm539_vm5, %v1070_v33, %v2027_v40  ;;  %v1084_v49 = vsel %vm539_vm5, %v1071_v15, %v2028_v39 }
  0xba   : > { %v1094_v50 = vpack.c.bf16 %v1084_v49, %v1083_v44  ;;  %v2031_v54 = vpop.permute.xlu0 %2030 }
  0xbb   : > { %v2033_v4 = vunpack.i.h.bf16 %v2031_v54  ;;  %v2032_v5 = vunpack.i.l.bf16 %v2031_v54 }
  0xbc   : > { %v2036_v9 = vpop.permute.xlu1 %2035  ;;  %1806 = vmatmul.mubr.msk.bf16.gmra.mrb[16].mxu0 %vm578_vm6, %v557_v61  ;;  %1860 = vmatmul.mubr.msk.bf16.gmra.mrb[36].mxu1 %vm578_vm6, %v1094_v50 }
  0xbd   : > { %v2038_v45 = vunpack.i.h.bf16 %v2036_v9  ;;  %v2037_v14 = vunpack.i.l.bf16 %v2036_v9  ;;  %v1073_v16 = vsel %vm315_vm2, %v2314_v7, %v2033_v4  ;;  %v1072_v19 = vsel %vm315_vm2, %v2312_v6, %v2032_v5  ;;  %1809 = vmatprep.mubr.msk.bf16.mxu0 %vm2138_vm1, %v2137_v0  ;;  %1863 = vmatprep.mubr.msk.bf16.mxu1 %vm2138_vm1, %v2137_v0  ;;  %v369_v6 = vld [vmem:[#allocation2 + $0xc0] ss:$2 sm:$0xf] }
  0xbe   : > { %v2041_v23 = vpop.permute.xlu0 %2040  ;;  %v538_v36 = vsel %vm315_vm2, %v369_v6, %v460_v51 }
  0xbf   : > { %v1085_v2 = vsel %vm539_vm5, %v1072_v19, %v2037_v14  ;;  %v1086_v20 = vsel %vm539_vm5, %v1073_v16, %v2038_v45  ;;  %v2043_v26 = vunpack.i.h.bf16 %v2041_v23  ;;  %v2042_v7 = vunpack.i.l.bf16 %v2041_v23 }
  0xc0   : > { %v2046_v52 = vpop.permute.xlu1 %2045  ;;  %v1095_v29 = vpack.c.bf16 %v1086_v20, %v1085_v2  ;;  %v552_v47 = vsel %vm539_vm5, %v538_v36, %v512_v41 }
  0xc1   : > { %v2048_v30 = vunpack.i.h.bf16 %v2046_v52  ;;  %v2047_v31 = vunpack.i.l.bf16 %v2046_v52  ;;  %v1075_v15 = vsel %vm315_vm2, %v2331_v12, %v2043_v26  ;;  %v1074_v33 = vsel %vm315_vm2, %v2329_v11, %v2042_v7  ;;  %v2582_v26 = vld [vmem:[%s2965_s2] ss:$0 sm:$0xff] }
  0xc2   : > { %v2051_v35 = vpop.permute.xlu0 %2050  ;;  %v559_v46 = vpack.c.bf16 %v552_v47, %v552_v47 }
  0xc3   : > { %v1087_v38 = vsel %vm539_vm5, %v1074_v33, %v2047_v31  ;;  %v1088_v39 = vsel %vm539_vm5, %v1075_v15, %v2048_v30  ;;  %v2053_v12 = vunpack.i.h.bf16 %v2051_v35  ;;  %v2052_v40 = vunpack.i.l.bf16 %v2051_v35 }
  0xc4   : > { %1810 = vmatmul.mubr.msk.bf16.gmra.mrb[20].mxu0 %vm578_vm6, %v558_v32  ;;  %1864 = vmatmul.mubr.msk.bf16.gmra.mrb[40].mxu1 %vm578_vm6, %v1095_v29  ;;  %v2056_v11 = vpop.permute.xlu1 %2055  ;;  %v1096_v51 = vpack.c.bf16 %v1088_v39, %v1087_v38 }
  0xc5   : > { %1813 = vmatprep.mubr.msk.bf16.mxu0 %vm2138_vm1, %v2137_v0  ;;  %1867 = vmatprep.mubr.msk.bf16.mxu1 %vm2138_vm1, %v2137_v0  ;;  %v2058_v42 = vunpack.i.h.bf16 %v2056_v11  ;;  %v2057_v43 = vunpack.i.l.bf16 %v2056_v11  ;;  %v1077_v44 = vsel %vm315_vm2, %v2352_v22, %v2053_v12  ;;  %v1076_v49 = vsel %vm315_vm2, %v2350_v21, %v2052_v40 }
  0xc6   : > { %v1000_v41 = vpop.permute.xlu0 %999 }
  0xc7   : > { %v1089_v61 = vsel %vm539_vm5, %v1076_v49, %v2057_v43  ;;  %v1090_v50 = vsel %vm539_vm5, %v1077_v44, %v2058_v42  ;;  %v1078_v22 = vsel %vm315_vm2, %v2375_v34, %v1000_v41  ;;  %v1214_v34 = vpack.c.bf16 %v2383_v37, %v2383_v37 }
  0xc8   : > { %v1097_v54 = vpack.c.bf16 %v1090_v50, %v1089_v61  ;;  %v1052_v21 = vpop.permute.xlu1 %1051 }
  0xc9   : > { %v1091_v60 = vsel %vm539_vm5, %v1078_v22, %v1052_v21 }
  0xca   : > { %v1098_v1 = vpack.c.bf16 %v1091_v60, %v1091_v60  ;;  %v2612_v60 = vld [vmem:[%s2967_s4] ss:$0 sm:$0xff] }
  0xcc   : > { %1814 = vmatmul.mubr.msk.bf16.gmra.mrb[24].mxu0 %vm578_vm6, %v559_v46  ;;  %1868 = vmatmul.mubr.msk.bf16.gmra.mrb[44].mxu1 %vm578_vm6, %v1096_v51 }
  0xcd   : > { %1871 = vmatprep.mubr.msk.bf16.mxu1 %vm2138_vm1, %v2137_v0  ;;  %1881 = vmatprep.mubr.msk.bf16.mxu0 %vm2138_vm1, %v2137_v0 }
  0xd4   : > { %1872 = vmatmul.mubr.msk.bf16.gmra.mrb[48].mxu1 %vm578_vm6, %v1097_v54  ;;  %1882 = vmatmul.mubr.msk.bf16.vlgmr.msra.gmra.mrb[28].mxu0 %vm315_vm2, %v1208_v55 }
  0xd5   : > { %1875 = vmatprep.mubr.msk.bf16.mxu1 %vm2138_vm1, %v2137_v0  ;;  %1885 = vmatprep.mubr.msk.bf16.mxu0 %vm2138_vm1, %v2137_v0 }
  0xdc   : > { %1876 = vmatmul.mubr.msk.bf16.gmra.mrb[52].mxu1 %vm578_vm6, %v1098_v1  ;;  %1886 = vmatmul.mubr.msk.bf16.gmra.mrb[32].mxu0 %vm315_vm2, %v1209_v58 }
  0xdd   : > { %1889 = vmatprep.mubr.msk.bf16.mxu0 %vm2138_vm1, %v2137_v0 }
  0xe4   : > { %1890 = vmatmul.mubr.msk.bf16.gmra.mrb[36].mxu0 %vm315_vm2, %v1210_v59 }
  0xe5   : > { %1893 = vmatprep.mubr.msk.bf16.mxu0 %vm2138_vm1, %v2137_v0 }
  0xec   : > { %1894 = vmatmul.mubr.msk.bf16.gmra.mrb[40].mxu0 %vm315_vm2, %v1211_v48 }
  0xed   : > { %1897 = vmatprep.mubr.msk.bf16.mxu0 %vm2138_vm1, %v2137_v0 }
  0xf3   : > { %v2542_v55 = vpop.f32.mrb[0].mxu1 }
  0xf4   : > { %1898 = vmatmul.mubr.msk.bf16.gmra.mrb[44].mxu0 %vm315_vm2, %v1212_v53  ;;  %v1821_v56 = vpop.f32.mrb[1].mxu1 }
  0xf5   : > { %1901 = vmatprep.mubr.msk.bf16.mxu0 %vm2138_vm1, %v2137_v0  ;;  %v2547_v57 = vpop.f32.mrb[2].mxu1 }
  0xf6   : > { %v1822_v62 = vpop.f32.mrb[3].mxu1 }
  0xfb   : > { %v2551_v3 = vpop.f32.mrb[4].mxu1 }
  0xfc   : > { %1902 = vmatmul.mubr.msk.bf16.gmra.mrb[48].mxu0 %vm315_vm2, %v1213_v63  ;;  %v1825_v8 = vpop.f32.mrb[5].mxu1 }
  0xfd   : > { %1905 = vmatprep.mubr.msk.bf16.mxu0 %vm2138_vm1, %v2137_v0  ;;  %v2556_v17 = vpop.f32.mrb[6].mxu1 }
  0xfe   : > { %v1826_v18 = vpop.f32.mrb[7].mxu1 }
 0x103   : > { %v2560_v58 = vpop.f32.mrb[8].mxu1 }
 0x104   : > { %1906 = vmatmul.mubr.msk.bf16.gmra.mrb[52].mxu0 %vm315_vm2, %v1214_v34  ;;  %v1829_v59 = vpop.f32.mrb[9].mxu1 }
 0x105   : > { %v2563_v27 = vpop.f32.mrb[10].mxu1 }
 0x106   : > { %v1830_v28 = vpop.f32.mrb[11].mxu1 }
 0x10b   : > { %v2565_v4 = vpop.f32.mrb[12].mxu1 }
 0x10c   : > { %v1833_v5 = vpop.f32.mrb[13].mxu1 }
 0x10d   : > { %v2567_v9 = vpop.f32.mrb[14].mxu1 }
 0x10e   : > { %v1834_v0 = vpop.f32.mrb[15].mxu1 }
 0x10f   : > { %v766_v0 = vadd.f32 %v2612_v60, %v2542_v55  ;;  %v2642_v55 = vadd.f32 %v2612_v60, %v2556_v17 }
 0x113   : > { %v2569_v10 = vpop.f32.mrb[16].mxu1 }
 0x114   : > { %v1837_v13 = vpop.f32.mrb[17].mxu1 }
 0x115   : > { %v2571_v45 = vpop.f32.mrb[18].mxu1  ;;  %v769_v13 = vadd.f32 %v2612_v60, %v2547_v57  ;;  %v2646_v57 = vadd.f32 %v2612_v60, %v2560_v58 }
 0x116   : > { %v1838_v37 = vpop.f32.mrb[19].mxu1 }
 0x11b   : > { %v2573_v14 = vpop.f32.mrb[20].mxu1 }
 0x11c   : > { %v1841_v16 = vpop.f32.mrb[21].mxu1 }
 0x11d   : > { %v2575_v19 = vpop.f32.mrb[22].mxu1 }
 0x11e   : > { %v1842_v2 = vpop.f32.mrb[23].mxu1 }
 0x123   : > { %v2577_v20 = vpop.f32.mrb[24].mxu1 }
 0x124   : > { %v1845_v23 = vpop.f32.mrb[25].mxu1 }
 0x125   : > { %v816_v24 = vpop.f32.mrb[26].mxu1 }
 0x126   : > { %v1846_v25 = vpop.f32.mrb[27].mxu1  ;;  %v2637_v24 = vadd.f32 %v2612_v60, %v2551_v3  ;;  %v2652_v3 = vadd.f32 %v2612_v60, %v2563_v27 }
 0x16f   : > { %v638_v7 = vpop.f32.mrb[0].mxu0 }
 0x170   : > { %v2585_v52 = vadd.f32 %v2582_v26, %v638_v7  ;;  %v1791_v29 = vpop.f32.mrb[1].mxu0 }
 0x171   : > { %v641_v6 = vpop.f32.mrb[2].mxu0 }
 0x172   : > { %v832_v30 = vmul.f32 0.044715, %v2585_v52  ;;  %v2589_v31 = vadd.f32 %v2582_v26, %v641_v6  ;;  %v1792_v32 = vpop.f32.mrb[3].mxu0 }
 0x174   : > { %v845_v15 = vmul.f32 %v832_v30, %v2585_v52  ;;  %v833_v33 = vmul.f32 0.044715, %v2589_v31 }
 0x176   : > { %v858_v35 = vmul.f32 %v845_v15, %v2585_v52  ;;  %v846_v36 = vmul.f32 %v833_v33, %v2589_v31 }
 0x177   : > { %v646_v38 = vpop.f32.mrb[4].mxu0 }
 0x178   : > { %v871_v39 = vadd.f32 %v858_v35, %v2585_v52  ;;  %v859_v12 = vmul.f32 %v846_v36, %v2589_v31  ;;  %v2598_v40 = vadd.f32 %v2582_v26, %v646_v38  ;;  %v1795_v11 = vpop.f32.mrb[5].mxu0  ;;  %v819_v36 = vmul.f32 0.5, %v2585_v52 }
 0x179   : > { %v649_v47 = vpop.f32.mrb[6].mxu0 }
 0x17a   : > { %v884_v51 = vmul.f32 0.7978846, %v871_v39  ;;  %v872_v42 = vadd.f32 %v859_v12, %v2589_v31  ;;  %v834_v43 = vmul.f32 0.044715, %v2598_v40  ;;  %v2603_v46 = vadd.f32 %v2582_v26, %v649_v47  ;;  %v1796_v44 = vpop.f32.mrb[7].mxu0 }
 0x17b   : > { %v2661_v12 = vadd.f32 %v2612_v60, %v2565_v4 }
 0x17c   : > { %v885_v49 = vmul.f32 0.7978846, %v872_v42  ;;  %v847_v61 = vmul.f32 %v834_v43, %v2598_v40  ;;  %v835_v50 = vmul.f32 0.044715, %v2603_v46  ;;  %2061 = vtanh.f32 %v884_v51 }
 0x17d   : > { %v2672_v43 = vadd.f32 %v2612_v60, %v2567_v9 }
 0x17e   : > { %v860_v41 = vmul.f32 %v847_v61, %v2598_v40  ;;  %v848_v54 = vmul.f32 %v835_v50, %v2603_v46  ;;  %2063 = vtanh.f32 %v885_v49 }
 0x17f   : > { %v654_v22 = vpop.f32.mrb[8].mxu0  ;;  %v1154_v21 = vpop.f32.mrb[28].mxu1 }
 0x180   : > { %v873_v1 = vadd.f32 %v860_v41, %v2598_v40  ;;  %v861_v48 = vmul.f32 %v848_v54, %v2603_v46  ;;  %v2617_v53 = vadd.f32 %v2582_v26, %v654_v22  ;;  %v2620_v56 = vadd.f32 %v2582_v26, %v1154_v21  ;;  %v1799_v62 = vpop.f32.mrb[9].mxu0  ;;  %v1853_v63 = vpop.f32.mrb[29].mxu1 }
 0x181   : > { %v657_v8 = vpop.f32.mrb[10].mxu0  ;;  %v1157_v18 = vpop.f32.mrb[30].mxu1  ;;  %v820_v22 = vmul.f32 0.5, %v2589_v31  ;;  %v2683_v21 = vadd.f32 %v2612_v60, %v2569_v10 }
 0x182   : > { %v886_v34 = vmul.f32 0.7978846, %v873_v1  ;;  %v874_v59 = vadd.f32 %v861_v48, %v2603_v46  ;;  %v836_v28 = vmul.f32 0.044715, %v2617_v53  ;;  %v1337_v5 = vmul.f32 0.044715, %v2620_v56 }
 0x183   : > { %v2630_v37 = vadd.f32 %v2582_v26, %v657_v8  ;;  %v2633_v16 = vadd.f32 %v2582_v26, %v1157_v18  ;;  %v1800_v2 = vpop.f32.mrb[11].mxu0  ;;  %v1854_v23 = vpop.f32.mrb[31].mxu1 }
 0x184   : > { %v887_v25 = vmul.f32 0.7978846, %v874_v59  ;;  %v1350_v7 = vmul.f32 %v1337_v5, %v2620_v56  ;;  %2065 = vtanh.f32 %v886_v34  ;;  %v849_v32 = vmul.f32 %v836_v28, %v2617_v53 }
 0x185   : > { %v837_v29 = vmul.f32 0.044715, %v2630_v37  ;;  %v1338_v6 = vmul.f32 0.044715, %v2633_v16  ;;  %v821_v28 = vmul.f32 0.5, %v2598_v40  ;;  %v822_v5 = vmul.f32 0.5, %v2603_v46 }
 0x186   : > { %v2062_v30 = vpop.eup %2061  ;;  %v1363_v15 = vmul.f32 %v1350_v7, %v2620_v56  ;;  %2067 = vtanh.f32 %v887_v25  ;;  %v862_v50 = vmul.f32 %v849_v32, %v2617_v53  ;;  %v2700_v25 = vmul.f32 0.5, %v2620_v56 }
 0x187   : > { %v850_v17 = vmul.f32 %v837_v29, %v2630_v37  ;;  %v1351_v33 = vmul.f32 %v1338_v6, %v2633_v16  ;;  %v662_v58 = vpop.f32.mrb[12].mxu0  ;;  %v1162_v35 = vpop.f32.mrb[32].mxu1  ;;  %v910_v38 = vadd.f32 1.0, %v2062_v30 }
 0x188   : > { %v2064_v39 = vpop.eup %2063  ;;  %v2664_v27 = vadd.f32 %v2582_v26, %v662_v58  ;;  %v2667_v11 = vadd.f32 %v2582_v26, %v1162_v35  ;;  %v1803_v47 = vpop.f32.mrb[13].mxu0  ;;  %v1376_v42 = vadd.f32 %v1363_v15, %v2620_v56  ;;  %v875_v23 = vadd.f32 %v862_v50, %v2617_v53 }
 0x189   : > { %v1857_v51 = vpop.f32.mrb[33].mxu1  ;;  %v665_v52 = vpop.f32.mrb[14].mxu0  ;;  %v923_v49 = vmul.f32 %v910_v38, %v819_v36  ;;  %v911_v61 = vadd.f32 1.0, %v2064_v39  ;;  %v1364_v4 = vmul.f32 %v1351_v33, %v2633_v16  ;;  %v863_v9 = vmul.f32 %v850_v17, %v2630_v37 }
 0x18a   : > { %v1165_v44 = vpop.f32.mrb[34].mxu1  ;;  %v1339_v41 = vmul.f32 0.044715, %v2667_v11  ;;  %v2678_v54 = vadd.f32 %v2582_v26, %v665_v52  ;;  %v1804_v48 = vpop.f32.mrb[15].mxu0  ;;  %v838_v8 = vmul.f32 0.044715, %v2664_v27 }
 0x18b   : > { %v2687_v1 = vadd.f32 %v2582_v26, %v1165_v44  ;;  %v1858_v62 = vpop.f32.mrb[35].mxu1  ;;  %v2689_v63 = vadd.f32 %v923_v49, %v766_v0  ;;  %v1389_v34 = vmul.f32 0.7978846, %v1376_v42  ;;  %v924_v59 = vmul.f32 %v911_v61, %v820_v22 }
 0x18c   : > { %v1352_v18 = vmul.f32 %v1339_v41, %v2667_v11  ;;  %v839_v31 = vmul.f32 0.044715, %v2678_v54  ;;  %v1377_v10 = vadd.f32 %v1364_v4, %v2633_v16  ;;  %v876_v29 = vadd.f32 %v863_v9, %v2630_v37 }
 0x18d   : > { %v1340_v0 = vmul.f32 0.044715, %v2687_v1  ;;  %v2702_v7 = vadd.f32 %v924_v59, %v769_v13  ;;  %v851_v46 = vmul.f32 %v838_v8, %v2664_v27  ;;  %2069 = vtanh.f32 %v1389_v34 }
 0x18e   : > { %v2066_v2 = vpop.eup %2065  ;;  %v1390_v32 = vmul.f32 0.7978846, %v1377_v10  ;;  %v1365_v40 = vmul.f32 %v1352_v18, %v2667_v11  ;;  %v852_v35 = vmul.f32 %v839_v31, %v2678_v54  ;;  %v888_v42 = vmul.f32 0.7978846, %v875_v23 }
 0x18f   : > { %v670_v6 = vpop.f32.mrb[16].mxu0  ;;  %v1170_v30 = vpop.f32.mrb[36].mxu1  ;;  %v912_v15 = vadd.f32 1.0, %v2066_v2  ;;  %v1353_v52 = vmul.f32 %v1340_v0, %v2687_v1  ;;  %v864_v9 = vmul.f32 %v851_v46, %v2664_v27  ;;  %v889_v18 = vmul.f32 0.7978846, %v876_v29 }
 0x190   : > { %v2068_v17 = vpop.eup %2067  ;;  %v2708_v33 = vadd.f32 %v2582_v26, %v670_v6  ;;  %v2711_v58 = vadd.f32 %v2582_v26, %v1170_v30  ;;  %v1807_v56 = vpop.f32.mrb[17].mxu0  ;;  %v1378_v47 = vadd.f32 %v1365_v40, %v2667_v11  ;;  %2071 = vtanh.f32 %v1390_v32 }
 0x191   : > { %v1861_v13 = vpop.f32.mrb[37].mxu1  ;;  %v673_v36 = vpop.f32.mrb[18].mxu0  ;;  %v925_v39 = vmul.f32 %v912_v15, %v821_v28  ;;  %v913_v51 = vadd.f32 1.0, %v2068_v17  ;;  %v865_v34 = vmul.f32 %v852_v35, %v2678_v54  ;;  %v1366_v28 = vmul.f32 %v1353_v52, %v2687_v1 }
 0x192   : > { %v1173_v38 = vpop.f32.mrb[38].mxu1  ;;  %v840_v44 = vmul.f32 0.044715, %v2708_v33  ;;  %v1341_v49 = vmul.f32 0.044715, %v2711_v58  ;;  %v2719_v61 = vadd.f32 %v2582_v26, %v673_v36  ;;  %v1808_v50 = vpop.f32.mrb[19].mxu0  ;;  %2073 = vtanh.f32 %v888_v42 }
 0x193   : > { %v2722_v4 = vadd.f32 %v2582_v26, %v1173_v38  ;;  %v1862_v41 = vpop.f32.mrb[39].mxu1  ;;  %v2725_v22 = vadd.f32 %v925_v39, %v2637_v24  ;;  %v1391_v62 = vmul.f32 0.7978846, %v1378_v47  ;;  %v926_v8 = vmul.f32 %v913_v51, %v822_v5 }
 0x194   : > { %v853_v48 = vmul.f32 %v840_v44, %v2708_v33  ;;  %v1354_v59 = vmul.f32 %v1341_v49, %v2711_v58  ;;  %v841_v31 = vmul.f32 0.044715, %v2719_v61  ;;  %v2737_v24 = vmul.f32 0.5, %v2617_v53 }
 0x195   : > { %v2733_v10 = vadd.f32 %v926_v8, %v2642_v55  ;;  %v1342_v23 = vmul.f32 0.044715, %v2722_v4  ;;  %v2743_v6 = vmul.f32 0.5, %v2633_v16  ;;  %v877_v55 = vadd.f32 %v864_v9, %v2664_v27 }
 0x196   : > { %v866_v2 = vmul.f32 %v853_v48, %v2708_v33  ;;  %v854_v5 = vmul.f32 %v841_v31, %v2719_v61  ;;  %2075 = vtanh.f32 %v1391_v62  ;;  %v2750_v15 = vmul.f32 0.5, %v2630_v37 }
 0x197   : > { %v678_v0 = vpop.f32.mrb[20].mxu0  ;;  %v1178_v29 = vpop.f32.mrb[40].mxu1  ;;  %v878_v40 = vadd.f32 %v865_v34, %v2678_v54  ;;  %v1379_v56 = vadd.f32 %v1366_v28, %v2687_v1  ;;  %v1367_v16 = vmul.f32 %v1354_v59, %v2711_v58  ;;  %2077 = vtanh.f32 %v889_v18 }
 0x198   : > { %v2747_v30 = vadd.f32 %v2582_v26, %v678_v0  ;;  %v1811_v32 = vpop.f32.mrb[21].mxu0  ;;  %v1865_v53 = vpop.f32.mrb[41].mxu1  ;;  %v867_v35 = vmul.f32 %v854_v5, %v2719_v61  ;;  %v2758_v38 = vadd.f32 %v2582_v26, %v1178_v29  ;;  %v879_v39 = vadd.f32 %v866_v2, %v2708_v33 }
 0x199   : > { %v681_v17 = vpop.f32.mrb[22].mxu0  ;;  %v1181_v46 = vpop.f32.mrb[42].mxu1  ;;  %v1355_v47 = vmul.f32 %v1342_v23, %v2722_v4  ;;  %v2769_v44 = vmul.f32 0.5, %v2667_v11  ;;  %v890_v49 = vmul.f32 0.7978846, %v877_v55  ;;  %v2774_v8 = vmul.f32 0.5, %v2687_v1 }
 0x19a   : > { %v2070_v13 = vpop.eup %2069  ;;  %v842_v36 = vmul.f32 0.044715, %v2747_v30  ;;  %v2761_v37 = vadd.f32 %v2582_v26, %v681_v17  ;;  %v2766_v51 = vadd.f32 %v2582_v26, %v1181_v46  ;;  %v1812_v42 = vpop.f32.mrb[23].mxu0  ;;  %v1392_v9 = vmul.f32 0.7978846, %v1379_v56 }
 0x19b   : > { %v1866_v52 = vpop.f32.mrb[43].mxu1  ;;  %v2072_v48 = vpop.eup %2071  ;;  %v891_v62 = vmul.f32 0.7978846, %v878_v40  ;;  %v2777_v18 = vmul.f32 0.5, %v2711_v58  ;;  %v1380_v34 = vadd.f32 %v1367_v16, %v2711_v58  ;;  %v880_v59 = vadd.f32 %v867_v35, %v2719_v61 }
 0x19c   : > { %v855_v50 = vmul.f32 %v842_v36, %v2747_v30  ;;  %v843_v41 = vmul.f32 0.044715, %v2761_v37  ;;  %v1343_v11 = vmul.f32 0.044715, %v2758_v38  ;;  %v1415_v28 = vadd.f32 1.0, %v2070_v13  ;;  %v2074_v58 = vpop.eup %2073 }
 0x19d   : > { %v2785_v2 = vadd.f32 %v2612_v60, %v2571_v45  ;;  %v2787_v5 = vmul.f32 0.7978846, %v879_v39  ;;  %v1344_v1 = vmul.f32 0.044715, %v2766_v51  ;;  %v1368_v29 = vmul.f32 %v1355_v47, %v2722_v4 }
 0x19e   : > { %v856_v31 = vmul.f32 %v843_v41, %v2761_v37  ;;  %v868_v55 = vmul.f32 %v855_v50, %v2747_v30  ;;  %v1416_v17 = vadd.f32 1.0, %v2072_v48  ;;  %2079 = vtanh.f32 %v1392_v9 }
 0x19f   : > { %v686_v23 = vpop.f32.mrb[24].mxu0  ;;  %v1186_v0 = vpop.f32.mrb[44].mxu1  ;;  %v914_v56 = vadd.f32 1.0, %v2074_v58  ;;  %v1393_v16 = vmul.f32 0.7978846, %v1380_v34  ;;  %v1381_v13 = vadd.f32 %v1368_v29, %v2722_v4  ;;  %2081 = vtanh.f32 %v890_v49 }
 0x1a0   : > { %v2793_v32 = vadd.f32 %v2582_v26, %v686_v23  ;;  %v1815_v53 = vpop.f32.mrb[25].mxu0  ;;  %v1869_v40 = vpop.f32.mrb[45].mxu1  ;;  %v2796_v36 = vmul.f32 0.7978846, %v880_v59  ;;  %v1356_v39 = vmul.f32 %v1343_v11, %v2758_v38  ;;  %v869_v47 = vmul.f32 %v856_v31, %v2761_v37 }
 0x1a1   : > { %v689_v45 = vpop.f32.mrb[26].mxu0  ;;  %v1189_v46 = vpop.f32.mrb[46].mxu1  ;;  %v1428_v42 = vmul.f32 %v1415_v28, %v2700_v25  ;;  %v1357_v50 = vmul.f32 %v1344_v1, %v2766_v51  ;;  %v2804_v9 = vadd.f32 %v2582_v26, %v1186_v0  ;;  %v927_v49 = vmul.f32 %v914_v56, %v2737_v24 }
 0x1a2   : > { %v2076_v35 = vpop.eup %2075  ;;  %v844_v41 = vmul.f32 0.044715, %v2793_v32  ;;  %v1816_v48 = vpop.f32.mrb[27].mxu0  ;;  %v881_v59 = vadd.f32 %v868_v55, %v2747_v30  ;;  %v1429_v11 = vmul.f32 %v1416_v17, %v2743_v6  ;;  %v1394_v31 = vmul.f32 0.7978846, %v1381_v13 }
 0x1a3   : > { %v2078_v52 = vpop.eup %2077  ;;  %v1870_v34 = vpop.f32.mrb[47].mxu1  ;;  %v2810_v25 = vadd.f32 %v2582_v26, %v1189_v46  ;;  %v2813_v28 = vadd.f32 %v927_v49, %v2646_v57  ;;  %2083 = vtanh.f32 %v1393_v16  ;;  %v2816_v1 = vmul.f32 0.5, %v2722_v4 }
 0x1a4   : > { %v915_v23 = vadd.f32 1.0, %v2078_v52  ;;  %v882_v0 = vadd.f32 %v869_v47, %v2761_v37  ;;  %v1417_v24 = vadd.f32 1.0, %v2076_v35  ;;  %v1369_v6 = vmul.f32 %v1356_v39, %v2758_v38 }
 0x1a5   : > { %v857_v58 = vmul.f32 %v844_v41, %v2793_v32  ;;  %v1345_v55 = vmul.f32 0.044715, %v2804_v9  ;;  %2085 = vtanh.f32 %v891_v62  ;;  %v1370_v57 = vmul.f32 %v1357_v50, %v2766_v51 }
 0x1a6   : > { %v928_v29 = vmul.f32 %v915_v23, %v2750_v15  ;;  %v2824_v17 = vmul.f32 0.7978846, %v881_v59  ;;  %2087 = vtanh.f32 %v1394_v31  ;;  %v825_v15 = vmul.f32 0.5, %v2664_v27 }
 0x1a7   : > { %v1194_v53 = vpop.f32.mrb[48].mxu1  ;;  %v1270_v40 = vpop.f32.mrb[28].mxu0  ;;  %v1346_v56 = vmul.f32 0.044715, %v2810_v25  ;;  %v1382_v62 = vadd.f32 %v1369_v6, %v2758_v38  ;;  %v1383_v39 = vadd.f32 %v1370_v57, %v2766_v51  ;;  %v2835_v52 = vmul.f32 0.7978846, %v882_v0 }
 0x1a8   : > { %v1271_v4 = vadd.f32 %v2612_v60, %v1270_v40  ;;  %v1873_v45 = vpop.f32.mrb[49].mxu1  ;;  %v1883_v46 = vpop.f32.mrb[29].mxu0  ;;  %v2831_v35 = vadd.f32 %v928_v29, %v2652_v3  ;;  %v2838_v50 = vadd.f32 %v2582_v26, %v1194_v53  ;;  %v1430_v34 = vmul.f32 %v1417_v24, %v2769_v44 }
 0x1a9   : > { %v1197_v16 = vpop.f32.mrb[50].mxu1  ;;  %v1273_v13 = vpop.f32.mrb[30].mxu0  ;;  %v870_v59 = vmul.f32 %v857_v58, %v2793_v32  ;;  %v1358_v3 = vmul.f32 %v1345_v55, %v2804_v9  ;;  %v1395_v31 = vmul.f32 0.7978846, %v1382_v62  ;;  %v1359_v53 = vmul.f32 %v1346_v56, %v2810_v25 }
 0x1aa   : > { %v2080_v47 = vpop.eup %2079  ;;  %v1441_v41 = vadd.f32 %v1428_v42, %v1271_v4  ;;  %v1884_v27 = vpop.f32.mrb[31].mxu0  ;;  %v1274_v23 = vadd.f32 %v2612_v60, %v1273_v13  ;;  %v2846_v0 = vadd.f32 %v2582_v26, %v1197_v16  ;;  %v826_v42 = vmul.f32 0.5, %v2678_v54 }
 0x1ab   : > { %v1874_v48 = vpop.f32.mrb[51].mxu1  ;;  %v2082_v49 = vpop.eup %2081  ;;  %v1418_v24 = vadd.f32 1.0, %v2080_v47  ;;  %v1396_v58 = vmul.f32 0.7978846, %v1383_v39  ;;  %v1347_v55 = vmul.f32 0.044715, %v2838_v50  ;;  %2089 = vtanh.f32 %v2787_v5 }
 0x1ac   : > { %v1454_v29 = vmax.f32 %v2689_v63, %v1441_v41  ;;  %v916_v6 = vadd.f32 1.0, %v2082_v49  ;;  %v1442_v44 = vadd.f32 %v1429_v11, %v1274_v23  ;;  %v883_v54 = vadd.f32 %v870_v59, %v2793_v32 }
 0x1ad   : > { %v2084_v57 = vpop.eup %2083  ;;  %2091 = vtanh.f32 %v1395_v31  ;;  %v1371_v56 = vmul.f32 %v1358_v3, %v2804_v9  ;;  %v1348_v11 = vmul.f32 0.044715, %v2846_v0  ;;  %v827_v41 = vmul.f32 0.5, %v2708_v33 }
 0x1ae   : > { %v1679_v63 = vpack.c.bf16 %v1454_v29, %v1454_v29  ;;  %v929_v40 = vmul.f32 %v916_v6, %v825_v15  ;;  %v1455_v4 = vmax.f32 %v2702_v7, %v1442_v44  ;;  %2093 = vtanh.f32 %v1396_v58 }
 0x1af   : > { %v1202_v45 = vpop.f32.mrb[52].mxu1  ;;  %v1278_v46 = vpop.f32.mrb[32].mxu0  ;;  %v1384_v27 = vadd.f32 %v1371_v56, %v2804_v9  ;;  %2095 = vtanh.f32 %v2796_v36  ;;  %v1360_v49 = vmul.f32 %v1347_v55, %v2838_v50  ;;  %v1372_v44 = vmul.f32 %v1359_v53, %v2810_v25 }
 0x1b0   : > { %1521 = vst.msk [vmem:[%s2853_s16] sm:$0xf] %vm1520_vm7, %v1679_v63  ;;  %v1279_v16 = vadd.f32 %v2612_v60, %v1278_v46  ;;  %v1887_v13 = vpop.f32.mrb[33].mxu0  ;;  %v1877_v15 = vpop.f32.mrb[53].mxu1  ;;  %v2865_v5 = vadd.f32 %v929_v40, %v2661_v12  ;;  %v1680_v7 = vpack.c.bf16 %v1455_v4, %v1455_v4  ;;  %v1431_v12 = vmul.f32 %v1418_v24, %v2774_v8 }
 0x1b1   : > { %v2086_v62 = vpop.eup %2085  ;;  %v1281_v39 = vpop.f32.mrb[34].mxu0  ;;  %v2876_v29 = vadd.f32 %v2582_v26, %v1202_v45  ;;  %v1397_v6 = vmul.f32 0.7978846, %v1384_v27  ;;  %v1361_v36 = vmul.f32 %v1348_v11, %v2846_v0  ;;  %v1419_v55 = vadd.f32 1.0, %v2084_v57 }
 0x1b2   : > { %v1205_v47 = vpop.f32.mrb[54].mxu1  ;;  %v2088_v48 = vpop.eup %2087  ;;  %v1443_v59 = vadd.f32 %v1430_v34, %v1279_v16  ;;  %v1282_v3 = vadd.f32 %v2612_v60, %v1281_v39  ;;  %1522 = vst.msk [vmem:[%s2853_s16 + $0x4] sm:$0xf] %vm1520_vm7, %v1680_v7  ;;  %v917_v33 = vadd.f32 1.0, %v2086_v62  ;;  %v1385_v24 = vadd.f32 %v1372_v44, %v2810_v25 }
 0x1b3   : > { %v1888_v23 = vpop.f32.mrb[35].mxu0  ;;  %v1878_v31 = vpop.f32.mrb[55].mxu1  ;;  %v1420_v63 = vadd.f32 1.0, %v2088_v48  ;;  %2097 = vtanh.f32 %v1397_v6  ;;  %v1373_v4 = vmul.f32 %v1360_v49, %v2838_v50  ;;  %v1349_v53 = vmul.f32 0.044715, %v2876_v29 }
 0x1b4   : > { %v1456_v58 = vmax.f32 %v2725_v22, %v1443_v59  ;;  %v1444_v34 = vadd.f32 %v1431_v12, %v1282_v3  ;;  %v930_v8 = vmul.f32 %v917_v33, %v826_v42  ;;  %2099 = vtanh.f32 %v2824_v17 }
 0x1b5   : > { %v1398_v46 = vmul.f32 0.7978846, %v1385_v24  ;;  %2101 = vtanh.f32 %v2835_v52  ;;  %v2090_v42 = vpop.eup %2089  ;;  %v1432_v17 = vmul.f32 %v1419_v55, %v2777_v18  ;;  %v1386_v11 = vadd.f32 %v1373_v4, %v2838_v50 }
 0x1b6   : > { %v1681_v40 = vpack.c.bf16 %v1456_v58, %v1456_v58  ;;  %v1457_v26 = vmax.f32 %v2733_v10, %v1444_v34  ;;  %v2887_v22 = vadd.f32 %v930_v8, %v2672_v43  ;;  %v896_v13 = vmul.f32 0.7978846, %v883_v54 }
 0x1b7   : > { %v1286_v45 = vpop.f32.mrb[36].mxu0  ;;  %v2092_v16 = vpop.eup %2091  ;;  %v918_v43 = vadd.f32 1.0, %v2090_v42  ;;  %2103 = vtanh.f32 %v1398_v46  ;;  %v1374_v62 = vmul.f32 %v1361_v36, %v2846_v0  ;;  %v1433_v47 = vmul.f32 %v1420_v63, %v2816_v1 }
 0x1b8   : > { %1523 = vst.msk [vmem:[%s2853_s16 + $0x8] sm:$0xf] %vm1520_vm7, %v1681_v40  ;;  %v1682_v57 = vpack.c.bf16 %v1457_v26, %v1457_v26  ;;  %v1287_v10 = vadd.f32 %v2612_v60, %v1286_v45  ;;  %v1891_v56 = vpop.f32.mrb[37].mxu0  ;;  %v2094_v7 = vpop.eup %2093  ;;  %v828_v18 = vmul.f32 0.5, %v2719_v61  ;;  %v1362_v49 = vmul.f32 %v1349_v53, %v2876_v29 }
 0x1b9   : > { %v1289_v15 = vpop.f32.mrb[38].mxu0  ;;  %v2096_v48 = vpop.eup %2095  ;;  %v931_v54 = vmul.f32 %v918_v43, %v827_v41  ;;  %v1399_v59 = vmul.f32 0.7978846, %v1386_v11  ;;  %v1387_v3 = vadd.f32 %v1374_v62, %v2846_v0  ;;  %v1421_v31 = vadd.f32 1.0, %v2092_v16 }
 0x1ba   : > { %1524 = vst.msk [vmem:[%s2853_s16 + $0xc] sm:$0xf] %vm1520_vm7, %v1682_v57  ;;  %v1445_v52 = vadd.f32 %v1432_v17, %v1287_v10  ;;  %v1290_v39 = vadd.f32 %v2612_v60, %v1289_v15  ;;  %v1892_v27 = vpop.f32.mrb[39].mxu0  ;;  %v919_v33 = vadd.f32 1.0, %v2096_v48  ;;  %v1330_v6 = vmul.f32 0.5, %v2758_v38 }
 0x1bb   : > { %v1422_v44 = vadd.f32 1.0, %v2094_v7  ;;  %v2906_v1 = vadd.f32 %v931_v54, %v2683_v21  ;;  %v1400_v61 = vmul.f32 0.7978846, %v1387_v3  ;;  %2105 = vtanh.f32 %v896_v13 }
 0x1bc   : > { %v1458_v12 = vmax.f32 %v2813_v28, %v1445_v52  ;;  %v1446_v23 = vadd.f32 %v1433_v47, %v1290_v39  ;;  %v932_v41 = vmul.f32 %v919_v33, %v828_v18  ;;  %v1331_v28 = vmul.f32 0.5, %v2766_v51 }
 0x1bd   : > { %v2098_v34 = vpop.eup %2097  ;;  %v829_v63 = vmul.f32 0.5, %v2747_v30  ;;  %2107 = vtanh.f32 %v1399_v59  ;;  %v1375_v38 = vmul.f32 %v1362_v49, %v2876_v29  ;;  %v1434_v40 = vmul.f32 %v1421_v31, %v1330_v6 }
 0x1be   : > { %v1683_v36 = vpack.c.bf16 %v1458_v12, %v1458_v12  ;;  %v1459_v58 = vmax.f32 %v2831_v35, %v1446_v23  ;;  %v2100_v8 = vpop.eup %2099  ;;  %v945_v26 = vadd.f32 %v932_v41, %v2785_v2  ;;  %v830_v51 = vmul.f32 0.5, %v2761_v37 }
 0x1bf   : > { %v1294_v55 = vpop.f32.mrb[40].mxu0  ;;  %v2102_v4 = vpop.eup %2101  ;;  %v920_v45 = vadd.f32 1.0, %v2100_v8  ;;  %2109 = vtanh.f32 %v1400_v61  ;;  %v1388_v30 = vadd.f32 %v1375_v38, %v2876_v29  ;;  %v1435_v57 = vmul.f32 %v1422_v44, %v1331_v28 }
 0x1c0   : > { %1525 = vst.msk [vmem:[%s2853_s16 + $0x10] sm:$0xf] %vm1520_vm7, %v1683_v36  ;;  %v1684_v21 = vpack.c.bf16 %v1459_v58, %v1459_v58  ;;  %v1295_v24 = vadd.f32 %v2612_v60, %v1294_v55  ;;  %v1895_v35 = vpop.f32.mrb[41].mxu0  ;;  %v921_v17 = vadd.f32 1.0, %v2102_v4  ;;  %v806_v2 = vadd.f32 %v2612_v60, %v2573_v14 }
 0x1c1   : > { %v1297_v53 = vpop.f32.mrb[42].mxu0  ;;  %v2104_v56 = vpop.eup %2103  ;;  %v809_v11 = vadd.f32 %v2612_v60, %v2575_v19  ;;  %v933_v37 = vmul.f32 %v920_v45, %v829_v63  ;;  %v1401_v16 = vmul.f32 0.7978846, %v1388_v30  ;;  %v1423_v43 = vadd.f32 1.0, %v2098_v34 }
 0x1c2   : > { %1526 = vst.msk [vmem:[%s2853_s16 + $0x14] sm:$0xf] %vm1520_vm7, %v1684_v21  ;;  %v1447_v46 = vadd.f32 %v1434_v40, %v1295_v24  ;;  %v1298_v42 = vadd.f32 %v2612_v60, %v1297_v53  ;;  %v1896_v10 = vpop.f32.mrb[43].mxu0  ;;  %v934_v62 = vmul.f32 %v921_v17, %v830_v51  ;;  %v1332_v7 = vmul.f32 0.5, %v2804_v9 }
 0x1c3   : > { %v946_v52 = vadd.f32 %v933_v37, %v806_v2  ;;  %v1424_v27 = vadd.f32 1.0, %v2104_v56  ;;  %2111 = vtanh.f32 %v1401_v16  ;;  %v1333_v59 = vmul.f32 0.5, %v2810_v25 }
 0x1c4   : > { %v1460_v13 = vmax.f32 %v2865_v5, %v1447_v46  ;;  %v1448_v15 = vadd.f32 %v1435_v57, %v1298_v42  ;;  %v947_v14 = vadd.f32 %v934_v62, %v809_v11  ;;  %v1436_v49 = vmul.f32 %v1423_v43, %v1332_v7 }
 0x1c5   : > { %v2106_v19 = vpop.eup %2105  ;;  %v831_v12 = vmul.f32 0.5, %v2793_v32  ;;  %v1437_v33 = vmul.f32 %v1424_v27, %v1333_v59  ;;  %v814_v61 = vadd.f32 %v2612_v60, %v2577_v20  ;;  %v1334_v28 = vmul.f32 0.5, %v2838_v50 }
 0x1c6   : > { %v1685_v39 = vpack.c.bf16 %v1460_v13, %v1460_v13  ;;  %v1461_v47 = vmax.f32 %v2887_v22, %v1448_v15  ;;  %v922_v22 = vadd.f32 1.0, %v2106_v19  ;;  %v1336_v57 = vmul.f32 0.5, %v2876_v29 }
 0x1c7   : > { %v1302_v18 = vpop.f32.mrb[44].mxu0  ;;  %v2108_v9 = vpop.eup %2107 }
 0x1c8   : > { %1527 = vst.msk [vmem:[%s2853_s16 + $0x18] sm:$0xf] %vm1520_vm7, %v1685_v39  ;;  %v1686_v48 = vpack.c.bf16 %v1461_v47, %v1461_v47  ;;  %v1303_v5 = vadd.f32 %v2612_v60, %v1302_v18  ;;  %v1899_v54 = vpop.f32.mrb[45].mxu0  ;;  %v935_v36 = vmul.f32 %v922_v22, %v831_v12  ;;  %v1425_v41 = vadd.f32 1.0, %v2108_v9 }
 0x1c9   : > { %v1305_v3 = vpop.f32.mrb[46].mxu0  ;;  %v2110_v44 = vpop.eup %2109 }
 0x1ca   : > { %1528 = vst.msk [vmem:[%s2853_s16 + $0x1c] sm:$0xf] %vm1520_vm7, %v1686_v48  ;;  %v1449_v23 = vadd.f32 %v1436_v49, %v1303_v5  ;;  %v1306_v31 = vadd.f32 %v2612_v60, %v1305_v3  ;;  %v1900_v6 = vpop.f32.mrb[47].mxu0  ;;  %v948_v32 = vadd.f32 %v935_v36, %v814_v61  ;;  %v1426_v63 = vadd.f32 1.0, %v2110_v44 }
 0x1cb   : > { %v1438_v24 = vmul.f32 %v1425_v41, %v1334_v28 }
 0x1cc   : > { %v1462_v25 = vmax.f32 %v2906_v1, %v1449_v23  ;;  %v1450_v58 = vadd.f32 %v1437_v33, %v1306_v31  ;;  %v1335_v1 = vmul.f32 0.5, %v2846_v0 }
 0x1cd   : > { %v2112_v40 = vpop.eup %2111 }
 0x1ce   : > { %v1687_v34 = vpack.c.bf16 %v1462_v25, %v1462_v25  ;;  %v1463_v55 = vmax.f32 %v945_v26, %v1450_v58  ;;  %v1439_v50 = vmul.f32 %v1426_v63, %v1335_v1  ;;  %v1427_v30 = vadd.f32 1.0, %v2112_v40 }
 0x1cf   : > { %v1310_v38 = vpop.f32.mrb[48].mxu0 }
 0x1d0   : > { %1529 = vst.msk [vmem:[%s2853_s16 + $0x20] sm:$0xf] %vm1520_vm7, %v1687_v34  ;;  %v1688_v8 = vpack.c.bf16 %v1463_v55, %v1463_v55  ;;  %v1311_v21 = vadd.f32 %v2612_v60, %v1310_v38  ;;  %v1903_v20 = vpop.f32.mrb[49].mxu0  ;;  %v1440_v56 = vmul.f32 %v1427_v30, %v1336_v57 }
 0x1d1   : > { %v1313_v35 = vpop.f32.mrb[50].mxu0 }
 0x1d2   : > { %1530 = vst.msk [vmem:[%s2853_s16 + $0x24] sm:$0xf] %vm1520_vm7, %v1688_v8  ;;  %v1451_v4 = vadd.f32 %v1438_v24, %v1311_v21  ;;  %v1314_v26 = vadd.f32 %v2612_v60, %v1313_v35  ;;  %v1904_v53 = vpop.f32.mrb[51].mxu0 }
 0x1d4   : > { %v1464_v45 = vmax.f32 %v946_v52, %v1451_v4  ;;  %v1452_v51 = vadd.f32 %v1439_v50, %v1314_v26 }
 0x1d6   : > { %v1689_v46 = vpack.c.bf16 %v1464_v45, %v1464_v45  ;;  %v1465_v42 = vmax.f32 %v947_v14, %v1452_v51 }
 0x1d7   : > { %v1318_v10 = vpop.f32.mrb[52].mxu0 }
 0x1d8   : > { %1531 = vst.msk [vmem:[%s2853_s16 + $0x28] sm:$0xf] %vm1520_vm7, %v1689_v46  ;;  %v1690_v0 = vpack.c.bf16 %v1465_v42, %v1465_v42  ;;  %v1319_v17 = vadd.f32 %v2612_v60, %v1318_v10  ;;  %v1907_v2 = vpop.f32.mrb[53].mxu0 }
 0x1d9   : > { %v1321_v11 = vpop.f32.mrb[54].mxu0 }
 0x1da   : > { %1532 = vst.msk [vmem:[%s2853_s16 + $0x2c] sm:$0xf] %vm1520_vm7, %v1690_v0  ;;  %v1453_v37 = vadd.f32 %v1440_v56, %v1319_v17  ;;  %v1908_v16 = vpop.f32.mrb[55].mxu0 }
 0x1dc   : > { %v1466_v13 = vmax.f32 %v948_v32, %v1453_v37 }
 0x1de   : > { %v1691_v15 = vpack.c.bf16 %v1466_v13, %v1466_v13 }
 0x1e0   : > { %1534 = vst.msk [vmem:[%s2853_s16 + $0x30] sm:$0x3] %vm1533_vm8, %v1691_v15 }
 0x1e1 PF: > { %s15_s20 = sadd.s32 1, %s2135_s20   ;;  %s2969_s18 = smov %s2131_s19 }
 0x1e2   : > { %p12_p5 = scmp.ge.s32.totalorder %s15_s20, 4   ;;  %s2970_s19 = smov %s2972_s21 }
 0x1e4   :  { %14 = sbr.rel (!%p12_p5) target bundleno = 2 (0x2), region = 121 }

// kernel: run.12
= control target key start
LH: loop header
LB: loop body
LE: loop exit
PB: predicated region body
PF: predicated region fallthrough
CT: control target
= control target key end

     0   :  { %s1718_s18 = smov 0   ;;  %s1720_s19 = smov 0   ;;  %s2111_s0 = inlined_call_operand.vmem [shape: bf16[2,1,102,8], index: 0, kind: input, shape index: {}]   ;;  %s2112_s1 = inlined_call_operand.vmem [shape: bf16[24,11], index: 1, kind: input, shape index: {}]   ;;  %s2113_s2 = inlined_call_operand.vmem [shape: f32[1,11], index: 2, kind: input, shape index: {}]   ;;  %s2114_s3 = inlined_call_operand.vmem [shape: bf16[8,11], index: 3, kind: input, shape index: {}]   ;;  %s2115_s4 = inlined_call_operand.vmem [shape: f32[1,11], index: 4, kind: input, shape index: {}]   ;;  %s2116_s5 = inlined_call_operand.vmem [shape: bf16[2,20,11], index: 5, kind: output, shape index: {}]  }
   0x1   :  { %s1722_s20 = smov 0  }
   0x2 LB: > { %s27_s21 = sadd.s32 1, %s1680_s19  ;;  %p1353_p0 = scmp.ge.s32.totalorder %s1684_s20, 1  ;;  %s1684_s20 = sphi %s1722_s20, %s15_s20   ;;  %s1680_s19 = sphi %s1720_s19, %s2118_s19   ;;  %s1676_s18 = sphi %s1718_s18, %s2117_s18  }
   0x3   : > { %p29_p1 = scmp.ge.s32.totalorder %s27_s21, 2  ;;  %p207_p2 = scmp.lt.s32.totalorder %s1684_s20, 3 }
   0x5   : > { %s2120_s21 = smov (%p29_p1, %s27_s21), 0  ;;  %p208_p3 = pnand %p1353_p0, %p207_p2 }
   0x6   : > { %p243_p4 = scmp.lt.s32.totalorder (!%p208_p3), %s1676_s18, 1  ;;  %vm381_vm0 = vcmask (!%p208_p3), 1043456   ;;  %v1739_v0 = vld [vmem:[%s2114_s3] sm:$0xf] (!%p208_p3)  ;;  %vm289_vm1 = vcmask (!%p208_p3), 64512   ;;  %vm302_vm2 = vcmask (!%p208_p3), 62464  }
   0x7   : > { %211 = sbr.rel (%p208_p3) target bundleno = 437 (0x1b5), region = 40  ;;  %1523 = vmatprep.subr.msk.bf16.mxu1 (!%p208_p3), %vm381_vm0, %v1739_v0  ;;  %v1747_v1 = vsel (!%p208_p3), %vm381_vm0, %v1739_v0, 0  ;;  %v1757_v17 = vld [vmem:[%s2112_s1] sm:$0xff] (!%p208_p3)   ;;  %v1778_v23 = vld [vmem:[%s2112_s1 + $0x8] ss:$0 sps:$4 sm:$0xff] (!%p208_p3)   ;;  %s1686_s7 = smov (!%p208_p3), 16  }
   0x8   : > { %1461 = vmatpush3.bf16.msra.mxu1 (!%p208_p3), %v1747_v1  ;;  %1452 = vmatprep.subr.bf16.mxu0 (!%p208_p3), %v1757_v17  ;;  %v1782_v24 = vsel (!%p208_p3), %vm381_vm0, %v1778_v23, 0  ;;  %s1687_s8 = smov (!%p208_p3), 8   ;;  %vm350_vm3 = vcmask (!%p208_p3), 130048   ;;  %vm374_vm4 = vcmask (!%p208_p3), 195584   ;;  %vm1257_vm5 = vcmask (!%p208_p3), 82944  }
   0x9   : > { %1466 = vmatprep.subr.bf16.mxu1 (!%p208_p3), %v1757_v17  ;;  %1453 = vmatpush3.bf16.msra.mxu0 (!%p208_p3), %v1757_v17  ;;  %vm1254_vm6 = vcmask (!%p208_p3), 84992  }
   0xa   : > { %1522 = vmatprep.subr.msk.bf16.mxu0 (!%p208_p3), %vm381_vm0, %v1778_v23 }
   0xd   : > { %1455 = vmatpush3.bf16.msra.mxu0 (!%p208_p3), %v1782_v24 }
   0xe   : > { %s2122_s18 = smov (!%p243_p4, %s1676_s18), 1  ;;  %1525 = vmatprep.subr.msk.bf16.mxu0 %vm381_vm0, %v1739_v0 }
   0xf   : > { %s1532_s24 = smul.u32 52, %s2122_s18 }
  0x10   : > { %s1533_s13 = smul.u32 12, %s2122_s18 }
  0x11   : > { %s251_s27 = scalar_lea.vmem %s2111_s0, %s1532_s24 }
  0x12   : > { %v1389_v2 = vld [vmem:[%s251_s27] sm:$0xff]   ;;  %v1412_v3 = vld [vmem:[%s251_s27 + $0x8] sm:$0xff]   ;;  %v1413_v4 = vld [vmem:[%s251_s27 + $0x10] sm:$0xff]   ;;  %s260_s16 = scalar_lea.vmem %s2116_s5, %s1533_s13 }
  0x13   : > { %v1390_v5 = vunpack.c.l.bf16 %v1389_v2  ;;  %v1391_v6 = vunpack.c.h.bf16 %v1389_v2  ;;  %v1394_v7 = vunpack.c.l.bf16 %v1412_v3  ;;  %v1395_v8 = vunpack.c.h.bf16 %v1412_v3  ;;  %v1414_v9 = vld [vmem:[%s251_s27 + $0x18] sm:$0xff]   ;;  %v1415_v10 = vld [vmem:[%s251_s27 + $0x20] sm:$0xff]   ;;  %v1416_v11 = vld [vmem:[%s251_s27 + $0x28] sm:$0xff]  }
  0x14   : > { %v1398_v12 = vunpack.c.l.bf16 %v1413_v4  ;;  %v1399_v13 = vunpack.c.h.bf16 %v1413_v4  ;;  %v1402_v14 = vunpack.c.l.bf16 %v1414_v9  ;;  %v1403_v15 = vunpack.c.h.bf16 %v1414_v9  ;;  %v275_v16 = vld [vmem:[%s251_s27 + $0x30] sm:$0x7] }
  0x15   : > { %v1406_v18 = vunpack.c.l.bf16 %v1415_v10  ;;  %v1407_v19 = vunpack.c.h.bf16 %v1415_v10  ;;  %290 = vst.msk [vmem:[#allocation2] sm:$0xff] %vm289_vm1, %v1390_v5  ;;  %291 = vst.msk [vmem:[#allocation2 + $0x8] sm:$0xff] %vm289_vm1, %v1391_v6  ;;  %v1410_v20 = vunpack.c.l.bf16 %v1416_v11  ;;  %v1411_v21 = vunpack.c.h.bf16 %v1416_v11 }
  0x16   : > { %292 = vst.msk [vmem:[#allocation2 + $0x10] sm:$0xff] %vm289_vm1, %v1394_v7  ;;  %293 = vst.msk [vmem:[#allocation2 + $0x18] sm:$0xff] %vm289_vm1, %v1395_v8  ;;  %v288_v22 = vunpack.c.l.bf16 %v275_v16 }
  0x17   : > { %294 = vst.msk [vmem:[#allocation2 + $0x20] sm:$0xff] %vm289_vm1, %v1398_v12  ;;  %295 = vst.msk [vmem:[#allocation2 + $0x28] sm:$0xff] %vm289_vm1, %v1399_v13 }
  0x18   : > { %296 = vst.msk [vmem:[#allocation2 + $0x30] sm:$0xff] %vm289_vm1, %v1402_v14  ;;  %297 = vst.msk [vmem:[#allocation2 + $0x38] sm:$0xff] %vm289_vm1, %v1403_v15 }
  0x19   : > { %298 = vst.msk [vmem:[#allocation2 + $0x40] sm:$0xff] %vm289_vm1, %v1406_v18  ;;  %299 = vst.msk [vmem:[#allocation2 + $0x48] sm:$0xff] %vm289_vm1, %v1407_v19 }
  0x1a   : > { %300 = vst.msk [vmem:[#allocation2 + $0x50] sm:$0xff] %vm289_vm1, %v1410_v20  ;;  %301 = vst.msk [vmem:[#allocation2 + $0x58] sm:$0xff] %vm289_vm1, %v1411_v21 }
  0x1b   : > { %303 = vst.msk [vmem:[#allocation2 + $0x60] sm:$0x3f] %vm302_vm2, %v288_v22 }
  0x1e   : > { %v1789_v25 = vld [vmem:[#allocation2 + $0x3] ss:$5 sm:$0xff]  ;;  %v1791_v26 = vld [vmem:[#allocation2 + $0x2] ss:$5 sm:$0xff] }
  0x1f   : > { %v1797_v29 = vld [vmem:[#allocation2 + $0x4] ss:$5 sm:$0xff]  ;;  %v1832_v47 = vld [vmem:[#allocation2 + $0x5] ss:$5 sm:$0xff] }
  0x20   : > { %v1793_v27 = vld [vmem:[#allocation2 + $0x2b] ss:$5 sm:$0xff]  ;;  %v1795_v28 = vld [vmem:[#allocation2 + $0x2a] ss:$5 sm:$0xff] }
  0x21   : > { %v1570_v30 = vpack.i.bf16 %v1793_v27, %v1789_v25  ;;  %v1560_v31 = vpack.i.bf16 %v1795_v28, %v1791_v26  ;;  %v312_v34 = vld [vmem:[#allocation2 + $0x1] ss:$5 sm:$0xff]  ;;  %v314_v37 = vld [vmem:[#allocation2 + $0x29] ss:$5 sm:$0xff] }
  0x22   : > { %v1803_v32 = vld [vmem:[#allocation2 + $0x53] ss:$5 sm:$0xf]  ;;  %v1805_v33 = vld [vmem:[#allocation2 + $0x52] ss:$5 sm:$0xf]  ;;  %v433_v41 = vpack.c.bf16 %v314_v37, %v312_v34  ;;  %v1595_v46 = vpack.i.bf16 %v314_v37, %v312_v34 }
  0x23   : > { %1571 = vrot.lane.b32.xlu1 %v1570_v30, %s1686_s7  ;;  %1561 = vrot.lane.b32.xlu0 %v1560_v31, %s1687_s8  ;;  %v1575_v35 = vpack.i.bf16 %v1797_v29, %v1803_v32  ;;  %v1565_v36 = vpack.i.bf16 %v1789_v25, %v1805_v33  ;;  %v316_v38 = vld [vmem:[#allocation2 + $0x51] ss:$5 sm:$0xf]  ;;  %v1815_v40 = vld [vmem:[#allocation2 + $0x54] ss:$5 sm:$0xf]  ;;  %v1580_v44 = vpack.i.bf16 %v1803_v32, %v1793_v27 }
  0x24   : > { %v1813_v39 = vld [vmem:[#allocation2 + $0x2c] ss:$5 sm:$0xff]  ;;  %v434_v42 = vpack.c.bf16 %v316_v38, %v316_v38  ;;  %1462 = vmatprep.mubr.msk.bf16.mxu1 %vm289_vm1, %v433_v41  ;;  %v1834_v48 = vld [vmem:[#allocation2 + $0x2d] ss:$5 sm:$0xff]  ;;  %v1600_v49 = vpack.i.bf16 %v316_v38, %v1815_v40 }
  0x25   : > { %v1585_v43 = vpack.i.bf16 %v1815_v40, %v1813_v39  ;;  %v1590_v45 = vpack.i.bf16 %v1813_v39, %v1797_v29  ;;  %v1605_v50 = vpack.i.bf16 %v1834_v48, %v1832_v47  ;;  %v1843_v51 = vld [vmem:[#allocation2 + $0x55] ss:$5 sm:$0xf]  ;;  %v1066_v54 = vld [vmem:[#allocation2 + $0x2e] ss:$5 sm:$0xff]  ;;  %v1152_v57 = vpack.c.bf16 %v1834_v48, %v1832_v47 }
  0x26   : > { %1463 = vmatmul.mubr.msk.bf16.vlgmr.msra.gmra.mrb[0].mxu1 %vm289_vm1, %v434_v42  ;;  %v1615_v52 = vpack.i.bf16 %v1805_v33, %v1843_v51  ;;  %v1064_v53 = vld [vmem:[#allocation2 + $0x6] ss:$5 sm:$0xff]  ;;  %v1068_v56 = vld [vmem:[#allocation2 + $0x56] ss:$5 sm:$0xf] }
  0x27   : > { %1576 = vrot.lane.b32.xlu1 %v1575_v35, %s1686_s7  ;;  %1566 = vrot.lane.b32.xlu0 %v1565_v36, %s1687_s8  ;;  %v1625_v55 = vpack.i.bf16 %v1066_v54, %v1064_v53 }
  0x28   : > { %1467 = vmatpush3.bf16.msra.mxu1 %v1757_v17 }
  0x29   : > { %1524 = vmatprep.subr.msk.bf16.mxu1 %vm381_vm0, %v1778_v23 }
  0x2b   : > { %1586 = vrot.lane.b32.xlu1 %v1585_v43, %s1686_s7  ;;  %1581 = vrot.lane.b32.xlu0 %v1580_v44, %s1687_s8 }
  0x2c   : > { %1469 = vmatpush3.bf16.msra.mxu1 %v1782_v24 }
  0x2d   : > { %1480 = vmatprep.subr.bf16.mxu1 %v1757_v17 }
  0x2f   : > { %1591 = vrot.lane.b32.xlu0 %v1590_v45, %s1687_s8  ;;  %1596 = vrot.lane.b32.xlu1 %v1595_v46, %s1687_s8 }
  0x33   : > { %1601 = vrot.lane.b32.xlu0 %v1600_v49, %s1687_s8  ;;  %1606 = vrot.lane.b32.xlu1 %v1605_v50, %s1686_s7 }
  0x37   : > { %1611 = vrot.lane.b32.xlu0 %v1560_v31, %s1686_s7  ;;  %1616 = vrot.lane.b32.xlu1 %v1615_v52, %s1686_s7 }
  0x3b   : > { %1621 = vrot.lane.b32.xlu0 %v1605_v50, %s1687_s8  ;;  %1073 = vrot.lane.b32.xlu1 %v1843_v51, %s1687_s8 }
  0x3f   : > { %1626 = vrot.lane.b32.xlu0 %v1625_v55, %s1686_s7  ;;  %1085 = vrot.lane.b32.xlu1 %v1068_v56, %s1686_s7 }
  0x95   : > { %v1572_v58 = vpop.permute.xlu1 %1571  ;;  %v1562_v59 = vpop.permute.xlu0 %1561 }
  0x96   : > { %v1574_v60 = vunpack.i.h.bf16 %v1572_v58  ;;  %v1573_v61 = vunpack.i.l.bf16 %v1572_v58  ;;  %v1564_v62 = vunpack.i.h.bf16 %v1562_v59  ;;  %v1563_v63 = vunpack.i.l.bf16 %v1562_v59  ;;  %v310_v58 = vld [vmem:[#allocation2 + $0x50] ss:$5 sm:$0xf] }
  0x98   : > { %v557_v2 = vsel %vm289_vm1, %v314_v37, %v1564_v62  ;;  %v556_v3 = vsel %vm289_vm1, %v312_v34, %v1563_v63  ;;  %v306_v63 = vld [vmem:[#allocation2] ss:$5 sm:$0xff] }
  0x99   : > { %v1577_v4 = vpop.permute.xlu1 %1576  ;;  %v1567_v5 = vpop.permute.xlu0 %1566  ;;  %v559_v6 = vsel %vm350_vm3, %v556_v3, %v1573_v61  ;;  %v560_v7 = vsel %vm350_vm3, %v557_v2, %v1574_v60  ;;  %v308_v2 = vld [vmem:[#allocation2 + $0x28] ss:$5 sm:$0xff] }
  0x9a   : > { %v1578_v8 = vunpack.i.l.bf16 %v1577_v4  ;;  %v1568_v9 = vunpack.i.l.bf16 %v1567_v5  ;;  %v562_v10 = vpack.c.bf16 %v560_v7, %v559_v6  ;;  %v1569_v11 = vunpack.i.h.bf16 %v1567_v5 }
  0x9b   : > { %v1579_v20 = vunpack.i.h.bf16 %v1577_v4 }
  0x9c   : > { %v558_v12 = vsel %vm289_vm1, %v316_v38, %v1568_v9  ;;  %1470 = vmatprep.mubr.msk.bf16.mxu1 %vm374_vm4, %v562_v10  ;;  %v734_v30 = vsel %vm289_vm1, %v1791_v26, %v1569_v11 }
  0x9d   : > { %v561_v13 = vsel %vm350_vm3, %v558_v12, %v1578_v8  ;;  %v1587_v14 = vpop.permute.xlu1 %1586  ;;  %v1582_v15 = vpop.permute.xlu0 %1581  ;;  %v737_v42 = vsel %vm350_vm3, %v734_v30, %v1579_v20 }
  0x9e   : > { %v563_v16 = vpack.c.bf16 %v561_v13, %v561_v13  ;;  %v1589_v18 = vunpack.i.h.bf16 %v1587_v14  ;;  %v1584_v19 = vunpack.i.h.bf16 %v1582_v15  ;;  %v1588_v21 = vunpack.i.l.bf16 %v1587_v14 }
  0x9f   : > { %v1583_v22 = vunpack.i.l.bf16 %v1582_v15 }
  0xa0   : > { %v736_v31 = vsel %vm289_vm1, %v1805_v33, %v1584_v19  ;;  %1471 = vmatmul.mubr.msk.bf16.vlgmr.msra.gmra.mrb[4].mxu1 %vm374_vm4, %v563_v16 }
  0xa1   : > { %v735_v34 = vsel %vm289_vm1, %v1795_v28, %v1583_v22  ;;  %1481 = vmatpush3.bf16.msra.mxu1 %v1757_v17  ;;  %v1592_v35 = vpop.permute.xlu0 %1591  ;;  %v1597_v36 = vpop.permute.xlu1 %1596  ;;  %v739_v37 = vsel %vm350_vm3, %v736_v31, %v1589_v18  ;;  %v618_v31 = vpack.c.bf16 %v1795_v28, %v1791_v26 }
  0xa2   : > { %1526 = vmatprep.subr.msk.bf16.mxu1 %vm381_vm0, %v1778_v23  ;;  %v1594_v38 = vunpack.i.h.bf16 %v1592_v35  ;;  %v1593_v41 = vunpack.i.l.bf16 %v1592_v35  ;;  %v738_v43 = vsel %vm350_vm3, %v735_v34, %v1588_v21  ;;  %v741_v45 = vpack.c.bf16 %v739_v37, %v739_v37 }
  0xa3   : > { %v740_v44 = vpack.c.bf16 %v738_v43, %v737_v42  ;;  %v1599_v50 = vunpack.i.h.bf16 %v1597_v36  ;;  %v1598_v52 = vunpack.i.l.bf16 %v1597_v36 }
  0xa4   : > { %v913_v55 = vsel %vm289_vm1, %v1793_v27, %v1594_v38  ;;  %v912_v56 = vsel %vm289_vm1, %v1789_v25, %v1593_v41 }
  0xa5   : > { %1483 = vmatpush3.bf16.msra.mxu1 %v1782_v24  ;;  %v1602_v46 = vpop.permute.xlu0 %1601  ;;  %v1607_v49 = vpop.permute.xlu1 %1606  ;;  %1484 = vmatprep.mubr.msk.bf16.mxu1 %vm374_vm4, %v740_v44  ;;  %v347_v12 = vsel %vm289_vm1, %v306_v63, %v1598_v52  ;;  %v348_v13 = vsel %vm289_vm1, %v308_v2, %v1599_v50 }
  0xa6   : > { %v1609_v53 = vunpack.i.h.bf16 %v1607_v49  ;;  %v1608_v54 = vunpack.i.l.bf16 %v1607_v49  ;;  %1494 = vmatprep.subr.bf16.mxu1 %v1757_v17  ;;  %v1604_v59 = vunpack.i.h.bf16 %v1602_v46  ;;  %v1603_v60 = vunpack.i.l.bf16 %v1602_v46 }
  0xa7   : > { %v796_v46 = vpack.c.bf16 %v1793_v27, %v1789_v25  ;;  %v974_v25 = vpack.c.bf16 %v1813_v39, %v1797_v29  ;;  %v975_v27 = vpack.c.bf16 %v1815_v40, %v1815_v40 }
  0xa8   : > { %v916_v61 = vsel %vm350_vm3, %v913_v55, %v1609_v53  ;;  %v915_v62 = vsel %vm350_vm3, %v912_v56, %v1608_v54  ;;  %1485 = vmatmul.mubr.msk.bf16.vlgmr.msra.gmra.mrb[8].mxu1 %vm374_vm4, %v741_v45  ;;  %v349_v10 = vsel %vm289_vm1, %v310_v58, %v1604_v59  ;;  %v914_v11 = vsel %vm289_vm1, %v1803_v32, %v1603_v60 }
  0xa9   : > { %v918_v3 = vpack.c.bf16 %v916_v61, %v915_v62  ;;  %1495 = vmatpush3.bf16.msra.mxu1 %v1757_v17  ;;  %v1612_v4 = vpop.permute.xlu0 %1611  ;;  %v1617_v5 = vpop.permute.xlu1 %1616 }
  0xaa   : > { %v1614_v6 = vunpack.i.h.bf16 %v1612_v4  ;;  %v1613_v7 = vunpack.i.l.bf16 %v1612_v4  ;;  %v1619_v8 = vunpack.i.h.bf16 %v1617_v5  ;;  %v1618_v9 = vunpack.i.l.bf16 %v1617_v5  ;;  %1528 = vmatprep.subr.msk.bf16.mxu1 %vm381_vm0, %v1778_v23 }
  0xab   : > { %1498 = vmatprep.mubr.msk.bf16.mxu1 %vm374_vm4, %v918_v3 }
  0xac   : > { %v353_v14 = vsel %vm350_vm3, %v349_v10, %v1619_v8  ;;  %v917_v15 = vsel %vm350_vm3, %v914_v11, %v1618_v9  ;;  %v351_v16 = vsel %vm350_vm3, %v347_v12, %v1613_v7  ;;  %v352_v18 = vsel %vm350_vm3, %v348_v13, %v1614_v6 }
  0xad   : > { %v355_v19 = vpack.c.bf16 %v353_v14, %v353_v14  ;;  %v919_v20 = vpack.c.bf16 %v917_v15, %v917_v15  ;;  %1497 = vmatpush3.bf16.msra.mxu1 %v1782_v24  ;;  %v1622_v21 = vpop.permute.xlu0 %1621  ;;  %v1074_v22 = vpop.permute.xlu1 %1073  ;;  %v354_v30 = vpack.c.bf16 %v352_v18, %v351_v16 }
  0xae   : > { %1508 = vmatprep.subr.bf16.mxu1 %v1757_v17  ;;  %v1624_v34 = vunpack.i.h.bf16 %v1622_v21  ;;  %v1623_v35 = vunpack.i.l.bf16 %v1622_v21  ;;  %v1092_v36 = vsel %vm289_vm1, %v1815_v40, %v1074_v22 }
  0xaf   : > { %1456 = vmatprep.mubr.msk.bf16.mxu0 %vm374_vm4, %v354_v30 }
  0xb0   : > { %1457 = vmatmul.mubr.msk.bf16.vlgmr.msra.gmra.mrb[0].mxu0 %vm374_vm4, %v355_v19  ;;  %1499 = vmatmul.mubr.msk.bf16.vlgmr.msra.gmra.mrb[12].mxu1 %vm374_vm4, %v919_v20  ;;  %v1091_v26 = vsel %vm289_vm1, %v1813_v39, %v1624_v34  ;;  %v1090_v28 = vsel %vm289_vm1, %v1797_v29, %v1623_v35  ;;  %v1153_v29 = vpack.c.bf16 %v1843_v51, %v1843_v51 }
  0xb1   : > { %1509 = vmatpush3.bf16.msra.mxu1 %v1757_v17  ;;  %v1627_v37 = vpop.permute.xlu0 %1626  ;;  %v1086_v38 = vpop.permute.xlu1 %1085  ;;  %1475 = vmatpush3.bf16.msra.mxu0 %v1747_v1 }
  0xb2   : > { %v1629_v41 = vunpack.i.h.bf16 %v1627_v37  ;;  %v1628_v42 = vunpack.i.l.bf16 %v1627_v37  ;;  %1530 = vmatprep.subr.msk.bf16.mxu1 %vm381_vm0, %v1778_v23  ;;  %1476 = vmatprep.mubr.msk.bf16.mxu0 %vm289_vm1, %v618_v31  ;;  %v1095_v43 = vsel %vm350_vm3, %v1092_v36, %v1086_v38  ;;  %v619_v23 = vpack.c.bf16 %v1805_v33, %v1805_v33 }
  0xb3   : > { %1527 = vmatprep.subr.msk.bf16.mxu0 %vm381_vm0, %v1739_v0  ;;  %v1097_v49 = vpack.c.bf16 %v1095_v43, %v1095_v43 }
  0xb4   : > { %v1093_v17 = vsel %vm350_vm3, %v1090_v28, %v1628_v42  ;;  %v1094_v44 = vsel %vm350_vm3, %v1091_v26, %v1629_v41 }
  0xb5   : > { %v1096_v45 = vpack.c.bf16 %v1094_v44, %v1093_v17  ;;  %1511 = vmatpush3.bf16.msra.mxu1 %v1782_v24  ;;  %v797_v24 = vpack.c.bf16 %v1803_v32, %v1803_v32 }
  0xb7   : > { %1512 = vmatprep.mubr.msk.bf16.mxu1 %vm374_vm4, %v1096_v45 }
  0xb8   : > { %1477 = vmatmul.mubr.msk.bf16.vlgmr.msra.gmra.mrb[4].mxu0 %vm289_vm1, %v619_v23  ;;  %1513 = vmatmul.mubr.msk.bf16.vlgmr.msra.gmra.mrb[16].mxu1 %vm374_vm4, %v1097_v49 }
  0xb9   : > { %1489 = vmatpush3.bf16.msra.mxu0 %v1747_v1  ;;  %1490 = vmatprep.mubr.msk.bf16.mxu0 %vm289_vm1, %v796_v46 }
  0xba   : > { %1529 = vmatprep.subr.msk.bf16.mxu0 %vm381_vm0, %v1739_v0 }
  0xc0   : > { %1491 = vmatmul.mubr.msk.bf16.vlgmr.msra.gmra.mrb[8].mxu0 %vm289_vm1, %v797_v24 }
  0xc1   : > { %1503 = vmatpush3.bf16.msra.mxu0 %v1747_v1  ;;  %1504 = vmatprep.mubr.msk.bf16.mxu0 %vm289_vm1, %v974_v25 }
  0xc2   : > { %1531 = vmatprep.subr.msk.bf16.mxu0 %vm381_vm0, %v1739_v0 }
  0xc8   : > { %1505 = vmatmul.mubr.msk.bf16.vlgmr.msra.gmra.mrb[12].mxu0 %vm289_vm1, %v975_v27 }
  0xc9   : > { %1517 = vmatpush3.bf16.msra.mxu0 %v1747_v1  ;;  %1518 = vmatprep.mubr.msk.bf16.mxu0 %vm289_vm1, %v1152_v57  ;;  %v1965_v1 = vld [vmem:[%s2113_s2] ss:$0 sm:$0xff] }
  0xd0   : > { %1519 = vmatmul.mubr.msk.bf16.vlgmr.msra.gmra.mrb[16].mxu0 %vm289_vm1, %v1153_v29 }
  0xf9   : > { %v1956_v32 = vpop.f32.mrb[0].mxu1 }
  0xfa   : > { %v1958_v0 = vpop.f32.mrb[1].mxu1 }
  0xfb   : > { %v1465_v33 = vpop.f32.mrb[2].mxu1 }
  0xfc   : > { %v1960_v39 = vpop.f32.mrb[3].mxu1 }
 0x173   : > { %v1472_v40 = vpop.f32.mrb[4].mxu1 }
 0x174   : > { %v613_v47 = vadd.f32 %v1472_v40, %v1965_v1  ;;  %v604_v48 = vpop.f32.mrb[5].mxu1 }
 0x175   : > { %v605_v51 = vadd.f32 %v1965_v1, %v604_v48  ;;  %v1473_v57 = vpop.f32.mrb[6].mxu1 }
 0x176   : > { %v679_v50 = vmul.f32 0.044715, %v613_v47  ;;  %v607_v52 = vpop.f32.mrb[7].mxu1  ;;  %v676_v27 = vmul.f32 0.5, %v613_v47 }
 0x177   : > { %v677_v53 = vmul.f32 0.044715, %v605_v51  ;;  %v608_v54 = vadd.f32 %v1965_v1, %v607_v52  ;;  %v674_v29 = vmul.f32 0.5, %v605_v51 }
 0x178   : > { %v682_v55 = vmul.f32 %v679_v50, %v613_v47 }
 0x179   : > { %v680_v56 = vmul.f32 %v677_v53, %v605_v51  ;;  %v678_v58 = vmul.f32 0.044715, %v608_v54  ;;  %v675_v33 = vmul.f32 0.5, %v608_v54  ;;  %v2018_v53 = vld [vmem:[%s2115_s4] ss:$0 sm:$0xff] }
 0x17a   : > { %v685_v59 = vmul.f32 %v682_v55, %v613_v47 }
 0x17b   : > { %v681_v60 = vmul.f32 %v678_v58, %v608_v54  ;;  %v1486_v61 = vpop.f32.mrb[8].mxu1  ;;  %v683_v62 = vmul.f32 %v680_v56, %v605_v51 }
 0x17c   : > { %v1971_v63 = vadd.f32 %v1486_v61, %v1965_v1  ;;  %v782_v2 = vpop.f32.mrb[9].mxu1  ;;  %v688_v3 = vadd.f32 %v685_v59, %v613_v47 }
 0x17d   : > { %v1974_v4 = vadd.f32 %v1965_v1, %v782_v2  ;;  %v1487_v5 = vpop.f32.mrb[10].mxu1  ;;  %v686_v6 = vadd.f32 %v683_v62, %v605_v51  ;;  %v684_v7 = vmul.f32 %v681_v60, %v608_v54 }
 0x17e   : > { %v857_v8 = vmul.f32 0.044715, %v1971_v63  ;;  %v785_v9 = vpop.f32.mrb[11].mxu1  ;;  %v691_v10 = vmul.f32 0.7978846, %v688_v3 }
 0x17f   : > { %v855_v11 = vmul.f32 0.044715, %v1974_v4  ;;  %v1979_v12 = vadd.f32 %v1965_v1, %v785_v9  ;;  %v689_v13 = vmul.f32 0.7978846, %v686_v6  ;;  %v687_v14 = vadd.f32 %v684_v7, %v608_v54 }
 0x180   : > { %v860_v15 = vmul.f32 %v857_v8, %v1971_v63  ;;  %1632 = vtanh.f32 %v691_v10 }
 0x181   : > { %v858_v16 = vmul.f32 %v855_v11, %v1974_v4  ;;  %v856_v18 = vmul.f32 0.044715, %v1979_v12  ;;  %1634 = vtanh.f32 %v689_v13  ;;  %v690_v19 = vmul.f32 0.7978846, %v687_v14 }
 0x182   : > { %v863_v20 = vmul.f32 %v860_v15, %v1971_v63 }
 0x183   : > { %v1458_v21 = vpop.f32.mrb[0].mxu0  ;;  %v1500_v22 = vpop.f32.mrb[12].mxu1  ;;  %1636 = vtanh.f32 %v690_v19  ;;  %v859_v36 = vmul.f32 %v856_v18, %v1979_v12  ;;  %v861_v26 = vmul.f32 %v858_v16, %v1974_v4 }
 0x184   : > { %v1986_v30 = vadd.f32 %v1458_v21, %v1965_v1  ;;  %v1989_v31 = vadd.f32 %v1500_v22, %v1965_v1  ;;  %v419_v34 = vpop.f32.mrb[1].mxu0  ;;  %v960_v35 = vpop.f32.mrb[13].mxu1  ;;  %v866_v23 = vadd.f32 %v863_v20, %v1971_v63 }
 0x185   : > { %v1993_v37 = vadd.f32 %v1965_v1, %v419_v34  ;;  %v1996_v38 = vadd.f32 %v1965_v1, %v960_v35  ;;  %v1459_v41 = vpop.f32.mrb[2].mxu0  ;;  %v1501_v42 = vpop.f32.mrb[14].mxu1  ;;  %v864_v57 = vadd.f32 %v861_v26, %v1974_v4  ;;  %v862_v50 = vmul.f32 %v859_v36, %v1979_v12 }
 0x186   : > { %v504_v28 = vmul.f32 0.044715, %v1986_v30  ;;  %v1035_v43 = vmul.f32 0.044715, %v1989_v31  ;;  %v422_v17 = vpop.f32.mrb[3].mxu0  ;;  %v963_v44 = vpop.f32.mrb[15].mxu1 }
 0x187   : > { %v502_v45 = vmul.f32 0.044715, %v1993_v37  ;;  %v1033_v46 = vmul.f32 0.044715, %v1996_v38  ;;  %v2005_v49 = vadd.f32 %v1965_v1, %v422_v17  ;;  %v2008_v24 = vadd.f32 %v1965_v1, %v963_v44 }
 0x188   : > { %v507_v25 = vmul.f32 %v504_v28, %v1986_v30  ;;  %v1038_v47 = vmul.f32 %v1035_v43, %v1989_v31  ;;  %v869_v2 = vmul.f32 0.7978846, %v866_v23  ;;  %v867_v26 = vmul.f32 0.7978846, %v864_v57 }
 0x189   : > { %v505_v40 = vmul.f32 %v502_v45, %v1993_v37  ;;  %v503_v48 = vmul.f32 0.044715, %v2005_v49  ;;  %v1036_v51 = vmul.f32 %v1033_v46, %v1996_v38  ;;  %v1034_v54 = vmul.f32 0.044715, %v2008_v24 }
 0x18a   : > { %v1633_v52 = vpop.eup %1632  ;;  %v510_v55 = vmul.f32 %v507_v25, %v1986_v30  ;;  %v1041_v57 = vmul.f32 %v1038_v47, %v1989_v31 }
 0x18b   : > { %v1635_v56 = vpop.eup %1634  ;;  %v508_v58 = vmul.f32 %v505_v40, %v1993_v37  ;;  %v506_v59 = vmul.f32 %v503_v48, %v2005_v49  ;;  %v1478_v60 = vpop.f32.mrb[4].mxu0  ;;  %v697_v61 = vadd.f32 1.0, %v1633_v52  ;;  %v1037_v46 = vmul.f32 %v1034_v54, %v2008_v24 }
 0x18c   : > { %v1514_v62 = vpop.f32.mrb[16].mxu1  ;;  %v513_v3 = vadd.f32 %v510_v55, %v1986_v30  ;;  %v669_v5 = vadd.f32 %v1478_v60, %v2018_v53  ;;  %v660_v7 = vpop.f32.mrb[5].mxu0  ;;  %v695_v8 = vadd.f32 1.0, %v1635_v56  ;;  %v494_v54 = vadd.f32 %v1956_v32, %v2018_v53 }
 0x18d   : > { %v2029_v6 = vadd.f32 %v1514_v62, %v1965_v1  ;;  %v1138_v9 = vpop.f32.mrb[17].mxu1  ;;  %v511_v10 = vadd.f32 %v508_v58, %v1993_v37  ;;  %v509_v11 = vmul.f32 %v506_v59, %v2005_v49  ;;  %v700_v13 = vmul.f32 %v697_v61, %v676_v27  ;;  %v1479_v15 = vpop.f32.mrb[6].mxu0 }
 0x18e   : > { %v661_v14 = vadd.f32 %v2018_v53, %v660_v7  ;;  %v1515_v16 = vpop.f32.mrb[18].mxu1  ;;  %v1637_v18 = vpop.eup %1636  ;;  %v516_v19 = vmul.f32 0.7978846, %v513_v3  ;;  %v698_v21 = vmul.f32 %v695_v8, %v674_v29  ;;  %v2036_v22 = vadd.f32 %v1965_v1, %v1138_v9 }
 0x18f   : > { %v1213_v20 = vmul.f32 0.044715, %v2029_v6  ;;  %v663_v34 = vpop.f32.mrb[7].mxu0  ;;  %v1141_v35 = vpop.f32.mrb[19].mxu1  ;;  %v514_v36 = vmul.f32 0.7978846, %v511_v10  ;;  %v512_v41 = vadd.f32 %v509_v11, %v2005_v49  ;;  %v2039_v42 = vadd.f32 %v700_v13, %v669_v5 }
 0x190   : > { %1638 = vtanh.f32 %v516_v19  ;;  %v2041_v28 = vadd.f32 %v698_v21, %v661_v14  ;;  %v1211_v43 = vmul.f32 0.044715, %v2036_v22  ;;  %v664_v17 = vadd.f32 %v2018_v53, %v663_v34 }
 0x191   : > { %v515_v44 = vmul.f32 0.7978846, %v512_v41  ;;  %1640 = vtanh.f32 %v514_v36  ;;  %v696_v23 = vadd.f32 1.0, %v1637_v18  ;;  %v2046_v45 = vadd.f32 %v1965_v1, %v1141_v35 }
 0x192   : > { %v1216_v25 = vmul.f32 %v1213_v20, %v2029_v6  ;;  %1642 = vtanh.f32 %v869_v2  ;;  %v865_v27 = vadd.f32 %v862_v50, %v1979_v12  ;;  %v1214_v52 = vmul.f32 %v1211_v43, %v2036_v22 }
 0x193   : > { %1644 = vtanh.f32 %v515_v44  ;;  %v699_v29 = vmul.f32 %v696_v23, %v675_v33  ;;  %v1212_v40 = vmul.f32 0.044715, %v2046_v45  ;;  %v1492_v48 = vpop.f32.mrb[8].mxu0  ;;  %v1044_v33 = vadd.f32 %v1041_v57, %v1989_v31 }
 0x194   : > { %v838_v55 = vpop.f32.mrb[9].mxu0  ;;  %1646 = vtanh.f32 %v867_v26  ;;  %v868_v1 = vmul.f32 0.7978846, %v865_v27  ;;  %v486_v59 = vadd.f32 %v2018_v53, %v1958_v0  ;;  %v1039_v47 = vmul.f32 %v1036_v51, %v1996_v38 }
 0x195   : > { %v2056_v56 = vadd.f32 %v699_v29, %v664_v17  ;;  %v1215_v58 = vmul.f32 %v1212_v40, %v2046_v45  ;;  %v1493_v50 = vpop.f32.mrb[10].mxu0  ;;  %v1040_v61 = vmul.f32 %v1037_v46, %v2008_v24  ;;  %v489_v62 = vadd.f32 %v2018_v53, %v1960_v39 }
 0x196   : > { %v841_v60 = vpop.f32.mrb[11].mxu0  ;;  %1648 = vtanh.f32 %v868_v1  ;;  %v854_v32 = vmul.f32 0.5, %v1971_v63  ;;  %v1047_v2 = vmul.f32 0.7978846, %v1044_v33  ;;  %v1219_v3 = vmul.f32 %v1216_v25, %v2029_v6 }
 0x197   : > { %v852_v5 = vmul.f32 0.5, %v1974_v4  ;;  %v1042_v7 = vadd.f32 %v1039_v47, %v1996_v38  ;;  %v1043_v0 = vadd.f32 %v1040_v61, %v2008_v24  ;;  %v1217_v8 = vmul.f32 %v1214_v52, %v2036_v22 }
 0x198   : > { %v853_v51 = vmul.f32 0.5, %v1979_v12  ;;  %1650 = vtanh.f32 %v1047_v2  ;;  %v1222_v9 = vadd.f32 %v1219_v3, %v2029_v6  ;;  %v1218_v39 = vmul.f32 %v1215_v58, %v2046_v45 }
 0x199   : > { %v501_v63 = vmul.f32 0.5, %v1986_v30  ;;  %v1045_v11 = vmul.f32 0.7978846, %v1042_v7  ;;  %v1046_v13 = vmul.f32 0.7978846, %v1043_v0  ;;  %v1220_v4 = vadd.f32 %v1217_v8, %v2036_v22 }
 0x19a   : > { %v1639_v10 = vpop.eup %1638  ;;  %v499_v16 = vmul.f32 0.5, %v1993_v37  ;;  %v1225_v19 = vmul.f32 0.7978846, %v1222_v9  ;;  %v1221_v12 = vadd.f32 %v1218_v39, %v2046_v45  ;;  %v500_v34 = vmul.f32 0.5, %v2005_v49 }
 0x19b   : > { %v1641_v14 = vpop.eup %1640  ;;  %v522_v15 = vadd.f32 1.0, %v1639_v10  ;;  %v1506_v18 = vpop.f32.mrb[12].mxu0  ;;  %1652 = vtanh.f32 %v1045_v11  ;;  %v1223_v36 = vmul.f32 0.7978846, %v1220_v4  ;;  %v847_v26 = vadd.f32 %v1492_v48, %v2018_v53 }
 0x19c   : > { %v1643_v20 = vpop.eup %1642  ;;  %v520_v21 = vadd.f32 1.0, %v1641_v14  ;;  %v1016_v35 = vpop.f32.mrb[13].mxu0  ;;  %1654 = vtanh.f32 %v1046_v13  ;;  %v1224_v25 = vmul.f32 0.7978846, %v1221_v12  ;;  %v839_v49 = vadd.f32 %v2018_v53, %v838_v55 }
 0x19d   : > { %v1645_v30 = vpop.eup %1644  ;;  %v525_v41 = vmul.f32 %v522_v15, %v501_v63  ;;  %v875_v43 = vadd.f32 1.0, %v1643_v20  ;;  %v1507_v17 = vpop.f32.mrb[14].mxu0  ;;  %1656 = vtanh.f32 %v1225_v19  ;;  %v842_v58 = vadd.f32 %v2018_v53, %v841_v60 }
 0x19e   : > { %v1647_v44 = vpop.eup %1646  ;;  %v523_v37 = vmul.f32 %v520_v21, %v499_v16  ;;  %v521_v23 = vadd.f32 1.0, %v1645_v30  ;;  %v1019_v46 = vpop.f32.mrb[15].mxu0  ;;  %1658 = vtanh.f32 %v1223_v36  ;;  %v1025_v0 = vadd.f32 %v1506_v18, %v2018_v53 }
 0x19f   : > { %v528_v27 = vadd.f32 %v525_v41, %v494_v54  ;;  %v878_v29 = vmul.f32 %v875_v43, %v854_v32  ;;  %v873_v40 = vadd.f32 1.0, %v1647_v44  ;;  %1660 = vtanh.f32 %v1224_v25 }
 0x1a0   : > { %v1649_v57 = vpop.eup %1648  ;;  %v526_v52 = vadd.f32 %v523_v37, %v486_v59  ;;  %v524_v1 = vmul.f32 %v521_v23, %v500_v34  ;;  %v1032_v60 = vmul.f32 0.5, %v1989_v31  ;;  %v1017_v13 = vadd.f32 %v2018_v53, %v1016_v35 }
 0x1a1   : > { %v706_v48 = vmax.f32 %v528_v27, %v2039_v42  ;;  %v881_v50 = vadd.f32 %v878_v29, %v847_v26  ;;  %v876_v33 = vmul.f32 %v873_v40, %v852_v5  ;;  %v874_v47 = vadd.f32 1.0, %v1649_v57 }
 0x1a2   : > { %v704_v61 = vmax.f32 %v526_v52, %v2041_v28  ;;  %v527_v2 = vadd.f32 %v524_v1, %v489_v62  ;;  %v1651_v54 = vpop.eup %1650  ;;  %v1020_v15 = vadd.f32 %v2018_v53, %v1019_v46  ;;  %v1031_v31 = vmul.f32 0.5, %v2008_v24 }
 0x1a3   : > { %v884_v32 = vmax.f32 %v706_v48, %v881_v50  ;;  %v879_v3 = vadd.f32 %v876_v33, %v839_v49  ;;  %v877_v55 = vmul.f32 %v874_v47, %v853_v51  ;;  %v1520_v7 = vpop.f32.mrb[16].mxu0  ;;  %v1053_v8 = vadd.f32 1.0, %v1651_v54 }
 0x1a4   : > { %v705_v59 = vmax.f32 %v527_v2, %v2056_v56  ;;  %v1194_v42 = vpop.f32.mrb[17].mxu0  ;;  %v1030_v51 = vmul.f32 0.5, %v1996_v38  ;;  %v1203_v19 = vadd.f32 %v1520_v7, %v2018_v53  ;;  %v1210_v12 = vmul.f32 0.5, %v2029_v6 }
 0x1a5   : > { %v882_v9 = vmax.f32 %v704_v61, %v879_v3  ;;  %v880_v5 = vadd.f32 %v877_v55, %v842_v58  ;;  %v1521_v39 = vpop.f32.mrb[18].mxu0  ;;  %v1653_v10 = vpop.eup %1652  ;;  %v1056_v28 = vmul.f32 %v1053_v8, %v1032_v60  ;;  %v1208_v38 = vmul.f32 0.5, %v2036_v22 }
 0x1a6   : > { %v1197_v62 = vpop.f32.mrb[19].mxu0  ;;  %v1655_v63 = vpop.eup %1654  ;;  %v1051_v4 = vadd.f32 1.0, %v1653_v10  ;;  %v1195_v41 = vadd.f32 %v2018_v53, %v1194_v42  ;;  %v1209_v44 = vmul.f32 0.5, %v2046_v45 }
 0x1a7   : > { %v883_v11 = vmax.f32 %v705_v59, %v880_v5  ;;  %v1657_v56 = vpop.eup %1656  ;;  %v1059_v14 = vadd.f32 %v1056_v28, %v1025_v0  ;;  %v1052_v16 = vadd.f32 1.0, %v1655_v63  ;;  %v1198_v17 = vadd.f32 %v2018_v53, %v1197_v62 }
 0x1a8   : > { %v1054_v18 = vmul.f32 %v1051_v4, %v1030_v51  ;;  %v1231_v20 = vadd.f32 1.0, %v1657_v56  ;;  %v1659_v21 = vpop.eup %1658 }
 0x1a9   : > { %v1062_v34 = vmax.f32 %v884_v32, %v1059_v14  ;;  %v1055_v35 = vmul.f32 %v1052_v16, %v1031_v31  ;;  %v1229_v26 = vadd.f32 1.0, %v1659_v21  ;;  %v1661_v43 = vpop.eup %1660 }
 0x1aa   : > { %v1057_v36 = vadd.f32 %v1054_v18, %v1017_v13  ;;  %v1234_v30 = vmul.f32 %v1231_v20, %v1210_v12  ;;  %v1230_v46 = vadd.f32 1.0, %v1661_v43 }
 0x1ab   : > { %v1058_v24 = vadd.f32 %v1055_v35, %v1020_v15  ;;  %v1232_v23 = vmul.f32 %v1229_v26, %v1208_v38 }
 0x1ac   : > { %v1060_v37 = vmax.f32 %v882_v9, %v1057_v36  ;;  %v1237_v6 = vadd.f32 %v1234_v30, %v1203_v19  ;;  %v1233_v22 = vmul.f32 %v1230_v46, %v1209_v44 }
 0x1ad   : > { %v1061_v25 = vmax.f32 %v883_v11, %v1058_v24  ;;  %v1235_v29 = vadd.f32 %v1232_v23, %v1195_v41 }
 0x1ae   : > { %v1240_v27 = vmax.f32 %v1062_v34, %v1237_v6  ;;  %v1236_v57 = vadd.f32 %v1233_v22, %v1198_v17 }
 0x1af   : > { %v1238_v40 = vmax.f32 %v1060_v37, %v1235_v29 }
 0x1b0   : > { %v1387_v49 = vpack.c.bf16 %v1240_v27, %v1240_v27  ;;  %v1239_v45 = vmax.f32 %v1061_v25, %v1236_v57 }
 0x1b1   : > { %v1385_v53 = vpack.c.bf16 %v1238_v40, %v1238_v40 }
 0x1b2   : > { %1258 = vst.msk [vmem:[%s260_s16 + $0x8] sm:$0x3] %vm1257_vm5, %v1387_v49  ;;  %v1386_v52 = vpack.c.bf16 %v1239_v45, %v1239_v45 }
 0x1b3   : > { %1255 = vst.msk [vmem:[%s260_s16] sm:$0xf] %vm1254_vm6, %v1385_v53 }
 0x1b4   : > { %1256 = vst.msk [vmem:[%s260_s16 + $0x4] sm:$0xf] %vm1254_vm6, %v1386_v52 }
 0x1b5 PF: > { %s15_s20 = sadd.s32 1, %s1684_s20   ;;  %s2117_s18 = smov %s1680_s19 }
 0x1b6   : > { %p12_p5 = scmp.ge.s32.totalorder %s15_s20, 4   ;;  %s2118_s19 = smov %s2120_s21 }
 0x1b8   :  { %14 = sbr.rel (!%p12_p5) target bundleno = 2 (0x2), region = 90 }

// kernel: run.13
= control target key start
LH: loop header
LB: loop body
LE: loop exit
PB: predicated region body
PF: predicated region fallthrough
CT: control target
= control target key end

     0   :  { %s1220_s18 = smov 0   ;;  %s1222_s19 = smov 0   ;;  %s1392_s0 = inlined_call_operand.vmem [shape: bf16[2,1,22,11], index: 0, kind: input, shape index: {}]   ;;  %s1393_s1 = inlined_call_operand.vmem [shape: bf16[33,16], index: 1, kind: input, shape index: {}]   ;;  %s1394_s2 = inlined_call_operand.vmem [shape: f32[1,16], index: 2, kind: input, shape index: {}]   ;;  %s1395_s3 = inlined_call_operand.vmem [shape: bf16[11,16], index: 3, kind: input, shape index: {}]   ;;  %s1396_s4 = inlined_call_operand.vmem [shape: f32[1,16], index: 4, kind: input, shape index: {}]   ;;  %s1397_s5 = inlined_call_operand.vmem [shape: bf16[2,4,16], index: 5, kind: output, shape index: {}]  }
   0x1   :  { %s1224_s20 = smov 0  }
   0x2 LB: > { %s27_s21 = sadd.s32 1, %s1178_s19  ;;  %p965_p0 = scmp.ge.s32.totalorder %s1182_s20, 1  ;;  %s1182_s20 = sphi %s1224_s20, %s15_s20   ;;  %s1178_s19 = sphi %s1222_s19, %s1399_s19   ;;  %s1174_s18 = sphi %s1220_s18, %s1398_s18  }
   0x3   : > { %p29_p1 = scmp.ge.s32.totalorder %s27_s21, 2  ;;  %p207_p2 = scmp.lt.s32.totalorder %s1182_s20, 3 }
   0x5   : > { %s1401_s21 = smov (%p29_p1, %s27_s21), 0  ;;  %p208_p3 = pnand %p965_p0, %p207_p2 }
   0x6   : > { %p241_p4 = scmp.lt.s32.totalorder (!%p208_p3), %s1174_s18, 1  ;;  %vm381_vm0 = vcmask (!%p208_p3), 1044480   ;;  %v1184_v0 = vmov (!%p208_p3), 0.0   ;;  %vm382_vm1 = vcmask (!%p208_p3), 1045504   ;;  %v1146_v1 = vld [vmem:[%s1395_s3] sm:$0x3f] (!%p208_p3)  }
   0x7   : > { %211 = sbr.rel (%p208_p3) target bundleno = 434 (0x1b2), region = 40  ;;  %1030 = vmatprep.subr.bf16.mxu1 (!%p208_p3), %v1184_v0  ;;  %1020 = vmatprep.subr.bf16.mxu0 (!%p208_p3), %v1184_v0  ;;  %v1248_v2 = vld [vmem:[%s1393_s1] sm:$0xff] (!%p208_p3)   ;;  %v1185_v3 = vmov (!%p208_p3), 65535   ;;  %vm1186_vm2 = vmmov (!%p208_p3), 0   ;;  %v1265_v7 = vld [vmem:[%s1393_s1 + $0x8] sm:$0xff] (!%p208_p3)   ;;  %vm264_vm3 = vcmask (!%p208_p3), 89088  }
   0x8   : > { %v383_v4 = vsel (!%p208_p3), %vm381_vm0, 4294967295, %v1185_v3  ;;  %1032 = vmatprep.mubr.msk.bf16.mxu1 (!%p208_p3), %vm1186_vm2, %v1184_v0  ;;  %1026 = vmatprep.mubr.msk.bf16.mxu0 (!%p208_p3), %vm1186_vm2, %v1184_v0  ;;  %vm267_vm4 = vcmask (!%p208_p3), 87040   ;;  %v1149_v13 = vld [vmem:[%s1393_s1 + $0x10] ss:$0 sps:$4 sm:$0x11] (!%p208_p3)   ;;  %vm318_vm5 = vcmask (!%p208_p3), 1040384  }
   0x9   : > { %v384_v5 = vsel (!%p208_p3), %vm382_vm1, %v383_v4, 0  ;;  %1021 = vmatpush3.bf16.msra.mxu0 (!%p208_p3), %v1248_v2  ;;  %v1187_v14 = vmov (!%p208_p3), 0   ;;  %s1188_s9 = smov (!%p208_p3), 11   ;;  %s1189_s10 = smov (!%p208_p3), 22   ;;  %vm285_vm6 = vcmask (!%p208_p3), 179200   ;;  %vm314_vm7 = vcmask (!%p208_p3), 269312  }
   0xa   : > { %v1256_v6 = vand.u32 (!%p208_p3), %v1146_v1, %v384_v5  ;;  %1022 = vmatprep.subr.bf16.mxu0 (!%p208_p3), %v1184_v0  ;;  %v320_v15 = vsel (!%p208_p3), %vm318_vm5, 65535, %v1187_v14  ;;  %v1369_v1 = vld [vmem:[%s1394_s2] ss:$0 sm:$0xff] (!%p208_p3)  ;;  %vm879_vm8 = vcmask (!%p208_p3), 123904  }
   0xb   : > { %v1276_v16 = vand.u32 (!%p208_p3), %v1149_v13, %v320_v15 }
   0xc   : > { %1031 = vmatpush3.bf16.msra.mxu1 (!%p208_p3), %v1256_v6 }
   0xd   : > { %1036 = vmatprep.subr.bf16.mxu1 (!%p208_p3), %v1184_v0  ;;  %1023 = vmatpush3.bf16.msra.mxu0 (!%p208_p3), %v1265_v7 }
   0xe   : > { %s1403_s18 = smov (!%p241_p4, %s1174_s18), 1  ;;  %1024 = vmatprep.subr.bf16.mxu0 %v1184_v0 }
   0xf   : > { %s1100_s26 = smul.u32 12, %s1403_s18  ;;  %s967_s15 = sshll.u32 %s1403_s18, 1 }
  0x10   : > { %s256_s22 = scalar_lea.vmem %s1397_s5, %s967_s15 }
  0x11   : > { %s249_s29 = scalar_lea.vmem %s1392_s0, %s1100_s26  ;;  %1025 = vmatpush3.bf16.msra.mxu0 %v1276_v16 }
  0x12   : > { %v987_v8 = vld [vmem:[%s249_s29] sm:$0xff]   ;;  %v260_v9 = vld [vmem:[%s249_s29 + $0x8] sm:$0x7]  ;;  %1046 = vmatprep.subr.bf16.mxu0 %v1184_v0 }
  0x13   : > { %v988_v10 = vunpack.c.l.bf16 %v987_v8  ;;  %v989_v11 = vunpack.c.h.bf16 %v987_v8  ;;  %v263_v12 = vunpack.c.l.bf16 %v260_v9 }
  0x15   : > { %265 = vst.msk [vmem:[#allocation2] sm:$0xff] %vm264_vm3, %v988_v10  ;;  %266 = vst.msk [vmem:[#allocation2 + $0x8] sm:$0xff] %vm264_vm3, %v989_v11 }
  0x16   : > { %268 = vst.msk [vmem:[#allocation2 + $0x10] sm:$0x3f] %vm267_vm4, %v263_v12 }
  0x1c   : > { %v271_v30 = vld [vmem:[#allocation2] ss:$5 sm:$0xf] }
  0x1d   : > { %v273_v17 = vld [vmem:[#allocation2 + $0x1] ss:$5 sm:$0xf]  ;;  %v275_v18 = vld [vmem:[#allocation2 + $0x2] ss:$5 sm:$0xf] }
  0x1e   : > { %v1131_v19 = vpack.i.bf16 %v273_v17, %v275_v18  ;;  %v364_v20 = vpack.c.bf16 %v273_v17, %v273_v17  ;;  %v1280_v21 = vld [vmem:[#allocation2 + $0x3] ss:$5 sm:$0xf]  ;;  %v1284_v23 = vld [vmem:[#allocation2 + $0x4] ss:$5 sm:$0xf]  ;;  %v493_v41 = vpack.c.bf16 %v275_v18, %v275_v18 }
  0x1f   : > { %550 = vrot.lane.b32.xlu1 %v1280_v21, %s1188_s9  ;;  %v1136_v22 = vpack.i.bf16 %v275_v18, %v1280_v21  ;;  %v1287_v24 = vld [vmem:[#allocation2 + $0x5] ss:$5 sm:$0xf]  ;;  %v769_v26 = vld [vmem:[#allocation2 + $0x6] ss:$5 sm:$0xf]  ;;  %v603_v47 = vpack.c.bf16 %v1280_v21, %v1280_v21  ;;  %v713_v49 = vpack.c.bf16 %v1284_v23, %v1284_v23 }
  0x20   : > { %1132 = vrot.lane.b32.xlu0 %v1131_v19, %s1188_s9  ;;  %1033 = vmatmul.mubr.msk.bf16.vlgmr.msra.gmra.mrb[0].mxu1 %vm264_vm3, %v364_v20  ;;  %v1141_v25 = vpack.i.bf16 %v1287_v24, %v1284_v23  ;;  %v823_v59 = vpack.c.bf16 %v1287_v24, %v1287_v24 }
  0x21   : > { %1037 = vmatpush3.bf16.msra.mxu1 %v1248_v2  ;;  %1042 = vmatprep.mubr.msk.bf16.mxu1 %vm1186_vm2, %v1184_v0 }
  0x22   : > { %1038 = vmatprep.subr.bf16.mxu1 %v1184_v0 }
  0x23   : > { %554 = vrot.lane.b32.xlu1 %v1284_v23, %s1189_s10 }
  0x24   : > { %1137 = vrot.lane.b32.xlu0 %v1136_v22, %s1189_s10 }
  0x25   : > { %1039 = vmatpush3.bf16.msra.mxu1 %v1265_v7 }
  0x26   : > { %1040 = vmatprep.subr.bf16.mxu1 %v1184_v0 }
  0x27   : > { %664 = vrot.lane.b32.xlu1 %v1287_v24, %s1189_s10 }
  0x28   : > { %1142 = vrot.lane.b32.xlu0 %v1141_v25, %s1188_s9 }
  0x29   : > { %1041 = vmatpush3.bf16.msra.mxu1 %v1276_v16 }
  0x2a   : > { %1052 = vmatprep.subr.bf16.mxu1 %v1184_v0 }
  0x2c   : > { %774 = vrot.lane.b32.xlu0 %v769_v26, %s1189_s10 }
  0x91   : > { %v551_v40 = vpop.permute.xlu1 %550 }
  0x92   : > { %v1133_v27 = vpop.permute.xlu0 %1132  ;;  %v557_v42 = vsel %vm264_vm3, %v275_v18, %v551_v40 }
  0x93   : > { %v1135_v28 = vunpack.i.h.bf16 %v1133_v27  ;;  %v1134_v29 = vunpack.i.l.bf16 %v1133_v27 }
  0x95   : > { %v284_v34 = vsel %vm264_vm3, %v271_v30, %v1135_v28  ;;  %v447_v35 = vsel %vm264_vm3, %v273_v17, %v1134_v29  ;;  %v555_v43 = vpop.permute.xlu1 %554 }
  0x96   : > { %v1138_v31 = vpop.permute.xlu0 %1137  ;;  %v558_v44 = vsel %vm285_vm6, %v557_v42, %v555_v43  ;;  %v973_v42 = vld [vmem:[%s1396_s4] ss:$0 sm:$0xff] }
  0x97   : > { %v1140_v32 = vunpack.i.h.bf16 %v1138_v31  ;;  %v1139_v33 = vunpack.i.l.bf16 %v1138_v31  ;;  %v559_v45 = vpack.c.bf16 %v558_v44, %v558_v44 }
  0x99   : > { %v286_v36 = vsel %vm285_vm6, %v284_v34, %v1140_v32  ;;  %v448_v37 = vsel %vm285_vm6, %v447_v35, %v1139_v33  ;;  %v665_v50 = vpop.permute.xlu1 %664 }
  0x9a   : > { %v287_v38 = vpack.c.bf16 %v286_v36, %v286_v36  ;;  %v449_v39 = vpack.c.bf16 %v448_v37, %v448_v37  ;;  %v1143_v46 = vpop.permute.xlu0 %1142 }
  0x9b   : > { %v1144_v48 = vunpack.i.l.bf16 %v1143_v46  ;;  %v1145_v52 = vunpack.i.h.bf16 %v1143_v46 }
  0x9c   : > { %1027 = vmatmul.mubr.msk.bf16.vlgmr.msra.gmra.mrb[0].mxu0 %vm314_vm7, %v287_v38  ;;  %1043 = vmatmul.mubr.msk.bf16.vlgmr.msra.gmra.mrb[4].mxu1 %vm314_vm7, %v449_v39 }
  0x9d   : > { %1053 = vmatpush3.bf16.msra.mxu1 %v1248_v2  ;;  %1047 = vmatpush3.bf16.msra.mxu0 %v1256_v6  ;;  %v667_v51 = vsel %vm264_vm3, %v1280_v21, %v1144_v48  ;;  %v777_v56 = vsel %vm264_vm3, %v1284_v23, %v1145_v52 }
  0x9e   : > { %1054 = vmatprep.subr.bf16.mxu1 %v1184_v0  ;;  %1048 = vmatprep.mubr.msk.bf16.mxu0 %vm1186_vm2, %v1184_v0  ;;  %v668_v53 = vsel %vm285_vm6, %v667_v51, %v665_v50  ;;  %v775_v55 = vpop.permute.xlu0 %774 }
  0x9f   : > { %1062 = vmatprep.subr.bf16.mxu0 %v1184_v0  ;;  %1058 = vmatprep.mubr.msk.bf16.mxu1 %vm1186_vm2, %v1184_v0  ;;  %v669_v54 = vpack.c.bf16 %v668_v53, %v668_v53  ;;  %v778_v57 = vsel %vm285_vm6, %v777_v56, %v775_v55 }
  0xa0   : > { %v779_v58 = vpack.c.bf16 %v778_v57, %v778_v57 }
  0xa1   : > { %1055 = vmatpush3.bf16.msra.mxu1 %v1265_v7 }
  0xa2   : > { %1056 = vmatprep.subr.bf16.mxu1 %v1184_v0 }
  0xa4   : > { %1049 = vmatmul.mubr.msk.bf16.vlgmr.msra.gmra.mrb[4].mxu0 %vm264_vm3, %v493_v41 }
  0xa5   : > { %1057 = vmatpush3.bf16.msra.mxu1 %v1276_v16  ;;  %1063 = vmatpush3.bf16.msra.mxu0 %v1256_v6 }
  0xa6   : > { %1078 = vmatprep.subr.bf16.mxu1 %v1184_v0  ;;  %1064 = vmatprep.mubr.msk.bf16.mxu0 %vm1186_vm2, %v1184_v0 }
  0xa7   : > { %1068 = vmatprep.subr.bf16.mxu0 %v1184_v0 }
  0xa8   : > { %1059 = vmatmul.mubr.msk.bf16.vlgmr.msra.gmra.mrb[8].mxu1 %vm314_vm7, %v559_v45 }
  0xa9   : > { %1079 = vmatpush3.bf16.msra.mxu1 %v1256_v6  ;;  %1080 = vmatprep.mubr.msk.bf16.mxu1 %vm1186_vm2, %v1184_v0 }
  0xaa   : > { %1084 = vmatprep.subr.bf16.mxu1 %v1184_v0 }
  0xac   : > { %1065 = vmatmul.mubr.msk.bf16.vlgmr.msra.gmra.mrb[8].mxu0 %vm264_vm3, %v603_v47 }
  0xad   : > { %1069 = vmatpush3.bf16.msra.mxu0 %v1248_v2  ;;  %1074 = vmatprep.mubr.msk.bf16.mxu0 %vm1186_vm2, %v1184_v0 }
  0xae   : > { %1070 = vmatprep.subr.bf16.mxu0 %v1184_v0 }
  0xb0   : > { %1081 = vmatmul.mubr.msk.bf16.vlgmr.msra.gmra.mrb[12].mxu1 %vm264_vm3, %v713_v49 }
  0xb1   : > { %1085 = vmatpush3.bf16.msra.mxu1 %v1248_v2  ;;  %1071 = vmatpush3.bf16.msra.mxu0 %v1265_v7 }
  0xb2   : > { %1086 = vmatprep.subr.bf16.mxu1 %v1184_v0  ;;  %1072 = vmatprep.subr.bf16.mxu0 %v1184_v0 }
  0xb3   : > { %1090 = vmatprep.mubr.msk.bf16.mxu1 %vm1186_vm2, %v1184_v0 }
  0xb5   : > { %1087 = vmatpush3.bf16.msra.mxu1 %v1265_v7  ;;  %1073 = vmatpush3.bf16.msra.mxu0 %v1276_v16 }
  0xb6   : > { %1088 = vmatprep.subr.bf16.mxu1 %v1184_v0  ;;  %1094 = vmatprep.subr.bf16.mxu0 %v1184_v0 }
  0xb8   : > { %1075 = vmatmul.mubr.msk.bf16.vlgmr.msra.gmra.mrb[12].mxu0 %vm314_vm7, %v669_v54 }
  0xb9   : > { %1089 = vmatpush3.bf16.msra.mxu1 %v1276_v16  ;;  %1095 = vmatpush3.bf16.msra.mxu0 %v1256_v6 }
  0xba   : > { %1096 = vmatprep.mubr.msk.bf16.mxu0 %vm1186_vm2, %v1184_v0 }
  0xbc   : > { %1091 = vmatmul.mubr.msk.bf16.vlgmr.msra.gmra.mrb[16].mxu1 %vm314_vm7, %v779_v58 }
  0xc0   : > { %1097 = vmatmul.mubr.msk.bf16.vlgmr.msra.gmra.mrb[16].mxu0 %vm264_vm3, %v823_v59 }
  0xf3   : > { %v422_v60 = vpop.f32.mrb[0].mxu1 }
  0xf4   : > { %v1034_v61 = vpop.f32.mrb[1].mxu1  ;;  %v423_v50 = vadd.f32 %v973_v42, %v422_v60 }
  0xf5   : > { %v425_v62 = vpop.f32.mrb[2].mxu1 }
  0xf6   : > { %v1035_v63 = vpop.f32.mrb[3].mxu1 }
 0x16f   : > { %v358_v2 = vpop.f32.mrb[0].mxu0  ;;  %v487_v3 = vpop.f32.mrb[4].mxu1 }
 0x170   : > { %v359_v0 = vadd.f32 %v1369_v1, %v358_v2  ;;  %v488_v4 = vadd.f32 %v1369_v1, %v487_v3  ;;  %v1028_v5 = vpop.f32.mrb[1].mxu0  ;;  %v1044_v6 = vpop.f32.mrb[5].mxu1 }
 0x171   : > { %v361_v7 = vpop.f32.mrb[2].mxu0  ;;  %v490_v8 = vpop.f32.mrb[6].mxu1 }
 0x172   : > { %v429_v9 = vmul.f32 0.044715, %v359_v0  ;;  %v538_v10 = vmul.f32 0.044715, %v488_v4  ;;  %v1029_v11 = vpop.f32.mrb[3].mxu0  ;;  %v1045_v12 = vpop.f32.mrb[7].mxu1 }
 0x173   : > { %v428_v46 = vmul.f32 0.5, %v359_v0  ;;  %v537_v48 = vmul.f32 0.5, %v488_v4 }
 0x174   : > { %v430_v13 = vmul.f32 %v429_v9, %v359_v0  ;;  %v539_v14 = vmul.f32 %v538_v10, %v488_v4 }
 0x176   : > { %v431_v15 = vmul.f32 %v430_v13, %v359_v0  ;;  %v540_v16 = vmul.f32 %v539_v14, %v488_v4 }
 0x177   : > { %v531_v17 = vpop.f32.mrb[4].mxu0 }
 0x178   : > { %v432_v18 = vadd.f32 %v431_v15, %v359_v0  ;;  %v541_v19 = vadd.f32 %v540_v16, %v488_v4  ;;  %v1050_v20 = vpop.f32.mrb[5].mxu0  ;;  %v532_v52 = vadd.f32 %v973_v42, %v531_v17 }
 0x179   : > { %v534_v21 = vpop.f32.mrb[6].mxu0 }
 0x17a   : > { %v433_v22 = vmul.f32 0.7978846, %v432_v18  ;;  %v542_v23 = vmul.f32 0.7978846, %v541_v19  ;;  %v1051_v24 = vpop.f32.mrb[7].mxu0 }
 0x17b   : > { %v597_v25 = vpop.f32.mrb[8].mxu1 }
 0x17c   : > { %1150 = vtanh.f32 %v433_v22  ;;  %v598_v26 = vadd.f32 %v1369_v1, %v597_v25  ;;  %v1060_v27 = vpop.f32.mrb[9].mxu1 }
 0x17d   : > { %1152 = vtanh.f32 %v542_v23  ;;  %v600_v28 = vpop.f32.mrb[10].mxu1 }
 0x17e   : > { %v648_v29 = vmul.f32 0.044715, %v598_v26  ;;  %v1061_v30 = vpop.f32.mrb[11].mxu1  ;;  %v647_v9 = vmul.f32 0.5, %v598_v26 }
 0x17f   : > { %v641_v31 = vpop.f32.mrb[8].mxu0 }
 0x180   : > { %v649_v32 = vmul.f32 %v648_v29, %v598_v26  ;;  %v1066_v33 = vpop.f32.mrb[9].mxu0  ;;  %v642_v15 = vadd.f32 %v973_v42, %v641_v31 }
 0x181   : > { %v644_v34 = vpop.f32.mrb[10].mxu0 }
 0x182   : > { %v650_v35 = vmul.f32 %v649_v32, %v598_v26  ;;  %v1067_v36 = vpop.f32.mrb[11].mxu0 }
 0x183   : > { %v751_v37 = vpop.f32.mrb[12].mxu1 }
 0x184   : > { %v651_v38 = vadd.f32 %v650_v35, %v598_v26  ;;  %v1082_v39 = vpop.f32.mrb[13].mxu1  ;;  %v752_v27 = vadd.f32 %v973_v42, %v751_v37 }
 0x185   : > { %v754_v40 = vpop.f32.mrb[14].mxu1 }
 0x186   : > { %v1151_v41 = vpop.eup %1150  ;;  %v652_v43 = vmul.f32 0.7978846, %v651_v38  ;;  %v1083_v44 = vpop.f32.mrb[15].mxu1 }
 0x187   : > { %v1153_v45 = vpop.eup %1152  ;;  %v435_v47 = vadd.f32 1.0, %v1151_v41 }
 0x188   : > { %v544_v49 = vadd.f32 1.0, %v1153_v45  ;;  %1154 = vtanh.f32 %v652_v43 }
 0x189   : > { %v436_v51 = vmul.f32 %v435_v47, %v428_v46 }
 0x18a   : > { %v545_v53 = vmul.f32 %v544_v49, %v537_v48 }
 0x18b   : > { %v437_v54 = vadd.f32 %v436_v51, %v423_v50  ;;  %v707_v55 = vpop.f32.mrb[12].mxu0 }
 0x18c   : > { %v546_v56 = vadd.f32 %v545_v53, %v532_v52  ;;  %v708_v57 = vadd.f32 %v1369_v1, %v707_v55  ;;  %v1076_v58 = vpop.f32.mrb[13].mxu0 }
 0x18d   : > { %v710_v59 = vpop.f32.mrb[14].mxu0 }
 0x18e   : > { %v547_v61 = vmax.f32 %v437_v54, %v546_v56  ;;  %v758_v62 = vmul.f32 0.044715, %v708_v57  ;;  %v1077_v63 = vpop.f32.mrb[15].mxu0  ;;  %v757_v25 = vmul.f32 0.5, %v708_v57 }
 0x18f   : > { %v817_v2 = vpop.f32.mrb[16].mxu1 }
 0x190   : > { %v759_v3 = vmul.f32 %v758_v62, %v708_v57  ;;  %v818_v0 = vadd.f32 %v1369_v1, %v817_v2  ;;  %v1092_v4 = vpop.f32.mrb[17].mxu1 }
 0x191   : > { %v820_v5 = vpop.f32.mrb[18].mxu1 }
 0x192   : > { %v1155_v60 = vpop.eup %1154  ;;  %v760_v6 = vmul.f32 %v759_v3, %v708_v57  ;;  %v868_v7 = vmul.f32 0.044715, %v818_v0  ;;  %v1093_v8 = vpop.f32.mrb[19].mxu1  ;;  %v867_v32 = vmul.f32 0.5, %v818_v0 }
 0x193   : > { %v654_v10 = vadd.f32 1.0, %v1155_v60  ;;  %v861_v11 = vpop.f32.mrb[16].mxu0 }
 0x194   : > { %v761_v12 = vadd.f32 %v760_v6, %v708_v57  ;;  %v869_v13 = vmul.f32 %v868_v7, %v818_v0  ;;  %v1098_v14 = vpop.f32.mrb[17].mxu0  ;;  %v862_v31 = vadd.f32 %v973_v42, %v861_v11 }
 0x195   : > { %v655_v16 = vmul.f32 %v654_v10, %v647_v9  ;;  %v864_v17 = vpop.f32.mrb[18].mxu0 }
 0x196   : > { %v762_v18 = vmul.f32 0.7978846, %v761_v12  ;;  %v870_v19 = vmul.f32 %v869_v13, %v818_v0  ;;  %v1099_v20 = vpop.f32.mrb[19].mxu0 }
 0x197   : > { %v656_v21 = vadd.f32 %v655_v16, %v642_v15 }
 0x198   : > { %1156 = vtanh.f32 %v762_v18  ;;  %v871_v1 = vadd.f32 %v870_v19, %v818_v0 }
 0x199   : > { %v657_v22 = vmax.f32 %v547_v61, %v656_v21 }
 0x19a   : > { %v872_v23 = vmul.f32 0.7978846, %v871_v1 }
 0x19c   : > { %1158 = vtanh.f32 %v872_v23 }
 0x1a2   : > { %v1157_v24 = vpop.eup %1156 }
 0x1a3   : > { %v764_v26 = vadd.f32 1.0, %v1157_v24 }
 0x1a5   : > { %v765_v28 = vmul.f32 %v764_v26, %v757_v25 }
 0x1a6   : > { %v1159_v29 = vpop.eup %1158 }
 0x1a7   : > { %v766_v30 = vadd.f32 %v765_v28, %v752_v27  ;;  %v874_v33 = vadd.f32 1.0, %v1159_v29 }
 0x1a9   : > { %v767_v34 = vmax.f32 %v657_v22, %v766_v30  ;;  %v875_v35 = vmul.f32 %v874_v33, %v867_v32 }
 0x1ab   : > { %v876_v36 = vadd.f32 %v875_v35, %v862_v31 }
 0x1ad   : > { %v877_v38 = vmax.f32 %v767_v34, %v876_v36 }
 0x1af   : > { %v878_v39 = vpack.c.bf16 %v877_v38, %v877_v38 }
 0x1b1   : > { %880 = vst.msk [vmem:[%s256_s22] sm:$0x3] %vm879_vm8, %v878_v39 }
 0x1b2 PF: > { %s15_s20 = sadd.s32 1, %s1182_s20   ;;  %s1398_s18 = smov %s1178_s19 }
 0x1b3   : > { %p12_p5 = scmp.ge.s32.totalorder %s15_s20, 4   ;;  %s1399_s19 = smov %s1401_s21 }
 0x1b5   :  { %14 = sbr.rel (!%p12_p5) target bundleno = 2 (0x2), region = 76 }

// kernel: run.18
= control target key start
LH: loop header
LB: loop body
LE: loop exit
PB: predicated region body
PF: predicated region fallthrough
CT: control target
= control target key end

     0   :  { %s326_s14 = smov 0   ;;  %s352_s0 = inlined_call_operand.vmem [shape: bf16[2,4,16], index: 0, kind: input, shape index: {}]   ;;  %s353_s1 = inlined_call_operand.vmem [shape: f32[1,16], index: 1, kind: input, shape index: {}]   ;;  %s354_s2 = inlined_call_operand.<no memory space> [shape: f32[1,1], index: 2, kind: input, shape index: {}]   ;;  %s355_s3 = inlined_call_operand.vmem [shape: f32[2,1,16], index: 3, kind: output, shape index: {}]  }
   0x1   :  { %v8_v0 = vstv %s354_s2 }
   0x2   :  { %9 = vst [vmem:[#allocation2] sm:$0x1] %v8_v0 }
   0x3 LB: > { %s270_s15 = sadd.s32 4294967295, %s300_s14   ;;  %p274_p0 = scmp.ge.s32.totalorder %s300_s14, 1  ;;  %s300_s14 = sphi %s326_s14, %s15_s14  }
   0x4   : > { %p138_p1 = scmp.lt.s32.totalorder %s300_s14, 3 }
   0x6   : > { %p139_p2 = pnand %p274_p0, %p138_p1 }
   0x7   : > { %p159_p3 = scmp.lt.s32.totalorder (!%p139_p2), %s270_s15, 1  ;;  %v276_v2 = vld [vmem:[%s353_s1] ss:$0 sm:$0xff] (!%p139_p2)  ;;  %vm176_vm0 = vcmask (!%p139_p2), 125952   ;;  %v302_v6 = vmov (!%p139_p2), 0   ;;  %vm188_vm1 = vcmask (!%p139_p2), 3072  }
   0x8   : > { %142 = sbr.rel (%p139_p2) target bundleno = 366 (0x16e), region = 32  ;;  %289 = vset.pattern.permute.xlu0 (!%p139_p2), %v302_v6  ;;  %vm221_vm2 = vcmask (!%p139_p2), 122880  }
   0x9   : > { %v277_v7 = vld [vmem:[#allocation2] ss:$0 sm:$0xff] (!%p139_p2) }
   0xf   : > { %s357_s15 = smov (!%p159_p3, %s270_s15), 1 }
  0x10   : > { %s275_s2 = sshll.u32 %s357_s15, 1  ;;  %s165_s23 = scalar_lea.vmem %s355_s3, %s357_s15 }
  0x11   : > { %s162_s18 = scalar_lea.vmem %s352_s0, %s275_s2 }
  0x12   : > { %v166_v1 = vld [vmem:[%s162_s18] sm:$0x3] }
  0x13   : > { %v167_v3 = vunpack.c.l.bf16 %v166_v1 }
  0x15   : > { %v175_v4 = vmul.f32 %v276_v2, %v167_v3 }
  0x17   : > { %v177_v5 = vsel %vm176_vm0, %v175_v4, 0.0 }
  0x18   : > { %178 = vadd.xlane.f32.xlu0 %v177_v5 }
  0xa5   : > { %v179_v8 = vpop.xlane.xlu0 %178 }
  0xa6   : > { %v187_v9 = vadd.f32 %v277_v7, %v179_v8 }
  0xa8   : > { %v189_v10 = vsel %vm188_vm1, %v187_v9, -inf }
  0xa9   : > { %v190_v11 = vrot.slane %v189_v10, 4 }
  0xab   : > { %v191_v12 = vmax.f32 %v189_v10, %v190_v11 }
  0xad   : > { %v192_v13 = vrot.slane %v191_v12, 2 }
  0xaf   : > { %v193_v14 = vmax.f32 %v191_v12, %v192_v13 }
  0xb1   : > { %v194_v15 = vrot.slane %v193_v14, 1 }
  0xb3   : > { %v195_v16 = vmax.f32 %v193_v14, %v194_v15 }
  0xb5   : > { %v196_v17 = vsub.f32 %v187_v9, %v195_v16 }
  0xb7   : > { %v197_v18 = vmul.f32 1.442695, %v196_v17 }
  0xb9   : > { %290 = vpow2.f32 %v197_v18 }
  0xc3   : > { %v291_v19 = vpop.eup %290 }
  0xc4   : > { %v199_v20 = vsel %vm188_vm1, %v291_v19, 0.0 }
  0xc5   : > { %v200_v21 = vrot.slane %v199_v20, 4 }
  0xc7   : > { %v201_v22 = vadd.f32 %v200_v21, %v199_v20 }
  0xc9   : > { %v202_v23 = vrot.slane %v201_v22, 2 }
  0xcb   : > { %v203_v24 = vadd.f32 %v202_v23, %v201_v22 }
  0xcd   : > { %v204_v25 = vrot.slane %v203_v24, 1 }
  0xcf   : > { %v205_v26 = vadd.f32 %v204_v25, %v203_v24 }
  0xd1   : > { %292 = vrcp.f32 %v205_v26 }
  0xdb   : > { %v293_v27 = vpop.eup %292 }
  0xdc   : > { %v207_v28 = vmul.f32 %v293_v27, %v291_v19 }
  0xde   : > { %210 = vperm.xlu0 %289, %v207_v28  }
 0x15d   : > { %v211_v29 = vpop.permute.xlu0 %210 }
 0x15e   : > { %v213_v30 = vmul.f32 %v211_v29, %v167_v3 }
 0x160   : > { %v214_v31 = vsel %vm176_vm0, %v213_v30, 0.0 }
 0x161   : > { %v215_v32 = vrot.slane %v214_v31, 4 }
 0x163   : > { %v216_v33 = vadd.f32 %v215_v32, %v214_v31 }
 0x165   : > { %v217_v34 = vrot.slane %v216_v33, 2 }
 0x167   : > { %v218_v35 = vadd.f32 %v217_v34, %v216_v33 }
 0x169   : > { %v219_v36 = vrot.slane %v218_v35, 1 }
 0x16b   : > { %v220_v37 = vadd.f32 %v219_v36, %v218_v35 }
 0x16d   : > { %222 = vst.msk [vmem:[%s165_s23] sm:$0x1] %vm221_vm2, %v220_v37 }
 0x16e PF: > { %s15_s14 = sadd.s32 1, %s300_s14  }
 0x16f   : > { %p12_p4 = scmp.ge.s32.totalorder %s15_s14, 4  }
 0x171   :  { %14 = sbr.rel (!%p12_p4) target bundleno = 3 (0x3), region = 62 }

// kernel: run.16
= control target key start
LH: loop header
LB: loop body
LE: loop exit
PB: predicated region body
PF: predicated region fallthrough
CT: control target
= control target key end

     0   :  { %s877_s17 = smov 0   ;;  %s935_s0 = inlined_call_operand.vmem [shape: bf16[2,4,16], index: 0, kind: input, shape index: {}]   ;;  %s936_s1 = inlined_call_operand.vmem [shape: bf16[2,4,16], index: 1, kind: input, shape index: {}]   ;;  %s937_s2 = inlined_call_operand.vmem [shape: f32[2,1,4], index: 2, kind: input, shape index: {}]   ;;  %s938_s3 = inlined_call_operand.vmem [shape: bf16[4,8], index: 3, kind: input, shape index: {}]   ;;  %s939_s4 = inlined_call_operand.vmem [shape: f32[1,8], index: 4, kind: input, shape index: {}]   ;;  %s940_s5 = inlined_call_operand.vmem [shape: bf16[16,16], index: 5, kind: input, shape index: {}]   ;;  %s941_s6 = inlined_call_operand.vmem [shape: bf16[8,16], index: 6, kind: input, shape index: {}]   ;;  %s942_s7 = inlined_call_operand.vmem [shape: bf16[16,16], index: 7, kind: input, shape index: {}]   ;;  %s943_s8 = inlined_call_operand.vmem [shape: f32[1,16], index: 8, kind: input, shape index: {}]   ;;  %s944_s9 = inlined_call_operand.vmem [shape: f32[1,16], index: 9, kind: input, shape index: {}]   ;;  %s945_s10 = inlined_call_operand.vmem [shape: f32[1,16], index: 10, kind: input, shape index: {}]   ;;  %s946_s11 = inlined_call_operand.vmem [shape: bf16[2,4,16], index: 11, kind: output, shape index: {}]  }
   0x1 LB: > { %s742_s18 = sadd.s32 4294967295, %s813_s17   ;;  %p746_p0 = scmp.ge.s32.totalorder %s813_s17, 1  ;;  %s813_s17 = sphi %s877_s17, %s21_s17  }
   0x2   : > { %p353_p1 = scmp.lt.s32.totalorder %s813_s17, 3 }
   0x4   : > { %p354_p2 = pnand %p746_p0, %p353_p1 }
   0x5   : > { %v416_v0 = vld [vmem:[%s938_s3] sm:$0x3] (!%p354_p2)  ;;  %vm422_vm0 = vcmask (!%p354_p2), 1041408   ;;  %p398_p3 = scmp.lt.s32.totalorder (!%p354_p2), %s742_s18, 1  ;;  %v815_v1 = vmov (!%p354_p2), 0.0   ;;  %vm816_vm1 = vmmov (!%p354_p2), 0   ;;  %v621_v22 = vlaneseq (!%p354_p2) }
   0x6   : > { %357 = sbr.rel (%p354_p2) target bundleno = 776 (0x308), region = 64  ;;  %769 = vmatprep.subr.bf16.mxu0 (!%p354_p2), %v815_v1  ;;  %v424_v2 = vsel (!%p354_p2), %vm422_vm0, %v416_v0, 0  ;;  %771 = vmatprep.mubr.msk.bf16.mxu0 (!%p354_p2), %vm816_vm1, %v815_v1  ;;  %vm418_vm2 = vcmask (!%p354_p2), 31744   ;;  %v467_v5 = vld [vmem:[%s941_s6] sm:$0xf] (!%p354_p2)  ;;  %vm472_vm3 = vcmask (!%p354_p2), 1043456  }
   0x7   : > { %770 = vmatpush3.bf16.msra.mxu0 (!%p354_p2), %v424_v2  ;;  %775 = vmatprep.subr.bf16.mxu1 (!%p354_p2), %v815_v1  ;;  %v474_v6 = vsel (!%p354_p2), %vm472_vm3, %v467_v5, 0  ;;  %v803_v7 = vld [vmem:[%s942_s7] sm:$0xff] (!%p354_p2)   ;;  %vm528_vm4 = vcmask (!%p354_p2), 130048   ;;  %vm468_vm5 = vcmask (!%p354_p2), 64512   ;;  %v622_v24 = vshrl.u32 (!%p354_p2), %v621_v22, 7 }
   0x8   : > { %777 = vmatprep.mubr.msk.bf16.mxu1 (!%p354_p2), %vm816_vm1, %v815_v1  ;;  %781 = vmatprep.subr.bf16.mxu0 (!%p354_p2), %v815_v1  ;;  %v417_v9 = vld [vmem:[%s939_s4] sm:$0x1] (!%p354_p2)  ;;  %vm636_vm6 = vcmask (!%p354_p2), 125952   ;;  %vm666_vm7 = vcmask (!%p354_p2), 123904  }
   0x9   : > { %776 = vmatpush3.bf16.msra.mxu1 (!%p354_p2), %v474_v6  ;;  %v804_v14 = vld [vmem:[%s940_s5] sm:$0xff] (!%p354_p2)   ;;  %v623_v28 = vsub.s32 (!%p354_p2), 0, %v622_v24 }
   0xa   : > { %787 = vmatprep.subr.bf16.mxu1 (!%p354_p2), %v815_v1  ;;  %v756_v34 = vld [vmem:[%s943_s8] ss:$0 sm:$0xff] (!%p354_p2) }
   0xb   : > { %v757_v48 = vld [vmem:[%s944_s9] ss:$0 sm:$0xff] (!%p354_p2) }
   0xc   : > { %v758_v50 = vld [vmem:[%s945_s10] ss:$0 sm:$0xff] (!%p354_p2) }
   0xd   : > { %s948_s18 = smov (!%p398_p3, %s742_s18), 1 }
   0xe   : > { %s408_s23 = scalar_lea.vmem %s937_s2, %s948_s18  ;;  %s900_s28 = sshll.u32 %s948_s18, 1 }
   0xf   : > { %v414_v3 = vld [vmem:[%s408_s23] sm:$0x1]  ;;  %s405_s12 = scalar_lea.vmem %s936_s1, %s900_s28  ;;  %s401_s20 = scalar_lea.vmem %s935_s0, %s900_s28 }
  0x10   : > { %v415_v4 = vpack.c.bf16 %v414_v3, %v414_v3  ;;  %v519_v8 = vld [vmem:[%s405_s12] sm:$0x3]  ;;  %s412_s30 = scalar_lea.vmem %s946_s11, %s900_s28 }
  0x11   : > { %v516_v17 = vld [vmem:[%s401_s20] sm:$0x3] }
  0x12   : > { %772 = vmatmul.mubr.msk.bf16.vlgmr.msra.gmra.mrb[0].mxu0 %vm418_vm2, %v415_v4 }
  0x13   : > { %783 = vmatprep.mubr.msk.bf16.mxu0 %vm816_vm1, %v815_v1  ;;  %782 = vmatpush3.bf16.msra.mxu0 %v803_v7 }
  0x1a   : > { %784 = vmatmul.mubr.msk.bf16.vlgmr.msra.gmra.mrb[4].mxu0 %vm528_vm4, %v519_v8 }
  0xe5   : > { %v460_v10 = vpop.f32.mrb[0].mxu0 }
  0xe6   : > { %v461_v11 = vadd.f32 %v460_v10, %v417_v9  ;;  %v773_v12 = vpop.f32.mrb[1].mxu0 }
  0xe7   : > { %v463_v13 = vpop.f32.mrb[2].mxu0 }
  0xe8   : > { %v466_v15 = vpack.c.bf16 %v461_v11, %v461_v11  ;;  %v774_v16 = vpop.f32.mrb[3].mxu0 }
  0xea   : > { %778 = vmatmul.mubr.msk.bf16.vlgmr.msra.gmra.mrb[0].mxu1 %vm468_vm5, %v466_v15 }
  0xeb   : > { %788 = vmatpush3.bf16.msra.mxu1 %v804_v14  ;;  %789 = vmatprep.mubr.msk.bf16.mxu1 %vm816_vm1, %v815_v1 }
  0xed   : > { %v566_v18 = vpop.f32.mrb[4].mxu0 }
  0xee   : > { %v785_v19 = vpop.f32.mrb[5].mxu0 }
  0xef   : > { %v569_v20 = vpop.f32.mrb[6].mxu0 }
  0xf0   : > { %v786_v21 = vpop.f32.mrb[7].mxu0 }
  0xf2   : > { %790 = vmatmul.mubr.msk.bf16.vlgmr.msra.gmra.mrb[4].mxu1 %vm528_vm4, %v516_v17 }
 0x1bd   : > { %v510_v23 = vpop.f32.mrb[0].mxu1 }
 0x1be   : > { %v779_v25 = vpop.f32.mrb[1].mxu1  ;;  %v624_v30 = vrot.slane %v510_v23, %v623_v28 }
 0x1bf   : > { %v513_v26 = vpop.f32.mrb[2].mxu1 }
 0x1c0   : > { %v780_v27 = vpop.f32.mrb[3].mxu1 }
 0x1c5   : > { %v615_v29 = vpop.f32.mrb[4].mxu1 }
 0x1c6   : > { %v616_v31 = vadd.f32 %v615_v29, %v566_v18  ;;  %v791_v32 = vpop.f32.mrb[5].mxu1 }
 0x1c7   : > { %v618_v33 = vpop.f32.mrb[6].mxu1 }
 0x1c8   : > { %v625_v35 = vadd.f32 %v624_v30, %v616_v31  ;;  %v792_v36 = vpop.f32.mrb[7].mxu1 }
 0x1ca   : > { %v633_v37 = vadd.f32 %v756_v34, %v625_v35 }
 0x1cc   : > { %v637_v38 = vsel %vm636_vm6, %v633_v37, 0.0 }
 0x1cd   : > { %638 = vadd.xlane.f32.xlu0 %v637_v38 }
 0x25a   : > { %v639_v39 = vpop.xlane.xlu0 %638 }
 0x25b   : > { %v641_v40 = vmul.f32 0.0625, %v639_v39 }
 0x25d   : > { %v642_v41 = vsub.f32 %v633_v37, %v641_v40 }
 0x25f   : > { %v643_v42 = vmul.f32 %v642_v41, %v642_v41 }
 0x261   : > { %v644_v43 = vsel %vm636_vm6, %v643_v42, 0.0 }
 0x262   : > { %645 = vadd.xlane.f32.xlu0 %v644_v43 }
 0x2ef   : > { %v646_v44 = vpop.xlane.xlu0 %645 }
 0x2f0   : > { %v647_v45 = vmul.f32 0.0625, %v646_v44 }
 0x2f2   : > { %v648_v46 = vadd.f32 1e-05, %v647_v45 }
 0x2f4   : > { %805 = vrsqrt.f32 %v648_v46 }
 0x2fe   : > { %v806_v47 = vpop.eup %805 }
 0x2ff   : > { %v650_v49 = vmul.f32 %v806_v47, %v642_v41 }
 0x301   : > { %v657_v51 = vmul.f32 %v757_v48, %v650_v49 }
 0x303   : > { %v664_v52 = vadd.f32 %v758_v50, %v657_v51 }
 0x305   : > { %v665_v53 = vpack.c.bf16 %v664_v52, %v664_v52 }
 0x307   : > { %667 = vst.msk [vmem:[%s412_s30] sm:$0x3] %vm666_vm7, %v665_v53 }
 0x308 PF: > { %s21_s17 = sadd.s32 1, %s813_s17  }
 0x309   : > { %p18_p4 = scmp.ge.s32.totalorder %s21_s17, 4  }
 0x30b   :  { %20 = sbr.rel (!%p18_p4) target bundleno = 1 (0x1), region = 100 }

// kernel: run.19
= control target key start
LH: loop header
LB: loop body
LE: loop exit
PB: predicated region body
PF: predicated region fallthrough
CT: control target
= control target key end

     0   :  { %v220_v1 = vmov 0.0   ;;  %vm39_vm0 = vcmask 130048   ;;  %vm221_vm1 = vmmov 0   ;;  %s282_s0 = inlined_call_operand.vmem [shape: f32[2,16], index: 0, kind: input, shape index: {}]   ;;  %s283_s1 = inlined_call_operand.vmem [shape: bf16[16,16], index: 1, kind: input, shape index: {}]   ;;  %s284_s2 = inlined_call_operand.vmem [shape: f32[1,16], index: 2, kind: input, shape index: {}]   ;;  %s285_s3 = inlined_call_operand.vmem [shape: bf16[16,16], index: 3, kind: input, shape index: {}]   ;;  %s286_s4 = inlined_call_operand.vmem [shape: f32[1,16], index: 4, kind: input, shape index: {}]   ;;  %s287_s5 = inlined_call_operand.hbm [shape: f32[2,16], index: 5, kind: output, shape index: {}]  }
   0x1   :  { %v192_v0 = vld [vmem:[%s283_s1] sm:$0xff]   ;;  %177 = vmatprep.subr.bf16.mxu0 %v220_v1  ;;  %183 = vmatprep.subr.bf16.mxu1 %v220_v1 }
   0x2   :  { %v22_v2 = vld [vmem:[%s282_s0] sm:$0x3]  ;;  %178 = vmatpush3.bf16.msra.mxu0 %v192_v0  ;;  %179 = vmatprep.mubr.msk.bf16.mxu0 %vm221_vm1, %v220_v1 }
   0x3   :  { %v23_v3 = vpack.c.bf16 %v22_v2, %v22_v2 }
   0x4   :  { %10 = vsyncpa [#allocation3], 0  ;;  %185 = vmatprep.mubr.msk.bf16.mxu1 %vm221_vm1, %v220_v1  ;;  %v193_v4 = vld [vmem:[%s285_s3] sm:$0xff]   ;;  %s222_s3 = smov [#allocation2]   ;;  %vm151_vm2 = vcmask 123904  }
   0x5   :  { %180 = vmatmul.mubr.msk.bf16.vlgmr.msra.gmra.mrb[0].mxu0 %vm39_vm0, %v23_v3  ;;  %184 = vmatpush3.bf16.msra.mxu1 %v193_v4  ;;  %v167_v5 = vld [vmem:[%s284_s2] ss:$0 sm:$0xff]  ;;  %s159_s25 = sshll.u32 %s222_s3, 4  ;;  %s160_s25 = int_to_ptr.vmem [resolvable:$true] %s159_s25 }
   0x6   :  { %v170_v21 = vld [vmem:[%s286_s4] ss:$0 sm:$0xff]  ;;  %s196_s26 = scalar_lea.vmem %s160_s25, 32  ;;  %p201_p1 = scmp.lt.s32.totalorder %s160_s25, %s160_s25 }
   0x7   :  { %p197_p0 = scmp.ne.s32.totalorder %s160_s25, %s196_s26  ;;  %p202_p2 = scmp.lt.s32.totalorder %s196_s26, %s196_s26 }
   0x9   :  { %p203_p3 = por %p202_p2, %p201_p1 }
   0xb   :  { %p204_p4 = pnand %p203_p3, %p197_p0 }
  0xd8   :  { %v77_v6 = vpop.f32.mrb[0].mxu0 }
  0xd9   :  { %v78_v7 = vadd.f32 %v167_v5, %v77_v6  ;;  %v181_v8 = vpop.f32.mrb[1].mxu0 }
  0xda   :  { %v80_v9 = vpop.f32.mrb[2].mxu0 }
  0xdb   :  { %v84_v10 = vmul.f32 0.044715, %v78_v7  ;;  %v182_v11 = vpop.f32.mrb[3].mxu0  ;;  %v83_v17 = vmul.f32 0.5, %v78_v7 }
  0xdd   :  { %v85_v12 = vmul.f32 %v84_v10, %v78_v7 }
  0xdf   :  { %v86_v13 = vmul.f32 %v85_v12, %v78_v7 }
  0xe1   :  { %v87_v14 = vadd.f32 %v86_v13, %v78_v7 }
  0xe3   :  { %v88_v15 = vmul.f32 0.7978846, %v87_v14 }
  0xe5   :  { %194 = vtanh.f32 %v88_v15 }
  0xef   :  { %v195_v16 = vpop.eup %194 }
  0xf0   :  { %v90_v18 = vadd.f32 1.0, %v195_v16 }
  0xf2   :  { %v91_v19 = vmul.f32 %v90_v18, %v83_v17 }
  0xf4   :  { %v92_v20 = vpack.c.bf16 %v91_v19, %v91_v19 }
  0xf6   :  { %186 = vmatmul.mubr.msk.bf16.vlgmr.msra.gmra.mrb[0].mxu1 %vm39_vm0, %v92_v20 }
 0x1c9   :  { %v145_v22 = vpop.f32.mrb[0].mxu1 }
 0x1ca   :  { %v146_v23 = vadd.f32 %v170_v21, %v145_v22  ;;  %v187_v24 = vpop.f32.mrb[1].mxu1 }
 0x1cb   :  { %v148_v25 = vpop.f32.mrb[2].mxu1 }
 0x1cc   :  { %v188_v26 = vpop.f32.mrb[3].mxu1  ;;  %152 = vst.msk [vmem:[#allocation2] sm:$0x3] %vm151_vm2, %v146_v23 }
 0x1cd   :  { %207 = shalt.err (!%p204_p4)
}
 0x1ce   :  { %s208_s4 = scalar_lea.hbm %s287_s5, 32 }
 0x1cf   :  { %p209_p5 = scmp.ne.s32.totalorder %s287_s5, %s208_s4  ;;  %p212_p6 = scmp.lt.u32.totalorder %s208_s4, %s287_s5 }
 0x1d1   :  { %p214_p7 = pnand %p212_p6, %p209_p5 }
 0x1d3   :  { %217 = shalt.err (!%p214_p7)
}
 0x1d4   :  { %162 = dma.vmem_to_hbm [thread:$0]  %s160_s25, 32, %s287_s5, [#allocation3]  }
 0x1d5   :  { %218 = dma.done.wait [#allocation3], 32  }
 0x1d6   :  { %219 = vsyncadd [#allocation3], 4294967264 }
 0x1d7   :  { %166 = vsyncpa [#allocation3], 1 }

// kernel: run.17
= control target key start
LH: loop header
LB: loop body
LE: loop exit
PB: predicated region body
PF: predicated region fallthrough
CT: control target
= control target key end

     0   :  { %s1326_s29 = smov 0   ;;  %s1448_s0 = inlined_call_operand.vmem [shape: bf16[2,4,16], index: 0, kind: input, shape index: {}]   ;;  %s1449_s1 = inlined_call_operand.vmem [shape: bf16[16,48], index: 1, kind: input, shape index: {}]   ;;  %s1450_s2 = inlined_call_operand.vmem [shape: f32[1,48], index: 2, kind: input, shape index: {}]   ;;  %s1451_s3 = inlined_call_operand.vmem [shape: bf16[16,16], index: 3, kind: input, shape index: {}]   ;;  %s1452_s4 = inlined_call_operand.vmem [shape: f32[1,16], index: 4, kind: input, shape index: {}]   ;;  %s1453_s5 = inlined_call_operand.vmem [shape: f32[1,16], index: 5, kind: input, shape index: {}]   ;;  %s1454_s6 = inlined_call_operand.vmem [shape: f32[1,16], index: 6, kind: input, shape index: {}]   ;;  %s1455_s7 = inlined_call_operand.vmem [shape: bf16[16,64], index: 7, kind: input, shape index: {}]   ;;  %s1456_s8 = inlined_call_operand.vmem [shape: f32[1,64], index: 8, kind: input, shape index: {}]   ;;  %s1457_s9 = inlined_call_operand.vmem [shape: bf16[64,16], index: 9, kind: input, shape index: {}]   ;;  %s1458_s10 = inlined_call_operand.vmem [shape: f32[1,16], index: 10, kind: input, shape index: {}]   ;;  %s1459_s11 = inlined_call_operand.vmem [shape: f32[1,16], index: 11, kind: input, shape index: {}]   ;;  %s1460_s12 = inlined_call_operand.vmem [shape: f32[1,16], index: 12, kind: input, shape index: {}]   ;;  %s1461_s13 = inlined_call_operand.vmem [shape: bf16[2,4,4], index: 13, kind: input, shape index: {}]   ;;  %s1462_s14 = inlined_call_operand.vmem [shape: bf16[2,4,16], index: 14, kind: output, shape index: {}]  }
   0x1 LB: > { %s1092_s30 = sadd.s32 4294967295, %s1241_s29   ;;  %p1096_p0 = scmp.ge.s32.totalorder %s1241_s29, 1  ;;  %s1241_s29 = sphi %s1326_s29, %s24_s29  }
   0x2   : > { %p411_p1 = scmp.lt.s32.totalorder %s1241_s29, 3 }
   0x4   : > { %p412_p2 = pnand %p1096_p0, %p411_p1 }
   0x5   : > { %v1214_v0 = vld [vmem:[%s1449_s1] sm:$0xff] (!%p412_p2)   ;;  %v1243_v1 = vmov (!%p412_p2), 0.0   ;;  %p455_p3 = scmp.lt.s32.totalorder (!%p412_p2), %s1092_s30, 1  ;;  %vm1244_vm0 = vmmov (!%p412_p2), 0   ;;  %vm481_vm1 = vcmask (!%p412_p2), 130048   ;;  %s1245_s23 = smov (!%p412_p2), 120  }
   0x6   : > { %415 = sbr.rel (%p412_p2) target bundleno = 2530 (0x9e2), region = 76  ;;  %1144 = vmatprep.subr.bf16.mxu0 (!%p412_p2), %v1243_v1  ;;  %1162 = vmatprep.subr.bf16.mxu1 (!%p412_p2), %v1243_v1  ;;  %v1099_v3 = vld [vmem:[%s1450_s2] ss:$0 sm:$0xff] (!%p412_p2)  ;;  %s1246_s24 = smov (!%p412_p2), 112   ;;  %vm529_vm2 = vcmask (!%p412_p2), 64512   ;;  %vm580_vm3 = vcmask (!%p412_p2), 27648  }
   0x7   : > { %1145 = vmatpush3.bf16.msra.mxu0 (!%p412_p2), %v1214_v0  ;;  %1146 = vmatprep.mubr.msk.bf16.mxu0 (!%p412_p2), %vm1244_vm0, %v1243_v1  ;;  %s1247_s25 = smov (!%p412_p2), 104   ;;  %v577_v15 = vld [vmem:[%s1461_s13] sm:$0x3] (!%p412_p2)  ;;  %v1105_v18 = vld [vmem:[%s1461_s13 + $0x2] sm:$0x3] (!%p412_p2)  ;;  %s1248_s16 = smov (!%p412_p2), 88  }
   0x8   : > { %1150 = vmatprep.subr.bf16.mxu0 (!%p412_p2), %v1243_v1  ;;  %1164 = vmatprep.mubr.msk.bf16.mxu1 (!%p412_p2), %vm1244_vm0, %v1243_v1  ;;  %v578_v16 = vunpack.c.l.bf16 (!%p412_p2), %v577_v15  ;;  %v696_v24 = vunpack.c.l.bf16 (!%p412_p2), %v1105_v18  ;;  %s1249_s18 = smov (!%p412_p2), 96   ;;  %vm599_vm4 = vcmask (!%p412_p2), 1041408   ;;  %vm595_vm5 = vcmask (!%p412_p2), 31744   ;;  %v1215_v55 = vld [vmem:[%s1451_s3] sm:$0xff] (!%p412_p2)   ;;  %s1250_s21 = smov (!%p412_p2), 8  }
   0x9   : > { %vm825_vm6 = vcmask (!%p412_p2), 125952   ;;  %vm962_vm7 = vcmask (!%p412_p2), 523264   ;;  %vm1037_vm8 = vcmask (!%p412_p2), 123904  }
   0xd   : > { %s1464_s30 = smov (!%p455_p3, %s1092_s30), 1 }
   0xe   : > { %s1097_s17 = sshll.u32 %s1464_s30, 1 }
   0xf   : > { %s458_s20 = scalar_lea.vmem %s1448_s0, %s1097_s17  ;;  %s462_s22 = scalar_lea.vmem %s1462_s14, %s1097_s17 }
  0x10   : > { %v1352_v2 = vld [vmem:[%s458_s20] sm:$0x3] }
  0x11   : > { %1147 = vmatmul.mubr.msk.bf16.vlgmr.msra.gmra.mrb[0].mxu0 %vm481_vm1, %v1352_v2 }
  0x12   : > { %1152 = vmatprep.mubr.msk.bf16.mxu0 %vm1244_vm0, %v1243_v1 }
  0xe4   : > { %v519_v4 = vpop.f32.mrb[0].mxu0 }
  0xe5   : > { %v520_v5 = vadd.f32 %v1099_v3, %v519_v4  ;;  %v1148_v6 = vpop.f32.mrb[1].mxu0 }
  0xe6   : > { %v522_v7 = vpop.f32.mrb[2].mxu0  ;;  %v465_v6 = vunpack.c.l.bf16 %v1352_v2  ;;  %v1216_v2 = vld [vmem:[%s1455_s7] sm:$0xff]  }
  0xe7   : > { %v525_v8 = vpack.c.bf16 %v520_v5, %v520_v5  ;;  %v1149_v9 = vpop.f32.mrb[3].mxu0  ;;  %v1107_v5 = vld [vmem:[%s1452_s4] ss:$0 sm:$0xff] }
  0xe9   : > { %643 = vrot.lane.b32.xlu1 %v525_v8, %s1245_s23  ;;  %527 = vrot.lane.b32.xlu0 %v525_v8, %s1246_s24 }
  0xed   : > { %645 = vrot.lane.b32.xlu0 %v525_v8, %s1247_s25 }
 0x15b   : > { %v528_v10 = vpop.permute.xlu0 %527  ;;  %v644_v14 = vpop.permute.xlu1 %643 }
 0x15c   : > { %v534_v11 = vsel %vm529_vm2, %v528_v10, 0 }
 0x15d   : > { %1151 = vmatpush3.bf16.xpose.msra.mxu0 %v534_v11 }
 0x15e   : > { %1156 = vmatprep.subr.bf16.mxu0 %v1243_v1 }
 0x15f   : > { %v646_v12 = vpop.permute.xlu0 %645 }
 0x160   : > { %v651_v13 = vsel %vm529_vm2, %v646_v12, 0 }
 0x161   : > { %1163 = vmatpush3.bf16.xpose.msra.mxu1 %v651_v13 }
 0x162   : > { %1174 = vmatprep.subr.bf16.mxu1 %v1243_v1 }
 0x164   : > { %1153 = vmatmul.mubr.msk.bf16.vlgmr.msra.gmra.mrb[4].mxu0 %vm529_vm2, %v525_v8 }
 0x165   : > { %1158 = vmatprep.mubr.msk.bf16.mxu0 %vm1244_vm0, %v1243_v1 }
 0x168   : > { %1165 = vmatmul.mubr.msk.bf16.vlgmr.msra.gmra.mrb[0].mxu1 %vm529_vm2, %v644_v14 }
 0x169   : > { %1176 = vmatprep.mubr.msk.bf16.mxu1 %vm1244_vm0, %v1243_v1  ;;  %1175 = vmatpush3.bf16.msra.mxu1 %v1215_v55 }
 0x16a   : > { %1186 = vmatprep.subr.bf16.mxu1 %v1243_v1 }
 0x237   : > { %v570_v17 = vpop.f32.mrb[4].mxu0 }
 0x238   : > { %v576_v19 = vmul.f32 0.35355338, %v570_v17  ;;  %v1154_v20 = vpop.f32.mrb[5].mxu0 }
 0x239   : > { %v573_v21 = vpop.f32.mrb[6].mxu0 }
 0x23a   : > { %v1155_v22 = vpop.f32.mrb[7].mxu0  ;;  %v579_v23 = vadd.f32 %v578_v16, %v576_v19 }
 0x23b   : > { %v687_v25 = vpop.f32.mrb[0].mxu1 }
 0x23c   : > { %v693_v26 = vmul.f32 0.35355338, %v687_v25  ;;  %v1166_v27 = vpop.f32.mrb[1].mxu1  ;;  %v581_v28 = vsel %vm580_vm3, %v579_v23, -inf  ;;  %v1111_v25 = vld [vmem:[%s1454_s6] ss:$0 sm:$0xff] }
 0x23d   : > { %v690_v29 = vpop.f32.mrb[2].mxu1  ;;  %582 = vmax.xlane.f32.xlu1 %v581_v28 }
 0x23e   : > { %v1167_v30 = vpop.f32.mrb[3].mxu1  ;;  %v697_v31 = vadd.f32 %v696_v24, %v693_v26  ;;  %v1217_v29 = vld [vmem:[%s1457_s9] sm:$0xff]  }
 0x23f   : > { %v1218_v30 = vld [vmem:[%s1457_s9 + $0x8] sm:$0xff]  }
 0x240   : > { %v698_v32 = vsel %vm580_vm3, %v697_v31, -inf }
 0x241   : > { %699 = vmax.xlane.f32.xlu0 %v698_v32  ;;  %v1220_v32 = vld [vmem:[%s1457_s9 + $0x18] sm:$0xff]  }
 0x2ca   : > { %v583_v33 = vpop.xlane.xlu1 %582 }
 0x2cb   : > { %v584_v34 = vsub.f32 %v579_v23, %v583_v33  ;;  %v1110_v23 = vld [vmem:[%s1453_s5] ss:$0 sm:$0xff] }
 0x2cc   : > { %v1112_v33 = vld [vmem:[%s1456_s8] ss:$0 sm:$0xff] }
 0x2cd   : > { %v585_v35 = vmul.f32 1.442695, %v584_v34 }
 0x2ce   : > { %v700_v36 = vpop.xlane.xlu0 %699 }
 0x2cf   : > { %1221 = vpow2.f32 %v585_v35  ;;  %v701_v37 = vsub.f32 %v697_v31, %v700_v36  ;;  %v1219_v31 = vld [vmem:[%s1457_s9 + $0x10] sm:$0xff]  }
 0x2d1   : > { %v702_v38 = vmul.f32 1.442695, %v701_v37 }
 0x2d3   : > { %1223 = vpow2.f32 %v702_v38 }
 0x2d9   : > { %v1222_v39 = vpop.eup %1221 }
 0x2da   : > { %v587_v40 = vsel %vm580_vm3, %v1222_v39, 0.0 }
 0x2db   : > { %588 = vadd.xlane.f32.xlu0 %v587_v40 }
 0x2dd   : > { %v1224_v41 = vpop.eup %1223 }
 0x2de   : > { %v704_v42 = vsel %vm580_vm3, %v1224_v41, 0.0 }
 0x2df   : > { %705 = vadd.xlane.f32.xlu1 %v704_v42 }
 0x2f0   : > { %710 = vrot.lane.b32.xlu1 %v525_v8, %s1248_s16 }
 0x2f1   : > { %593 = vrot.lane.b32.xlu0 %v525_v8, %s1249_s18 }
 0x368   : > { %v589_v43 = vpop.xlane.xlu0 %588 }
 0x369   : > { %1225 = vrcp.f32 %v589_v43 }
 0x36c   : > { %v594_v44 = vpop.permute.xlu0 %593  ;;  %v706_v45 = vpop.xlane.xlu1 %705 }
 0x36d   : > { %v601_v46 = vsel %vm599_vm4, %v594_v44, 0  ;;  %1227 = vrcp.f32 %v706_v45 }
 0x36e   : > { %1157 = vmatpush3.bf16.msra.mxu0 %v601_v46 }
 0x36f   : > { %1168 = vmatprep.subr.bf16.mxu0 %v1243_v1 }
 0x370   : > { %v711_v49 = vpop.permute.xlu1 %710 }
 0x371   : > { %v716_v52 = vsel %vm599_vm4, %v711_v49, 0 }
 0x373   : > { %v1226_v47 = vpop.eup %1225 }
 0x374   : > { %v591_v48 = vmul.f32 %v1226_v47, %v1222_v39 }
 0x376   : > { %v592_v50 = vpack.c.bf16 %v591_v48, %v591_v48  ;;  %v1115_v48 = vld [vmem:[%s1458_s10] ss:$0 sm:$0xff] }
 0x377   : > { %v1228_v51 = vpop.eup %1227 }
 0x378   : > { %1159 = vmatmul.mubr.msk.bf16.vlgmr.msra.gmra.mrb[8].mxu0 %vm595_vm5, %v592_v50  ;;  %v708_v53 = vmul.f32 %v1228_v51, %v1224_v41 }
 0x379   : > { %1169 = vmatpush3.bf16.msra.mxu0 %v716_v52  ;;  %1170 = vmatprep.mubr.msk.bf16.mxu0 %vm1244_vm0, %v1243_v1 }
 0x37a   : > { %1180 = vmatprep.subr.bf16.mxu0 %v1243_v1  ;;  %v709_v54 = vpack.c.bf16 %v708_v53, %v708_v53 }
 0x380   : > { %1171 = vmatmul.mubr.msk.bf16.vlgmr.msra.gmra.mrb[12].mxu0 %vm595_vm5, %v709_v54 }
 0x381   : > { %1182 = vmatprep.mubr.msk.bf16.mxu0 %vm1244_vm0, %v1243_v1  ;;  %1181 = vmatpush3.bf16.msra.mxu0 %v1216_v2 }
 0x44b   : > { %v637_v56 = vpop.f32.mrb[8].mxu0 }
 0x44c   : > { %v1160_v57 = vpop.f32.mrb[9].mxu0 }
 0x44d   : > { %v640_v58 = vpop.f32.mrb[10].mxu0 }
 0x44e   : > { %v1161_v59 = vpop.f32.mrb[11].mxu0 }
 0x453   : > { %v752_v60 = vpop.f32.mrb[12].mxu0 }
 0x454   : > { %759 = vrot.lane.b32.xlu1 %v752_v60, %s1250_s21  ;;  %v1172_v61 = vpop.f32.mrb[13].mxu0 }
 0x455   : > { %v755_v62 = vpop.f32.mrb[14].mxu0 }
 0x456   : > { %v1173_v63 = vpop.f32.mrb[15].mxu0 }
 0x4c6   : > { %v760_v0 = vpop.permute.xlu1 %759 }
 0x4c7   : > { %v762_v3 = vsel %vm529_vm2, %v637_v56, %v760_v0 }
 0x4c8   : > { %v763_v4 = vpack.c.bf16 %v762_v3, %v762_v3  ;;  %v1121_v3 = vld [vmem:[%s1459_s11] ss:$0 sm:$0xff] }
 0x4ca   : > { %1177 = vmatmul.mubr.msk.bf16.vlgmr.msra.gmra.mrb[4].mxu1 %vm481_vm1, %v763_v4 }
 0x4cb   : > { %1194 = vmatprep.mubr.msk.bf16.mxu1 %vm1244_vm0, %v1243_v1  ;;  %1187 = vmatpush3.bf16.msra.mxu1 %v1217_v29 }
 0x4cc   : > { %1188 = vmatprep.subr.bf16.mxu1 %v1243_v1 }
 0x4cf   : > { %1189 = vmatpush3.bf16.msra.mxu1 %v1218_v30 }
 0x4d0   : > { %1190 = vmatprep.subr.bf16.mxu1 %v1243_v1 }
 0x4d3   : > { %1191 = vmatpush3.bf16.msra.mxu1 %v1219_v31 }
 0x4d4   : > { %1192 = vmatprep.subr.bf16.mxu1 %v1243_v1 }
 0x4d7   : > { %1193 = vmatpush3.bf16.msra.mxu1 %v1220_v32 }
 0x59d   : > { %v816_v7 = vpop.f32.mrb[4].mxu1 }
 0x59e   : > { %v817_v8 = vadd.f32 %v1107_v5, %v816_v7  ;;  %v1178_v9 = vpop.f32.mrb[5].mxu1  ;;  %v1122_v5 = vld [vmem:[%s1460_s12] ss:$0 sm:$0xff] }
 0x59f   : > { %v819_v10 = vpop.f32.mrb[6].mxu1 }
 0x5a0   : > { %v1179_v11 = vpop.f32.mrb[7].mxu1  ;;  %v822_v12 = vadd.f32 %v817_v8, %v465_v6 }
 0x5a2   : > { %v826_v13 = vsel %vm825_vm6, %v822_v12, 0.0 }
 0x5a3   : > { %827 = vadd.xlane.f32.xlu0 %v826_v13 }
 0x630   : > { %v828_v14 = vpop.xlane.xlu0 %827 }
 0x631   : > { %v830_v15 = vmul.f32 0.0625, %v828_v14 }
 0x633   : > { %v831_v16 = vsub.f32 %v822_v12, %v830_v15 }
 0x635   : > { %v832_v17 = vmul.f32 %v831_v16, %v831_v16 }
 0x637   : > { %v833_v18 = vsel %vm825_vm6, %v832_v17, 0.0 }
 0x638   : > { %834 = vadd.xlane.f32.xlu1 %v833_v18 }
 0x6c5   : > { %v835_v19 = vpop.xlane.xlu1 %834 }
 0x6c6   : > { %v836_v20 = vmul.f32 0.0625, %v835_v19 }
 0x6c8   : > { %v837_v21 = vadd.f32 1e-05, %v836_v20 }
 0x6ca   : > { %1229 = vrsqrt.f32 %v837_v21 }
 0x6d4   : > { %v1230_v22 = vpop.eup %1229 }
 0x6d5   : > { %v839_v24 = vmul.f32 %v1230_v22, %v831_v16 }
 0x6d7   : > { %v846_v26 = vmul.f32 %v1110_v23, %v839_v24 }
 0x6d9   : > { %v853_v27 = vadd.f32 %v1111_v25, %v846_v26 }
 0x6db   : > { %v854_v28 = vpack.c.bf16 %v853_v27, %v853_v27 }
 0x6dd   : > { %1183 = vmatmul.mubr.msk.bf16.vlgmr.msra.gmra.mrb[16].mxu0 %vm481_vm1, %v854_v28 }
 0x7b0   : > { %v907_v34 = vpop.f32.mrb[16].mxu0 }
 0x7b1   : > { %v908_v35 = vadd.f32 %v1112_v33, %v907_v34  ;;  %v1184_v36 = vpop.f32.mrb[17].mxu0 }
 0x7b2   : > { %v910_v37 = vpop.f32.mrb[18].mxu0 }
 0x7b3   : > { %v914_v38 = vmul.f32 0.044715, %v908_v35  ;;  %v1185_v39 = vpop.f32.mrb[19].mxu0  ;;  %v913_v45 = vmul.f32 0.5, %v908_v35 }
 0x7b5   : > { %v915_v40 = vmul.f32 %v914_v38, %v908_v35 }
 0x7b7   : > { %v916_v41 = vmul.f32 %v915_v40, %v908_v35 }
 0x7b9   : > { %v917_v42 = vadd.f32 %v916_v41, %v908_v35 }
 0x7bb   : > { %v918_v43 = vmul.f32 0.7978846, %v917_v42 }
 0x7bd   : > { %1231 = vtanh.f32 %v918_v43 }
 0x7c7   : > { %v1232_v44 = vpop.eup %1231 }
 0x7c8   : > { %v920_v46 = vadd.f32 1.0, %v1232_v44 }
 0x7ca   : > { %v921_v1 = vmul.f32 %v920_v46, %v913_v45 }
 0x7cc   : > { %v922_v47 = vpack.c.bf16 %v921_v1, %v921_v1 }
 0x7ce   : > { %1195 = vmatmul.mubr.msk.bf16.vlgmr.msra.gmra.mrb[8].mxu1 %vm962_vm7, %v922_v47 }
 0x8a1   : > { %v1000_v49 = vpop.f32.mrb[8].mxu1 }
 0x8a2   : > { %v1001_v50 = vadd.f32 %v1115_v48, %v1000_v49  ;;  %v1196_v51 = vpop.f32.mrb[9].mxu1 }
 0x8a3   : > { %v1003_v52 = vpop.f32.mrb[10].mxu1 }
 0x8a4   : > { %v1197_v53 = vpop.f32.mrb[11].mxu1  ;;  %v1006_v54 = vadd.f32 %v1001_v50, %v853_v27 }
 0x8a6   : > { %v1009_v55 = vsel %vm825_vm6, %v1006_v54, 0.0 }
 0x8a7   : > { %1010 = vadd.xlane.f32.xlu0 %v1009_v55 }
 0x934   : > { %v1011_v56 = vpop.xlane.xlu0 %1010 }
 0x935   : > { %v1012_v57 = vmul.f32 0.0625, %v1011_v56 }
 0x937   : > { %v1013_v58 = vsub.f32 %v1006_v54, %v1012_v57 }
 0x939   : > { %v1014_v59 = vmul.f32 %v1013_v58, %v1013_v58 }
 0x93b   : > { %v1015_v60 = vsel %vm825_vm6, %v1014_v59, 0.0 }
 0x93c   : > { %1016 = vadd.xlane.f32.xlu0 %v1015_v60 }
 0x9c9   : > { %v1017_v61 = vpop.xlane.xlu0 %1016 }
 0x9ca   : > { %v1018_v62 = vmul.f32 0.0625, %v1017_v61 }
 0x9cc   : > { %v1019_v63 = vadd.f32 1e-05, %v1018_v62 }
 0x9ce   : > { %1233 = vrsqrt.f32 %v1019_v63 }
 0x9d8   : > { %v1234_v0 = vpop.eup %1233 }
 0x9d9   : > { %v1021_v4 = vmul.f32 %v1234_v0, %v1013_v58 }
 0x9db   : > { %v1028_v6 = vmul.f32 %v1121_v3, %v1021_v4 }
 0x9dd   : > { %v1035_v7 = vadd.f32 %v1122_v5, %v1028_v6 }
 0x9df   : > { %v1036_v8 = vpack.c.bf16 %v1035_v7, %v1035_v7 }
 0x9e1   : > { %1038 = vst.msk [vmem:[%s462_s22] sm:$0x3] %vm1037_vm8, %v1036_v8 }
 0x9e2 PF: > { %s24_s29 = sadd.s32 1, %s1241_s29  }
 0x9e3   : > { %p21_p4 = scmp.ge.s32.totalorder %s24_s29, 4  }
 0x9e5   :  { %23 = sbr.rel (!%p21_p4) target bundleno = 1 (0x1), region = 107 }

</bundles_post_ra>
